<compile_context>
chip_gen: v6e
topology: v6e:2x2x1
jax: 0.10.0
libtpu: 0.0.40
codegen_flags: <defaults>
</compile_context>

<pallas_src>
import string

import jax
import jax.numpy as jnp
from jax import lax
from jax.experimental import pallas as pl
from jax.experimental.pallas import tpu as pltpu

VOCAB_CHARS = string.printable      # 100 chars: stand-in for the FastText vocab
CHAR_VEC_DIM = 256                  # matches the module default char_vec_dim=256
VOCAB_PAD = 128                     # vocab padded to 128 rows (lane/MXU aligned)
TOKEN_BLOCK = 1024                  # output rows per grid step (sweep 1024-2048)
SMALL_N_BYPASS = 1024               # below this, plain jnp.take beats kernel launch overhead


def _embed_onehot_kernel(idx_ref, table_ref, out_ref):
    # idx_ref:   VMEM (TOKEN_BLOCK, 1) int32     -- ids for this block
    # table_ref: VMEM (VOCAB_PAD, dim) float32   -- whole (padded) table, resident
    # out_ref:   VMEM (TOKEN_BLOCK, dim)         -- one block of output rows
    ids = idx_ref[...]                                               # (TB, 1)
    iota = lax.broadcasted_iota(jnp.int32, (TOKEN_BLOCK, VOCAB_PAD), 1)
    one_hot = (ids == iota).astype(table_ref.dtype)                  # (TB, VOCAB_PAD)
    # One MXU matmul replaces TOKEN_BLOCK scalar-addressed row copies.
    # precision=HIGHEST -> exact multi-pass f32: gathered rows reproduce the table
    # bit-exactly (one-hot entries 0/1 are exact in every pass).
    # Out-of-range ids give an all-zero one-hot row -> zero output (no OOB reads).
    out_ref[...] = jnp.dot(
        one_hot,
        table_ref[...],
        precision=lax.Precision.HIGHEST,
        preferred_element_type=jnp.float32,
    ).astype(out_ref.dtype)


def _pad_table(table: jax.Array) -> jax.Array:
    vocab, dim = table.shape
    if vocab == VOCAB_PAD:
        return table
    pad_rows = VOCAB_PAD - vocab
    return jnp.concatenate(
        [table, jnp.zeros((pad_rows, dim), table.dtype)], axis=0
    )


def text2vec_forward(
    char_ids: jax.Array,
    table: jax.Array,
    *,
    output_dtype=jnp.float32,   # set to jnp.bfloat16 to halve writeback bytes (off-spec)
) -> jax.Array:
    """Pallas equivalent of Text2Vec.forward: gather rows of `table` by id."""
    n = char_ids.shape[0]
    ids = char_ids.astype(jnp.int32)

    # Tiny inputs: kernel launch/pad overhead dominates; XLA gather is at roofline.
    if n < SMALL_N_BYPASS:
        return jnp.take(table, ids, axis=0).astype(output_dtype)

    vocab, dim = table.shape
    assert vocab <= VOCAB_PAD, "vocab must fit the padded table"
    table_p = _pad_table(table)

    n_blocks = pl.cdiv(n, TOKEN_BLOCK)
    n_pad = n_blocks * TOKEN_BLOCK
    # Pad only the (4 B/token) ids so every *input* block is full; the output keeps
    # its exact (n, dim) shape and Pallas clips the ragged last block's writeback.
    ids_p = jnp.pad(ids.reshape(n, 1), ((0, n_pad - n), (0, 0)))

    out_itemsize = jnp.dtype(output_dtype).itemsize
    cost = pl.CostEstimate(
        flops=2 * n_pad * VOCAB_PAD * dim,
        transcendentals=0,
        bytes_accessed=n * dim * out_itemsize + n_pad * 4 + VOCAB_PAD * dim * 4,
    )

    return pl.pallas_call(
        _embed_onehot_kernel,
        out_shape=jax.ShapeDtypeStruct((n, dim), output_dtype),
        grid_spec=pltpu.PrefetchScalarGridSpec(
            num_scalar_prefetch=0,
            grid=(n_blocks,),
            in_specs=[
                # ids: blocked VMEM input, pipelined per step
                pl.BlockSpec((TOKEN_BLOCK, 1), lambda i: (i, 0)),
                # full padded table every step (constant block index -> stays in VMEM)
                pl.BlockSpec((VOCAB_PAD, dim), lambda i: (0, 0)),
            ],
            out_specs=pl.BlockSpec((TOKEN_BLOCK, dim), lambda i: (i, 0)),
        ),
        compiler_params=pltpu.CompilerParams(
            # Token blocks are independent -> shard across v7x's 2 TensorCores.
            dimension_semantics=("parallel",),
        ),
        cost_estimate=cost,
    )(ids_p, table_p)


def chars_to_ids(text: str) -> jnp.ndarray:
    lut = {c: i for i, c in enumerate(VOCAB_CHARS)}
    return jnp.array([lut.get(c, 0) for c in text], dtype=jnp.int32)


if __name__ == "__main__":
    # Deterministic "trained" FastText table (synthetic; no .model file is loaded).
    # TODO(synk): FastText training / model-file loading has no Pallas equivalent;
    # the learned table is replaced by a deterministic random table.
    key = jax.random.PRNGKey(0)
    vocab_size = len(VOCAB_CHARS)                      # 100
    table = jax.random.normal(key, (vocab_size, CHAR_VEC_DIM), dtype=jnp.float32)

    # Long text with a ragged length (2500 % TOKEN_BLOCK != 0) -> exercises the
    # Pallas kernel path including the clipped last output block.
    text = (string.printable * 26)[:2500]
    char_ids = chars_to_ids(text)
    vecs = jax.block_until_ready(text2vec_forward(char_ids, table))
    ref = jnp.take(table, char_ids, axis=0)
    assert vecs.shape == (len(text), CHAR_VEC_DIM)
    assert vecs.dtype == jnp.float32
    assert bool(jnp.allclose(vecs, ref))

    # Short text -> bypass path (jnp.take), same semantics.
    short_ids = chars_to_ids("hello tpu")
    short_vecs = jax.block_until_ready(text2vec_forward(short_ids, table))
    short_ref = jnp.take(table, short_ids, axis=0)
    assert short_vecs.shape == (9, CHAR_VEC_DIM)
    assert bool(jnp.allclose(short_vecs, short_ref))

    print("KERNEL_OK")
</pallas_src>

<mosaic_0001>
module attributes {stable_mosaic.version = 11 : i64} {
  func.func @_embed_onehot_kernel(%arg0: i32, %arg1: memref<1024x1xi32, #tpu.memory_space<vmem>>, %arg2: memref<128x256xf32, #tpu.memory_space<vmem>>, %arg3: memref<1024x256xf32, #tpu.memory_space<vmem>>) attributes {dimension_semantics = [#tpu.dimension_semantics<parallel>], iteration_bounds = array<i64: 3>, scalar_prefetch = 0 : i64, scratch_operands = 0 : i64, tpu.core_type = #tpu.core_type<tc>, window_params = [{transform_indices = @transform_0, window_bounds = array<i64: 1024, 1>}, {pipeline_mode = #tpu.pipeline_mode<synchronous>, transform_indices = @transform_1, window_bounds = array<i64: 128, 256>}, {transform_indices = @transform_2, window_bounds = array<i64: 1024, 256>}]} {
    %c0 = arith.constant 0 : index
    %c0_0 = arith.constant 0 : index
    %0 = vector.load %arg1[%c0, %c0_0] : memref<1024x1xi32, #tpu.memory_space<vmem>>, vector<1024x1xi32>
    %1 = tpu.iota {dimensions = array<i32: 1>} : vector<1024x128xi32>
    %2 = vector.broadcast %0 : vector<1024x1xi32> to vector<1024x128xi32>
    %3 = arith.cmpi eq, %2, %1 : vector<1024x128xi32>
    %4 = arith.extui %3 : vector<1024x128xi1> to vector<1024x128xi32>
    %5 = arith.sitofp %4 : vector<1024x128xi32> to vector<1024x128xf32>
    %c0_1 = arith.constant 0 : index
    %c0_2 = arith.constant 0 : index
    %6 = vector.load %arg2[%c0_1, %c0_2] : memref<128x256xf32, #tpu.memory_space<vmem>>, vector<128x256xf32>
    %cst = arith.constant dense<0.000000e+00> : vector<1024x256xf32>
    %7 = tpu.matmul %5, %6, %cst {dimension_numbers = #tpu.dot_dimension_numbers<[1], [0], [0], [1], [0, 0, 1, 1], [], []>, precision = #tpu.contract_precision<fp32>} : vector<1024x128xf32>, vector<128x256xf32>, vector<1024x256xf32> -> vector<1024x256xf32>
    %c0_3 = arith.constant 0 : index
    %c0_4 = arith.constant 0 : index
    %8 = vector.load %arg3[%c0_3, %c0_4] : memref<1024x256xf32, #tpu.memory_space<vmem>>, vector<1024x256xf32>
    tpu.vector_store %arg3[%c0_3, %c0_4], %7 {strides = array<i32>} : memref<1024x256xf32, #tpu.memory_space<vmem>>, vector<1024x256xf32>,
    return
  }
  func.func @transform_0(%arg0: i32) -> (i32, i32) {
    %c0_i32 = arith.constant 0 : i32
    %c0_i32_0 = arith.constant 0 : i32
    return %arg0, %c0_i32 : i32, i32
  }
  func.func @transform_1(%arg0: i32) -> (i32, i32) {
    %c0_i32 = arith.constant 0 : i32
    %c0_i32_0 = arith.constant 0 : i32
    %c0_i32_1 = arith.constant 0 : i32
    return %c0_i32, %c0_i32_0 : i32, i32
  }
  func.func @transform_2(%arg0: i32) -> (i32, i32) {
    %c0_i32 = arith.constant 0 : i32
    %c0_i32_0 = arith.constant 0 : i32
    return %arg0, %c0_i32 : i32, i32
  }
}

</mosaic_0001>

<bundles_post_ra>
// kernel: tpu_custom_call.1
= control target key start
LH: loop header
LB: loop body
LE: loop exit
PB: predicated region body
PF: predicated region fallthrough
CT: control target
= control target key end

     0   :  { %7 = vsyncpa [#allocation3], 0  ;;  %s16271_s0 = inlined_call_operand.vmem [shape: s32[3072,1], index: 0, kind: input, shape index: {}]   ;;  %s16272_s1 = inlined_call_operand.hbm [shape: f32[128,256], index: 1, kind: input, shape index: {}]   ;;  %s16273_s2 = inlined_call_operand.hbm [shape: f32[2500,256], index: 2, kind: output, shape index: {}]  }
   0x1   :  { %8 = vsyncpa [#allocation4], 0 }
   0x2   :  { %10 = vsyncpa [#allocation4 + $0x1], 0  ;;  %s9234_s9 = smov 0   ;;  %s9236_s10 = smov 0  }
   0x3   :  { %s9238_s11 = smov 0   ;;  %s9240_s12 = smov 0  }
   0x4 LB: > { %s9255_s13 = sadd.s32 4294967295, %s9208_s12   ;;  %s8525_s14 = sadd.s32 4294967294, %s9208_s12   ;;  %s9208_s12 = sphi %s9240_s12, %s18941_s12   ;;  %s9204_s11 = sphi %s9238_s11, %s18940_s11   ;;  %s9200_s10 = sphi %s9236_s10, %s18939_s10   ;;  %s9196_s9 = sphi %s9234_s9, %s18938_s9  }
   0x5   : > { %s9259_s15 = sadd.s32 1, %s9208_s12   ;;  %s70_s16 = sadd.s32 1, %s9204_s11 }
   0x6   : > { %s67_s17 = ssub.s32 %s9208_s12, %s9259_s15  ;;  %p80_p0 = scmp.ne.s32.totalorder %s9204_s11, %s9200_s10 }
   0x7   : > { %p68_p1 = scmp.eq.s32.totalorder %s67_s17, 0  ;;  %p81_p2 = scmp.eq.s32.totalorder %s9255_s13, 2 }
   0x8   : > { %p86_p3 = scmp.ne.s32.totalorder %s9200_s10, %s9196_s9  ;;  %p87_p4 = scmp.eq.s32.totalorder %s8525_s14, 2 }
   0x9   : > { %s9270_s18 = scalar_select %p68_p1, %s9204_s11, %s70_s16  }
   0xa   : > { %p9272_p5 = por %p81_p2, %p80_p0  ;;  %p9276_p6 = por %p87_p4, %p86_p3 }
   0xb   : > { %p8526_p7 = scmp.ge.s32.totalorder %s9208_s12, 1  ;;  %p94_p8 = scmp.lt.s32.totalorder %s9208_s12, 4 }
   0xc   : > { %s16996_s20 = scalar_select %p9276_p6, 1, 0 }
   0xd   : > { %p9073_p9 = scmp.eq.s32.totalorder %s9255_s13, 0  ;;  %p9283_p10 = pnand %p8526_p7, %p94_p8 }
   0xe   : > { %s9210_s22 = smov [#allocation2]  }
   0xf   : > { %s106_s23 = sshll.u32 %s9210_s22, 4  ;;  %p9065_p11 = pneg %p9283_p10  ;;  %s107_s23 = int_to_ptr.vmem [resolvable:$true] %s106_s23 }
  0x10   : > { %s9129_s24 = scalar_lea.vmem %s107_s23, 4096  ;;  %p9137_p3 = scmp.lt.s32.totalorder %s107_s23, %s107_s23 }
  0x11   : > { %p9066_p12 = pnand %p9073_p9, %p9065_p11  ;;  %p9130_p0 = scmp.ne.s32.totalorder %s107_s23, %s9129_s24 }
  0x12   : > { %p9138_p4 = scmp.lt.s32.totalorder %s9129_s24, %s9129_s24 }
  0x13   : > { %p9120_p13 = pneg %p9066_p12 }
  0x14   : > { %p9139_p6 = por %p9138_p4, %p9137_p3 }
  0x15   : > { %p9132_p1 = pnand %p9130_p0, %p9120_p13 }
  0x17   : > { %p9133_p2 = pneg %p9132_p1 }
  0x19   : > { %p9140_p7 = pnand %p9139_p6, %p9133_p2 }
  0x1b   : > { %9143 = shalt.err (!%p9140_p7)
}
  0x1c   : > { %s9211_s25 = smov 256   ;;  %s9212_s26 = smov 16  }
  0x1d   : > { %9068 = dma.hbm_to_vmem [thread:$0]  (!%p9066_p12), %s16272_s1, 4096, %s107_s23, [#allocation3], %s9211_s25, %s9211_s25, %s9212_s26  }
  0x1e   : > { %131 = sbr.rel (%p9283_p10) target bundleno = 1938 (0x792), region = 28 }
  0x23   : > { %9187 = dma.done.wait (%p9073_p9), [#allocation3], 4096  }
  0x24   : > { %9189 = vsyncadd (%p9073_p9), [#allocation3], 4294963200  ;;  %s9301_s29 = sshll.u32 %s9255_s13, 7  ;;  %v9213_v0 = vmov 0   ;;  %v16292_v1 = vmov 0.0   ;;  %v1094_v12 = vld [vmem:[#allocation2 + $0xf8] sm:$0xff] }
  0x25   : > { %9117 = vset.pattern.permute.xlu1 %v9213_v0  ;;  %9116 = vset.pattern.permute.xlu0 %v9213_v0  ;;  %p154_p6 = scmp.lt.s32.totalorder %s9301_s29, 383  ;;  %v1093_v13 = vld [vmem:[#allocation2 + $0xf0] sm:$0xff]  ;;  %v1092_v14 = vld [vmem:[#allocation2 + $0xe8] sm:$0xff]  ;;  %v9324_v17 = vand.u32 4294901760, %v1094_v12  ;;  %v1091_v20 = vld [vmem:[#allocation2 + $0xe0] sm:$0xff]  ;;  %s150_s7 = sand.u32 1, %s9200_s10  }
  0x26   : > { %2824 = vmatprep.mubr.f32.mxu1 %v16292_v1  ;;  %1191 = vmatprep.mubr.f32.mxu0 %v16292_v1  ;;  %v9326_v18 = vand.u32 4294901760, %v1093_v13  ;;  %v9328_v19 = vand.u32 4294901760, %v1092_v14  ;;  %v9330_v21 = vand.u32 4294901760, %v1091_v20  ;;  %v1090_v22 = vld [vmem:[#allocation2 + $0xd8] sm:$0xff]  ;;  %v1089_v23 = vld [vmem:[#allocation2 + $0xd0] sm:$0xff]  ;;  %v1088_v24 = vld [vmem:[#allocation2 + $0xc8] sm:$0xff] }
  0x27   : > { %s155_s30 = scalar_select %p154_p6, %s9301_s29, 383  ;;  %v9333_v25 = vsub.f32 %v1094_v12, %v9324_v17  ;;  %v9341_v28 = vand.u32 4294901760, %v1090_v22  ;;  %v1087_v29 = vld [vmem:[#allocation2 + $0xc0] sm:$0xff]  ;;  %1096 = vmatprep.subr.mxu0 %v9324_v17  ;;  %v9347_v31 = vand.u32 4294901760, %v1089_v23  ;;  %v9349_v32 = vand.u32 4294901760, %v1088_v24  ;;  %v1086_v52 = vld [vmem:[#allocation2 + $0xb8] sm:$0xff] }
  0x28   : > { %16998 = vst [vmem:[#allocation8_spill] sm:$0xff] %v9326_v18  ;;  %16999 = vst [vmem:[#allocation9_spill] sm:$0xff] %v9328_v19  ;;  %v9336_v26 = vsub.f32 %v1093_v13, %v9326_v18  ;;  %v9339_v27 = vsub.f32 %v1092_v14, %v9328_v19  ;;  %v9345_v30 = vsub.f32 %v1091_v20, %v9330_v21  ;;  %v9351_v33 = vand.u32 4294901760, %v1087_v29  ;;  %v1085_v53 = vld [vmem:[#allocation2 + $0xb0] sm:$0xff]  ;;  %v1084_v54 = vld [vmem:[#allocation2 + $0xa8] sm:$0xff]  ;;  %s8531_s8 = sshll.u32 %s150_s7, 11 }
  0x29   : > { %s8533_s3 = sshll.u32 %s155_s30, 3  ;;  %17000 = vst [vmem:[#allocation10_spill] sm:$0xff] %v9330_v21  ;;  %17002 = vst [vmem:[#allocation12_spill] sm:$0xff] %v9341_v28  ;;  %1098 = vmatpush1.msra.mxu0 %v9326_v18  ;;  %v16289_v34 = vand.u32 4294901760, %v9333_v25  ;;  %v9358_v37 = vsub.f32 %v1090_v22, %v9341_v28  ;;  %v9364_v41 = vsub.f32 %v1089_v23, %v9347_v31  ;;  %v1083_v60 = vld [vmem:[#allocation2 + $0xa0] sm:$0xff]  ;;  %v1070_v1 = vld [vmem:[#allocation2 + $0x38] sm:$0xff] }
  0x2a   : > { %s9310_s6 = scalar_lea.vmem %s16271_s0, %s8533_s3  ;;  %17001 = vst [vmem:[#allocation11_spill] sm:$0xff] %v9339_v27  ;;  %v16288_v35 = vand.u32 4294901760, %v9336_v26  ;;  %v16287_v36 = vand.u32 4294901760, %v9339_v27  ;;  %v16286_v40 = vand.u32 4294901760, %v9345_v30  ;;  %v9367_v42 = vsub.f32 %v1088_v24, %v9349_v32  ;;  %1100 = vmatprep.subr.mxu0 %v9328_v19  ;;  %s14928_s14 = scalar_lea.vmem [#allocation5], %s8531_s8 }
  0x2b   : > { %v167_v2 = vld [vmem:[%s9310_s6 + $0x10] sm:$0xff]  ;;  %v165_v3 = vld [vmem:[%s9310_s6] sm:$0xff]  ;;  %v168_v4 = vld [vmem:[%s9310_s6 + $0x18] sm:$0xff]  ;;  %17003 = vst [vmem:[#allocation13_spill] sm:$0xff] %v9358_v37  ;;  %v9370_v43 = vsub.f32 %v1087_v29, %v9351_v33  ;;  %v2603_v44 = vsub.f32 %v9333_v25, %v16289_v34  ;;  %v16285_v47 = vand.u32 4294901760, %v9358_v37  ;;  %1102 = vmatpush1.msra.mxu0 %v9330_v21  ;;  %v16284_v49 = vand.u32 4294901760, %v9364_v41 }
  0x2c   : > { %302 = vperm.xlu1 %9117, %v167_v2   ;;  %296 = vperm.xlu0 %9116, %v165_v3   ;;  %v166_v5 = vld [vmem:[%s9310_s6 + $0x8] sm:$0xff]  ;;  %v169_v7 = vld [vmem:[%s9310_s6 + $0x20] sm:$0xff]  ;;  %v172_v8 = vld [vmem:[%s9310_s6 + $0x38] sm:$0xff]  ;;  %17004 = vst [vmem:[#allocation14_spill] sm:$0xff] %v9367_v42  ;;  %v2609_v45 = vsub.f32 %v9336_v26, %v16288_v35  ;;  %v2615_v46 = vsub.f32 %v9339_v27, %v16287_v36  ;;  %v16282_v50 = vand.u32 4294901760, %v9367_v42  ;;  %v9416_v14 = vand.u32 4294901760, %v1083_v60 }
  0x2d   : > { %v170_v6 = vld [vmem:[%s9310_s6 + $0x28] sm:$0xff]  ;;  %v171_v9 = vld [vmem:[%s9310_s6 + $0x30] sm:$0xff]  ;;  %v173_v11 = vld [vmem:[%s9310_s6 + $0x40] sm:$0xff]  ;;  %v2621_v48 = vsub.f32 %v9345_v30, %v16286_v40  ;;  %v16281_v51 = vand.u32 4294901760, %v9370_v43  ;;  %1104 = vmatprep.subr.mxu0 %v9341_v28  ;;  %v2604_v56 = vand.u32 4294901760, %v2603_v44  ;;  %v2627_v59 = vsub.f32 %v9358_v37, %v16285_v47  ;;  %s16211_s16 = scalar_lea.sflag [#allocation4], %s150_s7 }
  0x2e   : > { %v174_v10 = vld [vmem:[%s9310_s6 + $0x48] sm:$0xff]  ;;  %v176_v15 = vld [vmem:[%s9310_s6 + $0x58] sm:$0xff]  ;;  %v175_v16 = vld [vmem:[%s9310_s6 + $0x50] sm:$0xff]  ;;  %v2610_v57 = vand.u32 4294901760, %v2609_v45  ;;  %v2616_v58 = vand.u32 4294901760, %v2615_v46  ;;  %v2633_v63 = vsub.f32 %v9364_v41, %v16284_v49  ;;  %v2639_v0 = vsub.f32 %v9367_v42, %v16282_v50  ;;  %1106 = vmatpush1.msra.mxu0 %v9347_v31  ;;  %s8438_s17 = ssub.s32 (%p9272_p5), 313, %s9301_s29 }
  0x2f   : > { %v178_v38 = vld [vmem:[%s9310_s6 + $0x68] sm:$0xff]  ;;  %v177_v39 = vld [vmem:[%s9310_s6 + $0x60] sm:$0xff]  ;;  %v180_v55 = vld [vmem:[%s9310_s6 + $0x78] sm:$0xff]  ;;  %v2622_v62 = vand.u32 4294901760, %v2621_v48  ;;  %v9405_v2 = vsub.f32 %v9370_v43, %v16281_v51  ;;  %2605 = vmatprep.subr.mxu1 %v2604_v56  ;;  %1108 = vmatprep.subr.mxu0 %v9349_v32  ;;  %v9433_v29 = vsub.f32 %v1083_v60, %v9416_v14  ;;  %p8439_p8 = scmp.lt.s32.totalorder (%p9272_p5), %s8438_s17, 128 }
  0x30   : > { %305 = vperm.xlu1 %9117, %v168_v4   ;;  %299 = vperm.xlu0 %9116, %v166_v5   ;;  %v179_v61 = vld [vmem:[%s9310_s6 + $0x70] sm:$0xff]  ;;  %v1082_v3 = vld [vmem:[#allocation2 + $0x98] sm:$0xff]  ;;  %v2628_v5 = vand.u32 4294901760, %v2627_v59  ;;  %v2640_v12 = vand.u32 4294901760, %v2639_v0  ;;  %v182_v23 = vld [vmem:[%s9310_s6 + $0x88] sm:$0xff] }
  0x31   : > { %v1081_v4 = vld [vmem:[#allocation2 + $0x90] sm:$0xff]  ;;  %2611 = vmatpush1.msra.mxu1 %v2610_v57  ;;  %v2646_v13 = vand.u32 4294901760, %v9405_v2  ;;  %1110 = vmatpush1.msra.mxu0 %v9351_v33  ;;  %v9428_v22 = vand.u32 4294901760, %v1082_v3  ;;  %v181_v24 = vld [vmem:[%s9310_s6 + $0x80] sm:$0xff]  ;;  %v184_v57 = vld [vmem:[%s9310_s6 + $0x98] sm:$0xff] }
  0x32   : > { %2617 = vmatprep.subr.mxu1 %v2616_v58  ;;  %v183_v58 = vld [vmem:[%s9310_s6 + $0x90] sm:$0xff]  ;;  %v186_v51 = vld [vmem:[%s9310_s6 + $0xa8] sm:$0xff]  ;;  %v185_v50 = vld [vmem:[%s9310_s6 + $0xa0] sm:$0xff] }
  0x33   : > { %2623 = vmatpush1.msra.mxu1 %v2622_v62  ;;  %v187_v36 = vld [vmem:[%s9310_s6 + $0xb0] sm:$0xff] }
  0x34   : > { %311 = vperm.xlu1 %9117, %v170_v6   ;;  %308 = vperm.xlu0 %9116, %v169_v7   ;;  %v9408_v6 = vand.u32 4294901760, %v1086_v52  ;;  %v9410_v7 = vand.u32 4294901760, %v1085_v53 }
  0x35   : > { %2629 = vmatprep.subr.mxu1 %v2628_v5  ;;  %v1077_v5 = vld [vmem:[#allocation2 + $0x70] sm:$0xff] }
  0x36   : > { %1112 = vmatprep.subr.mxu0 %v9408_v6 }
  0x37   : > { %1114 = vmatpush1.msra.mxu0 %v9410_v7 }
  0x38   : > { %317 = vperm.xlu1 %9117, %v172_v8   ;;  %314 = vperm.xlu0 %9116, %v171_v9   ;;  %v9412_v8 = vand.u32 4294901760, %v1084_v54  ;;  %v1080_v9 = vld [vmem:[#allocation2 + $0x88] sm:$0xff] }
  0x3a   : > { %v9426_v20 = vsub.f32 %v1084_v54, %v9412_v8  ;;  %1116 = vmatprep.subr.mxu0 %v9412_v8 }
  0x3b   : > { %1118 = vmatpush1.msra.mxu0 %v9416_v14 }
  0x3c   : > { %323 = vperm.xlu1 %9117, %v174_v10   ;;  %320 = vperm.xlu0 %9116, %v173_v11   ;;  %v1079_v10 = vld [vmem:[#allocation2 + $0x80] sm:$0xff]  ;;  %v2634_v11 = vand.u32 4294901760, %v2633_v63  ;;  %v16275_v48 = vand.u32 4294901760, %v9426_v20 }
  0x3d   : > { %v9439_v44 = vand.u32 4294901760, %v1079_v10  ;;  %1120 = vmatprep.subr.mxu0 %v9428_v22 }
  0x3e   : > { %2635 = vmatpush1.msra.mxu1 %v2634_v11 }
  0x3f   : > { %v9457_v56 = vsub.f32 %v1079_v10, %v9439_v44  ;;  %2641 = vmatprep.subr.mxu1 %v2640_v12 }
  0x40   : > { %329 = vperm.xlu1 %9117, %v176_v15   ;;  %326 = vperm.xlu0 %9116, %v175_v16   ;;  %v9420_v15 = vsub.f32 %v1086_v52, %v9408_v6  ;;  %v9423_v16 = vsub.f32 %v1085_v53, %v9410_v7  ;;  %v9446_v52 = vsub.f32 %v1082_v3, %v9428_v22  ;;  %v16274_v53 = vand.u32 4294901760, %v9433_v29 }
  0x41   : > { %v16283_v3 = vand.u32 4294901760, %v9457_v56  ;;  %2647 = vmatpush1.msra.mxu1 %v2646_v13  ;;  %v1073_v13 = vld [vmem:[#allocation2 + $0x50] sm:$0xff] }
  0x42   : > { %v16280_v45 = vand.u32 4294901760, %v9420_v15  ;;  %v16276_v46 = vand.u32 4294901760, %v9423_v16  ;;  %v16278_v62 = vand.u32 4294901760, %v9446_v52  ;;  %v2669_v63 = vsub.f32 %v9433_v29, %v16274_v53  ;;  %v1075_v53 = vld [vmem:[#allocation2 + $0x60] sm:$0xff] }
  0x43   : > { %v9507_v40 = vand.u32 4294901760, %v1075_v53 }
  0x44   : > { %335 = vperm.xlu1 %9117, %v178_v38   ;;  %332 = vperm.xlu0 %9116, %v177_v39   ;;  %v9435_v38 = vand.u32 4294901760, %v1081_v4  ;;  %v9437_v39 = vand.u32 4294901760, %v1080_v9  ;;  %v2651_v59 = vsub.f32 %v9420_v15, %v16280_v45  ;;  %v2657_v60 = vsub.f32 %v9423_v16, %v16276_v46  ;;  %v1071_v45 = vld [vmem:[#allocation2 + $0x40] sm:$0xff] }
  0x45   : > { %v2675_v11 = vsub.f32 %v9446_v52, %v16278_v62  ;;  %17008 = vst [vmem:[#allocation18_spill] sm:$0xff] %v9507_v40 }
  0x46   : > { %v9451_v54 = vsub.f32 %v1081_v4, %v9435_v38  ;;  %v1078_v4 = vld [vmem:[#allocation2 + $0x78] sm:$0xff]  ;;  %v2652_v10 = vand.u32 4294901760, %v2651_v59  ;;  %v9494_v59 = vsub.f32 %v9457_v56, %v16283_v3  ;;  %1122 = vmatpush1.msra.mxu0 %v9435_v38 }
  0x47   : > { %1124 = vmatprep.subr.mxu0 %v9437_v39 }
  0x48   : > { %341 = vperm.xlu1 %9117, %v180_v55   ;;  %338 = vperm.xlu0 %9116, %v179_v61   ;;  %v9454_v55 = vsub.f32 %v1080_v9, %v9437_v39  ;;  %v2663_v61 = vsub.f32 %v9426_v20, %v16275_v48  ;;  %v16277_v0 = vand.u32 4294901760, %v9451_v54  ;;  %v1076_v9 = vld [vmem:[#allocation2 + $0x68] sm:$0xff]  ;;  %v2670_v48 = vand.u32 4294901760, %v2669_v63 }
  0x49   : > { %v9497_v63 = vand.u32 4294901760, %v1078_v4  ;;  %v9501_v62 = vand.u32 4294901760, %v1076_v9  ;;  %2653 = vmatprep.subr.mxu1 %v2652_v10  ;;  %v2694_v47 = vand.u32 4294901760, %v9494_v59  ;;  %1126 = vmatpush1.msra.mxu0 %v9439_v44  ;;  %v9523_v10 = vsub.f32 %v1075_v53, %v9507_v40  ;;  %v188_v53 = vld [vmem:[%s9310_s6 + $0xb8] sm:$0xff] }
  0x4a   : > { %v16279_v2 = vand.u32 4294901760, %v9454_v55  ;;  %v2681_v46 = vsub.f32 %v9451_v54, %v16277_v0  ;;  %v9499_v0 = vand.u32 4294901760, %v1077_v5 }
  0x4b   : > { %17005 = vst [vmem:[#allocation15_spill] sm:$0xff] %v9497_v63  ;;  %17007 = vst [vmem:[#allocation17_spill] sm:$0xff] %v9501_v62  ;;  %1128 = vmatprep.subr.mxu0 %v9497_v63  ;;  %v16301_v35 = vand.u32 4294901760, %v9523_v10 }
  0x4c   : > { %347 = vperm.xlu1 %9117, %v182_v23   ;;  %344 = vperm.xlu0 %9116, %v181_v24   ;;  %v2658_v23 = vand.u32 4294901760, %v2657_v60  ;;  %v2664_v24 = vand.u32 4294901760, %v2663_v61  ;;  %v9489_v12 = vsub.f32 %v9454_v55, %v16279_v2  ;;  %v1074_v60 = vld [vmem:[#allocation2 + $0x58] sm:$0xff]  ;;  %v2676_v61 = vand.u32 4294901760, %v2675_v11  ;;  %17006 = vst [vmem:[#allocation16_spill] sm:$0xff] %v9499_v0  ;;  %v1072_v2 = vld [vmem:[#allocation2 + $0x48] sm:$0xff] }
  0x4d   : > { %v2682_v3 = vand.u32 4294901760, %v2681_v46  ;;  %v9517_v11 = vsub.f32 %v1076_v9, %v9501_v62  ;;  %v9519_v46 = vand.u32 4294901760, %v1074_v60  ;;  %17013 = vst [vmem:[#allocation23_spill] sm:$0xff] %v9523_v10  ;;  %1130 = vmatpush1.msra.mxu0 %v9499_v0 }
  0x4e   : > { %v2688_v49 = vand.u32 4294901760, %v9489_v12  ;;  %2659 = vmatpush1.msra.mxu1 %v2658_v23  ;;  %v9525_v23 = vand.u32 4294901760, %v1073_v13  ;;  %v9529_v12 = vand.u32 4294901760, %v1071_v45  ;;  %1132 = vmatprep.subr.mxu0 %v9501_v62 }
  0x4f   : > { %17011 = vst [vmem:[#allocation21_spill] sm:$0xff] %v9517_v11  ;;  %17012 = vst [vmem:[#allocation22_spill] sm:$0xff] %v9519_v46  ;;  %2665 = vmatprep.subr.mxu1 %v2664_v24  ;;  %v16296_v59 = vand.u32 4294901760, %v9517_v11  ;;  %v9536_v24 = vsub.f32 %v1074_v60, %v9519_v46  ;;  %1134 = vmatpush1.msra.mxu0 %v9507_v40 }
  0x50   : > { %353 = vperm.xlu1 %9117, %v184_v57   ;;  %350 = vperm.xlu0 %9116, %v183_v58   ;;  %v9511_v57 = vsub.f32 %v1078_v4, %v9497_v63  ;;  %v9514_v58 = vsub.f32 %v1077_v5, %v9499_v0  ;;  %17014 = vst [vmem:[#allocation24_spill] sm:$0xff] %v9525_v23  ;;  %v9527_v4 = vand.u32 4294901760, %v1072_v2  ;;  %17015 = vst [vmem:[#allocation25_spill] sm:$0xff] %v9529_v12  ;;  %v1069_v0 = vld [vmem:[#allocation2 + $0x30] sm:$0xff] }
  0x51   : > { %17016 = vst [vmem:[#allocation26_spill] sm:$0xff] %v9536_v24  ;;  %2671 = vmatpush1.msra.mxu1 %v2670_v48  ;;  %v9542_v34 = vsub.f32 %v1073_v13, %v9525_v23  ;;  %v2711_v13 = vsub.f32 %v9517_v11, %v16296_v59  ;;  %v1068_v59 = vld [vmem:[#allocation2 + $0x28] sm:$0xff]  ;;  %v17020_v62 = vand.u32 4294901760, %v9536_v24  ;;  %1136 = vmatprep.subr.mxu0 %v9519_v46 }
  0x52   : > { %17009 = vst [vmem:[#allocation19_spill] sm:$0xff] %v9511_v57  ;;  %17010 = vst [vmem:[#allocation20_spill] sm:$0xff] %v9514_v58  ;;  %v16290_v5 = vand.u32 4294901760, %v9511_v57  ;;  %v16291_v9 = vand.u32 4294901760, %v9514_v58  ;;  %2677 = vmatprep.subr.mxu1 %v2676_v61  ;;  %v189_v61 = vld [vmem:[%s9310_s6 + $0xc0] sm:$0xff]  ;;  %1138 = vmatpush1.msra.mxu0 %v9525_v23 }
  0x53   : > { %17017 = vst [vmem:[#allocation27_spill] sm:$0xff] %v9542_v34  ;;  %2683 = vmatpush1.msra.mxu1 %v2682_v3  ;;  %v2723_v11 = vsub.f32 %v9536_v24, %v17020_v62  ;;  %1140 = vmatprep.subr.mxu0 %v9527_v4 }
  0x54   : > { %359 = vperm.xlu1 %9117, %v186_v51   ;;  %356 = vperm.xlu0 %9116, %v185_v50   ;;  %v9545_v51 = vsub.f32 %v1072_v2, %v9527_v4  ;;  %v9548_v50 = vsub.f32 %v1071_v45, %v9529_v12  ;;  %v2699_v60 = vsub.f32 %v9511_v57, %v16290_v5  ;;  %v2712_v5 = vand.u32 4294901760, %v2711_v13 }
  0x55   : > { %v2705_v48 = vsub.f32 %v9514_v58, %v16291_v9  ;;  %v2717_v45 = vsub.f32 %v9523_v10, %v16301_v35  ;;  %v1067_v35 = vld [vmem:[#allocation2 + $0x20] sm:$0xff]  ;;  %v190_v10 = vld [vmem:[%s9310_s6 + $0xc8] sm:$0xff]  ;;  %2689 = vmatprep.subr.mxu1 %v2688_v49  ;;  %v17021_v9 = vand.u32 4294901760, %v9542_v34  ;;  %v9586_v49 = vand.u32 4294901760, %v1070_v1  ;;  %1142 = vmatpush1.msra.mxu0 %v9529_v12 }
  0x56   : > { %17018 = vst [vmem:[#allocation28_spill] sm:$0xff] %v9545_v51  ;;  %17019 = vst [vmem:[#allocation29_spill] sm:$0xff] %v9548_v50  ;;  %v2700_v2 = vand.u32 4294901760, %v2699_v60  ;;  %v17022_v40 = vand.u32 4294901760, %v9545_v51  ;;  %2695 = vmatpush1.msra.mxu1 %v2694_v47  ;;  %v17023_v62 = vand.u32 4294901760, %v9548_v50  ;;  %v9590_v13 = vand.u32 4294901760, %v1068_v59 }
  0x57   : > { %v2706_v3 = vand.u32 4294901760, %v2705_v48  ;;  %v2718_v63 = vand.u32 4294901760, %v2717_v45  ;;  %v2729_v58 = vsub.f32 %v9542_v34, %v17021_v9  ;;  %17024 = vst [vmem:[#allocation30_spill] sm:$0xff] %v9586_v49  ;;  %v9588_v48 = vand.u32 4294901760, %v1069_v0  ;;  %v1065_v9 = vld [vmem:[#allocation2 + $0x10] sm:$0xff]  ;;  %v1063_v45 = vld [vmem:[#allocation2] sm:$0xff]  ;;  %1144 = vmatprep.subr.mxu0 %v9586_v49 }
  0x58   : > { %365 = vperm.xlu1 %9117, %v188_v53   ;;  %362 = vperm.xlu0 %9116, %v187_v36   ;;  %v2735_v36 = vsub.f32 %v9545_v51, %v17022_v40  ;;  %v1066_v53 = vld [vmem:[#allocation2 + $0x18] sm:$0xff]  ;;  %v9584_v60 = vsub.f32 %v9548_v50, %v17023_v62  ;;  %v1064_v40 = vld [vmem:[#allocation2 + $0x8] sm:$0xff]  ;;  %v2724_v47 = vand.u32 4294901760, %v2723_v11  ;;  %v9593_v34 = vand.u32 4294901760, %v1067_v35 }
  0x59   : > { %17025 = vst [vmem:[#allocation31_spill] sm:$0xff] %v9588_v48  ;;  %2701 = vmatprep.subr.mxu1 %v2700_v2  ;;  %v2730_v51 = vand.u32 4294901760, %v2729_v58  ;;  %v9597_v62 = vsub.f32 %v1070_v1, %v9586_v49  ;;  %v9600_v50 = vsub.f32 %v1069_v0, %v9588_v48  ;;  %v9603_v23 = vsub.f32 %v1068_v59, %v9590_v13  ;;  %v192_v11 = vld [vmem:[%s9310_s6 + $0xd8] sm:$0xff]  ;;  %v191_v58 = vld [vmem:[%s9310_s6 + $0xd0] sm:$0xff] }
  0x5a   : > { %v2736_v46 = vand.u32 4294901760, %v2735_v36  ;;  %v9605_v24 = vand.u32 4294901760, %v1066_v53  ;;  %2707 = vmatpush1.msra.mxu1 %v2706_v3  ;;  %v9610_v2 = vsub.f32 %v1067_v35, %v9593_v34  ;;  %v9612_v36 = vand.u32 4294901760, %v1065_v9  ;;  %1146 = vmatpush1.msra.mxu0 %v9588_v48  ;;  %v194_v3 = vld [vmem:[%s9310_s6 + $0xe8] sm:$0xff] }
  0x5b   : > { %17026 = vst [vmem:[#allocation32_spill] sm:$0xff] %v9597_v62  ;;  %17027 = vst [vmem:[#allocation33_spill] sm:$0xff] %v9600_v50  ;;  %v9617_v1 = vand.u32 4294901760, %v1063_v45  ;;  %2713 = vmatprep.subr.mxu1 %v2712_v5  ;;  %v16326_v59 = vand.u32 4294901760, %v9600_v50  ;;  %v17035_v49 = vand.u32 4294901760, %v9603_v23  ;;  %1148 = vmatprep.subr.mxu0 %v9590_v13 }
  0x5c   : > { %371 = vperm.xlu1 %9117, %v190_v10   ;;  %368 = vperm.xlu0 %9116, %v189_v61   ;;  %17028 = vst [vmem:[#allocation34_spill] sm:$0xff] %v9603_v23  ;;  %17029 = vst [vmem:[#allocation35_spill] sm:$0xff] %v9612_v36  ;;  %v9614_v10 = vand.u32 4294901760, %v1064_v40  ;;  %v9623_v35 = vsub.f32 %v1066_v53, %v9605_v24  ;;  %v9628_v12 = vsub.f32 %v1065_v9, %v9612_v36 }
  0x5d   : > { %17031 = vst [vmem:[#allocation37_spill] sm:$0xff] %v9617_v1  ;;  %2719 = vmatpush1.msra.mxu1 %v2718_v63  ;;  %v9634_v0 = vsub.f32 %v1063_v45, %v9617_v1  ;;  %v17034_v53 = vand.u32 4294901760, %v9597_v62  ;;  %v2753_v63 = vsub.f32 %v9600_v50, %v16326_v59  ;;  %v2742_v45 = vand.u32 4294901760, %v9584_v60  ;;  %1150 = vmatpush1.msra.mxu0 %v9593_v34 }
  0x5e   : > { %17030 = vst [vmem:[#allocation36_spill] sm:$0xff] %v9614_v10  ;;  %v9631_v5 = vsub.f32 %v1064_v40, %v9614_v10  ;;  %v193_v40 = vld [vmem:[%s9310_s6 + $0xe0] sm:$0xff]  ;;  %2725 = vmatprep.subr.mxu1 %v2724_v47  ;;  %v17036_v59 = vand.u32 4294901760, %v9610_v2  ;;  %v17037_v48 = vand.u32 4294901760, %v9623_v35  ;;  %1152 = vmatprep.subr.mxu0 %v9605_v24  ;;  %v17038_v47 = vand.u32 4294901760, %v9628_v12 }
  0x5f   : > { %17033 = vst [vmem:[#allocation39_spill] sm:$0xff] %v9634_v0  ;;  %v2747_v61 = vsub.f32 %v9597_v62, %v17034_v53  ;;  %2731 = vmatpush1.msra.mxu1 %v2730_v51  ;;  %v2754_v60 = vand.u32 4294901760, %v2753_v63  ;;  %v196_v51 = vld [vmem:[%s9310_s6 + $0xf8] sm:$0xff]  ;;  %1154 = vmatpush1.msra.mxu0 %v9612_v36 }
  0x60   : > { %17032 = vst [vmem:[#allocation38_spill] sm:$0xff] %v9631_v5  ;;  %377 = vperm.xlu1 %9117, %v192_v11   ;;  %374 = vperm.xlu0 %9116, %v191_v58   ;;  %v2759_v11 = vsub.f32 %v9603_v23, %v17035_v49  ;;  %v2765_v9 = vsub.f32 %v9610_v2, %v17036_v59  ;;  %v17039_v63 = vand.u32 4294901760, %v9631_v5 }
  0x61   : > { %v2748_v53 = vand.u32 4294901760, %v2747_v61  ;;  %2737 = vmatprep.subr.mxu1 %v2736_v46  ;;  %v2771_v49 = vsub.f32 %v9623_v35, %v17037_v48  ;;  %v195_v61 = vld [vmem:[%s9310_s6 + $0xf0] sm:$0xff]  ;;  %v2777_v46 = vsub.f32 %v9628_v12, %v17038_v47  ;;  %1156 = vmatprep.subr.mxu0 %v9614_v10 }
  0x62   : > { %2743 = vmatpush1.msra.mxu1 %v2742_v45  ;;  %v2760_v59 = vand.u32 4294901760, %v2759_v11  ;;  %v2766_v48 = vand.u32 4294901760, %v2765_v9  ;;  %v2783_v58 = vsub.f32 %v9631_v5, %v17039_v63  ;;  %1158 = vmatpush1.msra.mxu0 %v9617_v1  ;;  %v198_v11 = vld [vmem:[%s9310_s6 + $0x108] sm:$0xff]  ;;  %v197_v9 = vld [vmem:[%s9310_s6 + $0x100] sm:$0xff] }
  0x63   : > { %2749 = vmatprep.subr.mxu1 %v2748_v53  ;;  %v2778_v53 = vand.u32 4294901760, %v2777_v46  ;;  %3723 = vmatprep.subr.mxu0 %v9333_v25  ;;  %v203_v46 = vld [vmem:[%s9310_s6 + $0x130] sm:$0xff]  ;;  %v205_v63 = vld [vmem:[%s9310_s6 + $0x140] sm:$0xff] }
  0x64   : > { %383 = vperm.xlu1 %9117, %v194_v3   ;;  %380 = vperm.xlu0 %9116, %v193_v40   ;;  %v2772_v3 = vand.u32 4294901760, %v2771_v49  ;;  %v17040_v40 = vand.u32 4294901760, %v9634_v0  ;;  %v2784_v47 = vand.u32 4294901760, %v2783_v58  ;;  %v200_v49 = vld [vmem:[%s9310_s6 + $0x118] sm:$0xff] }
  0x65   : > { %2755 = vmatpush1.msra.mxu1 %v2754_v60  ;;  %v204_v58 = vld [vmem:[%s9310_s6 + $0x138] sm:$0xff] }
  0x66   : > { %v2789_v45 = vsub.f32 %v9634_v0, %v17040_v40  ;;  %2761 = vmatprep.subr.mxu1 %v2760_v59  ;;  %v201_v59 = vld [vmem:[%s9310_s6 + $0x120] sm:$0xff]  ;;  %v207_v40 = vld [vmem:[%s9310_s6 + $0x150] sm:$0xff] }
  0x67   : > { %2767 = vmatpush1.msra.mxu1 %v2766_v48  ;;  %v206_v48 = vld [vmem:[%s9310_s6 + $0x148] sm:$0xff] }
  0x68   : > { %389 = vperm.xlu1 %9117, %v196_v51   ;;  %386 = vperm.xlu0 %9116, %v195_v61   ;;  %v2790_v60 = vand.u32 4294901760, %v2789_v45  ;;  %v199_v51 = vld [vmem:[%s9310_s6 + $0x110] sm:$0xff]  ;;  %v202_v61 = vld [vmem:[%s9310_s6 + $0x128] sm:$0xff] }
  0x69   : > { %2773 = vmatprep.subr.mxu1 %v2772_v3  ;;  %v208_v3 = vld [vmem:[%s9310_s6 + $0x158] sm:$0xff]  ;;  %v210_v45 = vld [vmem:[%s9310_s6 + $0x168] sm:$0xff] }
  0x6a   : > { %2779 = vmatpush1.msra.mxu1 %v2778_v53  ;;  %v211_v53 = vld [vmem:[%s9310_s6 + $0x170] sm:$0xff] }
  0x6b   : > { %2785 = vmatprep.subr.mxu1 %v2784_v47  ;;  %v214_v47 = vld [vmem:[%s9310_s6 + $0x188] sm:$0xff] }
  0x6c   : > { %395 = vperm.xlu1 %9117, %v198_v11   ;;  %392 = vperm.xlu0 %9116, %v197_v9   ;;  %v209_v11 = vld [vmem:[%s9310_s6 + $0x160] sm:$0xff]  ;;  %v212_v9 = vld [vmem:[%s9310_s6 + $0x178] sm:$0xff] }
  0x6d   : > { %2791 = vmatpush1.msra.mxu1 %v2790_v60  ;;  %v213_v60 = vld [vmem:[%s9310_s6 + $0x180] sm:$0xff] }
  0x6e   : > { %4875 = vmatprep.subr.mxu1 %v9324_v17 }
  0x70   : > { %401 = vperm.xlu1 %9117, %v200_v49   ;;  %398 = vperm.xlu0 %9116, %v199_v51   ;;  %v216_v49 = vld [vmem:[%s9310_s6 + $0x198] sm:$0xff]  ;;  %v215_v51 = vld [vmem:[%s9310_s6 + $0x190] sm:$0xff] }
  0x74   : > { %407 = vperm.xlu1 %9117, %v202_v61   ;;  %404 = vperm.xlu0 %9116, %v201_v59   ;;  %v218_v61 = vld [vmem:[%s9310_s6 + $0x1a8] sm:$0xff]  ;;  %v217_v59 = vld [vmem:[%s9310_s6 + $0x1a0] sm:$0xff] }
  0x78   : > { %413 = vperm.xlu1 %9117, %v204_v58   ;;  %410 = vperm.xlu0 %9116, %v203_v46   ;;  %v220_v58 = vld [vmem:[%s9310_s6 + $0x1b8] sm:$0xff]  ;;  %v219_v46 = vld [vmem:[%s9310_s6 + $0x1b0] sm:$0xff] }
  0x7c   : > { %419 = vperm.xlu1 %9117, %v206_v48   ;;  %416 = vperm.xlu0 %9116, %v205_v63   ;;  %v222_v48 = vld [vmem:[%s9310_s6 + $0x1c8] sm:$0xff]  ;;  %v221_v63 = vld [vmem:[%s9310_s6 + $0x1c0] sm:$0xff] }
  0x80   : > { %425 = vperm.xlu1 %9117, %v208_v3   ;;  %422 = vperm.xlu0 %9116, %v207_v40   ;;  %v224_v3 = vld [vmem:[%s9310_s6 + $0x1d8] sm:$0xff]  ;;  %v223_v40 = vld [vmem:[%s9310_s6 + $0x1d0] sm:$0xff] }
  0x84   : > { %431 = vperm.xlu1 %9117, %v210_v45   ;;  %428 = vperm.xlu0 %9116, %v209_v11   ;;  %v293_v45 = vlaneseq  ;;  %v226_v11 = vld [vmem:[%s9310_s6 + $0x1e8] sm:$0xff] }
  0x88   : > { %437 = vperm.xlu1 %9117, %v212_v9   ;;  %434 = vperm.xlu0 %9116, %v211_v53   ;;  %v225_v9 = vld [vmem:[%s9310_s6 + $0x1e0] sm:$0xff]  ;;  %v9708_v53 = vand.u32 127, %v293_v45 }
  0x8a   : > { %17041 = vst [vmem:[#allocation40_spill] sm:$0xff] %v9708_v53 }
  0x8c   : > { %443 = vperm.xlu1 %9117, %v214_v47   ;;  %440 = vperm.xlu0 %9116, %v213_v60   ;;  %v228_v47 = vld [vmem:[%s9310_s6 + $0x1f8] sm:$0xff]  ;;  %v227_v60 = vld [vmem:[%s9310_s6 + $0x1f0] sm:$0xff] }
  0x90   : > { %449 = vperm.xlu1 %9117, %v216_v49   ;;  %446 = vperm.xlu0 %9116, %v215_v51  }
  0x94   : > { %455 = vperm.xlu1 %9117, %v218_v61   ;;  %452 = vperm.xlu0 %9116, %v217_v59   ;;  %v17044_v61 = vmov 0.0  }
  0x98   : > { %461 = vperm.xlu1 %9117, %v220_v58   ;;  %458 = vperm.xlu0 %9116, %v219_v46   ;;  %v16333_v46 = vmov 1.0  }
  0x9c   : > { %467 = vperm.xlu1 %9117, %v222_v48   ;;  %464 = vperm.xlu0 %9116, %v221_v63   ;;  %v230_v48 = vld [vmem:[%s9310_s6 + $0x208] sm:$0xff]  ;;  %v229_v63 = vld [vmem:[%s9310_s6 + $0x200] sm:$0xff] }
  0xa0   : > { %473 = vperm.xlu1 %9117, %v224_v3   ;;  %470 = vperm.xlu0 %9116, %v223_v40  }
  0xa4   : > { %479 = vperm.xlu1 %9117, %v226_v11   ;;  %476 = vperm.xlu0 %9116, %v225_v9  }
  0xa7   : > { %v9712_v49 = vpop.permute.xlu1 %302  ;;  %v9714_v51 = vpop.permute.xlu0 %296 }
  0xa8   : > { %17042 = vst [vmem:[#allocation41_spill] sm:$0xff] %v9712_v49  ;;  %17043 = vst [vmem:[#allocation42_spill] sm:$0xff] %v9714_v51  ;;  %vm681_vm0 = vcmp.eq.s32.totalorder %v9712_v49, %v9708_v53  ;;  %vm679_vm1 = vcmp.eq.s32.totalorder %v9714_v51, %v9708_v53  ;;  %485 = vperm.xlu1 %9117, %v228_v47   ;;  %482 = vperm.xlu0 %9116, %v227_v60  }
  0xa9   : > { %v8536_v59 = vsel %vm681_vm0, 1.0, %v17044_v61  ;;  %v8534_v58 = vsel %vm679_vm1, 1.0, %v17044_v61  ;;  %8662 = vmatmul.mubr.msk.f32.vlgmr.msra.gmra.mxu1 %vm679_vm1, %v16333_v46 }
  0xaa   : > { %v9734_v3 = vsub.f32 %v8534_v58, %v8534_v58  ;;  %2831 = vmatprep.mubr.f32.mxu1 %v17044_v61  ;;  %4877 = vmatpush1.msra.mxu1 %v9326_v18  ;;  %v9738_v40 = vsub.f32 %v8536_v59, %v8536_v59  ;;  %v232_v59 = vld [vmem:[%s9310_s6 + $0x218] sm:$0xff]  ;;  %v231_v58 = vld [vmem:[%s9310_s6 + $0x210] sm:$0xff]  ;;  %v233_v18 = vld [vmem:[%s9310_s6 + $0x220] sm:$0xff] }
  0xab   : > { %v9740_v45 = vpop.permute.xlu1 %305  ;;  %v9742_v11 = vpop.permute.xlu0 %299  ;;  %4879 = vmatprep.subr.mxu1 %v9328_v19 }
  0xac   : > { %17045 = vst [vmem:[#allocation43_spill] sm:$0xff] %v9734_v3  ;;  %17046 = vst [vmem:[#allocation44_spill] sm:$0xff] %v9740_v45  ;;  %vm682_vm2 = vcmp.eq.s32.totalorder %v9740_v45, %v9708_v53  ;;  %vm680_vm3 = vcmp.eq.s32.totalorder %v9742_v11, %v9708_v53  ;;  %491 = vperm.xlu1 %9117, %v230_v48   ;;  %488 = vperm.xlu0 %9116, %v229_v63   ;;  %v16337_v9 = vand.u32 4294901760, %v9734_v3 }
  0xad   : > { %17047 = vst [vmem:[#allocation45_spill] sm:$0xff] %v9742_v11  ;;  %v8537_v47 = vsel %vm682_vm2, 1.0, %v17044_v61  ;;  %v8535_v60 = vsel %vm680_vm3, 1.0, %v17044_v61  ;;  %8663 = vmatmul.mubr.msk.f32.gmra.mxu1 %vm680_vm3, %v16333_v46 }
  0xae   : > { %v9764_v48 = vsub.f32 %v8535_v60, %v8535_v60  ;;  %2838 = vmatprep.mubr.f32.mxu1 %v17044_v61  ;;  %v1195_v63 = vsub.f32 %v9734_v3, %v16337_v9  ;;  %4881 = vmatpush1.msra.mxu1 %v9330_v21  ;;  %v9776_v46 = vsub.f32 %v8537_v47, %v8537_v47  ;;  %v17050_v3 = vmov 1.0   ;;  %v234_v47 = vld [vmem:[%s9310_s6 + $0x228] sm:$0xff] }
  0xaf   : > { %v9770_v51 = vpop.permute.xlu1 %311  ;;  %v9772_v19 = vpop.permute.xlu0 %308  ;;  %4883 = vmatprep.subr.mxu1 %v9341_v28  ;;  %v17052_v28 = vand.u32 4294901760, %v9738_v40 }
  0xb0   : > { %17048 = vst [vmem:[#allocation46_spill] sm:$0xff] %v9770_v51  ;;  %17049 = vst [vmem:[#allocation47_spill] sm:$0xff] %v9772_v19  ;;  %vm683_vm4 = vcmp.eq.s32.totalorder %v9772_v19, %v9708_v53  ;;  %497 = vperm.xlu1 %9117, %v232_v59   ;;  %494 = vperm.xlu0 %9116, %v231_v58   ;;  %v1196_v60 = vand.u32 4294901760, %v1195_v63  ;;  %v16344_v11 = vand.u32 4294901760, %v9764_v48  ;;  %v16348_v21 = vand.u32 4294901760, %v9776_v46 }
  0xb1   : > { %v8538_v9 = vsel %vm683_vm4, 1.0, %v17044_v61  ;;  %8664 = vmatmul.mubr.msk.f32.gmra.mxu1 %vm681_vm0, %v17050_v3  ;;  %vm684_vm5 = vcmp.eq.s32.totalorder %v9770_v51, %v9708_v53 }
  0xb2   : > { %1197 = vmatmul.mubr.f32.vlgmr.msra.gmra.mxu0 %v1196_v60  ;;  %2845 = vmatprep.mubr.f32.mxu1 %v17044_v61  ;;  %v1206_v59 = vsub.f32 %v9764_v48, %v16344_v11  ;;  %v9802_v63 = vsub.f32 %v8538_v9, %v8538_v9  ;;  %v1217_v60 = vsub.f32 %v9738_v40, %v17052_v28  ;;  %v8539_v11 = vsel %vm684_vm5, 1.0, %v17044_v61  ;;  %v236_v9 = vld [vmem:[%s9310_s6 + $0x238] sm:$0xff] }
  0xb3   : > { %3726 = vmatpush1.msra.mxu0 %v9336_v26  ;;  %v9799_v58 = vpop.permute.xlu0 %314  ;;  %1202 = vmatprep.mubr.f32.mxu0 %v17044_v61  ;;  %v9826_v28 = vsub.f32 %v8539_v11, %v8539_v11  ;;  %v1228_v45 = vsub.f32 %v9776_v46, %v16348_v21  ;;  %v238_v11 = vld [vmem:[%s9310_s6 + $0x248] sm:$0xff] }
  0xb4   : > { %17051 = vst [vmem:[#allocation48_spill] sm:$0xff] %v9799_v58  ;;  %503 = vperm.xlu1 %9117, %v234_v47   ;;  %500 = vperm.xlu0 %9116, %v233_v18   ;;  %v1207_v49 = vand.u32 4294901760, %v1206_v59  ;;  %v235_v47 = vld [vmem:[%s9310_s6 + $0x230] sm:$0xff]  ;;  %vm685_vm6 = vcmp.eq.s32.totalorder %v9799_v58, %v9708_v53  ;;  %v9822_v18 = vpop.permute.xlu1 %317  ;;  %v1218_v59 = vand.u32 4294901760, %v1217_v60 }
  0xb5   : > { %8665 = vmatmul.mubr.msk.f32.gmra.mxu1 %vm682_vm2, %v17050_v3  ;;  %3729 = vmatprep.subr.mxu0 %v9339_v27  ;;  %17053 = vst [vmem:[#allocation49_spill] sm:$0xff] %v9822_v18  ;;  %17054 = vst [vmem:[#allocation50_spill] sm:$0xff] %v9826_v28  ;;  %v16352_v27 = vand.u32 4294901760, %v9802_v63  ;;  %vm686_vm7 = vcmp.eq.s32.totalorder %v9822_v18, %v9708_v53  ;;  %v1229_v21 = vand.u32 4294901760, %v1228_v45 }
  0xb6   : > { %1208 = vmatmul.mubr.f32.gmra.mxu0 %v1207_v49  ;;  %2852 = vmatprep.mubr.f32.mxu1 %v17044_v61  ;;  %v8540_v49 = vsel %vm685_vm6, 1.0, %v17044_v61 }
  0xb7   : > { %1213 = vmatprep.mubr.f32.mxu0 %v17044_v61  ;;  %3732 = vmatpush1.msra.mxu0 %v9345_v30  ;;  %v9846_v60 = vpop.permute.xlu0 %320  ;;  %v1239_v19 = vsub.f32 %v9802_v63, %v16352_v27 }
  0xb8   : > { %509 = vperm.xlu1 %9117, %v236_v9   ;;  %506 = vperm.xlu0 %9116, %v235_v47   ;;  %v237_v9 = vld [vmem:[%s9310_s6 + $0x240] sm:$0xff]  ;;  %17055 = vst [vmem:[#allocation51_spill] sm:$0xff] %v9846_v60  ;;  %v9850_v47 = vsub.f32 %v8540_v49, %v8540_v49  ;;  %v240_v49 = vld [vmem:[%s9310_s6 + $0x258] sm:$0xff]  ;;  %vm687_vm8 = vcmp.eq.s32.totalorder %v9846_v60, %v9708_v53  ;;  %v9870_v45 = vpop.permute.xlu1 %323 }
  0xb9   : > { %8666 = vmatmul.mubr.msk.f32.gmra.mxu1 %vm683_vm4, %v17050_v3  ;;  %3735 = vmatprep.subr.mxu0 %v9358_v37  ;;  %v16356_v37 = vand.u32 4294901760, %v9826_v28  ;;  %17057 = vst [vmem:[#allocation53_spill] sm:$0xff] %v9870_v45  ;;  %v1240_v27 = vand.u32 4294901760, %v1239_v19  ;;  %vm688_vm9 = vcmp.eq.s32.totalorder %v9870_v45, %v9708_v53 }
  0xba   : > { %1219 = vmatmul.mubr.f32.gmra.mxu0 %v1218_v59  ;;  %2859 = vmatprep.mubr.f32.mxu1 %v17044_v61  ;;  %17056 = vst [vmem:[#allocation52_spill] sm:$0xff] %v9850_v47  ;;  %v8541_v59 = vsel %vm686_vm7, 1.0, %v17044_v61 }
  0xbb   : > { %1224 = vmatprep.mubr.f32.mxu0 %v17044_v61  ;;  %3738 = vmatpush1.msra.mxu0 %v9364_v41  ;;  %v1250_v51 = vsub.f32 %v9826_v28, %v16356_v37  ;;  %v9894_v19 = vpop.permute.xlu0 %326 }
  0xbc   : > { %515 = vperm.xlu1 %9117, %v238_v11   ;;  %512 = vperm.xlu0 %9116, %v237_v9   ;;  %v239_v11 = vld [vmem:[%s9310_s6 + $0x250] sm:$0xff]  ;;  %v9874_v9 = vsub.f32 %v8541_v59, %v8541_v59  ;;  %v242_v59 = vld [vmem:[%s9310_s6 + $0x268] sm:$0xff]  ;;  %17059 = vst [vmem:[#allocation55_spill] sm:$0xff] %v9894_v19  ;;  %vm689_vm10 = vcmp.eq.s32.totalorder %v9894_v19, %v9708_v53 }
  0xbd   : > { %8667 = vmatmul.mubr.msk.f32.gmra.mxu1 %vm684_vm5, %v17050_v3  ;;  %3741 = vmatprep.subr.mxu0 %v9367_v42  ;;  %v16361_v42 = vand.u32 4294901760, %v9850_v47  ;;  %v1251_v37 = vand.u32 4294901760, %v1250_v51  ;;  %v9918_v51 = vpop.permute.xlu1 %329 }
  0xbe   : > { %1230 = vmatmul.mubr.f32.gmra.mxu0 %v1229_v21  ;;  %2866 = vmatprep.mubr.f32.mxu1 %v17044_v61  ;;  %17058 = vst [vmem:[#allocation54_spill] sm:$0xff] %v9874_v9  ;;  %v8542_v21 = vsel %vm687_vm8, 1.0, %v17044_v61  ;;  %v16366_v28 = vand.u32 4294901760, %v9874_v9  ;;  %17061 = vst [vmem:[#allocation57_spill] sm:$0xff] %v9918_v51  ;;  %vm690_vm11 = vcmp.eq.s32.totalorder %v9918_v51, %v9708_v53 }
  0xbf   : > { %1235 = vmatprep.mubr.f32.mxu0 %v17044_v61  ;;  %4885 = vmatpush1.msra.mxu1 %v9347_v31  ;;  %v1261_v58 = vsub.f32 %v9850_v47, %v16361_v42 }
  0xc0   : > { %521 = vperm.xlu1 %9117, %v240_v49   ;;  %518 = vperm.xlu0 %9116, %v239_v11   ;;  %v241_v49 = vld [vmem:[%s9310_s6 + $0x260] sm:$0xff]  ;;  %v9898_v11 = vsub.f32 %v8542_v21, %v8542_v21  ;;  %v244_v21 = vld [vmem:[%s9310_s6 + $0x278] sm:$0xff]  ;;  %v1272_v18 = vsub.f32 %v9874_v9, %v16366_v28 }
  0xc1   : > { %8668 = vmatmul.mubr.msk.f32.gmra.mxu1 %vm685_vm6, %v17050_v3  ;;  %3744 = vmatpush1.msra.mxu0 %v9370_v43  ;;  %v1262_v42 = vand.u32 4294901760, %v1261_v58  ;;  %v9942_v58 = vpop.permute.xlu0 %332 }
  0xc2   : > { %1241 = vmatmul.mubr.f32.gmra.mxu0 %v1240_v27  ;;  %2873 = vmatprep.mubr.f32.mxu1 %v17044_v61  ;;  %17060 = vst [vmem:[#allocation56_spill] sm:$0xff] %v9898_v11  ;;  %v8543_v27 = vsel %vm688_vm9, 1.0, %v17044_v61  ;;  %v16371_v47 = vand.u32 4294901760, %v9898_v11  ;;  %17063 = vst [vmem:[#allocation59_spill] sm:$0xff] %v9942_v58  ;;  %v1273_v28 = vand.u32 4294901760, %v1272_v18  ;;  %vm16391_vm12 = vcmp.eq.s32.totalorder %v9942_v58, %v9708_v53  ;;  %v9966_v18 = vpop.permute.xlu1 %335 }
  0xc3   : > { %1246 = vmatprep.mubr.f32.mxu0 %v17044_v61  ;;  %4887 = vmatprep.subr.mxu1 %v9349_v32  ;;  %17065 = vst [vmem:[#allocation61_spill] sm:$0xff] %v9966_v18  ;;  %vm16397_vm13 = vcmp.eq.s32.totalorder %v9966_v18, %v9708_v53 }
  0xc4   : > { %527 = vperm.xlu1 %9117, %v242_v59   ;;  %524 = vperm.xlu0 %9116, %v241_v49   ;;  %v243_v59 = vld [vmem:[%s9310_s6 + $0x270] sm:$0xff]  ;;  %v9922_v49 = vsub.f32 %v8543_v27, %v8543_v27  ;;  %v246_v27 = vld [vmem:[%s9310_s6 + $0x288] sm:$0xff]  ;;  %v1283_v60 = vsub.f32 %v9898_v11, %v16371_v47 }
  0xc5   : > { %8669 = vmatmul.mubr.msk.f32.gmra.mxu1 %vm686_vm7, %v17050_v3  ;;  %3747 = vmatprep.subr.mxu0 %v9420_v15 }
  0xc6   : > { %1252 = vmatmul.mubr.f32.gmra.mxu0 %v1251_v37  ;;  %2880 = vmatprep.mubr.f32.mxu1 %v17044_v61  ;;  %17062 = vst [vmem:[#allocation58_spill] sm:$0xff] %v9922_v49  ;;  %v8544_v37 = vsel %vm689_vm10, 1.0, %v17044_v61  ;;  %v16376_v9 = vand.u32 4294901760, %v9922_v49  ;;  %v1284_v47 = vand.u32 4294901760, %v1283_v60  ;;  %v9990_v60 = vpop.permute.xlu0 %338 }
  0xc7   : > { %1257 = vmatprep.mubr.f32.mxu0 %v17044_v61  ;;  %4889 = vmatpush1.msra.mxu1 %v9351_v33  ;;  %17067 = vst [vmem:[#allocation63_spill] sm:$0xff] %v9990_v60  ;;  %vm16403_vm14 = vcmp.eq.s32.totalorder %v9990_v60, %v9708_v53 }
  0xc8   : > { %533 = vperm.xlu1 %9117, %v244_v21   ;;  %530 = vperm.xlu0 %9116, %v243_v59   ;;  %v245_v21 = vld [vmem:[%s9310_s6 + $0x280] sm:$0xff]  ;;  %v9946_v59 = vsub.f32 %v8544_v37, %v8544_v37  ;;  %v248_v37 = vld [vmem:[%s9310_s6 + $0x298] sm:$0xff]  ;;  %v1294_v45 = vsub.f32 %v9922_v49, %v16376_v9 }
  0xc9   : > { %8670 = vmatmul.mubr.msk.f32.gmra.mxu1 %vm687_vm8, %v17050_v3  ;;  %3750 = vmatpush1.msra.mxu0 %v9423_v16 }
  0xca   : > { %1263 = vmatmul.mubr.f32.gmra.mxu0 %v1262_v42  ;;  %2887 = vmatprep.mubr.f32.mxu1 %v17044_v61  ;;  %17064 = vst [vmem:[#allocation60_spill] sm:$0xff] %v9946_v59  ;;  %v8545_v42 = vsel %vm690_vm11, 1.0, %v17044_v61  ;;  %v16381_v11 = vand.u32 4294901760, %v9946_v59  ;;  %v1295_v9 = vand.u32 4294901760, %v1294_v45  ;;  %v10014_v45 = vpop.permute.xlu1 %341 }
  0xcb   : > { %1268 = vmatprep.mubr.f32.mxu0 %v17044_v61  ;;  %4891 = vmatprep.subr.mxu1 %v9408_v6  ;;  %17069 = vst [vmem:[#allocation65_spill] sm:$0xff] %v10014_v45  ;;  %vm16409_vm15 = vcmp.eq.s32.totalorder %v10014_v45, %v9708_v53 }
  0xcc   : > { %539 = vperm.xlu1 %9117, %v246_v27   ;;  %536 = vperm.xlu0 %9116, %v245_v21   ;;  %v247_v27 = vld [vmem:[%s9310_s6 + $0x290] sm:$0xff]  ;;  %v9970_v21 = vsub.f32 %v8545_v42, %v8545_v42  ;;  %v250_v42 = vld [vmem:[%s9310_s6 + $0x2a8] sm:$0xff]  ;;  %v1305_v19 = vsub.f32 %v9946_v59, %v16381_v11 }
  0xcd   : > { %8671 = vmatmul.mubr.msk.f32.gmra.mxu1 %vm688_vm9, %v17050_v3  ;;  %3753 = vmatprep.subr.mxu0 %v9426_v20 }
  0xce   : > { %1274 = vmatmul.mubr.f32.gmra.mxu0 %v1273_v28  ;;  %2894 = vmatprep.mubr.f32.mxu1 %v17044_v61  ;;  %17066 = vst [vmem:[#allocation62_spill] sm:$0xff] %v9970_v21  ;;  %v8546_v28 = vsel %vm16391_vm12, 1.0, %v17044_v61  ;;  %v16386_v49 = vand.u32 4294901760, %v9970_v21  ;;  %v1306_v11 = vand.u32 4294901760, %v1305_v19  ;;  %v10038_v19 = vpop.permute.xlu0 %344 }
  0xcf   : > { %1279 = vmatprep.mubr.f32.mxu0 %v17044_v61  ;;  %4893 = vmatpush1.msra.mxu1 %v9410_v7  ;;  %17071 = vst [vmem:[#allocation67_spill] sm:$0xff] %v10038_v19 }
  0xd0   : > { %545 = vperm.xlu1 %9117, %v248_v37   ;;  %542 = vperm.xlu0 %9116, %v247_v27   ;;  %v249_v37 = vld [vmem:[%s9310_s6 + $0x2a0] sm:$0xff]  ;;  %v9994_v27 = vsub.f32 %v8546_v28, %v8546_v28  ;;  %v252_v28 = vld [vmem:[%s9310_s6 + $0x2b8] sm:$0xff]  ;;  %v1316_v51 = vsub.f32 %v9970_v21, %v16386_v49 }
  0xd1   : > { %8672 = vmatmul.mubr.msk.f32.gmra.mxu1 %vm689_vm10, %v17050_v3  ;;  %3756 = vmatpush1.msra.mxu0 %v9433_v29 }
  0xd2   : > { %1285 = vmatmul.mubr.f32.gmra.mxu0 %v1284_v47  ;;  %2901 = vmatprep.mubr.f32.mxu1 %v17044_v61  ;;  %17068 = vst [vmem:[#allocation64_spill] sm:$0xff] %v9994_v27  ;;  %v8547_v47 = vsel %vm16397_vm13, 1.0, %v17044_v61  ;;  %v16392_v59 = vand.u32 4294901760, %v9994_v27  ;;  %v1317_v49 = vand.u32 4294901760, %v1316_v51  ;;  %v10062_v51 = vpop.permute.xlu1 %347 }
  0xd3   : > { %1290 = vmatprep.mubr.f32.mxu0 %v17044_v61  ;;  %4895 = vmatprep.subr.mxu1 %v9412_v8  ;;  %17073 = vst [vmem:[#allocation69_spill] sm:$0xff] %v10062_v51 }
  0xd4   : > { %551 = vperm.xlu1 %9117, %v250_v42   ;;  %548 = vperm.xlu0 %9116, %v249_v37   ;;  %v251_v42 = vld [vmem:[%s9310_s6 + $0x2b0] sm:$0xff]  ;;  %v10018_v37 = vsub.f32 %v8547_v47, %v8547_v47  ;;  %v254_v47 = vld [vmem:[%s9310_s6 + $0x2c8] sm:$0xff]  ;;  %v1327_v58 = vsub.f32 %v9994_v27, %v16392_v59 }
  0xd5   : > { %8673 = vmatmul.mubr.msk.f32.gmra.mxu1 %vm690_vm11, %v17050_v3  ;;  %3759 = vmatprep.subr.mxu0 %v9446_v52 }
  0xd6   : > { %1296 = vmatmul.mubr.f32.gmra.mxu0 %v1295_v9  ;;  %2908 = vmatprep.mubr.f32.mxu1 %v17044_v61  ;;  %17070 = vst [vmem:[#allocation66_spill] sm:$0xff] %v10018_v37  ;;  %v8548_v9 = vsel %vm16403_vm14, 1.0, %v17044_v61  ;;  %v16398_v21 = vand.u32 4294901760, %v10018_v37  ;;  %v1328_v59 = vand.u32 4294901760, %v1327_v58  ;;  %v10086_v58 = vpop.permute.xlu0 %350 }
  0xd7   : > { %1301 = vmatprep.mubr.f32.mxu0 %v17044_v61  ;;  %4897 = vmatpush1.msra.mxu1 %v9416_v14  ;;  %17075 = vst [vmem:[#allocation71_spill] sm:$0xff] %v10086_v58 }
  0xd8   : > { %557 = vperm.xlu1 %9117, %v252_v28   ;;  %554 = vperm.xlu0 %9116, %v251_v42   ;;  %v253_v28 = vld [vmem:[%s9310_s6 + $0x2c0] sm:$0xff]  ;;  %v10042_v42 = vsub.f32 %v8548_v9, %v8548_v9  ;;  %v256_v9 = vld [vmem:[%s9310_s6 + $0x2d8] sm:$0xff]  ;;  %v1338_v18 = vsub.f32 %v10018_v37, %v16398_v21 }
  0xd9   : > { %8674 = vmatmul.mubr.msk.f32.gmra.mxu1 %vm16391_vm12, %v17050_v3  ;;  %3762 = vmatpush1.msra.mxu0 %v9451_v54  ;;  %vm16416_vm12 = vcmp.eq.s32.totalorder %v10038_v19, %v9708_v53 }
  0xda   : > { %1307 = vmatmul.mubr.f32.gmra.mxu0 %v1306_v11  ;;  %2915 = vmatprep.mubr.f32.mxu1 %v17044_v61  ;;  %17072 = vst [vmem:[#allocation68_spill] sm:$0xff] %v10042_v42  ;;  %v8549_v11 = vsel %vm16409_vm15, 1.0, %v17044_v61  ;;  %v16404_v27 = vand.u32 4294901760, %v10042_v42  ;;  %v1339_v21 = vand.u32 4294901760, %v1338_v18  ;;  %v10110_v18 = vpop.permute.xlu1 %353 }
  0xdb   : > { %1312 = vmatprep.mubr.f32.mxu0 %v17044_v61  ;;  %4899 = vmatprep.subr.mxu1 %v9428_v22  ;;  %17077 = vst [vmem:[#allocation73_spill] sm:$0xff] %v10110_v18 }
  0xdc   : > { %563 = vperm.xlu1 %9117, %v254_v47   ;;  %560 = vperm.xlu0 %9116, %v253_v28   ;;  %v255_v47 = vld [vmem:[%s9310_s6 + $0x2d0] sm:$0xff]  ;;  %v10066_v28 = vsub.f32 %v8549_v11, %v8549_v11  ;;  %v258_v11 = vld [vmem:[%s9310_s6 + $0x2e8] sm:$0xff]  ;;  %v1349_v60 = vsub.f32 %v10042_v42, %v16404_v27 }
  0xdd   : > { %8675 = vmatmul.mubr.msk.f32.gmra.mxu1 %vm16397_vm13, %v17050_v3  ;;  %3765 = vmatprep.subr.mxu0 %v9454_v55  ;;  %vm16421_vm13 = vcmp.eq.s32.totalorder %v10062_v51, %v9708_v53 }
  0xde   : > { %1318 = vmatmul.mubr.f32.gmra.mxu0 %v1317_v49  ;;  %2922 = vmatprep.mubr.f32.mxu1 %v17044_v61  ;;  %17074 = vst [vmem:[#allocation70_spill] sm:$0xff] %v10066_v28  ;;  %v8550_v49 = vsel %vm16416_vm12, 1.0, %v17044_v61  ;;  %v16410_v37 = vand.u32 4294901760, %v10066_v28  ;;  %v1350_v27 = vand.u32 4294901760, %v1349_v60  ;;  %v10134_v60 = vpop.permute.xlu0 %356 }
  0xdf   : > { %1323 = vmatprep.mubr.f32.mxu0 %v17044_v61  ;;  %4901 = vmatpush1.msra.mxu1 %v9435_v38  ;;  %17080 = vst [vmem:[#allocation75_spill] sm:$0xff] %v10134_v60 }
  0xe0   : > { %569 = vperm.xlu1 %9117, %v256_v9   ;;  %566 = vperm.xlu0 %9116, %v255_v47   ;;  %v257_v9 = vld [vmem:[%s9310_s6 + $0x2e0] sm:$0xff]  ;;  %v10090_v47 = vsub.f32 %v8550_v49, %v8550_v49  ;;  %v260_v49 = vld [vmem:[%s9310_s6 + $0x2f8] sm:$0xff]  ;;  %v1360_v45 = vsub.f32 %v10066_v28, %v16410_v37 }
  0xe1   : > { %8676 = vmatmul.mubr.msk.f32.gmra.mxu1 %vm16403_vm14, %v17050_v3  ;;  %3768 = vmatpush1.msra.mxu0 %v9457_v56  ;;  %vm16426_vm14 = vcmp.eq.s32.totalorder %v10086_v58, %v9708_v53  ;;  %v17081_v37 = vld [vmem:[#allocation15_spill] sm:$0xff] }
  0xe2   : > { %1329 = vmatmul.mubr.f32.gmra.mxu0 %v1328_v59  ;;  %2929 = vmatprep.mubr.f32.mxu1 %v17044_v61  ;;  %17076 = vst [vmem:[#allocation72_spill] sm:$0xff] %v10090_v47  ;;  %v8551_v59 = vsel %vm16421_vm13, 1.0, %v17044_v61  ;;  %v1361_v19 = vand.u32 4294901760, %v1360_v45  ;;  %v17083_v28 = vand.u32 4294901760, %v10090_v47  ;;  %v10158_v45 = vpop.permute.xlu1 %359 }
  0xe3   : > { %1334 = vmatprep.mubr.f32.mxu0 %v17044_v61  ;;  %4903 = vmatprep.subr.mxu1 %v9437_v39  ;;  %17085 = vst [vmem:[#allocation77_spill] sm:$0xff] %v10158_v45 }
  0xe4   : > { %575 = vperm.xlu1 %9117, %v258_v11   ;;  %572 = vperm.xlu0 %9116, %v257_v9   ;;  %v259_v11 = vld [vmem:[%s9310_s6 + $0x2f0] sm:$0xff]  ;;  %v10114_v9 = vsub.f32 %v8551_v59, %v8551_v59  ;;  %v262_v59 = vld [vmem:[%s9310_s6 + $0x308] sm:$0xff] }
  0xe5   : > { %8677 = vmatmul.mubr.msk.f32.gmra.mxu1 %vm16409_vm15, %v17050_v3  ;;  %3771 = vmatprep.subr.mxu0 %v9511_v57  ;;  %vm16431_vm15 = vcmp.eq.s32.totalorder %v10110_v18, %v9708_v53 }
  0xe6   : > { %1340 = vmatmul.mubr.f32.gmra.mxu0 %v1339_v21  ;;  %2936 = vmatprep.mubr.f32.mxu1 %v17044_v61  ;;  %17078 = vst [vmem:[#allocation74_spill] sm:$0xff] %v10114_v9  ;;  %v8552_v21 = vsel %vm16426_vm14, 1.0, %v17044_v61 }
  0xe7   : > { %1345 = vmatprep.mubr.f32.mxu0 %v17044_v61  ;;  %4905 = vmatpush1.msra.mxu1 %v9439_v44  ;;  %v10138_v42 = vsub.f32 %v8552_v21, %v8552_v21  ;;  %v264_v21 = vld [vmem:[%s9310_s6 + $0x318] sm:$0xff] }
  0xe8   : > { %581 = vperm.xlu1 %9117, %v260_v49   ;;  %578 = vperm.xlu0 %9116, %v259_v11   ;;  %v261_v49 = vld [vmem:[%s9310_s6 + $0x300] sm:$0xff] }
  0xe9   : > { %8678 = vmatmul.mubr.msk.f32.gmra.mxu1 %vm16416_vm12, %v17050_v3  ;;  %v17079_v11 = vld [vmem:[#allocation20_spill] sm:$0xff]  ;;  %4907 = vmatprep.subr.mxu1 %v17081_v37  ;;  %17082 = vst [vmem:[#allocation76_spill] sm:$0xff] %v10138_v42  ;;  %vm16436_vm12 = vcmp.eq.s32.totalorder %v10134_v60, %v9708_v53 }
  0xea   : > { %3774 = vmatpush1.msra.mxu0 %v17079_v11  ;;  %2943 = vmatprep.mubr.f32.mxu1 %v17044_v61  ;;  %v1371_v11 = vsub.f32 %v10090_v47, %v17083_v28  ;;  %v17086_v28 = vld [vmem:[#allocation16_spill] sm:$0xff]  ;;  %v17088_v47 = vand.u32 4294901760, %v10114_v9 }
  0xeb   : > { %1351 = vmatmul.mubr.f32.gmra.mxu0 %v1350_v27  ;;  %v8553_v27 = vsel %vm16431_vm15, 1.0, %v17044_v61  ;;  %4909 = vmatpush1.msra.mxu1 %v17086_v28 }
  0xec   : > { %1356 = vmatprep.mubr.f32.mxu0 %v17044_v61  ;;  %587 = vperm.xlu1 %9117, %v262_v59   ;;  %v263_v59 = vld [vmem:[%s9310_s6 + $0x310] sm:$0xff]  ;;  %v10162_v57 = vsub.f32 %v8553_v27, %v8553_v27  ;;  %v1372_v51 = vand.u32 4294901760, %v1371_v11  ;;  %v266_v27 = vld [vmem:[%s9310_s6 + $0x328] sm:$0xff] }
  0xed   : > { %584 = vperm.xlu0 %9116, %v261_v49   ;;  %8679 = vmatmul.mubr.msk.f32.gmra.mxu1 %vm16421_vm13, %v17050_v3  ;;  %v17084_v49 = vld [vmem:[#allocation21_spill] sm:$0xff]  ;;  %vm16441_vm13 = vcmp.eq.s32.totalorder %v10158_v45, %v9708_v53 }
  0xee   : > { %3777 = vmatprep.subr.mxu0 %v17084_v49  ;;  %2950 = vmatprep.mubr.f32.mxu1 %v17044_v61  ;;  %17087 = vst [vmem:[#allocation78_spill] sm:$0xff] %v10162_v57  ;;  %v1382_v49 = vsub.f32 %v10114_v9, %v17088_v47  ;;  %v10182_v47 = vpop.permute.xlu0 %362  ;;  %v17091_v11 = vld [vmem:[#allocation17_spill] sm:$0xff]  ;;  %v17093_v9 = vand.u32 4294901760, %v10138_v42 }
  0xef   : > { %1362 = vmatmul.mubr.f32.gmra.mxu0 %v1361_v19  ;;  %v8554_v19 = vsel %vm16436_vm12, 1.0, %v17044_v61  ;;  %17090 = vst [vmem:[#allocation79_spill] sm:$0xff] %v10182_v47  ;;  %4911 = vmatprep.subr.mxu1 %v17091_v11 }
  0xf0   : > { %1367 = vmatprep.mubr.f32.mxu0 %v17044_v61  ;;  %593 = vperm.xlu1 %9117, %v264_v21   ;;  %v265_v21 = vld [vmem:[%s9310_s6 + $0x320] sm:$0xff]  ;;  %v10186_v37 = vsub.f32 %v8554_v19, %v8554_v19  ;;  %v1383_v58 = vand.u32 4294901760, %v1382_v49  ;;  %v268_v19 = vld [vmem:[%s9310_s6 + $0x338] sm:$0xff]  ;;  %v17096_v49 = vld [vmem:[#allocation18_spill] sm:$0xff] }
  0xf1   : > { %590 = vperm.xlu0 %9116, %v263_v59   ;;  %8680 = vmatmul.mubr.msk.f32.gmra.mxu1 %vm16426_vm14, %v17050_v3  ;;  %v17089_v59 = vld [vmem:[#allocation23_spill] sm:$0xff]  ;;  %vm16446_vm14 = vcmp.eq.s32.totalorder %v10182_v47, %v9708_v53 }
  0xf2   : > { %3780 = vmatpush1.msra.mxu0 %v17089_v59  ;;  %2957 = vmatprep.mubr.f32.mxu1 %v17044_v61  ;;  %17092 = vst [vmem:[#allocation80_spill] sm:$0xff] %v10186_v37  ;;  %v1393_v59 = vsub.f32 %v10138_v42, %v17093_v9  ;;  %v10206_v9 = vpop.permute.xlu1 %365  ;;  %v17098_v42 = vand.u32 4294901760, %v10162_v57 }
  0xf3   : > { %1373 = vmatmul.mubr.f32.gmra.mxu0 %v1372_v51  ;;  %v8555_v51 = vsel %vm16441_vm13, 1.0, %v17044_v61  ;;  %17095 = vst [vmem:[#allocation81_spill] sm:$0xff] %v10206_v9  ;;  %4913 = vmatpush1.msra.mxu1 %v17096_v49 }
  0xf4   : > { %1378 = vmatprep.mubr.f32.mxu0 %v17044_v61  ;;  %599 = vperm.xlu1 %9117, %v266_v27   ;;  %v267_v27 = vld [vmem:[%s9310_s6 + $0x330] sm:$0xff]  ;;  %v10210_v28 = vsub.f32 %v8555_v51, %v8555_v51  ;;  %v1394_v18 = vand.u32 4294901760, %v1393_v59  ;;  %v270_v51 = vld [vmem:[%s9310_s6 + $0x348] sm:$0xff] }
  0xf5   : > { %596 = vperm.xlu0 %9116, %v265_v21   ;;  %8681 = vmatmul.mubr.msk.f32.gmra.mxu1 %vm16431_vm15, %v17050_v3  ;;  %v17094_v21 = vld [vmem:[#allocation26_spill] sm:$0xff]  ;;  %vm16452_vm15 = vcmp.eq.s32.totalorder %v10206_v9, %v9708_v53 }
  0xf6   : > { %3783 = vmatprep.subr.mxu0 %v17094_v21  ;;  %2964 = vmatprep.mubr.f32.mxu1 %v17044_v61  ;;  %17097 = vst [vmem:[#allocation82_spill] sm:$0xff] %v10210_v28  ;;  %v1404_v21 = vsub.f32 %v10162_v57, %v17098_v42  ;;  %v10230_v42 = vpop.permute.xlu0 %368  ;;  %v17101_v59 = vld [vmem:[#allocation22_spill] sm:$0xff]  ;;  %v17103_v57 = vand.u32 4294901760, %v10186_v37 }
  0xf7   : > { %1384 = vmatmul.mubr.f32.gmra.mxu0 %v1383_v58  ;;  %v8556_v58 = vsel %vm16446_vm14, 1.0, %v17044_v61  ;;  %17100 = vst [vmem:[#allocation83_spill] sm:$0xff] %v10230_v42  ;;  %4915 = vmatprep.subr.mxu1 %v17101_v59 }
  0xf8   : > { %1389 = vmatprep.mubr.f32.mxu0 %v17044_v61  ;;  %605 = vperm.xlu1 %9117, %v268_v19   ;;  %v269_v19 = vld [vmem:[%s9310_s6 + $0x340] sm:$0xff]  ;;  %v10234_v11 = vsub.f32 %v8556_v58, %v8556_v58  ;;  %v1405_v60 = vand.u32 4294901760, %v1404_v21  ;;  %v272_v58 = vld [vmem:[%s9310_s6 + $0x358] sm:$0xff] }
  0xf9   : > { %602 = vperm.xlu0 %9116, %v267_v27   ;;  %8682 = vmatmul.mubr.msk.f32.gmra.mxu1 %vm16436_vm12, %v17050_v3  ;;  %v17099_v27 = vld [vmem:[#allocation27_spill] sm:$0xff]  ;;  %vm16458_vm12 = vcmp.eq.s32.totalorder %v10230_v42, %v9708_v53  ;;  %v17106_v21 = vld [vmem:[#allocation24_spill] sm:$0xff] }
  0xfa   : > { %3786 = vmatpush1.msra.mxu0 %v17099_v27  ;;  %2971 = vmatprep.mubr.f32.mxu1 %v17044_v61  ;;  %17102 = vst [vmem:[#allocation84_spill] sm:$0xff] %v10234_v11  ;;  %v1415_v27 = vsub.f32 %v10186_v37, %v17103_v57  ;;  %v10254_v57 = vpop.permute.xlu1 %371  ;;  %v17108_v37 = vand.u32 4294901760, %v10210_v28  ;;  %v17112_v47 = vand.u32 4294901760, %v10234_v11 }
  0xfb   : > { %1395 = vmatmul.mubr.f32.gmra.mxu0 %v1394_v18  ;;  %v8557_v18 = vsel %vm16452_vm15, 1.0, %v17044_v61  ;;  %17105 = vst [vmem:[#allocation85_spill] sm:$0xff] %v10254_v57  ;;  %4917 = vmatpush1.msra.mxu1 %v17106_v21 }
  0xfc   : > { %1400 = vmatprep.mubr.f32.mxu0 %v17044_v61  ;;  %611 = vperm.xlu1 %9117, %v270_v51   ;;  %v271_v51 = vld [vmem:[%s9310_s6 + $0x350] sm:$0xff]  ;;  %v10258_v49 = vsub.f32 %v8557_v18, %v8557_v18  ;;  %v1416_v45 = vand.u32 4294901760, %v1415_v27  ;;  %v274_v18 = vld [vmem:[%s9310_s6 + $0x368] sm:$0xff] }
  0xfd   : > { %608 = vperm.xlu0 %9116, %v269_v19   ;;  %8683 = vmatmul.mubr.msk.f32.gmra.mxu1 %vm16441_vm13, %v17050_v3  ;;  %v17104_v19 = vld [vmem:[#allocation28_spill] sm:$0xff]  ;;  %vm16464_vm13 = vcmp.eq.s32.totalorder %v10254_v57, %v9708_v53 }
  0xfe   : > { %3789 = vmatprep.subr.mxu0 %v17104_v19  ;;  %2978 = vmatprep.mubr.f32.mxu1 %v17044_v61  ;;  %17107 = vst [vmem:[#allocation24_spill] sm:$0xff] %v10258_v49  ;;  %v1426_v19 = vsub.f32 %v10210_v28, %v17108_v37  ;;  %v10278_v37 = vpop.permute.xlu0 %374  ;;  %v1437_v28 = vsub.f32 %v10234_v11, %v17112_v47  ;;  %v10302_v47 = vpop.permute.xlu1 %377  ;;  %v17116_v9 = vand.u32 4294901760, %v10258_v49 }
  0xff   : > { %1406 = vmatmul.mubr.f32.gmra.mxu0 %v1405_v60  ;;  %v8558_v60 = vsel %vm16458_vm12, 1.0, %v17044_v61  ;;  %17110 = vst [vmem:[#allocation86_spill] sm:$0xff] %v10278_v37  ;;  %4919 = vmatprep.subr.mxu1 %v9527_v4  ;;  %17113 = vst [vmem:[#allocation88_spill] sm:$0xff] %v10302_v47 }
 0x100   : > { %1411 = vmatprep.mubr.f32.mxu0 %v17044_v61  ;;  %617 = vperm.xlu1 %9117, %v272_v58   ;;  %v273_v58 = vld [vmem:[%s9310_s6 + $0x360] sm:$0xff]  ;;  %v10282_v27 = vsub.f32 %v8558_v60, %v8558_v60  ;;  %v1427_v59 = vand.u32 4294901760, %v1426_v19  ;;  %v276_v60 = vld [vmem:[%s9310_s6 + $0x378] sm:$0xff]  ;;  %v17114_v19 = vld [vmem:[#allocation25_spill] sm:$0xff]  ;;  %v1448_v11 = vsub.f32 %v10258_v49, %v17116_v9 }
 0x101   : > { %614 = vperm.xlu0 %9116, %v271_v51   ;;  %8684 = vmatmul.mubr.msk.f32.gmra.mxu1 %vm16446_vm14, %v17050_v3  ;;  %v17109_v51 = vld [vmem:[#allocation29_spill] sm:$0xff]  ;;  %vm16469_vm14 = vcmp.eq.s32.totalorder %v10278_v37, %v9708_v53  ;;  %v17118_v9 = vld [vmem:[#allocation30_spill] sm:$0xff] }
 0x102   : > { %3792 = vmatpush1.msra.mxu0 %v17109_v51  ;;  %2985 = vmatprep.mubr.f32.mxu1 %v17044_v61  ;;  %17111 = vst [vmem:[#allocation87_spill] sm:$0xff] %v10282_v27  ;;  %v1438_v51 = vand.u32 4294901760, %v1437_v28  ;;  %v10326_v28 = vpop.permute.xlu0 %380  ;;  %v17120_v42 = vand.u32 4294901760, %v10282_v27 }
 0x103   : > { %1417 = vmatmul.mubr.f32.gmra.mxu0 %v1416_v45  ;;  %v8559_v45 = vsel %vm16464_vm13, 1.0, %v17044_v61  ;;  %3795 = vmatprep.subr.mxu0 %v9597_v62  ;;  %17117 = vst [vmem:[#allocation89_spill] sm:$0xff] %v10326_v28  ;;  %v1449_v62 = vand.u32 4294901760, %v1448_v11  ;;  %v10350_v11 = vpop.permute.xlu1 %383 }
 0x104   : > { %1422 = vmatprep.mubr.f32.mxu0 %v17044_v61  ;;  %623 = vperm.xlu1 %9117, %v274_v18   ;;  %v275_v18 = vld [vmem:[%s9310_s6 + $0x370] sm:$0xff]  ;;  %v1459_v49 = vsub.f32 %v10282_v27, %v17120_v42  ;;  %17121 = vst [vmem:[#allocation90_spill] sm:$0xff] %v10350_v11  ;;  %v17122_v42 = vld [vmem:[#allocation31_spill] sm:$0xff] }
 0x105   : > { %620 = vperm.xlu0 %9116, %v273_v58   ;;  %8685 = vmatmul.mubr.msk.f32.gmra.mxu1 %vm16452_vm15, %v17050_v3  ;;  %v10306_v58 = vsub.f32 %v8559_v45, %v8559_v45  ;;  %v278_v45 = vld [vmem:[%s9310_s6 + $0x388] sm:$0xff]  ;;  %vm16475_vm15 = vcmp.eq.s32.totalorder %v10302_v47, %v9708_v53 }
 0x106   : > { %2992 = vmatprep.mubr.f32.mxu1 %v17044_v61  ;;  %4921 = vmatpush1.msra.mxu1 %v17114_v19 }
 0x107   : > { %1428 = vmatmul.mubr.f32.gmra.mxu0 %v1427_v59  ;;  %17115 = vst [vmem:[#allocation25_spill] sm:$0xff] %v10306_v58  ;;  %v8560_v59 = vsel %vm16469_vm14, 1.0, %v17044_v61  ;;  %4923 = vmatprep.subr.mxu1 %v17118_v9  ;;  %v17124_v57 = vand.u32 4294901760, %v10306_v58 }
 0x108   : > { %1433 = vmatprep.mubr.f32.mxu0 %v17044_v61  ;;  %629 = vperm.xlu1 %9117, %v276_v60   ;;  %v277_v60 = vld [vmem:[%s9310_s6 + $0x380] sm:$0xff] }
 0x109   : > { %626 = vperm.xlu0 %9116, %v275_v18   ;;  %8686 = vmatmul.mubr.msk.f32.gmra.mxu1 %vm16458_vm12, %v17050_v3  ;;  %v10330_v18 = vsub.f32 %v8560_v59, %v8560_v59  ;;  %v280_v59 = vld [vmem:[%s9310_s6 + $0x398] sm:$0xff]  ;;  %vm16481_vm12 = vcmp.eq.s32.totalorder %v10326_v28, %v9708_v53  ;;  %v1470_v27 = vsub.f32 %v10306_v58, %v17124_v57 }
 0x10a   : > { %3798 = vmatpush1.msra.mxu0 %v9600_v50  ;;  %2999 = vmatprep.mubr.f32.mxu1 %v17044_v61  ;;  %v1460_v50 = vand.u32 4294901760, %v1459_v49  ;;  %v10374_v49 = vpop.permute.xlu0 %386 }
 0x10b   : > { %1439 = vmatmul.mubr.f32.gmra.mxu0 %v1438_v51  ;;  %17119 = vst [vmem:[#allocation30_spill] sm:$0xff] %v10330_v18  ;;  %v8561_v51 = vsel %vm16475_vm15, 1.0, %v17044_v61  ;;  %3801 = vmatprep.subr.mxu0 %v9603_v23  ;;  %v16470_v23 = vand.u32 4294901760, %v10330_v18  ;;  %17125 = vst [vmem:[#allocation91_spill] sm:$0xff] %v10374_v49 }
 0x10c   : > { %1444 = vmatprep.mubr.f32.mxu0 %v17044_v61  ;;  %635 = vperm.xlu1 %9117, %v278_v45   ;;  %v279_v45 = vld [vmem:[%s9310_s6 + $0x390] sm:$0xff] }
 0x10d   : > { %632 = vperm.xlu0 %9116, %v277_v60   ;;  %8687 = vmatmul.mubr.msk.f32.gmra.mxu1 %vm16464_vm13, %v17050_v3  ;;  %v10354_v60 = vsub.f32 %v8561_v51, %v8561_v51  ;;  %v282_v51 = vld [vmem:[%s9310_s6 + $0x3a8] sm:$0xff]  ;;  %vm16487_vm13 = vcmp.eq.s32.totalorder %v10350_v11, %v9708_v53  ;;  %v1481_v37 = vsub.f32 %v10330_v18, %v16470_v23 }
 0x10e   : > { %3006 = vmatprep.mubr.f32.mxu1 %v17044_v61  ;;  %4925 = vmatpush1.msra.mxu1 %v17122_v42 }
 0x10f   : > { %1450 = vmatmul.mubr.f32.gmra.mxu0 %v1449_v62  ;;  %17123 = vst [vmem:[#allocation31_spill] sm:$0xff] %v10354_v60  ;;  %v8562_v62 = vsel %vm16481_vm12, 1.0, %v17044_v61  ;;  %4927 = vmatprep.subr.mxu1 %v9590_v13  ;;  %v16476_v58 = vand.u32 4294901760, %v10354_v60  ;;  %v1482_v23 = vand.u32 4294901760, %v1481_v37  ;;  %v10422_v37 = vpop.permute.xlu0 %392 }
 0x110   : > { %1455 = vmatprep.mubr.f32.mxu0 %v17044_v61  ;;  %641 = vperm.xlu1 %9117, %v280_v59   ;;  %v281_v59 = vld [vmem:[%s9310_s6 + $0x3a0] sm:$0xff]  ;;  %v10378_v57 = vsub.f32 %v8562_v62, %v8562_v62  ;;  %v284_v62 = vld [vmem:[%s9310_s6 + $0x3b8] sm:$0xff]  ;;  %17129 = vst [vmem:[#allocation95_spill] sm:$0xff] %v10422_v37 }
 0x111   : > { %638 = vperm.xlu0 %9116, %v279_v45   ;;  %8688 = vmatmul.mubr.msk.f32.gmra.mxu1 %vm16469_vm14, %v17050_v3  ;;  %v1471_v45 = vand.u32 4294901760, %v1470_v27  ;;  %vm16493_vm14 = vcmp.eq.s32.totalorder %v10374_v49, %v9708_v53  ;;  %v10398_v27 = vpop.permute.xlu1 %389  ;;  %v1492_v47 = vsub.f32 %v10354_v60, %v16476_v58 }
 0x112   : > { %3804 = vmatpush1.msra.mxu0 %v9610_v2  ;;  %3013 = vmatprep.mubr.f32.mxu1 %v17044_v61  ;;  %17126 = vst [vmem:[#allocation92_spill] sm:$0xff] %v10378_v57  ;;  %17127 = vst [vmem:[#allocation93_spill] sm:$0xff] %v10398_v27  ;;  %v16482_v18 = vand.u32 4294901760, %v10378_v57 }
 0x113   : > { %1461 = vmatmul.mubr.f32.gmra.mxu0 %v1460_v50  ;;  %v8563_v50 = vsel %vm16487_vm13, 1.0, %v17044_v61  ;;  %3807 = vmatprep.subr.mxu0 %v9623_v35  ;;  %v1493_v58 = vand.u32 4294901760, %v1492_v47 }
 0x114   : > { %1466 = vmatprep.mubr.f32.mxu0 %v17044_v61  ;;  %647 = vperm.xlu1 %9117, %v282_v51   ;;  %v283_v51 = vld [vmem:[%s9310_s6 + $0x3b0] sm:$0xff]  ;;  %v1503_v28 = vsub.f32 %v10378_v57, %v16482_v18 }
 0x115   : > { %644 = vperm.xlu0 %9116, %v281_v59   ;;  %8689 = vmatmul.mubr.msk.f32.gmra.mxu1 %vm16475_vm15, %v17050_v3  ;;  %v10402_v59 = vsub.f32 %v8563_v50, %v8563_v50  ;;  %v286_v50 = vld [vmem:[%s9310_s6 + $0x3c8] sm:$0xff]  ;;  %vm16497_vm15 = vcmp.eq.s32.totalorder %v10398_v27, %v9708_v53  ;;  %v10446_v47 = vpop.permute.xlu1 %395 }
 0x116   : > { %3020 = vmatprep.mubr.f32.mxu1 %v17044_v61  ;;  %4929 = vmatpush1.msra.mxu1 %v9593_v34  ;;  %17131 = vst [vmem:[#allocation97_spill] sm:$0xff] %v10446_v47  ;;  %v1504_v18 = vand.u32 4294901760, %v1503_v28  ;;  %v10470_v28 = vpop.permute.xlu0 %398 }
 0x117   : > { %1472 = vmatmul.mubr.f32.gmra.mxu0 %v1471_v45  ;;  %17128 = vst [vmem:[#allocation94_spill] sm:$0xff] %v10402_v59  ;;  %v8564_v45 = vsel %vm16493_vm14, 1.0, %v17044_v61  ;;  %4931 = vmatprep.subr.mxu1 %v9605_v24  ;;  %v16488_v60 = vand.u32 4294901760, %v10402_v59  ;;  %17133 = vst [vmem:[#allocation99_spill] sm:$0xff] %v10470_v28 }
 0x118   : > { %1477 = vmatprep.mubr.f32.mxu0 %v17044_v61  ;;  %653 = vperm.xlu1 %9117, %v284_v62   ;;  %v285_v62 = vld [vmem:[%s9310_s6 + $0x3c0] sm:$0xff] }
 0x119   : > { %650 = vperm.xlu0 %9116, %v283_v51   ;;  %8690 = vmatmul.mubr.msk.f32.gmra.mxu1 %vm16481_vm12, %v17050_v3  ;;  %v10426_v51 = vsub.f32 %v8564_v45, %v8564_v45  ;;  %v288_v45 = vld [vmem:[%s9310_s6 + $0x3d8] sm:$0xff]  ;;  %vm16498_vm12 = vcmp.eq.s32.totalorder %v10422_v37, %v9708_v53  ;;  %v1514_v11 = vsub.f32 %v10402_v59, %v16488_v60 }
 0x11a   : > { %3810 = vmatpush1.msra.mxu0 %v9628_v12  ;;  %3027 = vmatprep.mubr.f32.mxu1 %v17044_v61 }
 0x11b   : > { %1483 = vmatmul.mubr.f32.gmra.mxu0 %v1482_v23  ;;  %17130 = vst [vmem:[#allocation96_spill] sm:$0xff] %v10426_v51  ;;  %v8565_v23 = vsel %vm16497_vm15, 1.0, %v17044_v61  ;;  %3813 = vmatprep.subr.mxu0 %v9631_v5  ;;  %v16494_v57 = vand.u32 4294901760, %v10426_v51  ;;  %v1515_v60 = vand.u32 4294901760, %v1514_v11  ;;  %v17135_v11 = vand.u32 4294901760, %v9333_v25 }
 0x11c   : > { %1488 = vmatprep.mubr.f32.mxu0 %v17044_v61  ;;  %659 = vperm.xlu1 %9117, %v286_v50   ;;  %v287_v50 = vld [vmem:[%s9310_s6 + $0x3d0] sm:$0xff] }
 0x11d   : > { %656 = vperm.xlu0 %9116, %v285_v62   ;;  %8691 = vmatmul.mubr.msk.f32.gmra.mxu1 %vm16487_vm13, %v17050_v3  ;;  %v10450_v62 = vsub.f32 %v8565_v23, %v8565_v23  ;;  %v290_v23 = vld [vmem:[%s9310_s6 + $0x3e8] sm:$0xff]  ;;  %vm16502_vm13 = vcmp.eq.s32.totalorder %v10446_v47, %v9708_v53  ;;  %v1525_v49 = vsub.f32 %v10426_v51, %v16494_v57 }
 0x11e   : > { %3034 = vmatprep.mubr.f32.mxu1 %v17044_v61  ;;  %4933 = vmatpush1.msra.mxu1 %v9612_v36 }
 0x11f   : > { %1494 = vmatmul.mubr.f32.gmra.mxu0 %v1493_v58  ;;  %17132 = vst [vmem:[#allocation98_spill] sm:$0xff] %v10450_v62  ;;  %v8566_v58 = vsel %vm16498_vm12, 1.0, %v17044_v61  ;;  %4935 = vmatprep.subr.mxu1 %v9614_v10  ;;  %v1526_v59 = vand.u32 4294901760, %v1525_v49  ;;  %v17138_v25 = vand.u32 4294901760, %v10450_v62  ;;  %v10517_v49 = vpop.permute.xlu0 %404 }
 0x120   : > { %1499 = vmatprep.mubr.f32.mxu0 %v17044_v61  ;;  %665 = vperm.xlu1 %9117, %v288_v45   ;;  %v289_v45 = vld [vmem:[%s9310_s6 + $0x3e0] sm:$0xff]  ;;  %17139 = vst [vmem:[#allocation103_spill] sm:$0xff] %v10517_v49 }
 0x121   : > { %662 = vperm.xlu0 %9116, %v287_v50   ;;  %8692 = vmatmul.mubr.msk.f32.gmra.mxu1 %vm16493_vm14, %v17050_v3  ;;  %v10474_v50 = vsub.f32 %v8566_v58, %v8566_v58  ;;  %v292_v58 = vld [vmem:[%s9310_s6 + $0x3f8] sm:$0xff]  ;;  %vm16508_vm14 = vcmp.eq.s32.totalorder %v10470_v28, %v9708_v53 }
 0x122   : > { %3816 = vmatpush1.msra.mxu0 %v9634_v0  ;;  %3041 = vmatprep.mubr.f32.mxu1 %v17044_v61 }
 0x123   : > { %1505 = vmatmul.mubr.f32.gmra.mxu0 %v1504_v18  ;;  %17134 = vst [vmem:[#allocation100_spill] sm:$0xff] %v10474_v50  ;;  %v8567_v18 = vsel %vm16502_vm13, 1.0, %v17044_v61  ;;  %6126 = vmatprep.subr.mxu0 %v17135_v11  ;;  %v1536_v11 = vsub.f32 %v10450_v62, %v17138_v25  ;;  %v16499_v27 = vand.u32 4294901760, %v10474_v50 }
 0x124   : > { %1510 = vmatprep.mubr.f32.mxu0 %v17044_v61  ;;  %671 = vperm.xlu1 %9117, %v290_v23   ;;  %v291_v23 = vld [vmem:[%s9310_s6 + $0x3f0] sm:$0xff]  ;;  %v10499_v57 = vsub.f32 %v8567_v18, %v8567_v18 }
 0x125   : > { %668 = vperm.xlu0 %9116, %v289_v45   ;;  %8693 = vmatmul.mubr.msk.f32.gmra.mxu1 %vm16497_vm15, %v17050_v3  ;;  %v10495_v45 = vpop.permute.xlu1 %401 }
 0x126   : > { %3048 = vmatprep.mubr.f32.mxu1 %v17044_v61  ;;  %17136 = vst [vmem:[#allocation101_spill] sm:$0xff] %v10495_v45  ;;  %4937 = vmatpush1.msra.mxu1 %v9617_v1  ;;  %17137 = vst [vmem:[#allocation102_spill] sm:$0xff] %v10499_v57  ;;  %vm16514_vm15 = vcmp.eq.s32.totalorder %v10495_v45, %v9708_v53  ;;  %v16503_v25 = vand.u32 4294901760, %v10499_v57 }
 0x127   : > { %1516 = vmatmul.mubr.f32.gmra.mxu0 %v1515_v60  ;;  %v8568_v60 = vsel %vm16508_vm14, 1.0, %v17044_v61  ;;  %7181 = vmatprep.subr.mxu1 %v9324_v17  ;;  %v8569_v17 = vsel %vm16514_vm15, 1.0, %v17044_v61 }
 0x128   : > { %1521 = vmatprep.mubr.f32.mxu0 %v17044_v61  ;;  %677 = vperm.xlu1 %9117, %v292_v58   ;;  %v10520_v18 = vsub.f32 %v8568_v60, %v8568_v60  ;;  %v1537_v58 = vand.u32 4294901760, %v1536_v11  ;;  %v10540_v11 = vsub.f32 %v8569_v17, %v8569_v17 }
 0x129   : > { %674 = vperm.xlu0 %9116, %v291_v23   ;;  %8694 = vmatmul.mubr.msk.f32.gmra.mxu1 %vm16498_vm12, %v17050_v3  ;;  %v1547_v23 = vsub.f32 %v10474_v50, %v16499_v27  ;;  %vm16520_vm12 = vcmp.eq.s32.totalorder %v10517_v49, %v9708_v53  ;;  %v1558_v27 = vsub.f32 %v10499_v57, %v16503_v25 }
 0x12a   : > { %3055 = vmatprep.mubr.f32.mxu1 %v17044_v61  ;;  %17140 = vst [vmem:[#allocation104_spill] sm:$0xff] %v10520_v18  ;;  %17142 = vst [vmem:[#allocation106_spill] sm:$0xff] %v10540_v11  ;;  %v16509_v47 = vand.u32 4294901760, %v10520_v18  ;;  %v16515_v28 = vand.u32 4294901760, %v10540_v11 }
 0x12b   : > { %1527 = vmatmul.mubr.f32.gmra.mxu0 %v1526_v59  ;;  %v10537_v59 = vpop.permute.xlu1 %407  ;;  %v1548_v60 = vand.u32 4294901760, %v1547_v23  ;;  %v10557_v23 = vpop.permute.xlu0 %410  ;;  %v1559_v25 = vand.u32 4294901760, %v1558_v27 }
 0x12c   : > { %1532 = vmatprep.mubr.f32.mxu0 %v17044_v61  ;;  %17141 = vst [vmem:[#allocation105_spill] sm:$0xff] %v10537_v59  ;;  %17143 = vst [vmem:[#allocation107_spill] sm:$0xff] %v10557_v23  ;;  %v1569_v37 = vsub.f32 %v10520_v18, %v16509_v47  ;;  %v1580_v18 = vsub.f32 %v10540_v11, %v16515_v28 }
 0x12d   : > { %8695 = vmatmul.mubr.msk.f32.gmra.mxu1 %vm16502_vm13, %v17050_v3  ;;  %vm16526_vm13 = vcmp.eq.s32.totalorder %v10537_v59, %v9708_v53 }
 0x12e   : > { %3062 = vmatprep.mubr.f32.mxu1 %v17044_v61  ;;  %v1570_v47 = vand.u32 4294901760, %v1569_v37  ;;  %v1581_v28 = vand.u32 4294901760, %v1580_v18 }
 0x12f   : > { %1538 = vmatmul.mubr.f32.gmra.mxu0 %v1537_v58  ;;  %v8570_v58 = vsel %vm16520_vm12, 1.0, %v17044_v61  ;;  %v10577_v27 = vpop.permute.xlu1 %413  ;;  %v10597_v37 = vpop.permute.xlu0 %416 }
 0x130   : > { %1543 = vmatprep.mubr.f32.mxu0 %v17044_v61  ;;  %v10560_v17 = vsub.f32 %v8570_v58, %v8570_v58  ;;  %17145 = vst [vmem:[#allocation109_spill] sm:$0xff] %v10577_v27  ;;  %17147 = vst [vmem:[#allocation111_spill] sm:$0xff] %v10597_v37 }
 0x131   : > { %8696 = vmatmul.mubr.msk.f32.gmra.mxu1 %vm16508_vm14, %v17050_v3  ;;  %vm16532_vm14 = vcmp.eq.s32.totalorder %v10557_v23, %v9708_v53 }
 0x132   : > { %3069 = vmatprep.mubr.f32.mxu1 %v17044_v61  ;;  %17144 = vst [vmem:[#allocation108_spill] sm:$0xff] %v10560_v17  ;;  %v16521_v45 = vand.u32 4294901760, %v10560_v17 }
 0x133   : > { %1549 = vmatmul.mubr.f32.gmra.mxu0 %v1548_v60  ;;  %v8571_v60 = vsel %vm16526_vm13, 1.0, %v17044_v61  ;;  %v10617_v18 = vpop.permute.xlu1 %419 }
 0x134   : > { %1554 = vmatprep.mubr.f32.mxu0 %v17044_v61  ;;  %v10580_v58 = vsub.f32 %v8571_v60, %v8571_v60  ;;  %v1591_v11 = vsub.f32 %v10560_v17, %v16521_v45  ;;  %17149 = vst [vmem:[#allocation113_spill] sm:$0xff] %v10617_v18 }
 0x135   : > { %8697 = vmatmul.mubr.msk.f32.gmra.mxu1 %vm16514_vm15, %v17050_v3  ;;  %vm16538_vm15 = vcmp.eq.s32.totalorder %v10577_v27, %v9708_v53 }
 0x136   : > { %3076 = vmatprep.mubr.f32.mxu1 %v17044_v61  ;;  %17146 = vst [vmem:[#allocation110_spill] sm:$0xff] %v10580_v58  ;;  %v16527_v49 = vand.u32 4294901760, %v10580_v58  ;;  %v1592_v45 = vand.u32 4294901760, %v1591_v11  ;;  %v10637_v11 = vpop.permute.xlu0 %422 }
 0x137   : > { %1560 = vmatmul.mubr.f32.gmra.mxu0 %v1559_v25  ;;  %v8572_v25 = vsel %vm16532_vm14, 1.0, %v17044_v61  ;;  %17151 = vst [vmem:[#allocation115_spill] sm:$0xff] %v10637_v11 }
 0x138   : > { %1565 = vmatprep.mubr.f32.mxu0 %v17044_v61  ;;  %v10600_v60 = vsub.f32 %v8572_v25, %v8572_v25  ;;  %v1602_v17 = vsub.f32 %v10580_v58, %v16527_v49 }
 0x139   : > { %8698 = vmatmul.mubr.msk.f32.gmra.mxu1 %vm16520_vm12, %v17050_v3  ;;  %vm16544_vm12 = vcmp.eq.s32.totalorder %v10597_v37, %v9708_v53 }
 0x13a   : > { %3083 = vmatprep.mubr.f32.mxu1 %v17044_v61  ;;  %17148 = vst [vmem:[#allocation112_spill] sm:$0xff] %v10600_v60  ;;  %v16533_v59 = vand.u32 4294901760, %v10600_v60  ;;  %v1603_v49 = vand.u32 4294901760, %v1602_v17  ;;  %v10657_v17 = vpop.permute.xlu1 %425 }
 0x13b   : > { %1571 = vmatmul.mubr.f32.gmra.mxu0 %v1570_v47  ;;  %v8573_v47 = vsel %vm16538_vm15, 1.0, %v17044_v61  ;;  %17153 = vst [vmem:[#allocation117_spill] sm:$0xff] %v10657_v17 }
 0x13c   : > { %1576 = vmatprep.mubr.f32.mxu0 %v17044_v61  ;;  %v10620_v25 = vsub.f32 %v8573_v47, %v8573_v47  ;;  %v1613_v58 = vsub.f32 %v10600_v60, %v16533_v59 }
 0x13d   : > { %8699 = vmatmul.mubr.msk.f32.gmra.mxu1 %vm16526_vm13, %v17050_v3  ;;  %vm16550_vm13 = vcmp.eq.s32.totalorder %v10617_v18, %v9708_v53 }
 0x13e   : > { %3090 = vmatprep.mubr.f32.mxu1 %v17044_v61  ;;  %17150 = vst [vmem:[#allocation114_spill] sm:$0xff] %v10620_v25  ;;  %v16539_v23 = vand.u32 4294901760, %v10620_v25  ;;  %v1614_v59 = vand.u32 4294901760, %v1613_v58  ;;  %v10677_v58 = vpop.permute.xlu0 %428 }
 0x13f   : > { %1582 = vmatmul.mubr.f32.gmra.mxu0 %v1581_v28  ;;  %v8574_v28 = vsel %vm16544_vm12, 1.0, %v17044_v61  ;;  %17155 = vst [vmem:[#allocation119_spill] sm:$0xff] %v10677_v58 }
 0x140   : > { %1587 = vmatprep.mubr.f32.mxu0 %v17044_v61  ;;  %v10640_v47 = vsub.f32 %v8574_v28, %v8574_v28  ;;  %v1624_v60 = vsub.f32 %v10620_v25, %v16539_v23 }
 0x141   : > { %8700 = vmatmul.mubr.msk.f32.gmra.mxu1 %vm16532_vm14, %v17050_v3  ;;  %vm16556_vm14 = vcmp.eq.s32.totalorder %v10637_v11, %v9708_v53 }
 0x142   : > { %3097 = vmatprep.mubr.f32.mxu1 %v17044_v61  ;;  %17152 = vst [vmem:[#allocation116_spill] sm:$0xff] %v10640_v47  ;;  %v16545_v27 = vand.u32 4294901760, %v10640_v47  ;;  %v1625_v23 = vand.u32 4294901760, %v1624_v60  ;;  %v10697_v60 = vpop.permute.xlu1 %431 }
 0x143   : > { %1593 = vmatmul.mubr.f32.gmra.mxu0 %v1592_v45  ;;  %v8575_v45 = vsel %vm16550_vm13, 1.0, %v17044_v61  ;;  %17157 = vst [vmem:[#allocation121_spill] sm:$0xff] %v10697_v60 }
 0x144   : > { %1598 = vmatprep.mubr.f32.mxu0 %v17044_v61  ;;  %v10660_v28 = vsub.f32 %v8575_v45, %v8575_v45  ;;  %v1635_v25 = vsub.f32 %v10640_v47, %v16545_v27 }
 0x145   : > { %8701 = vmatmul.mubr.msk.f32.gmra.mxu1 %vm16538_vm15, %v17050_v3  ;;  %vm16562_vm15 = vcmp.eq.s32.totalorder %v10657_v17, %v9708_v53 }
 0x146   : > { %3104 = vmatprep.mubr.f32.mxu1 %v17044_v61  ;;  %17154 = vst [vmem:[#allocation118_spill] sm:$0xff] %v10660_v28  ;;  %v16551_v37 = vand.u32 4294901760, %v10660_v28  ;;  %v1636_v27 = vand.u32 4294901760, %v1635_v25  ;;  %v10717_v25 = vpop.permute.xlu0 %434 }
 0x147   : > { %1604 = vmatmul.mubr.f32.gmra.mxu0 %v1603_v49  ;;  %v8576_v49 = vsel %vm16556_vm14, 1.0, %v17044_v61  ;;  %17159 = vst [vmem:[#allocation123_spill] sm:$0xff] %v10717_v25 }
 0x148   : > { %1609 = vmatprep.mubr.f32.mxu0 %v17044_v61  ;;  %v10680_v45 = vsub.f32 %v8576_v49, %v8576_v49  ;;  %v1646_v47 = vsub.f32 %v10660_v28, %v16551_v37 }
 0x149   : > { %8702 = vmatmul.mubr.msk.f32.gmra.mxu1 %vm16544_vm12, %v17050_v3  ;;  %vm16568_vm12 = vcmp.eq.s32.totalorder %v10677_v58, %v9708_v53 }
 0x14a   : > { %3111 = vmatprep.mubr.f32.mxu1 %v17044_v61  ;;  %17156 = vst [vmem:[#allocation120_spill] sm:$0xff] %v10680_v45  ;;  %v16557_v18 = vand.u32 4294901760, %v10680_v45  ;;  %v1647_v37 = vand.u32 4294901760, %v1646_v47  ;;  %v10737_v47 = vpop.permute.xlu1 %437 }
 0x14b   : > { %1615 = vmatmul.mubr.f32.gmra.mxu0 %v1614_v59  ;;  %v8577_v59 = vsel %vm16562_vm15, 1.0, %v17044_v61  ;;  %17161 = vst [vmem:[#allocation125_spill] sm:$0xff] %v10737_v47 }
 0x14c   : > { %1620 = vmatprep.mubr.f32.mxu0 %v17044_v61  ;;  %v10700_v49 = vsub.f32 %v8577_v59, %v8577_v59  ;;  %v1657_v28 = vsub.f32 %v10680_v45, %v16557_v18 }
 0x14d   : > { %8703 = vmatmul.mubr.msk.f32.gmra.mxu1 %vm16550_vm13, %v17050_v3  ;;  %vm16574_vm13 = vcmp.eq.s32.totalorder %v10697_v60, %v9708_v53 }
 0x14e   : > { %3118 = vmatprep.mubr.f32.mxu1 %v17044_v61  ;;  %17158 = vst [vmem:[#allocation122_spill] sm:$0xff] %v10700_v49  ;;  %v16563_v11 = vand.u32 4294901760, %v10700_v49  ;;  %v1658_v18 = vand.u32 4294901760, %v1657_v28  ;;  %v10757_v28 = vpop.permute.xlu0 %440 }
 0x14f   : > { %1626 = vmatmul.mubr.f32.gmra.mxu0 %v1625_v23  ;;  %v8578_v23 = vsel %vm16568_vm12, 1.0, %v17044_v61  ;;  %17163 = vst [vmem:[#allocation127_spill] sm:$0xff] %v10757_v28 }
 0x150   : > { %1631 = vmatprep.mubr.f32.mxu0 %v17044_v61  ;;  %v10720_v59 = vsub.f32 %v8578_v23, %v8578_v23  ;;  %v1668_v45 = vsub.f32 %v10700_v49, %v16563_v11 }
 0x151   : > { %8704 = vmatmul.mubr.msk.f32.gmra.mxu1 %vm16556_vm14, %v17050_v3  ;;  %vm16580_vm14 = vcmp.eq.s32.totalorder %v10717_v25, %v9708_v53 }
 0x152   : > { %3125 = vmatprep.mubr.f32.mxu1 %v17044_v61  ;;  %17160 = vst [vmem:[#allocation124_spill] sm:$0xff] %v10720_v59  ;;  %v16569_v17 = vand.u32 4294901760, %v10720_v59  ;;  %v1669_v11 = vand.u32 4294901760, %v1668_v45  ;;  %v10777_v45 = vpop.permute.xlu1 %443 }
 0x153   : > { %1637 = vmatmul.mubr.f32.gmra.mxu0 %v1636_v27  ;;  %v8579_v27 = vsel %vm16574_vm13, 1.0, %v17044_v61  ;;  %17165 = vst [vmem:[#allocation129_spill] sm:$0xff] %v10777_v45 }
 0x154   : > { %1642 = vmatprep.mubr.f32.mxu0 %v17044_v61  ;;  %v10740_v23 = vsub.f32 %v8579_v27, %v8579_v27  ;;  %v1679_v49 = vsub.f32 %v10720_v59, %v16569_v17 }
 0x155   : > { %8705 = vmatmul.mubr.msk.f32.gmra.mxu1 %vm16562_vm15, %v17050_v3  ;;  %vm16588_vm15 = vcmp.eq.s32.totalorder %v10737_v47, %v9708_v53 }
 0x156   : > { %3132 = vmatprep.mubr.f32.mxu1 %v17044_v61  ;;  %17162 = vst [vmem:[#allocation126_spill] sm:$0xff] %v10740_v23  ;;  %v16575_v58 = vand.u32 4294901760, %v10740_v23  ;;  %v1680_v17 = vand.u32 4294901760, %v1679_v49  ;;  %v10797_v49 = vpop.permute.xlu0 %446 }
 0x157   : > { %1648 = vmatmul.mubr.f32.gmra.mxu0 %v1647_v37  ;;  %v8580_v37 = vsel %vm16580_vm14, 1.0, %v17044_v61  ;;  %17167 = vst [vmem:[#allocation131_spill] sm:$0xff] %v10797_v49 }
 0x158   : > { %1653 = vmatprep.mubr.f32.mxu0 %v17044_v61  ;;  %v10760_v27 = vsub.f32 %v8580_v37, %v8580_v37  ;;  %v1690_v59 = vsub.f32 %v10740_v23, %v16575_v58 }
 0x159   : > { %8706 = vmatmul.mubr.msk.f32.gmra.mxu1 %vm16568_vm12, %v17050_v3  ;;  %vm16598_vm12 = vcmp.eq.s32.totalorder %v10757_v28, %v9708_v53 }
 0x15a   : > { %3139 = vmatprep.mubr.f32.mxu1 %v17044_v61  ;;  %17164 = vst [vmem:[#allocation128_spill] sm:$0xff] %v10760_v27  ;;  %v16581_v60 = vand.u32 4294901760, %v10760_v27  ;;  %v1691_v58 = vand.u32 4294901760, %v1690_v59  ;;  %v10817_v59 = vpop.permute.xlu1 %449 }
 0x15b   : > { %1659 = vmatmul.mubr.f32.gmra.mxu0 %v1658_v18  ;;  %v8581_v18 = vsel %vm16588_vm15, 1.0, %v17044_v61  ;;  %17169 = vst [vmem:[#allocation133_spill] sm:$0xff] %v10817_v59 }
 0x15c   : > { %1664 = vmatprep.mubr.f32.mxu0 %v17044_v61  ;;  %v10780_v37 = vsub.f32 %v8581_v18, %v8581_v18  ;;  %v1701_v23 = vsub.f32 %v10760_v27, %v16581_v60 }
 0x15d   : > { %8707 = vmatmul.mubr.msk.f32.gmra.mxu1 %vm16574_vm13, %v17050_v3  ;;  %vm16606_vm13 = vcmp.eq.s32.totalorder %v10777_v45, %v9708_v53 }
 0x15e   : > { %3146 = vmatprep.mubr.f32.mxu1 %v17044_v61  ;;  %17166 = vst [vmem:[#allocation130_spill] sm:$0xff] %v10780_v37  ;;  %v16589_v25 = vand.u32 4294901760, %v10780_v37  ;;  %v1702_v60 = vand.u32 4294901760, %v1701_v23  ;;  %v10837_v23 = vpop.permute.xlu0 %452 }
 0x15f   : > { %1670 = vmatmul.mubr.f32.gmra.mxu0 %v1669_v11  ;;  %v8582_v11 = vsel %vm16598_vm12, 1.0, %v17044_v61  ;;  %17171 = vst [vmem:[#allocation135_spill] sm:$0xff] %v10837_v23 }
 0x160   : > { %1675 = vmatprep.mubr.f32.mxu0 %v17044_v61  ;;  %v10800_v18 = vsub.f32 %v8582_v11, %v8582_v11  ;;  %v1712_v27 = vsub.f32 %v10780_v37, %v16589_v25 }
 0x161   : > { %8708 = vmatmul.mubr.msk.f32.gmra.mxu1 %vm16580_vm14, %v17050_v3  ;;  %vm16615_vm14 = vcmp.eq.s32.totalorder %v10797_v49, %v9708_v53 }
 0x162   : > { %3153 = vmatprep.mubr.f32.mxu1 %v17044_v61  ;;  %17168 = vst [vmem:[#allocation132_spill] sm:$0xff] %v10800_v18  ;;  %v1713_v47 = vand.u32 4294901760, %v1712_v27  ;;  %v17173_v37 = vand.u32 4294901760, %v10800_v18  ;;  %v10857_v27 = vpop.permute.xlu1 %455 }
 0x163   : > { %1681 = vmatmul.mubr.f32.gmra.mxu0 %v1680_v17  ;;  %v8583_v17 = vsel %vm16606_vm13, 1.0, %v17044_v61  ;;  %17174 = vst [vmem:[#allocation137_spill] sm:$0xff] %v10857_v27 }
 0x164   : > { %1686 = vmatprep.mubr.f32.mxu0 %v17044_v61  ;;  %v10820_v11 = vsub.f32 %v8583_v17, %v8583_v17  ;;  %v1723_v50 = vsub.f32 %v10800_v18, %v17173_v37 }
 0x165   : > { %8709 = vmatmul.mubr.msk.f32.gmra.mxu1 %vm16588_vm15, %v17050_v3  ;;  %vm16620_vm15 = vcmp.eq.s32.totalorder %v10817_v59, %v9708_v53 }
 0x166   : > { %3160 = vmatprep.mubr.f32.mxu1 %v17044_v61  ;;  %17170 = vst [vmem:[#allocation134_spill] sm:$0xff] %v10820_v11  ;;  %v1724_v28 = vand.u32 4294901760, %v1723_v50  ;;  %v17176_v18 = vand.u32 4294901760, %v10820_v11 }
 0x167   : > { %1692 = vmatmul.mubr.f32.gmra.mxu0 %v1691_v58  ;;  %v8584_v58 = vsel %vm16615_vm14, 1.0, %v17044_v61 }
 0x168   : > { %1697 = vmatprep.mubr.f32.mxu0 %v17044_v61  ;;  %v10840_v25 = vsub.f32 %v8584_v58, %v8584_v58  ;;  %v1734_v51 = vsub.f32 %v10820_v11, %v17176_v18  ;;  %v10877_v18 = vpop.permute.xlu0 %458 }
 0x169   : > { %v2827_v57 = vpop.f32.mrf.mxu1  ;;  %8710 = vmatmul.mubr.msk.f32.gmra.mxu1 %vm16598_vm12, %v17050_v3  ;;  %vm16625_vm12 = vcmp.eq.s32.totalorder %v10837_v23, %v9708_v53  ;;  %17177 = vst [vmem:[#allocation139_spill] sm:$0xff] %v10877_v18 }
 0x16a   : > { %3167 = vmatprep.mubr.f32.mxu1 %v17044_v61  ;;  %17172 = vst [vmem:[#allocation136_spill] sm:$0xff] %v10840_v25  ;;  %v1735_v0 = vand.u32 4294901760, %v1734_v51  ;;  %v17180_v49 = vand.u32 4294901760, %v10840_v25 }
 0x16b   : > { %1703 = vmatmul.mubr.f32.gmra.mxu0 %v1702_v60  ;;  %v2829_v17 = vpop.f32.mrf.mxu1  ;;  %v8585_v60 = vsel %vm16620_vm15, 1.0, %v17044_v61 }
 0x16c   : > { %1708 = vmatprep.mubr.f32.mxu0 %v17044_v61  ;;  %v10860_v58 = vsub.f32 %v8585_v60, %v8585_v60  ;;  %v1745_v5 = vsub.f32 %v10840_v25, %v17180_v49  ;;  %v10901_v49 = vpop.permute.xlu1 %461 }
 0x16d   : > { %v2834_v62 = vpop.f32.mrf.mxu1  ;;  %8711 = vmatmul.mubr.msk.f32.gmra.mxu1 %vm16606_vm13, %v17050_v3  ;;  %vm16630_vm13 = vcmp.eq.s32.totalorder %v10857_v27, %v9708_v53  ;;  %17182 = vst [vmem:[#allocation143_spill] sm:$0xff] %v10901_v49 }
 0x16e   : > { %3174 = vmatprep.mubr.f32.mxu1 %v17044_v61  ;;  %17175 = vst [vmem:[#allocation138_spill] sm:$0xff] %v10860_v58  ;;  %v17185_v59 = vand.u32 4294901760, %v10860_v58 }
 0x16f   : > { %1714 = vmatmul.mubr.f32.gmra.mxu0 %v1713_v47  ;;  %v2836_v37 = vpop.f32.mrf.mxu1  ;;  %v8586_v47 = vsel %vm16625_vm12, 1.0, %v17044_v61 }
 0x170   : > { %1719 = vmatprep.mubr.f32.mxu0 %v17044_v61  ;;  %v10882_v11 = vsub.f32 %v8586_v47, %v8586_v47 }
 0x171   : > { %v2841_v1 = vpop.f32.mrf.mxu1  ;;  %8712 = vmatmul.mubr.msk.f32.gmra.mxu1 %vm16615_vm14, %v17050_v3  ;;  %vm16635_vm14 = vcmp.eq.s32.totalorder %v10877_v18, %v9708_v53 }
 0x172   : > { %v1198_v50 = vpop.f32.mrf.mxu0  ;;  %3181 = vmatprep.mubr.f32.mxu1 %v17044_v61  ;;  %17179 = vst [vmem:[#allocation141_spill] sm:$0xff] %v10882_v11  ;;  %v17190_v23 = vand.u32 4294901760, %v10882_v11 }
 0x173   : > { %1725 = vmatmul.mubr.f32.gmra.mxu0 %v1724_v28  ;;  %v10879_v60 = vadd.f32 %v2827_v57, %v1198_v50  ;;  %v2843_v45 = vpop.f32.mrf.mxu1  ;;  %v8587_v28 = vsel %vm16630_vm13, 1.0, %v17044_v61 }
 0x174   : > { %1730 = vmatprep.mubr.f32.mxu0 %v17044_v61  ;;  %v1200_v10 = vpop.f32.mrf.mxu0 }
 0x175   : > { %17178 = vst [vmem:[#allocation140_spill] sm:$0xff] %v10879_v60  ;;  %v10892_v57 = vadd.f32 %v2829_v17, %v1200_v10  ;;  %v2848_v50 = vpop.f32.mrf.mxu1  ;;  %8713 = vmatmul.mubr.msk.f32.gmra.mxu1 %vm16620_vm15, %v17050_v3  ;;  %v10906_v10 = vsub.f32 %v8587_v28, %v8587_v28  ;;  %v1756_v60 = vsub.f32 %v10860_v58, %v17185_v59  ;;  %v10925_v59 = vpop.permute.xlu0 %464 }
 0x176   : > { %v1209_v51 = vpop.f32.mrf.mxu0  ;;  %3188 = vmatprep.mubr.f32.mxu1 %v17044_v61  ;;  %vm16640_vm15 = vcmp.eq.s32.totalorder %v10901_v49, %v9708_v53  ;;  %17187 = vst [vmem:[#allocation147_spill] sm:$0xff] %v10925_v59 }
 0x177   : > { %17181 = vst [vmem:[#allocation142_spill] sm:$0xff] %v10892_v57  ;;  %1736 = vmatmul.mubr.f32.gmra.mxu0 %v1735_v0  ;;  %v10903_v47 = vadd.f32 %v2834_v62, %v1209_v51  ;;  %v2850_v36 = vpop.f32.mrf.mxu1  ;;  %17184 = vst [vmem:[#allocation145_spill] sm:$0xff] %v10906_v10  ;;  %v1746_v57 = vand.u32 4294901760, %v1745_v5  ;;  %v8588_v0 = vsel %vm16635_vm14, 1.0, %v17044_v61  ;;  %v17195_v27 = vand.u32 4294901760, %v10906_v10 }
 0x178   : > { %1741 = vmatprep.mubr.f32.mxu0 %v17044_v61  ;;  %v1211_v17 = vpop.f32.mrf.mxu0 }
 0x179   : > { %17183 = vst [vmem:[#allocation144_spill] sm:$0xff] %v10903_v47  ;;  %v10916_v62 = vadd.f32 %v2836_v37, %v1211_v17  ;;  %v2855_v51 = vpop.f32.mrf.mxu1  ;;  %8714 = vmatmul.mubr.msk.f32.gmra.mxu1 %vm16625_vm12, %v17050_v3  ;;  %v10930_v37 = vsub.f32 %v8588_v0, %v8588_v0  ;;  %v1767_v47 = vsub.f32 %v10882_v11, %v17190_v23  ;;  %v10949_v23 = vpop.permute.xlu1 %467 }
 0x17a   : > { %v1220_v5 = vpop.f32.mrf.mxu0  ;;  %3195 = vmatprep.mubr.f32.mxu1 %v17044_v61  ;;  %vm16645_vm12 = vcmp.eq.s32.totalorder %v10925_v59, %v9708_v53  ;;  %17192 = vst [vmem:[#allocation151_spill] sm:$0xff] %v10949_v23 }
 0x17b   : > { %17186 = vst [vmem:[#allocation146_spill] sm:$0xff] %v10916_v62  ;;  %1747 = vmatmul.mubr.f32.gmra.mxu0 %v1746_v57  ;;  %v10927_v28 = vadd.f32 %v2841_v1, %v1220_v5  ;;  %v2857_v25 = vpop.f32.mrf.mxu1  ;;  %17189 = vst [vmem:[#allocation149_spill] sm:$0xff] %v10930_v37  ;;  %v1757_v62 = vand.u32 4294901760, %v1756_v60  ;;  %v8589_v57 = vsel %vm16640_vm15, 1.0, %v17044_v61  ;;  %v17200_v18 = vand.u32 4294901760, %v10930_v37 }
 0x17c   : > { %1752 = vmatprep.mubr.f32.mxu0 %v17044_v61  ;;  %v1222_v17 = vpop.f32.mrf.mxu0 }
 0x17d   : > { %17188 = vst [vmem:[#allocation148_spill] sm:$0xff] %v10927_v28  ;;  %v10940_v1 = vadd.f32 %v2843_v45, %v1222_v17  ;;  %v2862_v5 = vpop.f32.mrf.mxu1  ;;  %8715 = vmatmul.mubr.msk.f32.gmra.mxu1 %vm16630_vm13, %v17050_v3  ;;  %v10954_v45 = vsub.f32 %v8589_v57, %v8589_v57  ;;  %v1778_v28 = vsub.f32 %v10906_v10, %v17195_v27  ;;  %v10973_v27 = vpop.permute.xlu0 %470 }
 0x17e   : > { %v1231_v60 = vpop.f32.mrf.mxu0  ;;  %3202 = vmatprep.mubr.f32.mxu1 %v17044_v61  ;;  %vm16650_vm13 = vcmp.eq.s32.totalorder %v10949_v23, %v9708_v53  ;;  %17197 = vst [vmem:[#allocation155_spill] sm:$0xff] %v10973_v27 }
 0x17f   : > { %17191 = vst [vmem:[#allocation150_spill] sm:$0xff] %v10940_v1  ;;  %1758 = vmatmul.mubr.f32.gmra.mxu0 %v1757_v62  ;;  %v10951_v0 = vadd.f32 %v2848_v50, %v1231_v60  ;;  %v2864_v58 = vpop.f32.mrf.mxu1  ;;  %17194 = vst [vmem:[#allocation153_spill] sm:$0xff] %v10954_v45  ;;  %v1768_v1 = vand.u32 4294901760, %v1767_v47  ;;  %v8590_v62 = vsel %vm16645_vm12, 1.0, %v17044_v61 }
 0x180   : > { %1763 = vmatprep.mubr.f32.mxu0 %v17044_v61  ;;  %v1233_v17 = vpop.f32.mrf.mxu0 }
 0x181   : > { %17193 = vst [vmem:[#allocation152_spill] sm:$0xff] %v10951_v0  ;;  %v10964_v50 = vadd.f32 %v2850_v36, %v1233_v17  ;;  %v2869_v60 = vpop.f32.mrf.mxu1  ;;  %8716 = vmatmul.mubr.msk.f32.gmra.mxu1 %vm16635_vm14, %v17050_v3  ;;  %v10978_v36 = vsub.f32 %v8590_v62, %v8590_v62  ;;  %v1789_v0 = vsub.f32 %v10930_v37, %v17200_v18  ;;  %v10997_v18 = vpop.permute.xlu1 %473 }
 0x182   : > { %v1242_v47 = vpop.f32.mrf.mxu0  ;;  %3209 = vmatprep.mubr.f32.mxu1 %v17044_v61  ;;  %vm16655_vm14 = vcmp.eq.s32.totalorder %v10973_v27, %v9708_v53  ;;  %17202 = vst [vmem:[#allocation159_spill] sm:$0xff] %v10997_v18 }
 0x183   : > { %17196 = vst [vmem:[#allocation154_spill] sm:$0xff] %v10964_v50  ;;  %1769 = vmatmul.mubr.f32.gmra.mxu0 %v1768_v1  ;;  %v10975_v57 = vadd.f32 %v2855_v51, %v1242_v47  ;;  %v2871_v11 = vpop.f32.mrf.mxu1  ;;  %17199 = vst [vmem:[#allocation157_spill] sm:$0xff] %v10978_v36  ;;  %v1779_v50 = vand.u32 4294901760, %v1778_v28  ;;  %v8591_v1 = vsel %vm16650_vm13, 1.0, %v17044_v61 }
 0x184   : > { %1774 = vmatprep.mubr.f32.mxu0 %v17044_v61  ;;  %v1244_v17 = vpop.f32.mrf.mxu0 }
 0x185   : > { %17198 = vst [vmem:[#allocation156_spill] sm:$0xff] %v10975_v57  ;;  %v10988_v51 = vadd.f32 %v2857_v25, %v1244_v17  ;;  %v2876_v47 = vpop.f32.mrf.mxu1  ;;  %8717 = vmatmul.mubr.msk.f32.gmra.mxu1 %vm16640_vm15, %v17050_v3  ;;  %v11002_v25 = vsub.f32 %v8591_v1, %v8591_v1  ;;  %v17205_v57 = vand.u32 4294901760, %v10954_v45  ;;  %vm16660_vm15 = vcmp.eq.s32.totalorder %v10997_v18, %v9708_v53 }
 0x186   : > { %v1253_v28 = vpop.f32.mrf.mxu0  ;;  %3216 = vmatprep.mubr.f32.mxu1 %v17044_v61 }
 0x187   : > { %17201 = vst [vmem:[#allocation158_spill] sm:$0xff] %v10988_v51  ;;  %1780 = vmatmul.mubr.f32.gmra.mxu0 %v1779_v50  ;;  %v10999_v62 = vadd.f32 %v2862_v5, %v1253_v28  ;;  %v2878_v10 = vpop.f32.mrf.mxu1  ;;  %17204 = vst [vmem:[#allocation161_spill] sm:$0xff] %v11002_v25  ;;  %v1790_v51 = vand.u32 4294901760, %v1789_v0  ;;  %v1800_v37 = vsub.f32 %v10954_v45, %v17205_v57  ;;  %v8592_v50 = vsel %vm16655_vm14, 1.0, %v17044_v61  ;;  %v11021_v57 = vpop.permute.xlu0 %476 }
 0x188   : > { %1785 = vmatprep.mubr.f32.mxu0 %v17044_v61  ;;  %v1255_v49 = vpop.f32.mrf.mxu0  ;;  %17207 = vst [vmem:[#allocation163_spill] sm:$0xff] %v11021_v57 }
 0x189   : > { %17203 = vst [vmem:[#allocation160_spill] sm:$0xff] %v10999_v62  ;;  %v11012_v5 = vadd.f32 %v2864_v58, %v1255_v49  ;;  %v2883_v28 = vpop.f32.mrf.mxu1  ;;  %8718 = vmatmul.mubr.msk.f32.gmra.mxu1 %vm16645_vm12, %v17050_v3  ;;  %v11027_v49 = vsub.f32 %v8592_v50, %v8592_v50  ;;  %v17210_v62 = vand.u32 4294901760, %v10978_v36  ;;  %vm16665_vm12 = vcmp.eq.s32.totalorder %v11021_v57, %v9708_v53 }
 0x18a   : > { %v1264_v0 = vpop.f32.mrf.mxu0  ;;  %3223 = vmatprep.mubr.f32.mxu1 %v17044_v61 }
 0x18b   : > { %17206 = vst [vmem:[#allocation162_spill] sm:$0xff] %v11012_v5  ;;  %1791 = vmatmul.mubr.f32.gmra.mxu0 %v1790_v51  ;;  %v11023_v1 = vadd.f32 %v2869_v60, %v1264_v0  ;;  %v2885_v17 = vpop.f32.mrf.mxu1  ;;  %17209 = vst [vmem:[#allocation165_spill] sm:$0xff] %v11027_v49  ;;  %v1801_v5 = vand.u32 4294901760, %v1800_v37  ;;  %v1811_v45 = vsub.f32 %v10978_v36, %v17210_v62  ;;  %v8593_v51 = vsel %vm16660_vm15, 1.0, %v17044_v61  ;;  %v11045_v62 = vpop.permute.xlu1 %479 }
 0x18c   : > { %1796 = vmatprep.mubr.f32.mxu0 %v17044_v61  ;;  %v1266_v59 = vpop.f32.mrf.mxu0  ;;  %17212 = vst [vmem:[#allocation167_spill] sm:$0xff] %v11045_v62 }
 0x18d   : > { %17208 = vst [vmem:[#allocation164_spill] sm:$0xff] %v11023_v1  ;;  %v11036_v60 = vadd.f32 %v2871_v11, %v1266_v59  ;;  %v2890_v0 = vpop.f32.mrf.mxu1  ;;  %8719 = vmatmul.mubr.msk.f32.gmra.mxu1 %vm16650_vm13, %v17050_v3  ;;  %v11050_v11 = vsub.f32 %v8593_v51, %v8593_v51  ;;  %v17215_v1 = vand.u32 4294901760, %v11002_v25  ;;  %vm16670_vm13 = vcmp.eq.s32.totalorder %v11045_v62, %v9708_v53 }
 0x18e   : > { %v1275_v37 = vpop.f32.mrf.mxu0  ;;  %3230 = vmatprep.mubr.f32.mxu1 %v17044_v61 }
 0x18f   : > { %17211 = vst [vmem:[#allocation166_spill] sm:$0xff] %v11036_v60  ;;  %1802 = vmatmul.mubr.f32.gmra.mxu0 %v1801_v5  ;;  %v11047_v50 = vadd.f32 %v2876_v47, %v1275_v37  ;;  %v2892_v58 = vpop.f32.mrf.mxu1  ;;  %17214 = vst [vmem:[#allocation169_spill] sm:$0xff] %v11050_v11  ;;  %v1812_v60 = vand.u32 4294901760, %v1811_v45  ;;  %v1822_v36 = vsub.f32 %v11002_v25, %v17215_v1  ;;  %v8594_v5 = vsel %vm16665_vm12, 1.0, %v17044_v61  ;;  %v11069_v1 = vpop.permute.xlu0 %482 }
 0x190   : > { %1807 = vmatprep.mubr.f32.mxu0 %v17044_v61  ;;  %v1277_v23 = vpop.f32.mrf.mxu0  ;;  %17217 = vst [vmem:[#allocation171_spill] sm:$0xff] %v11069_v1 }
 0x191   : > { %17213 = vst [vmem:[#allocation168_spill] sm:$0xff] %v11047_v50  ;;  %v11060_v47 = vadd.f32 %v2878_v10, %v1277_v23  ;;  %v2897_v37 = vpop.f32.mrf.mxu1  ;;  %8720 = vmatmul.mubr.msk.f32.gmra.mxu1 %vm16655_vm14, %v17050_v3  ;;  %v11075_v23 = vsub.f32 %v8594_v5, %v8594_v5  ;;  %v17220_v50 = vand.u32 4294901760, %v11027_v49  ;;  %vm16675_vm14 = vcmp.eq.s32.totalorder %v11069_v1, %v9708_v53 }
 0x192   : > { %v1286_v45 = vpop.f32.mrf.mxu0  ;;  %3237 = vmatprep.mubr.f32.mxu1 %v17044_v61 }
 0x193   : > { %17216 = vst [vmem:[#allocation170_spill] sm:$0xff] %v11060_v47  ;;  %1813 = vmatmul.mubr.f32.gmra.mxu0 %v1812_v60  ;;  %v11071_v51 = vadd.f32 %v2883_v28, %v1286_v45  ;;  %v2899_v59 = vpop.f32.mrf.mxu1  ;;  %17219 = vst [vmem:[#allocation173_spill] sm:$0xff] %v11075_v23  ;;  %v1823_v47 = vand.u32 4294901760, %v1822_v36  ;;  %v1833_v25 = vsub.f32 %v11027_v49, %v17220_v50  ;;  %v8595_v60 = vsel %vm16670_vm13, 1.0, %v17044_v61  ;;  %v11093_v50 = vpop.permute.xlu1 %485 }
 0x194   : > { %1818 = vmatprep.mubr.f32.mxu0 %v17044_v61  ;;  %v1288_v27 = vpop.f32.mrf.mxu0  ;;  %17222 = vst [vmem:[#allocation175_spill] sm:$0xff] %v11093_v50 }
 0x195   : > { %17218 = vst [vmem:[#allocation172_spill] sm:$0xff] %v11071_v51  ;;  %v11084_v28 = vadd.f32 %v2885_v17, %v1288_v27  ;;  %v2904_v45 = vpop.f32.mrf.mxu1  ;;  %8721 = vmatmul.mubr.msk.f32.gmra.mxu1 %vm16660_vm15, %v17050_v3  ;;  %v11098_v27 = vsub.f32 %v8595_v60, %v8595_v60  ;;  %v17225_v51 = vand.u32 4294901760, %v11050_v11  ;;  %vm16680_vm15 = vcmp.eq.s32.totalorder %v11093_v50, %v9708_v53 }
 0x196   : > { %v1297_v36 = vpop.f32.mrf.mxu0  ;;  %3244 = vmatprep.mubr.f32.mxu1 %v17044_v61 }
 0x197   : > { %17221 = vst [vmem:[#allocation174_spill] sm:$0xff] %v11084_v28  ;;  %1824 = vmatmul.mubr.f32.gmra.mxu0 %v1823_v47  ;;  %v11095_v5 = vadd.f32 %v2890_v0, %v1297_v36  ;;  %v2906_v10 = vpop.f32.mrf.mxu1  ;;  %17224 = vst [vmem:[#allocation177_spill] sm:$0xff] %v11098_v27  ;;  %v1834_v28 = vand.u32 4294901760, %v1833_v25  ;;  %v1844_v49 = vsub.f32 %v11050_v11, %v17225_v51  ;;  %v8596_v47 = vsel %vm16675_vm14, 1.0, %v17044_v61  ;;  %v11117_v51 = vpop.permute.xlu0 %488 }
 0x198   : > { %1829 = vmatprep.mubr.f32.mxu0 %v17044_v61  ;;  %v1299_v18 = vpop.f32.mrf.mxu0  ;;  %17227 = vst [vmem:[#allocation179_spill] sm:$0xff] %v11117_v51 }
 0x199   : > { %17223 = vst [vmem:[#allocation176_spill] sm:$0xff] %v11095_v5  ;;  %v11108_v0 = vadd.f32 %v2892_v58, %v1299_v18  ;;  %v2911_v36 = vpop.f32.mrf.mxu1  ;;  %8722 = vmatmul.mubr.msk.f32.gmra.mxu1 %vm16665_vm12, %v17050_v3  ;;  %v11123_v58 = vsub.f32 %v8596_v47, %v8596_v47  ;;  %v17230_v5 = vand.u32 4294901760, %v11075_v23  ;;  %vm16685_vm12 = vcmp.eq.s32.totalorder %v11117_v51, %v9708_v53 }
 0x19a   : > { %v1308_v25 = vpop.f32.mrf.mxu0  ;;  %3251 = vmatprep.mubr.f32.mxu1 %v17044_v61 }
 0x19b   : > { %17226 = vst [vmem:[#allocation178_spill] sm:$0xff] %v11108_v0  ;;  %1835 = vmatmul.mubr.f32.gmra.mxu0 %v1834_v28  ;;  %v11119_v60 = vadd.f32 %v2897_v37, %v1308_v25  ;;  %v2913_v17 = vpop.f32.mrf.mxu1  ;;  %17229 = vst [vmem:[#allocation181_spill] sm:$0xff] %v11123_v58  ;;  %v1845_v0 = vand.u32 4294901760, %v1844_v49  ;;  %v1855_v11 = vsub.f32 %v11075_v23, %v17230_v5  ;;  %v8597_v28 = vsel %vm16680_vm15, 1.0, %v17044_v61  ;;  %v11141_v5 = vpop.permute.xlu1 %491 }
 0x19c   : > { %1840 = vmatprep.mubr.f32.mxu0 %v17044_v61  ;;  %v1310_v57 = vpop.f32.mrf.mxu0  ;;  %17232 = vst [vmem:[#allocation183_spill] sm:$0xff] %v11141_v5 }
 0x19d   : > { %17228 = vst [vmem:[#allocation180_spill] sm:$0xff] %v11119_v60  ;;  %v11132_v37 = vadd.f32 %v2899_v59, %v1310_v57  ;;  %v2918_v25 = vpop.f32.mrf.mxu1  ;;  %8723 = vmatmul.mubr.msk.f32.gmra.mxu1 %vm16670_vm13, %v17050_v3  ;;  %v11146_v57 = vsub.f32 %v8597_v28, %v8597_v28  ;;  %v17235_v60 = vand.u32 4294901760, %v11098_v27  ;;  %vm16690_vm13 = vcmp.eq.s32.totalorder %v11141_v5, %v9708_v53 }
 0x19e   : > { %v1319_v49 = vpop.f32.mrf.mxu0  ;;  %3258 = vmatprep.mubr.f32.mxu1 %v17044_v61 }
 0x19f   : > { %17231 = vst [vmem:[#allocation182_spill] sm:$0xff] %v11132_v37  ;;  %1846 = vmatmul.mubr.f32.gmra.mxu0 %v1845_v0  ;;  %v11143_v47 = vadd.f32 %v2904_v45, %v1319_v49  ;;  %v2920_v18 = vpop.f32.mrf.mxu1  ;;  %17234 = vst [vmem:[#allocation185_spill] sm:$0xff] %v11146_v57  ;;  %v1856_v37 = vand.u32 4294901760, %v1855_v11  ;;  %v1866_v23 = vsub.f32 %v11098_v27, %v17235_v60  ;;  %v8598_v0 = vsel %vm16685_vm12, 1.0, %v17044_v61  ;;  %v11165_v60 = vpop.permute.xlu0 %494 }
 0x1a0   : > { %1851 = vmatprep.mubr.f32.mxu0 %v17044_v61  ;;  %v1321_v62 = vpop.f32.mrf.mxu0  ;;  %17237 = vst [vmem:[#allocation187_spill] sm:$0xff] %v11165_v60 }
 0x1a1   : > { %17233 = vst [vmem:[#allocation184_spill] sm:$0xff] %v11143_v47  ;;  %v11156_v45 = vadd.f32 %v2906_v10, %v1321_v62  ;;  %v2925_v49 = vpop.f32.mrf.mxu1  ;;  %8724 = vmatmul.mubr.msk.f32.gmra.mxu1 %vm16675_vm14, %v17050_v3  ;;  %v11171_v10 = vsub.f32 %v8598_v0, %v8598_v0  ;;  %v17240_v47 = vand.u32 4294901760, %v11123_v58  ;;  %vm16695_vm14 = vcmp.eq.s32.totalorder %v11165_v60, %v9708_v53 }
 0x1a2   : > { %v1330_v11 = vpop.f32.mrf.mxu0  ;;  %3265 = vmatprep.mubr.f32.mxu1 %v17044_v61 }
 0x1a3   : > { %17236 = vst [vmem:[#allocation186_spill] sm:$0xff] %v11156_v45  ;;  %1857 = vmatmul.mubr.f32.gmra.mxu0 %v1856_v37  ;;  %v11167_v28 = vadd.f32 %v2911_v36, %v1330_v11  ;;  %v2927_v59 = vpop.f32.mrf.mxu1  ;;  %17239 = vst [vmem:[#allocation189_spill] sm:$0xff] %v11171_v10  ;;  %v1867_v45 = vand.u32 4294901760, %v1866_v23  ;;  %v1877_v27 = vsub.f32 %v11123_v58, %v17240_v47  ;;  %v8599_v37 = vsel %vm16690_vm13, 1.0, %v17044_v61  ;;  %v11189_v47 = vpop.permute.xlu1 %497 }
 0x1a4   : > { %1862 = vmatprep.mubr.f32.mxu0 %v17044_v61  ;;  %v1332_v1 = vpop.f32.mrf.mxu0  ;;  %17242 = vst [vmem:[#allocation191_spill] sm:$0xff] %v11189_v47 }
 0x1a5   : > { %17238 = vst [vmem:[#allocation188_spill] sm:$0xff] %v11167_v28  ;;  %v11180_v36 = vadd.f32 %v2913_v17, %v1332_v1  ;;  %v2932_v11 = vpop.f32.mrf.mxu1  ;;  %8725 = vmatmul.mubr.msk.f32.gmra.mxu1 %vm16680_vm15, %v17050_v3  ;;  %v11194_v1 = vsub.f32 %v8599_v37, %v8599_v37  ;;  %v17245_v28 = vand.u32 4294901760, %v11146_v57  ;;  %vm16700_vm15 = vcmp.eq.s32.totalorder %v11189_v47, %v9708_v53 }
 0x1a6   : > { %v1341_v23 = vpop.f32.mrf.mxu0  ;;  %3272 = vmatprep.mubr.f32.mxu1 %v17044_v61 }
 0x1a7   : > { %17241 = vst [vmem:[#allocation190_spill] sm:$0xff] %v11180_v36  ;;  %1868 = vmatmul.mubr.f32.gmra.mxu0 %v1867_v45  ;;  %v11191_v0 = vadd.f32 %v2918_v25, %v1341_v23  ;;  %v2934_v62 = vpop.f32.mrf.mxu1  ;;  %17244 = vst [vmem:[#allocation193_spill] sm:$0xff] %v11194_v1  ;;  %v1878_v36 = vand.u32 4294901760, %v1877_v27  ;;  %v1888_v58 = vsub.f32 %v11146_v57, %v17245_v28  ;;  %v8600_v45 = vsel %vm16695_vm14, 1.0, %v17044_v61  ;;  %v11213_v28 = vpop.permute.xlu0 %500 }
 0x1a8   : > { %1873 = vmatprep.mubr.f32.mxu0 %v17044_v61  ;;  %v1343_v50 = vpop.f32.mrf.mxu0  ;;  %17247 = vst [vmem:[#allocation195_spill] sm:$0xff] %v11213_v28 }
 0x1a9   : > { %17243 = vst [vmem:[#allocation192_spill] sm:$0xff] %v11191_v0  ;;  %v11204_v25 = vadd.f32 %v2920_v18, %v1343_v50  ;;  %v2939_v23 = vpop.f32.mrf.mxu1  ;;  %8726 = vmatmul.mubr.msk.f32.gmra.mxu1 %vm16685_vm12, %v17050_v3  ;;  %v11219_v18 = vsub.f32 %v8600_v45, %v8600_v45  ;;  %v17250_v0 = vand.u32 4294901760, %v11171_v10  ;;  %vm16705_vm12 = vcmp.eq.s32.totalorder %v11213_v28, %v9708_v53 }
 0x1aa   : > { %3279 = vmatprep.mubr.f32.mxu1 %v17044_v61 }
 0x1ab   : > { %17246 = vst [vmem:[#allocation194_spill] sm:$0xff] %v11204_v25  ;;  %v1352_v27 = vpop.f32.mrf.mxu0  ;;  %1879 = vmatmul.mubr.f32.gmra.mxu0 %v1878_v36  ;;  %v2941_v17 = vpop.f32.mrf.mxu1  ;;  %17249 = vst [vmem:[#allocation197_spill] sm:$0xff] %v11219_v18  ;;  %v1889_v25 = vand.u32 4294901760, %v1888_v58  ;;  %v1899_v57 = vsub.f32 %v11171_v10, %v17250_v0  ;;  %v8601_v36 = vsel %vm16700_vm15, 1.0, %v17044_v61 }
 0x1ac   : > { %v11215_v37 = vadd.f32 %v2925_v49, %v1352_v27  ;;  %1884 = vmatprep.mubr.f32.mxu0 %v17044_v61  ;;  %v11237_v0 = vpop.permute.xlu1 %503 }
 0x1ad   : > { %v1354_v51 = vpop.f32.mrf.mxu0  ;;  %v2946_v27 = vpop.f32.mrf.mxu1  ;;  %8727 = vmatmul.mubr.msk.f32.gmra.mxu1 %vm16690_vm13, %v17050_v3  ;;  %17252 = vst [vmem:[#allocation199_spill] sm:$0xff] %v11237_v0  ;;  %vm16710_vm13 = vcmp.eq.s32.totalorder %v11237_v0, %v9708_v53 }
 0x1ae   : > { %17248 = vst [vmem:[#allocation196_spill] sm:$0xff] %v11215_v37  ;;  %v11228_v49 = vadd.f32 %v2927_v59, %v1354_v51  ;;  %3286 = vmatprep.mubr.f32.mxu1 %v17044_v61  ;;  %v11242_v51 = vsub.f32 %v8601_v36, %v8601_v36  ;;  %v17255_v37 = vand.u32 4294901760, %v11194_v1 }
 0x1af   : > { %v1363_v58 = vpop.f32.mrf.mxu0  ;;  %1890 = vmatmul.mubr.f32.gmra.mxu0 %v1889_v25  ;;  %v2948_v50 = vpop.f32.mrf.mxu1  ;;  %v8602_v25 = vsel %vm16705_vm12, 1.0, %v17044_v61 }
 0x1b0   : > { %17251 = vst [vmem:[#allocation198_spill] sm:$0xff] %v11228_v49  ;;  %v11239_v45 = vadd.f32 %v2932_v11, %v1363_v58  ;;  %1895 = vmatprep.mubr.f32.mxu0 %v17044_v61  ;;  %17254 = vst [vmem:[#allocation201_spill] sm:$0xff] %v11242_v51  ;;  %v1900_v49 = vand.u32 4294901760, %v1899_v57  ;;  %v1910_v10 = vsub.f32 %v11194_v1, %v17255_v37  ;;  %v11261_v37 = vpop.permute.xlu0 %506 }
 0x1b1   : > { %v1365_v5 = vpop.f32.mrf.mxu0  ;;  %v2953_v58 = vpop.f32.mrf.mxu1  ;;  %8728 = vmatmul.mubr.msk.f32.gmra.mxu1 %vm16695_vm14, %v17050_v3  ;;  %17257 = vst [vmem:[#allocation203_spill] sm:$0xff] %v11261_v37  ;;  %vm16715_vm14 = vcmp.eq.s32.totalorder %v11261_v37, %v9708_v53 }
 0x1b2   : > { %17253 = vst [vmem:[#allocation200_spill] sm:$0xff] %v11239_v45  ;;  %v11252_v11 = vadd.f32 %v2934_v62, %v1365_v5  ;;  %3293 = vmatprep.mubr.f32.mxu1 %v17044_v61  ;;  %v11267_v62 = vsub.f32 %v8602_v25, %v8602_v25  ;;  %v17260_v45 = vand.u32 4294901760, %v11219_v18 }
 0x1b3   : > { %v1374_v57 = vpop.f32.mrf.mxu0  ;;  %1901 = vmatmul.mubr.f32.gmra.mxu0 %v1900_v49  ;;  %v2955_v59 = vpop.f32.mrf.mxu1  ;;  %v8603_v49 = vsel %vm16710_vm13, 1.0, %v17044_v61 }
 0x1b4   : > { %17256 = vst [vmem:[#allocation202_spill] sm:$0xff] %v11252_v11  ;;  %v11263_v36 = vadd.f32 %v2939_v23, %v1374_v57  ;;  %1906 = vmatprep.mubr.f32.mxu0 %v17044_v61  ;;  %17259 = vst [vmem:[#allocation205_spill] sm:$0xff] %v11267_v62  ;;  %v1911_v11 = vand.u32 4294901760, %v1910_v10  ;;  %v1921_v1 = vsub.f32 %v11219_v18, %v17260_v45  ;;  %v11285_v45 = vpop.permute.xlu1 %509 }
 0x1b5   : > { %v1376_v60 = vpop.f32.mrf.mxu0  ;;  %v2960_v57 = vpop.f32.mrf.mxu1  ;;  %8729 = vmatmul.mubr.msk.f32.gmra.mxu1 %vm16700_vm15, %v17050_v3  ;;  %17262 = vst [vmem:[#allocation207_spill] sm:$0xff] %v11285_v45  ;;  %vm16720_vm15 = vcmp.eq.s32.totalorder %v11285_v45, %v9708_v53 }
 0x1b6   : > { %17258 = vst [vmem:[#allocation204_spill] sm:$0xff] %v11263_v36  ;;  %v11276_v23 = vadd.f32 %v2941_v17, %v1376_v60  ;;  %3300 = vmatprep.mubr.f32.mxu1 %v17044_v61  ;;  %v11290_v60 = vsub.f32 %v8603_v49, %v8603_v49  ;;  %v17265_v36 = vand.u32 4294901760, %v11242_v51 }
 0x1b7   : > { %v1385_v10 = vpop.f32.mrf.mxu0  ;;  %1912 = vmatmul.mubr.f32.gmra.mxu0 %v1911_v11  ;;  %v2962_v5 = vpop.f32.mrf.mxu1  ;;  %v8604_v11 = vsel %vm16715_vm14, 1.0, %v17044_v61 }
 0x1b8   : > { %17261 = vst [vmem:[#allocation206_spill] sm:$0xff] %v11276_v23  ;;  %v11287_v25 = vadd.f32 %v2946_v27, %v1385_v10  ;;  %1917 = vmatprep.mubr.f32.mxu0 %v17044_v61  ;;  %17264 = vst [vmem:[#allocation209_spill] sm:$0xff] %v11290_v60  ;;  %v1922_v23 = vand.u32 4294901760, %v1921_v1  ;;  %v1932_v18 = vsub.f32 %v11242_v51, %v17265_v36  ;;  %v11309_v36 = vpop.permute.xlu0 %512 }
 0x1b9   : > { %v1387_v47 = vpop.f32.mrf.mxu0  ;;  %v2967_v10 = vpop.f32.mrf.mxu1  ;;  %8730 = vmatmul.mubr.msk.f32.gmra.mxu1 %vm16705_vm12, %v17050_v3  ;;  %17267 = vst [vmem:[#allocation211_spill] sm:$0xff] %v11309_v36  ;;  %vm16725_vm12 = vcmp.eq.s32.totalorder %v11309_v36, %v9708_v53 }
 0x1ba   : > { %17263 = vst [vmem:[#allocation208_spill] sm:$0xff] %v11287_v25  ;;  %v11300_v27 = vadd.f32 %v2948_v50, %v1387_v47  ;;  %3307 = vmatprep.mubr.f32.mxu1 %v17044_v61  ;;  %v11315_v50 = vsub.f32 %v8604_v11, %v8604_v11  ;;  %v17270_v25 = vand.u32 4294901760, %v11267_v62 }
 0x1bb   : > { %v1396_v1 = vpop.f32.mrf.mxu0  ;;  %1923 = vmatmul.mubr.f32.gmra.mxu0 %v1922_v23  ;;  %v2969_v17 = vpop.f32.mrf.mxu1  ;;  %v8605_v23 = vsel %vm16720_vm15, 1.0, %v17044_v61 }
 0x1bc   : > { %17266 = vst [vmem:[#allocation210_spill] sm:$0xff] %v11300_v27  ;;  %v11311_v49 = vadd.f32 %v2953_v58, %v1396_v1  ;;  %1928 = vmatprep.mubr.f32.mxu0 %v17044_v61  ;;  %17269 = vst [vmem:[#allocation213_spill] sm:$0xff] %v11315_v50  ;;  %v1933_v27 = vand.u32 4294901760, %v1932_v18  ;;  %v1943_v51 = vsub.f32 %v11267_v62, %v17270_v25  ;;  %v11333_v25 = vpop.permute.xlu1 %515 }
 0x1bd   : > { %v1398_v28 = vpop.f32.mrf.mxu0  ;;  %v2974_v1 = vpop.f32.mrf.mxu1  ;;  %8731 = vmatmul.mubr.msk.f32.gmra.mxu1 %vm16710_vm13, %v17050_v3  ;;  %17272 = vst [vmem:[#allocation215_spill] sm:$0xff] %v11333_v25  ;;  %vm16730_vm13 = vcmp.eq.s32.totalorder %v11333_v25, %v9708_v53 }
 0x1be   : > { %17268 = vst [vmem:[#allocation212_spill] sm:$0xff] %v11311_v49  ;;  %v11324_v58 = vadd.f32 %v2955_v59, %v1398_v28  ;;  %3314 = vmatprep.mubr.f32.mxu1 %v17044_v61  ;;  %v11338_v28 = vsub.f32 %v8605_v23, %v8605_v23  ;;  %v17275_v49 = vand.u32 4294901760, %v11290_v60 }
 0x1bf   : > { %v1407_v18 = vpop.f32.mrf.mxu0  ;;  %1934 = vmatmul.mubr.f32.gmra.mxu0 %v1933_v27  ;;  %v2976_v47 = vpop.f32.mrf.mxu1  ;;  %v8606_v27 = vsel %vm16725_vm12, 1.0, %v17044_v61 }
 0x1c0   : > { %17271 = vst [vmem:[#allocation214_spill] sm:$0xff] %v11324_v58  ;;  %v11335_v11 = vadd.f32 %v2960_v57, %v1407_v18  ;;  %1939 = vmatprep.mubr.f32.mxu0 %v17044_v61  ;;  %17274 = vst [vmem:[#allocation217_spill] sm:$0xff] %v11338_v28  ;;  %v1944_v58 = vand.u32 4294901760, %v1943_v51  ;;  %v1954_v62 = vsub.f32 %v11290_v60, %v17275_v49  ;;  %v11357_v49 = vpop.permute.xlu0 %518 }
 0x1c1   : > { %v1409_v0 = vpop.f32.mrf.mxu0  ;;  %v2981_v18 = vpop.f32.mrf.mxu1  ;;  %8732 = vmatmul.mubr.msk.f32.gmra.mxu1 %vm16715_vm14, %v17050_v3  ;;  %17277 = vst [vmem:[#allocation219_spill] sm:$0xff] %v11357_v49  ;;  %vm16735_vm14 = vcmp.eq.s32.totalorder %v11357_v49, %v9708_v53 }
 0x1c2   : > { %17273 = vst [vmem:[#allocation216_spill] sm:$0xff] %v11335_v11  ;;  %v11348_v57 = vadd.f32 %v2962_v5, %v1409_v0  ;;  %3321 = vmatprep.mubr.f32.mxu1 %v17044_v61  ;;  %v11363_v5 = vsub.f32 %v8606_v27, %v8606_v27  ;;  %v17280_v11 = vand.u32 4294901760, %v11315_v50 }
 0x1c3   : > { %v1418_v51 = vpop.f32.mrf.mxu0  ;;  %1945 = vmatmul.mubr.f32.gmra.mxu0 %v1944_v58  ;;  %v2983_v59 = vpop.f32.mrf.mxu1  ;;  %v8607_v58 = vsel %vm16730_vm13, 1.0, %v17044_v61 }
 0x1c4   : > { %17276 = vst [vmem:[#allocation218_spill] sm:$0xff] %v11348_v57  ;;  %v11359_v23 = vadd.f32 %v2967_v10, %v1418_v51  ;;  %1950 = vmatprep.mubr.f32.mxu0 %v17044_v61  ;;  %17279 = vst [vmem:[#allocation221_spill] sm:$0xff] %v11363_v5  ;;  %v1955_v57 = vand.u32 4294901760, %v1954_v62  ;;  %v1965_v60 = vsub.f32 %v11315_v50, %v17280_v11  ;;  %v11381_v11 = vpop.permute.xlu1 %521 }
 0x1c5   : > { %v1420_v37 = vpop.f32.mrf.mxu0  ;;  %v2988_v51 = vpop.f32.mrf.mxu1  ;;  %8733 = vmatmul.mubr.msk.f32.gmra.mxu1 %vm16720_vm15, %v17050_v3  ;;  %17282 = vst [vmem:[#allocation223_spill] sm:$0xff] %v11381_v11  ;;  %vm16740_vm15 = vcmp.eq.s32.totalorder %v11381_v11, %v9708_v53 }
 0x1c6   : > { %17278 = vst [vmem:[#allocation220_spill] sm:$0xff] %v11359_v23  ;;  %v11372_v10 = vadd.f32 %v2969_v17, %v1420_v37  ;;  %3328 = vmatprep.mubr.f32.mxu1 %v17044_v61  ;;  %v11386_v37 = vsub.f32 %v8607_v58, %v8607_v58  ;;  %v17285_v23 = vand.u32 4294901760, %v11338_v28 }
 0x1c7   : > { %v1429_v62 = vpop.f32.mrf.mxu0  ;;  %1956 = vmatmul.mubr.f32.gmra.mxu0 %v1955_v57  ;;  %v2990_v0 = vpop.f32.mrf.mxu1  ;;  %v8608_v57 = vsel %vm16735_vm14, 1.0, %v17044_v61 }
 0x1c8   : > { %17281 = vst [vmem:[#allocation222_spill] sm:$0xff] %v11372_v10  ;;  %v11383_v27 = vadd.f32 %v2974_v1, %v1429_v62  ;;  %1961 = vmatprep.mubr.f32.mxu0 %v17044_v61  ;;  %17284 = vst [vmem:[#allocation225_spill] sm:$0xff] %v11386_v37  ;;  %v1966_v10 = vand.u32 4294901760, %v1965_v60  ;;  %v1976_v50 = vsub.f32 %v11338_v28, %v17285_v23  ;;  %v11405_v23 = vpop.permute.xlu0 %524 }
 0x1c9   : > { %v1431_v45 = vpop.f32.mrf.mxu0  ;;  %v2995_v62 = vpop.f32.mrf.mxu1  ;;  %8734 = vmatmul.mubr.msk.f32.gmra.mxu1 %vm16725_vm12, %v17050_v3  ;;  %17287 = vst [vmem:[#allocation227_spill] sm:$0xff] %v11405_v23  ;;  %vm16745_vm12 = vcmp.eq.s32.totalorder %v11405_v23, %v9708_v53 }
 0x1ca   : > { %17283 = vst [vmem:[#allocation224_spill] sm:$0xff] %v11383_v27  ;;  %v11396_v1 = vadd.f32 %v2976_v47, %v1431_v45  ;;  %3335 = vmatprep.mubr.f32.mxu1 %v17044_v61  ;;  %v11411_v47 = vsub.f32 %v8608_v57, %v8608_v57  ;;  %v17290_v27 = vand.u32 4294901760, %v11363_v5 }
 0x1cb   : > { %v1440_v60 = vpop.f32.mrf.mxu0  ;;  %1967 = vmatmul.mubr.f32.gmra.mxu0 %v1966_v10  ;;  %v2997_v17 = vpop.f32.mrf.mxu1  ;;  %v8609_v10 = vsel %vm16740_vm15, 1.0, %v17044_v61 }
 0x1cc   : > { %17286 = vst [vmem:[#allocation226_spill] sm:$0xff] %v11396_v1  ;;  %v11407_v58 = vadd.f32 %v2981_v18, %v1440_v60  ;;  %1972 = vmatprep.mubr.f32.mxu0 %v17044_v61  ;;  %17289 = vst [vmem:[#allocation229_spill] sm:$0xff] %v11411_v47  ;;  %v1977_v1 = vand.u32 4294901760, %v1976_v50  ;;  %v1987_v28 = vsub.f32 %v11363_v5, %v17290_v27  ;;  %v11429_v27 = vpop.permute.xlu1 %527 }
 0x1cd   : > { %v1442_v36 = vpop.f32.mrf.mxu0  ;;  %v3002_v60 = vpop.f32.mrf.mxu1  ;;  %8735 = vmatmul.mubr.msk.f32.gmra.mxu1 %vm16730_vm13, %v17050_v3  ;;  %17292 = vst [vmem:[#allocation231_spill] sm:$0xff] %v11429_v27  ;;  %vm16750_vm13 = vcmp.eq.s32.totalorder %v11429_v27, %v9708_v53 }
 0x1ce   : > { %17288 = vst [vmem:[#allocation228_spill] sm:$0xff] %v11407_v58  ;;  %v11420_v18 = vadd.f32 %v2983_v59, %v1442_v36  ;;  %3342 = vmatprep.mubr.f32.mxu1 %v17044_v61  ;;  %v11434_v36 = vsub.f32 %v8609_v10, %v8609_v10  ;;  %v17295_v58 = vand.u32 4294901760, %v11386_v37 }
 0x1cf   : > { %v1451_v50 = vpop.f32.mrf.mxu0  ;;  %1978 = vmatmul.mubr.f32.gmra.mxu0 %v1977_v1  ;;  %v3004_v45 = vpop.f32.mrf.mxu1  ;;  %v8610_v1 = vsel %vm16745_vm12, 1.0, %v17044_v61 }
 0x1d0   : > { %17291 = vst [vmem:[#allocation230_spill] sm:$0xff] %v11420_v18  ;;  %v11431_v57 = vadd.f32 %v2988_v51, %v1451_v50  ;;  %1983 = vmatprep.mubr.f32.mxu0 %v17044_v61  ;;  %17294 = vst [vmem:[#allocation233_spill] sm:$0xff] %v11434_v36  ;;  %v1988_v18 = vand.u32 4294901760, %v1987_v28  ;;  %v1998_v5 = vsub.f32 %v11386_v37, %v17295_v58  ;;  %v11453_v58 = vpop.permute.xlu0 %530 }
 0x1d1   : > { %v1453_v25 = vpop.f32.mrf.mxu0  ;;  %v3009_v50 = vpop.f32.mrf.mxu1  ;;  %8736 = vmatmul.mubr.msk.f32.gmra.mxu1 %vm16735_vm14, %v17050_v3  ;;  %17297 = vst [vmem:[#allocation235_spill] sm:$0xff] %v11453_v58  ;;  %vm16755_vm14 = vcmp.eq.s32.totalorder %v11453_v58, %v9708_v53 }
 0x1d2   : > { %17293 = vst [vmem:[#allocation232_spill] sm:$0xff] %v11431_v57  ;;  %v11444_v51 = vadd.f32 %v2990_v0, %v1453_v25  ;;  %3349 = vmatprep.mubr.f32.mxu1 %v17044_v61  ;;  %v11459_v0 = vsub.f32 %v8610_v1, %v8610_v1  ;;  %v17300_v57 = vand.u32 4294901760, %v11411_v47 }
 0x1d3   : > { %v1462_v28 = vpop.f32.mrf.mxu0  ;;  %1989 = vmatmul.mubr.f32.gmra.mxu0 %v1988_v18  ;;  %v3011_v59 = vpop.f32.mrf.mxu1  ;;  %v8611_v18 = vsel %vm16750_vm13, 1.0, %v17044_v61 }
 0x1d4   : > { %17296 = vst [vmem:[#allocation234_spill] sm:$0xff] %v11444_v51  ;;  %v11455_v10 = vadd.f32 %v2995_v62, %v1462_v28  ;;  %1994 = vmatprep.mubr.f32.mxu0 %v17044_v61  ;;  %17299 = vst [vmem:[#allocation237_spill] sm:$0xff] %v11459_v0  ;;  %v1999_v51 = vand.u32 4294901760, %v1998_v5  ;;  %v2009_v37 = vsub.f32 %v11411_v47, %v17300_v57  ;;  %v11477_v57 = vpop.permute.xlu1 %533 }
 0x1d5   : > { %v1464_v49 = vpop.f32.mrf.mxu0  ;;  %v3016_v28 = vpop.f32.mrf.mxu1  ;;  %8737 = vmatmul.mubr.msk.f32.gmra.mxu1 %vm16740_vm15, %v17050_v3  ;;  %17302 = vst [vmem:[#allocation239_spill] sm:$0xff] %v11477_v57  ;;  %vm16760_vm15 = vcmp.eq.s32.totalorder %v11477_v57, %v9708_v53 }
 0x1d6   : > { %17298 = vst [vmem:[#allocation236_spill] sm:$0xff] %v11455_v10  ;;  %v11468_v62 = vadd.f32 %v2997_v17, %v1464_v49  ;;  %3356 = vmatprep.mubr.f32.mxu1 %v17044_v61  ;;  %v11482_v49 = vsub.f32 %v8611_v18, %v8611_v18  ;;  %v17305_v10 = vand.u32 4294901760, %v11434_v36 }
 0x1d7   : > { %v1473_v5 = vpop.f32.mrf.mxu0  ;;  %2000 = vmatmul.mubr.f32.gmra.mxu0 %v1999_v51  ;;  %v3018_v25 = vpop.f32.mrf.mxu1  ;;  %v8612_v51 = vsel %vm16755_vm14, 1.0, %v17044_v61 }
 0x1d8   : > { %17301 = vst [vmem:[#allocation238_spill] sm:$0xff] %v11468_v62  ;;  %v11479_v1 = vadd.f32 %v3002_v60, %v1473_v5  ;;  %2005 = vmatprep.mubr.f32.mxu0 %v17044_v61  ;;  %17304 = vst [vmem:[#allocation241_spill] sm:$0xff] %v11482_v49  ;;  %v2010_v62 = vand.u32 4294901760, %v2009_v37  ;;  %v2020_v47 = vsub.f32 %v11434_v36, %v17305_v10  ;;  %v11501_v10 = vpop.permute.xlu0 %536 }
 0x1d9   : > { %v1475_v11 = vpop.f32.mrf.mxu0  ;;  %v3023_v5 = vpop.f32.mrf.mxu1  ;;  %8738 = vmatmul.mubr.msk.f32.gmra.mxu1 %vm16745_vm12, %v17050_v3  ;;  %17307 = vst [vmem:[#allocation243_spill] sm:$0xff] %v11501_v10  ;;  %vm16765_vm12 = vcmp.eq.s32.totalorder %v11501_v10, %v9708_v53 }
 0x1da   : > { %17303 = vst [vmem:[#allocation240_spill] sm:$0xff] %v11479_v1  ;;  %v11492_v60 = vadd.f32 %v3004_v45, %v1475_v11  ;;  %3363 = vmatprep.mubr.f32.mxu1 %v17044_v61  ;;  %v11507_v45 = vsub.f32 %v8612_v51, %v8612_v51  ;;  %v17310_v1 = vand.u32 4294901760, %v11459_v0 }
 0x1db   : > { %v1484_v37 = vpop.f32.mrf.mxu0  ;;  %2011 = vmatmul.mubr.f32.gmra.mxu0 %v2010_v62  ;;  %v3025_v17 = vpop.f32.mrf.mxu1  ;;  %v8613_v62 = vsel %vm16760_vm15, 1.0, %v17044_v61 }
 0x1dc   : > { %17306 = vst [vmem:[#allocation242_spill] sm:$0xff] %v11492_v60  ;;  %v11503_v18 = vadd.f32 %v3009_v50, %v1484_v37  ;;  %2016 = vmatprep.mubr.f32.mxu0 %v17044_v61  ;;  %17309 = vst [vmem:[#allocation245_spill] sm:$0xff] %v11507_v45  ;;  %v2021_v60 = vand.u32 4294901760, %v2020_v47  ;;  %v2031_v36 = vsub.f32 %v11459_v0, %v17310_v1  ;;  %v11525_v1 = vpop.permute.xlu1 %539 }
 0x1dd   : > { %v1486_v23 = vpop.f32.mrf.mxu0  ;;  %v3030_v37 = vpop.f32.mrf.mxu1  ;;  %8739 = vmatmul.mubr.msk.f32.gmra.mxu1 %vm16750_vm13, %v17050_v3  ;;  %17312 = vst [vmem:[#allocation247_spill] sm:$0xff] %v11525_v1  ;;  %vm16770_vm13 = vcmp.eq.s32.totalorder %v11525_v1, %v9708_v53 }
 0x1de   : > { %17308 = vst [vmem:[#allocation244_spill] sm:$0xff] %v11503_v18  ;;  %v11516_v50 = vadd.f32 %v3011_v59, %v1486_v23  ;;  %3370 = vmatprep.mubr.f32.mxu1 %v17044_v61  ;;  %v11530_v23 = vsub.f32 %v8613_v62, %v8613_v62  ;;  %v17315_v18 = vand.u32 4294901760, %v11482_v49 }
 0x1df   : > { %v1495_v47 = vpop.f32.mrf.mxu0  ;;  %2022 = vmatmul.mubr.f32.gmra.mxu0 %v2021_v60  ;;  %v3032_v11 = vpop.f32.mrf.mxu1  ;;  %v8614_v60 = vsel %vm16765_vm12, 1.0, %v17044_v61 }
 0x1e0   : > { %17311 = vst [vmem:[#allocation246_spill] sm:$0xff] %v11516_v50  ;;  %v11527_v51 = vadd.f32 %v3016_v28, %v1495_v47  ;;  %2027 = vmatprep.mubr.f32.mxu0 %v17044_v61  ;;  %17314 = vst [vmem:[#allocation249_spill] sm:$0xff] %v11530_v23  ;;  %v2032_v50 = vand.u32 4294901760, %v2031_v36  ;;  %v2042_v0 = vsub.f32 %v11482_v49, %v17315_v18  ;;  %v11549_v18 = vpop.permute.xlu0 %542 }
 0x1e1   : > { %v1497_v27 = vpop.f32.mrf.mxu0  ;;  %v3037_v47 = vpop.f32.mrf.mxu1  ;;  %8740 = vmatmul.mubr.msk.f32.gmra.mxu1 %vm16755_vm14, %v17050_v3  ;;  %17317 = vst [vmem:[#allocation251_spill] sm:$0xff] %v11549_v18  ;;  %vm16775_vm14 = vcmp.eq.s32.totalorder %v11549_v18, %v9708_v53 }
 0x1e2   : > { %17313 = vst [vmem:[#allocation248_spill] sm:$0xff] %v11527_v51  ;;  %v11540_v28 = vadd.f32 %v3018_v25, %v1497_v27  ;;  %3377 = vmatprep.mubr.f32.mxu1 %v17044_v61  ;;  %v11555_v25 = vsub.f32 %v8614_v60, %v8614_v60  ;;  %v17320_v51 = vand.u32 4294901760, %v11507_v45 }
 0x1e3   : > { %v1506_v36 = vpop.f32.mrf.mxu0  ;;  %2033 = vmatmul.mubr.f32.gmra.mxu0 %v2032_v50  ;;  %v3039_v59 = vpop.f32.mrf.mxu1  ;;  %v8615_v50 = vsel %vm16770_vm13, 1.0, %v17044_v61 }
 0x1e4   : > { %17316 = vst [vmem:[#allocation250_spill] sm:$0xff] %v11540_v28  ;;  %v11551_v62 = vadd.f32 %v3023_v5, %v1506_v36  ;;  %2038 = vmatprep.mubr.f32.mxu0 %v17044_v61  ;;  %17319 = vst [vmem:[#allocation253_spill] sm:$0xff] %v11555_v25  ;;  %v2043_v28 = vand.u32 4294901760, %v2042_v0  ;;  %v2053_v49 = vsub.f32 %v11507_v45, %v17320_v51  ;;  %v11573_v51 = vpop.permute.xlu1 %545 }
 0x1e5   : > { %v1508_v58 = vpop.f32.mrf.mxu0  ;;  %v3044_v36 = vpop.f32.mrf.mxu1  ;;  %8741 = vmatmul.mubr.msk.f32.gmra.mxu1 %vm16760_vm15, %v17050_v3  ;;  %17322 = vst [vmem:[#allocation255_spill] sm:$0xff] %v11573_v51  ;;  %vm16780_vm15 = vcmp.eq.s32.totalorder %v11573_v51, %v9708_v53 }
 0x1e6   : > { %17318 = vst [vmem:[#allocation252_spill] sm:$0xff] %v11551_v62  ;;  %v11564_v5 = vadd.f32 %v3025_v17, %v1508_v58  ;;  %3384 = vmatprep.mubr.f32.mxu1 %v17044_v61  ;;  %v11578_v58 = vsub.f32 %v8615_v50, %v8615_v50  ;;  %v17325_v62 = vand.u32 4294901760, %v11530_v23 }
 0x1e7   : > { %v1517_v0 = vpop.f32.mrf.mxu0  ;;  %2044 = vmatmul.mubr.f32.gmra.mxu0 %v2043_v28  ;;  %v3046_v27 = vpop.f32.mrf.mxu1  ;;  %v8616_v28 = vsel %vm16775_vm14, 1.0, %v17044_v61 }
 0x1e8   : > { %17321 = vst [vmem:[#allocation254_spill] sm:$0xff] %v11564_v5  ;;  %v11575_v60 = vadd.f32 %v3030_v37, %v1517_v0  ;;  %2049 = vmatprep.mubr.f32.mxu0 %v17044_v61  ;;  %17324 = vst [vmem:[#allocation257_spill] sm:$0xff] %v11578_v58  ;;  %v2054_v5 = vand.u32 4294901760, %v2053_v49  ;;  %v2064_v45 = vsub.f32 %v11530_v23, %v17325_v62  ;;  %v11597_v62 = vpop.permute.xlu0 %548 }
 0x1e9   : > { %v1519_v57 = vpop.f32.mrf.mxu0  ;;  %v3051_v0 = vpop.f32.mrf.mxu1  ;;  %8742 = vmatmul.mubr.msk.f32.gmra.mxu1 %vm16765_vm12, %v17050_v3  ;;  %17327 = vst [vmem:[#allocation259_spill] sm:$0xff] %v11597_v62  ;;  %vm16785_vm12 = vcmp.eq.s32.totalorder %v11597_v62, %v9708_v53 }
 0x1ea   : > { %17323 = vst [vmem:[#allocation256_spill] sm:$0xff] %v11575_v60  ;;  %v11588_v37 = vadd.f32 %v3032_v11, %v1519_v57  ;;  %3391 = vmatprep.mubr.f32.mxu1 %v17044_v61  ;;  %v11603_v11 = vsub.f32 %v8616_v28, %v8616_v28  ;;  %v17330_v60 = vand.u32 4294901760, %v11555_v25 }
 0x1eb   : > { %v1528_v49 = vpop.f32.mrf.mxu0  ;;  %2055 = vmatmul.mubr.f32.gmra.mxu0 %v2054_v5  ;;  %v3053_v17 = vpop.f32.mrf.mxu1  ;;  %v8617_v5 = vsel %vm16780_vm15, 1.0, %v17044_v61 }
 0x1ec   : > { %17326 = vst [vmem:[#allocation258_spill] sm:$0xff] %v11588_v37  ;;  %v11599_v50 = vadd.f32 %v3037_v47, %v1528_v49  ;;  %2060 = vmatprep.mubr.f32.mxu0 %v17044_v61  ;;  %17329 = vst [vmem:[#allocation261_spill] sm:$0xff] %v11603_v11  ;;  %v2065_v37 = vand.u32 4294901760, %v2064_v45  ;;  %v2075_v23 = vsub.f32 %v11555_v25, %v17330_v60  ;;  %v11621_v60 = vpop.permute.xlu1 %551 }
 0x1ed   : > { %v1530_v10 = vpop.f32.mrf.mxu0  ;;  %v3058_v49 = vpop.f32.mrf.mxu1  ;;  %8743 = vmatmul.mubr.msk.f32.gmra.mxu1 %vm16770_vm13, %v17050_v3  ;;  %17332 = vst [vmem:[#allocation263_spill] sm:$0xff] %v11621_v60  ;;  %vm16790_vm13 = vcmp.eq.s32.totalorder %v11621_v60, %v9708_v53 }
 0x1ee   : > { %17328 = vst [vmem:[#allocation260_spill] sm:$0xff] %v11599_v50  ;;  %v11612_v47 = vadd.f32 %v3039_v59, %v1530_v10  ;;  %3398 = vmatprep.mubr.f32.mxu1 %v17044_v61  ;;  %v11626_v10 = vsub.f32 %v8617_v5, %v8617_v5  ;;  %v17335_v50 = vand.u32 4294901760, %v11578_v58 }
 0x1ef   : > { %v1539_v45 = vpop.f32.mrf.mxu0  ;;  %2066 = vmatmul.mubr.f32.gmra.mxu0 %v2065_v37  ;;  %v3060_v57 = vpop.f32.mrf.mxu1  ;;  %v8618_v37 = vsel %vm16785_vm12, 1.0, %v17044_v61 }
 0x1f0   : > { %17331 = vst [vmem:[#allocation262_spill] sm:$0xff] %v11612_v47  ;;  %v11623_v28 = vadd.f32 %v3044_v36, %v1539_v45  ;;  %2071 = vmatprep.mubr.f32.mxu0 %v17044_v61  ;;  %17334 = vst [vmem:[#allocation265_spill] sm:$0xff] %v11626_v10  ;;  %v2076_v47 = vand.u32 4294901760, %v2075_v23  ;;  %v2086_v25 = vsub.f32 %v11578_v58, %v17335_v50  ;;  %v11645_v50 = vpop.permute.xlu0 %554 }
 0x1f1   : > { %v1541_v1 = vpop.f32.mrf.mxu0  ;;  %v3065_v45 = vpop.f32.mrf.mxu1  ;;  %8744 = vmatmul.mubr.msk.f32.gmra.mxu1 %vm16775_vm14, %v17050_v3  ;;  %17337 = vst [vmem:[#allocation267_spill] sm:$0xff] %v11645_v50  ;;  %vm16795_vm14 = vcmp.eq.s32.totalorder %v11645_v50, %v9708_v53 }
 0x1f2   : > { %17333 = vst [vmem:[#allocation264_spill] sm:$0xff] %v11623_v28  ;;  %v11636_v36 = vadd.f32 %v3046_v27, %v1541_v1  ;;  %3405 = vmatprep.mubr.f32.mxu1 %v17044_v61  ;;  %v11651_v27 = vsub.f32 %v8618_v37, %v8618_v37  ;;  %v17340_v28 = vand.u32 4294901760, %v11603_v11 }
 0x1f3   : > { %v1550_v23 = vpop.f32.mrf.mxu0  ;;  %2077 = vmatmul.mubr.f32.gmra.mxu0 %v2076_v47  ;;  %v3067_v59 = vpop.f32.mrf.mxu1  ;;  %v8619_v47 = vsel %vm16790_vm13, 1.0, %v17044_v61 }
 0x1f4   : > { %17336 = vst [vmem:[#allocation266_spill] sm:$0xff] %v11636_v36  ;;  %v11647_v5 = vadd.f32 %v3051_v0, %v1550_v23  ;;  %2082 = vmatprep.mubr.f32.mxu0 %v17044_v61  ;;  %17339 = vst [vmem:[#allocation269_spill] sm:$0xff] %v11651_v27  ;;  %v2087_v36 = vand.u32 4294901760, %v2086_v25  ;;  %v2097_v58 = vsub.f32 %v11603_v11, %v17340_v28  ;;  %v11669_v28 = vpop.permute.xlu1 %557 }
 0x1f5   : > { %v1552_v18 = vpop.f32.mrf.mxu0  ;;  %v3072_v23 = vpop.f32.mrf.mxu1  ;;  %8745 = vmatmul.mubr.msk.f32.gmra.mxu1 %vm16780_vm15, %v17050_v3  ;;  %17342 = vst [vmem:[#allocation271_spill] sm:$0xff] %v11669_v28  ;;  %vm16800_vm15 = vcmp.eq.s32.totalorder %v11669_v28, %v9708_v53 }
 0x1f6   : > { %17338 = vst [vmem:[#allocation268_spill] sm:$0xff] %v11647_v5  ;;  %v11660_v0 = vadd.f32 %v3053_v17, %v1552_v18  ;;  %3412 = vmatprep.mubr.f32.mxu1 %v17044_v61  ;;  %v11674_v18 = vsub.f32 %v8619_v47, %v8619_v47  ;;  %v17345_v5 = vand.u32 4294901760, %v11626_v10 }
 0x1f7   : > { %v1561_v25 = vpop.f32.mrf.mxu0  ;;  %2088 = vmatmul.mubr.f32.gmra.mxu0 %v2087_v36  ;;  %v3074_v1 = vpop.f32.mrf.mxu1  ;;  %v8620_v36 = vsel %vm16795_vm14, 1.0, %v17044_v61 }
 0x1f8   : > { %17341 = vst [vmem:[#allocation270_spill] sm:$0xff] %v11660_v0  ;;  %v11671_v37 = vadd.f32 %v3058_v49, %v1561_v25  ;;  %2093 = vmatprep.mubr.f32.mxu0 %v17044_v61  ;;  %17344 = vst [vmem:[#allocation273_spill] sm:$0xff] %v11674_v18  ;;  %v2098_v0 = vand.u32 4294901760, %v2097_v58  ;;  %v2108_v11 = vsub.f32 %v11626_v10, %v17345_v5  ;;  %v11693_v5 = vpop.permute.xlu0 %560 }
 0x1f9   : > { %v1563_v51 = vpop.f32.mrf.mxu0  ;;  %v3079_v25 = vpop.f32.mrf.mxu1  ;;  %8746 = vmatmul.mubr.msk.f32.gmra.mxu1 %vm16785_vm12, %v17050_v3  ;;  %17347 = vst [vmem:[#allocation275_spill] sm:$0xff] %v11693_v5  ;;  %vm16805_vm12 = vcmp.eq.s32.totalorder %v11693_v5, %v9708_v53 }
 0x1fa   : > { %17343 = vst [vmem:[#allocation272_spill] sm:$0xff] %v11671_v37  ;;  %v11684_v49 = vadd.f32 %v3060_v57, %v1563_v51  ;;  %3419 = vmatprep.mubr.f32.mxu1 %v17044_v61  ;;  %v11699_v57 = vsub.f32 %v8620_v36, %v8620_v36  ;;  %v17350_v37 = vand.u32 4294901760, %v11651_v27 }
 0x1fb   : > { %v1572_v58 = vpop.f32.mrf.mxu0  ;;  %2099 = vmatmul.mubr.f32.gmra.mxu0 %v2098_v0  ;;  %v3081_v17 = vpop.f32.mrf.mxu1  ;;  %v8621_v0 = vsel %vm16800_vm15, 1.0, %v17044_v61 }
 0x1fc   : > { %17346 = vst [vmem:[#allocation274_spill] sm:$0xff] %v11684_v49  ;;  %v11695_v47 = vadd.f32 %v3065_v45, %v1572_v58  ;;  %2104 = vmatprep.mubr.f32.mxu0 %v17044_v61  ;;  %17349 = vst [vmem:[#allocation277_spill] sm:$0xff] %v11699_v57  ;;  %v2109_v49 = vand.u32 4294901760, %v2108_v11  ;;  %v2119_v10 = vsub.f32 %v11651_v27, %v17350_v37  ;;  %v11717_v37 = vpop.permute.xlu1 %563 }
 0x1fd   : > { %v1574_v62 = vpop.f32.mrf.mxu0  ;;  %v3086_v58 = vpop.f32.mrf.mxu1  ;;  %8747 = vmatmul.mubr.msk.f32.gmra.mxu1 %vm16790_vm13, %v17050_v3  ;;  %17352 = vst [vmem:[#allocation279_spill] sm:$0xff] %v11717_v37  ;;  %vm16810_vm13 = vcmp.eq.s32.totalorder %v11717_v37, %v9708_v53 }
 0x1fe   : > { %17348 = vst [vmem:[#allocation276_spill] sm:$0xff] %v11695_v47  ;;  %v11708_v45 = vadd.f32 %v3067_v59, %v1574_v62  ;;  %3426 = vmatprep.mubr.f32.mxu1 %v17044_v61  ;;  %v11722_v62 = vsub.f32 %v8621_v0, %v8621_v0  ;;  %v17355_v47 = vand.u32 4294901760, %v11674_v18 }
 0x1ff   : > { %v1583_v11 = vpop.f32.mrf.mxu0  ;;  %2110 = vmatmul.mubr.f32.gmra.mxu0 %v2109_v49  ;;  %v3088_v51 = vpop.f32.mrf.mxu1  ;;  %v8622_v49 = vsel %vm16805_vm12, 1.0, %v17044_v61 }
 0x200   : > { %17351 = vst [vmem:[#allocation278_spill] sm:$0xff] %v11708_v45  ;;  %v11719_v36 = vadd.f32 %v3072_v23, %v1583_v11  ;;  %2115 = vmatprep.mubr.f32.mxu0 %v17044_v61  ;;  %17354 = vst [vmem:[#allocation281_spill] sm:$0xff] %v11722_v62  ;;  %v2120_v45 = vand.u32 4294901760, %v2119_v10  ;;  %v2130_v27 = vsub.f32 %v11674_v18, %v17355_v47  ;;  %v11741_v47 = vpop.permute.xlu0 %566 }
 0x201   : > { %v1585_v60 = vpop.f32.mrf.mxu0  ;;  %v3093_v11 = vpop.f32.mrf.mxu1  ;;  %8748 = vmatmul.mubr.msk.f32.gmra.mxu1 %vm16795_vm14, %v17050_v3  ;;  %17357 = vst [vmem:[#allocation283_spill] sm:$0xff] %v11741_v47  ;;  %vm16815_vm14 = vcmp.eq.s32.totalorder %v11741_v47, %v9708_v53 }
 0x202   : > { %17353 = vst [vmem:[#allocation280_spill] sm:$0xff] %v11719_v36  ;;  %v11732_v23 = vadd.f32 %v3074_v1, %v1585_v60  ;;  %3433 = vmatprep.mubr.f32.mxu1 %v17044_v61  ;;  %v11747_v1 = vsub.f32 %v8622_v49, %v8622_v49  ;;  %v17360_v36 = vand.u32 4294901760, %v11699_v57 }
 0x203   : > { %v1594_v10 = vpop.f32.mrf.mxu0  ;;  %2121 = vmatmul.mubr.f32.gmra.mxu0 %v2120_v45  ;;  %v3095_v59 = vpop.f32.mrf.mxu1  ;;  %v8623_v45 = vsel %vm16810_vm13, 1.0, %v17044_v61 }
 0x204   : > { %17356 = vst [vmem:[#allocation282_spill] sm:$0xff] %v11732_v23  ;;  %v11743_v0 = vadd.f32 %v3079_v25, %v1594_v10  ;;  %2126 = vmatprep.mubr.f32.mxu0 %v17044_v61  ;;  %17359 = vst [vmem:[#allocation285_spill] sm:$0xff] %v11747_v1  ;;  %v2131_v23 = vand.u32 4294901760, %v2130_v27  ;;  %v2141_v18 = vsub.f32 %v11699_v57, %v17360_v36  ;;  %v11765_v36 = vpop.permute.xlu1 %569 }
 0x205   : > { %v1596_v50 = vpop.f32.mrf.mxu0  ;;  %v3100_v10 = vpop.f32.mrf.mxu1  ;;  %8749 = vmatmul.mubr.msk.f32.gmra.mxu1 %vm16800_vm15, %v17050_v3  ;;  %17362 = vst [vmem:[#allocation287_spill] sm:$0xff] %v11765_v36  ;;  %vm16820_vm15 = vcmp.eq.s32.totalorder %v11765_v36, %v9708_v53 }
 0x206   : > { %17358 = vst [vmem:[#allocation284_spill] sm:$0xff] %v11743_v0  ;;  %v11756_v25 = vadd.f32 %v3081_v17, %v1596_v50  ;;  %3440 = vmatprep.mubr.f32.mxu1 %v17044_v61  ;;  %v11770_v50 = vsub.f32 %v8623_v45, %v8623_v45  ;;  %v17365_v0 = vand.u32 4294901760, %v11722_v62 }
 0x207   : > { %v1605_v27 = vpop.f32.mrf.mxu0  ;;  %2132 = vmatmul.mubr.f32.gmra.mxu0 %v2131_v23  ;;  %v3102_v60 = vpop.f32.mrf.mxu1  ;;  %v8624_v23 = vsel %vm16815_vm14, 1.0, %v17044_v61 }
 0x208   : > { %17361 = vst [vmem:[#allocation286_spill] sm:$0xff] %v11756_v25  ;;  %v11767_v49 = vadd.f32 %v3086_v58, %v1605_v27  ;;  %2137 = vmatprep.mubr.f32.mxu0 %v17044_v61  ;;  %17364 = vst [vmem:[#allocation289_spill] sm:$0xff] %v11770_v50  ;;  %v2142_v25 = vand.u32 4294901760, %v2141_v18  ;;  %v2152_v57 = vsub.f32 %v11722_v62, %v17365_v0  ;;  %v11789_v0 = vpop.permute.xlu0 %572 }
 0x209   : > { %v1607_v28 = vpop.f32.mrf.mxu0  ;;  %v3107_v27 = vpop.f32.mrf.mxu1  ;;  %8750 = vmatmul.mubr.msk.f32.gmra.mxu1 %vm16805_vm12, %v17050_v3  ;;  %17367 = vst [vmem:[#allocation291_spill] sm:$0xff] %v11789_v0  ;;  %vm16825_vm12 = vcmp.eq.s32.totalorder %v11789_v0, %v9708_v53 }
 0x20a   : > { %17363 = vst [vmem:[#allocation288_spill] sm:$0xff] %v11767_v49  ;;  %v11780_v58 = vadd.f32 %v3088_v51, %v1607_v28  ;;  %3447 = vmatprep.mubr.f32.mxu1 %v17044_v61  ;;  %v11795_v51 = vsub.f32 %v8624_v23, %v8624_v23  ;;  %v17370_v49 = vand.u32 4294901760, %v11747_v1 }
 0x20b   : > { %v1616_v18 = vpop.f32.mrf.mxu0  ;;  %2143 = vmatmul.mubr.f32.gmra.mxu0 %v2142_v25  ;;  %v3109_v17 = vpop.f32.mrf.mxu1  ;;  %v8625_v25 = vsel %vm16820_vm15, 1.0, %v17044_v61 }
 0x20c   : > { %17366 = vst [vmem:[#allocation290_spill] sm:$0xff] %v11780_v58  ;;  %v11791_v45 = vadd.f32 %v3093_v11, %v1616_v18  ;;  %2148 = vmatprep.mubr.f32.mxu0 %v17044_v61  ;;  %17369 = vst [vmem:[#allocation293_spill] sm:$0xff] %v11795_v51  ;;  %v2153_v58 = vand.u32 4294901760, %v2152_v57  ;;  %v2163_v62 = vsub.f32 %v11747_v1, %v17370_v49  ;;  %v11813_v49 = vpop.permute.xlu1 %575 }
 0x20d   : > { %v1618_v5 = vpop.f32.mrf.mxu0  ;;  %v3114_v18 = vpop.f32.mrf.mxu1  ;;  %8751 = vmatmul.mubr.msk.f32.gmra.mxu1 %vm16810_vm13, %v17050_v3  ;;  %17372 = vst [vmem:[#allocation295_spill] sm:$0xff] %v11813_v49  ;;  %vm16830_vm13 = vcmp.eq.s32.totalorder %v11813_v49, %v9708_v53 }
 0x20e   : > { %17368 = vst [vmem:[#allocation292_spill] sm:$0xff] %v11791_v45  ;;  %v11804_v11 = vadd.f32 %v3095_v59, %v1618_v5  ;;  %3454 = vmatprep.mubr.f32.mxu1 %v17044_v61  ;;  %v11818_v5 = vsub.f32 %v8625_v25, %v8625_v25  ;;  %v17375_v45 = vand.u32 4294901760, %v11770_v50 }
 0x20f   : > { %v1627_v57 = vpop.f32.mrf.mxu0  ;;  %2154 = vmatmul.mubr.f32.gmra.mxu0 %v2153_v58  ;;  %v3116_v28 = vpop.f32.mrf.mxu1  ;;  %v8626_v58 = vsel %vm16825_vm12, 1.0, %v17044_v61 }
 0x210   : > { %17371 = vst [vmem:[#allocation294_spill] sm:$0xff] %v11804_v11  ;;  %v11815_v23 = vadd.f32 %v3100_v10, %v1627_v57  ;;  %2159 = vmatprep.mubr.f32.mxu0 %v17044_v61  ;;  %17374 = vst [vmem:[#allocation297_spill] sm:$0xff] %v11818_v5  ;;  %v2164_v11 = vand.u32 4294901760, %v2163_v62  ;;  %v2174_v1 = vsub.f32 %v11770_v50, %v17375_v45  ;;  %v11837_v45 = vpop.permute.xlu0 %578 }
 0x211   : > { %v1629_v37 = vpop.f32.mrf.mxu0  ;;  %v3121_v57 = vpop.f32.mrf.mxu1  ;;  %8752 = vmatmul.mubr.msk.f32.gmra.mxu1 %vm16815_vm14, %v17050_v3  ;;  %17377 = vst [vmem:[#allocation299_spill] sm:$0xff] %v11837_v45  ;;  %vm16835_vm14 = vcmp.eq.s32.totalorder %v11837_v45, %v9708_v53 }
 0x212   : > { %17373 = vst [vmem:[#allocation296_spill] sm:$0xff] %v11815_v23  ;;  %v11828_v10 = vadd.f32 %v3102_v60, %v1629_v37  ;;  %3461 = vmatprep.mubr.f32.mxu1 %v17044_v61  ;;  %v11843_v60 = vsub.f32 %v8626_v58, %v8626_v58  ;;  %v17380_v23 = vand.u32 4294901760, %v11795_v51 }
 0x213   : > { %v1638_v62 = vpop.f32.mrf.mxu0  ;;  %2165 = vmatmul.mubr.f32.gmra.mxu0 %v2164_v11  ;;  %v3123_v59 = vpop.f32.mrf.mxu1  ;;  %v8627_v11 = vsel %vm16830_vm13, 1.0, %v17044_v61 }
 0x214   : > { %17376 = vst [vmem:[#allocation298_spill] sm:$0xff] %v11828_v10  ;;  %v11839_v25 = vadd.f32 %v3107_v27, %v1638_v62  ;;  %2170 = vmatprep.mubr.f32.mxu0 %v17044_v61  ;;  %17379 = vst [vmem:[#allocation301_spill] sm:$0xff] %v11843_v60  ;;  %v2175_v10 = vand.u32 4294901760, %v2174_v1  ;;  %v2185_v50 = vsub.f32 %v11795_v51, %v17380_v23  ;;  %v11861_v23 = vpop.permute.xlu1 %581 }
 0x215   : > { %v1640_v47 = vpop.f32.mrf.mxu0  ;;  %v3128_v62 = vpop.f32.mrf.mxu1  ;;  %8753 = vmatmul.mubr.msk.f32.gmra.mxu1 %vm16820_vm15, %v17050_v3  ;;  %17382 = vst [vmem:[#allocation303_spill] sm:$0xff] %v11861_v23  ;;  %vm16840_vm15 = vcmp.eq.s32.totalorder %v11861_v23, %v9708_v53 }
 0x216   : > { %17378 = vst [vmem:[#allocation300_spill] sm:$0xff] %v11839_v25  ;;  %v11852_v27 = vadd.f32 %v3109_v17, %v1640_v47  ;;  %3468 = vmatprep.mubr.f32.mxu1 %v17044_v61  ;;  %v11866_v47 = vsub.f32 %v8627_v11, %v8627_v11  ;;  %v17385_v25 = vand.u32 4294901760, %v11818_v5 }
 0x217   : > { %v1649_v1 = vpop.f32.mrf.mxu0  ;;  %2176 = vmatmul.mubr.f32.gmra.mxu0 %v2175_v10  ;;  %v3130_v37 = vpop.f32.mrf.mxu1  ;;  %v8628_v10 = vsel %vm16835_vm14, 1.0, %v17044_v61 }
 0x218   : > { %17381 = vst [vmem:[#allocation302_spill] sm:$0xff] %v11852_v27  ;;  %v11863_v58 = vadd.f32 %v3114_v18, %v1649_v1  ;;  %2181 = vmatprep.mubr.f32.mxu0 %v17044_v61  ;;  %17384 = vst [vmem:[#allocation305_spill] sm:$0xff] %v11866_v47  ;;  %v2186_v27 = vand.u32 4294901760, %v2185_v50  ;;  %v2196_v51 = vsub.f32 %v11818_v5, %v17385_v25  ;;  %v11885_v25 = vpop.permute.xlu0 %584 }
 0x219   : > { %v1651_v36 = vpop.f32.mrf.mxu0  ;;  %v3135_v1 = vpop.f32.mrf.mxu1  ;;  %8754 = vmatmul.mubr.msk.f32.gmra.mxu1 %vm16825_vm12, %v17050_v3  ;;  %17387 = vst [vmem:[#allocation307_spill] sm:$0xff] %v11885_v25  ;;  %vm16845_vm12 = vcmp.eq.s32.totalorder %v11885_v25, %v9708_v53 }
 0x21a   : > { %17383 = vst [vmem:[#allocation304_spill] sm:$0xff] %v11863_v58  ;;  %v11876_v18 = vadd.f32 %v3116_v28, %v1651_v36  ;;  %3475 = vmatprep.mubr.f32.mxu1 %v17044_v61  ;;  %v11891_v28 = vsub.f32 %v8628_v10, %v8628_v10  ;;  %v17390_v58 = vand.u32 4294901760, %v11843_v60 }
 0x21b   : > { %v1660_v50 = vpop.f32.mrf.mxu0  ;;  %2187 = vmatmul.mubr.f32.gmra.mxu0 %v2186_v27  ;;  %v3137_v17 = vpop.f32.mrf.mxu1  ;;  %v8629_v27 = vsel %vm16840_vm15, 1.0, %v17044_v61 }
 0x21c   : > { %17386 = vst [vmem:[#allocation306_spill] sm:$0xff] %v11876_v18  ;;  %v11887_v11 = vadd.f32 %v3121_v57, %v1660_v50  ;;  %2192 = vmatprep.mubr.f32.mxu0 %v17044_v61  ;;  %17389 = vst [vmem:[#allocation309_spill] sm:$0xff] %v11891_v28  ;;  %v2197_v18 = vand.u32 4294901760, %v2196_v51  ;;  %v2207_v5 = vsub.f32 %v11843_v60, %v17390_v58  ;;  %v11909_v58 = vpop.permute.xlu1 %587 }
 0x21d   : > { %v1662_v0 = vpop.f32.mrf.mxu0  ;;  %v3142_v50 = vpop.f32.mrf.mxu1  ;;  %8755 = vmatmul.mubr.msk.f32.gmra.mxu1 %vm16830_vm13, %v17050_v3  ;;  %17392 = vst [vmem:[#allocation311_spill] sm:$0xff] %v11909_v58  ;;  %vm16850_vm13 = vcmp.eq.s32.totalorder %v11909_v58, %v9708_v53 }
 0x21e   : > { %17388 = vst [vmem:[#allocation308_spill] sm:$0xff] %v11887_v11  ;;  %v11900_v57 = vadd.f32 %v3123_v59, %v1662_v0  ;;  %3482 = vmatprep.mubr.f32.mxu1 %v17044_v61  ;;  %v11914_v0 = vsub.f32 %v8629_v27, %v8629_v27  ;;  %v17395_v11 = vand.u32 4294901760, %v11866_v47 }
 0x21f   : > { %v1671_v51 = vpop.f32.mrf.mxu0  ;;  %2198 = vmatmul.mubr.f32.gmra.mxu0 %v2197_v18  ;;  %v3144_v36 = vpop.f32.mrf.mxu1  ;;  %v8630_v18 = vsel %vm16845_vm12, 1.0, %v17044_v61 }
 0x220   : > { %17391 = vst [vmem:[#allocation310_spill] sm:$0xff] %v11900_v57  ;;  %v11911_v10 = vadd.f32 %v3128_v62, %v1671_v51  ;;  %2203 = vmatprep.mubr.f32.mxu0 %v17044_v61  ;;  %17394 = vst [vmem:[#allocation313_spill] sm:$0xff] %v11914_v0  ;;  %v2208_v57 = vand.u32 4294901760, %v2207_v5  ;;  %v2218_v60 = vsub.f32 %v11866_v47, %v17395_v11  ;;  %v11933_v11 = vpop.permute.xlu0 %590 }
 0x221   : > { %v1673_v49 = vpop.f32.mrf.mxu0  ;;  %v3149_v51 = vpop.f32.mrf.mxu1  ;;  %8756 = vmatmul.mubr.msk.f32.gmra.mxu1 %vm16835_vm14, %v17050_v3  ;;  %17397 = vst [vmem:[#allocation315_spill] sm:$0xff] %v11933_v11  ;;  %vm16855_vm14 = vcmp.eq.s32.totalorder %v11933_v11, %v9708_v53 }
 0x222   : > { %17393 = vst [vmem:[#allocation312_spill] sm:$0xff] %v11911_v10  ;;  %v11924_v62 = vadd.f32 %v3130_v37, %v1673_v49  ;;  %3489 = vmatprep.mubr.f32.mxu1 %v17044_v61  ;;  %v11939_v37 = vsub.f32 %v8630_v18, %v8630_v18  ;;  %v17400_v10 = vand.u32 4294901760, %v11891_v28 }
 0x223   : > { %v1682_v5 = vpop.f32.mrf.mxu0  ;;  %2209 = vmatmul.mubr.f32.gmra.mxu0 %v2208_v57  ;;  %v3151_v59 = vpop.f32.mrf.mxu1  ;;  %v8631_v57 = vsel %vm16850_vm13, 1.0, %v17044_v61 }
 0x224   : > { %17396 = vst [vmem:[#allocation314_spill] sm:$0xff] %v11924_v62  ;;  %v11935_v27 = vadd.f32 %v3135_v1, %v1682_v5  ;;  %2214 = vmatprep.mubr.f32.mxu0 %v17044_v61  ;;  %17399 = vst [vmem:[#allocation317_spill] sm:$0xff] %v11939_v37  ;;  %v2219_v62 = vand.u32 4294901760, %v2218_v60  ;;  %v2229_v47 = vsub.f32 %v11891_v28, %v17400_v10  ;;  %v11957_v10 = vpop.permute.xlu1 %593 }
 0x225   : > { %v1684_v45 = vpop.f32.mrf.mxu0  ;;  %v3156_v5 = vpop.f32.mrf.mxu1  ;;  %8757 = vmatmul.mubr.msk.f32.gmra.mxu1 %vm16840_vm15, %v17050_v3  ;;  %17402 = vst [vmem:[#allocation319_spill] sm:$0xff] %v11957_v10  ;;  %vm16860_vm15 = vcmp.eq.s32.totalorder %v11957_v10, %v9708_v53 }
 0x226   : > { %17398 = vst [vmem:[#allocation316_spill] sm:$0xff] %v11935_v27  ;;  %v11948_v1 = vadd.f32 %v3137_v17, %v1684_v45  ;;  %3496 = vmatprep.mubr.f32.mxu1 %v17044_v61  ;;  %v11962_v45 = vsub.f32 %v8631_v57, %v8631_v57  ;;  %v17405_v27 = vand.u32 4294901760, %v11914_v0 }
 0x227   : > { %v1693_v60 = vpop.f32.mrf.mxu0  ;;  %2220 = vmatmul.mubr.f32.gmra.mxu0 %v2219_v62  ;;  %v3158_v49 = vpop.f32.mrf.mxu1  ;;  %v8632_v62 = vsel %vm16855_vm14, 1.0, %v17044_v61 }
 0x228   : > { %17401 = vst [vmem:[#allocation318_spill] sm:$0xff] %v11948_v1  ;;  %v11959_v18 = vadd.f32 %v3142_v50, %v1693_v60  ;;  %2225 = vmatprep.mubr.f32.mxu0 %v17044_v61  ;;  %17404 = vst [vmem:[#allocation321_spill] sm:$0xff] %v11962_v45  ;;  %v2230_v1 = vand.u32 4294901760, %v2229_v47  ;;  %v2240_v28 = vsub.f32 %v11914_v0, %v17405_v27  ;;  %v11981_v27 = vpop.permute.xlu0 %596 }
 0x229   : > { %v1695_v23 = vpop.f32.mrf.mxu0  ;;  %v3163_v60 = vpop.f32.mrf.mxu1  ;;  %8758 = vmatmul.mubr.msk.f32.gmra.mxu1 %vm16845_vm12, %v17050_v3  ;;  %17407 = vst [vmem:[#allocation323_spill] sm:$0xff] %v11981_v27  ;;  %vm16865_vm12 = vcmp.eq.s32.totalorder %v11981_v27, %v9708_v53 }
 0x22a   : > { %17403 = vst [vmem:[#allocation320_spill] sm:$0xff] %v11959_v18  ;;  %v11972_v50 = vadd.f32 %v3144_v36, %v1695_v23  ;;  %3503 = vmatprep.mubr.f32.mxu1 %v17044_v61  ;;  %v11987_v36 = vsub.f32 %v8632_v62, %v8632_v62  ;;  %v17410_v18 = vand.u32 4294901760, %v11939_v37 }
 0x22b   : > { %v1704_v47 = vpop.f32.mrf.mxu0  ;;  %2231 = vmatmul.mubr.f32.gmra.mxu0 %v2230_v1  ;;  %v3165_v17 = vpop.f32.mrf.mxu1  ;;  %v8633_v1 = vsel %vm16860_vm15, 1.0, %v17044_v61 }
 0x22c   : > { %17406 = vst [vmem:[#allocation322_spill] sm:$0xff] %v11972_v50  ;;  %v11983_v57 = vadd.f32 %v3149_v51, %v1704_v47  ;;  %2236 = vmatprep.mubr.f32.mxu0 %v17044_v61  ;;  %17409 = vst [vmem:[#allocation325_spill] sm:$0xff] %v11987_v36  ;;  %v2241_v50 = vand.u32 4294901760, %v2240_v28  ;;  %v2251_v0 = vsub.f32 %v11939_v37, %v17410_v18  ;;  %v12005_v18 = vpop.permute.xlu1 %599 }
 0x22d   : > { %v1706_v25 = vpop.f32.mrf.mxu0  ;;  %v3170_v47 = vpop.f32.mrf.mxu1  ;;  %8759 = vmatmul.mubr.msk.f32.gmra.mxu1 %vm16850_vm13, %v17050_v3  ;;  %17412 = vst [vmem:[#allocation327_spill] sm:$0xff] %v12005_v18  ;;  %vm16870_vm13 = vcmp.eq.s32.totalorder %v12005_v18, %v9708_v53 }
 0x22e   : > { %17408 = vst [vmem:[#allocation324_spill] sm:$0xff] %v11983_v57  ;;  %v11996_v51 = vadd.f32 %v3151_v59, %v1706_v25  ;;  %3510 = vmatprep.mubr.f32.mxu1 %v17044_v61  ;;  %v12010_v25 = vsub.f32 %v8633_v1, %v8633_v1  ;;  %v17415_v57 = vand.u32 4294901760, %v11962_v45 }
 0x22f   : > { %v1715_v28 = vpop.f32.mrf.mxu0  ;;  %2242 = vmatmul.mubr.f32.gmra.mxu0 %v2241_v50  ;;  %v3172_v23 = vpop.f32.mrf.mxu1  ;;  %v8634_v50 = vsel %vm16865_vm12, 1.0, %v17044_v61 }
 0x230   : > { %17411 = vst [vmem:[#allocation326_spill] sm:$0xff] %v11996_v51  ;;  %v12007_v62 = vadd.f32 %v3156_v5, %v1715_v28  ;;  %2247 = vmatprep.mubr.f32.mxu0 %v17044_v61  ;;  %17414 = vst [vmem:[#allocation329_spill] sm:$0xff] %v12010_v25  ;;  %v2252_v51 = vand.u32 4294901760, %v2251_v0  ;;  %v2262_v37 = vsub.f32 %v11962_v45, %v17415_v57  ;;  %v12029_v57 = vpop.permute.xlu0 %602 }
 0x231   : > { %v1717_v58 = vpop.f32.mrf.mxu0  ;;  %v3177_v28 = vpop.f32.mrf.mxu1  ;;  %8760 = vmatmul.mubr.msk.f32.gmra.mxu1 %vm16855_vm14, %v17050_v3  ;;  %17417 = vst [vmem:[#allocation331_spill] sm:$0xff] %v12029_v57  ;;  %vm16875_vm14 = vcmp.eq.s32.totalorder %v12029_v57, %v9708_v53 }
 0x232   : > { %17413 = vst [vmem:[#allocation328_spill] sm:$0xff] %v12007_v62  ;;  %v12020_v5 = vadd.f32 %v3158_v49, %v1717_v58  ;;  %3517 = vmatprep.mubr.f32.mxu1 %v17044_v61  ;;  %v12035_v49 = vsub.f32 %v8634_v50, %v8634_v50  ;;  %v17420_v62 = vand.u32 4294901760, %v11987_v36 }
 0x233   : > { %v1726_v0 = vpop.f32.mrf.mxu0  ;;  %2253 = vmatmul.mubr.f32.gmra.mxu0 %v2252_v51  ;;  %v3179_v59 = vpop.f32.mrf.mxu1  ;;  %v8635_v51 = vsel %vm16870_vm13, 1.0, %v17044_v61 }
 0x234   : > { %17416 = vst [vmem:[#allocation330_spill] sm:$0xff] %v12020_v5  ;;  %v12031_v1 = vadd.f32 %v3163_v60, %v1726_v0  ;;  %2258 = vmatprep.mubr.f32.mxu0 %v17044_v61  ;;  %17419 = vst [vmem:[#allocation333_spill] sm:$0xff] %v12035_v49  ;;  %v2263_v5 = vand.u32 4294901760, %v2262_v37  ;;  %v2273_v45 = vsub.f32 %v11987_v36, %v17420_v62  ;;  %v12053_v62 = vpop.permute.xlu1 %605 }
 0x235   : > { %v1728_v11 = vpop.f32.mrf.mxu0  ;;  %v3184_v0 = vpop.f32.mrf.mxu1  ;;  %8761 = vmatmul.mubr.msk.f32.gmra.mxu1 %vm16860_vm15, %v17050_v3  ;;  %17422 = vst [vmem:[#allocation335_spill] sm:$0xff] %v12053_v62  ;;  %vm16880_vm15 = vcmp.eq.s32.totalorder %v12053_v62, %v9708_v53 }
 0x236   : > { %17418 = vst [vmem:[#allocation332_spill] sm:$0xff] %v12031_v1  ;;  %v12044_v60 = vadd.f32 %v3165_v17, %v1728_v11  ;;  %3524 = vmatprep.mubr.f32.mxu1 %v17044_v61  ;;  %v12058_v11 = vsub.f32 %v8635_v51, %v8635_v51  ;;  %v17425_v1 = vand.u32 4294901760, %v12010_v25 }
 0x237   : > { %v1737_v37 = vpop.f32.mrf.mxu0  ;;  %2264 = vmatmul.mubr.f32.gmra.mxu0 %v2263_v5  ;;  %v3186_v58 = vpop.f32.mrf.mxu1  ;;  %v8636_v5 = vsel %vm16875_vm14, 1.0, %v17044_v61 }
 0x238   : > { %17421 = vst [vmem:[#allocation334_spill] sm:$0xff] %v12044_v60  ;;  %v12055_v50 = vadd.f32 %v3170_v47, %v1737_v37  ;;  %2269 = vmatprep.mubr.f32.mxu0 %v17044_v61  ;;  %17424 = vst [vmem:[#allocation337_spill] sm:$0xff] %v12058_v11  ;;  %v2274_v60 = vand.u32 4294901760, %v2273_v45  ;;  %v2284_v36 = vsub.f32 %v12010_v25, %v17425_v1  ;;  %v12077_v1 = vpop.permute.xlu0 %608 }
 0x239   : > { %v1739_v10 = vpop.f32.mrf.mxu0  ;;  %v3191_v37 = vpop.f32.mrf.mxu1  ;;  %8762 = vmatmul.mubr.msk.f32.gmra.mxu1 %vm16865_vm12, %v17050_v3  ;;  %17427 = vst [vmem:[#allocation339_spill] sm:$0xff] %v12077_v1  ;;  %vm16885_vm12 = vcmp.eq.s32.totalorder %v12077_v1, %v9708_v53 }
 0x23a   : > { %17423 = vst [vmem:[#allocation336_spill] sm:$0xff] %v12055_v50  ;;  %v12068_v47 = vadd.f32 %v3172_v23, %v1739_v10  ;;  %3531 = vmatprep.mubr.f32.mxu1 %v17044_v61  ;;  %v12083_v23 = vsub.f32 %v8636_v5, %v8636_v5  ;;  %v17430_v50 = vand.u32 4294901760, %v12035_v49 }
 0x23b   : > { %v1748_v45 = vpop.f32.mrf.mxu0  ;;  %2275 = vmatmul.mubr.f32.gmra.mxu0 %v2274_v60  ;;  %v3193_v17 = vpop.f32.mrf.mxu1  ;;  %v8637_v60 = vsel %vm16880_vm15, 1.0, %v17044_v61 }
 0x23c   : > { %17426 = vst [vmem:[#allocation338_spill] sm:$0xff] %v12068_v47  ;;  %v12079_v51 = vadd.f32 %v3177_v28, %v1748_v45  ;;  %2280 = vmatprep.mubr.f32.mxu0 %v17044_v61  ;;  %17429 = vst [vmem:[#allocation341_spill] sm:$0xff] %v12083_v23  ;;  %v2285_v47 = vand.u32 4294901760, %v2284_v36  ;;  %v2295_v25 = vsub.f32 %v12035_v49, %v17430_v50  ;;  %v12101_v50 = vpop.permute.xlu1 %611 }
 0x23d   : > { %v1750_v27 = vpop.f32.mrf.mxu0  ;;  %v3198_v45 = vpop.f32.mrf.mxu1  ;;  %8763 = vmatmul.mubr.msk.f32.gmra.mxu1 %vm16870_vm13, %v17050_v3  ;;  %17432 = vst [vmem:[#allocation343_spill] sm:$0xff] %v12101_v50  ;;  %vm16890_vm13 = vcmp.eq.s32.totalorder %v12101_v50, %v9708_v53 }
 0x23e   : > { %17428 = vst [vmem:[#allocation340_spill] sm:$0xff] %v12079_v51  ;;  %v12092_v28 = vadd.f32 %v3179_v59, %v1750_v27  ;;  %3538 = vmatprep.mubr.f32.mxu1 %v17044_v61  ;;  %v12106_v27 = vsub.f32 %v8637_v60, %v8637_v60  ;;  %v17435_v51 = vand.u32 4294901760, %v12058_v11 }
 0x23f   : > { %v1759_v36 = vpop.f32.mrf.mxu0  ;;  %2286 = vmatmul.mubr.f32.gmra.mxu0 %v2285_v47  ;;  %v3200_v10 = vpop.f32.mrf.mxu1  ;;  %v8638_v47 = vsel %vm16885_vm12, 1.0, %v17044_v61 }
 0x240   : > { %17431 = vst [vmem:[#allocation342_spill] sm:$0xff] %v12092_v28  ;;  %v12103_v5 = vadd.f32 %v3184_v0, %v1759_v36  ;;  %2291 = vmatprep.mubr.f32.mxu0 %v17044_v61  ;;  %17434 = vst [vmem:[#allocation345_spill] sm:$0xff] %v12106_v27  ;;  %v2296_v28 = vand.u32 4294901760, %v2295_v25  ;;  %v2306_v49 = vsub.f32 %v12058_v11, %v17435_v51  ;;  %v12125_v51 = vpop.permute.xlu0 %614 }
 0x241   : > { %v1761_v18 = vpop.f32.mrf.mxu0  ;;  %v3205_v36 = vpop.f32.mrf.mxu1  ;;  %8764 = vmatmul.mubr.msk.f32.gmra.mxu1 %vm16875_vm14, %v17050_v3  ;;  %17437 = vst [vmem:[#allocation347_spill] sm:$0xff] %v12125_v51  ;;  %vm16895_vm14 = vcmp.eq.s32.totalorder %v12125_v51, %v9708_v53 }
 0x242   : > { %17433 = vst [vmem:[#allocation344_spill] sm:$0xff] %v12103_v5  ;;  %v12116_v0 = vadd.f32 %v3186_v58, %v1761_v18  ;;  %3545 = vmatprep.mubr.f32.mxu1 %v17044_v61  ;;  %v12131_v58 = vsub.f32 %v8638_v47, %v8638_v47  ;;  %v17440_v5 = vand.u32 4294901760, %v12083_v23 }
 0x243   : > { %v1770_v25 = vpop.f32.mrf.mxu0  ;;  %2297 = vmatmul.mubr.f32.gmra.mxu0 %v2296_v28  ;;  %v3207_v59 = vpop.f32.mrf.mxu1  ;;  %v8639_v28 = vsel %vm16890_vm13, 1.0, %v17044_v61 }
 0x244   : > { %17436 = vst [vmem:[#allocation346_spill] sm:$0xff] %v12116_v0  ;;  %v12127_v60 = vadd.f32 %v3191_v37, %v1770_v25  ;;  %2302 = vmatprep.mubr.f32.mxu0 %v17044_v61  ;;  %17439 = vst [vmem:[#allocation349_spill] sm:$0xff] %v12131_v58  ;;  %v2307_v0 = vand.u32 4294901760, %v2306_v49  ;;  %v2317_v11 = vsub.f32 %v12083_v23, %v17440_v5  ;;  %v12149_v5 = vpop.permute.xlu1 %617 }
 0x245   : > { %v1772_v57 = vpop.f32.mrf.mxu0  ;;  %v3212_v25 = vpop.f32.mrf.mxu1  ;;  %8765 = vmatmul.mubr.msk.f32.gmra.mxu1 %vm16880_vm15, %v17050_v3  ;;  %17442 = vst [vmem:[#allocation351_spill] sm:$0xff] %v12149_v5  ;;  %vm16900_vm15 = vcmp.eq.s32.totalorder %v12149_v5, %v9708_v53 }
 0x246   : > { %17438 = vst [vmem:[#allocation348_spill] sm:$0xff] %v12127_v60  ;;  %v12140_v37 = vadd.f32 %v3193_v17, %v1772_v57  ;;  %3552 = vmatprep.mubr.f32.mxu1 %v17044_v61  ;;  %v12154_v57 = vsub.f32 %v8639_v28, %v8639_v28  ;;  %v17445_v60 = vand.u32 4294901760, %v12106_v27 }
 0x247   : > { %v1781_v49 = vpop.f32.mrf.mxu0  ;;  %2308 = vmatmul.mubr.f32.gmra.mxu0 %v2307_v0  ;;  %v3214_v18 = vpop.f32.mrf.mxu1  ;;  %v8640_v0 = vsel %vm16895_vm14, 1.0, %v17044_v61 }
 0x248   : > { %17441 = vst [vmem:[#allocation350_spill] sm:$0xff] %v12140_v37  ;;  %v12151_v47 = vadd.f32 %v3198_v45, %v1781_v49  ;;  %2313 = vmatprep.mubr.f32.mxu0 %v17044_v61  ;;  %17444 = vst [vmem:[#allocation353_spill] sm:$0xff] %v12154_v57  ;;  %v2318_v37 = vand.u32 4294901760, %v2317_v11  ;;  %v2328_v23 = vsub.f32 %v12106_v27, %v17445_v60  ;;  %v12173_v60 = vpop.permute.xlu0 %620 }
 0x249   : > { %v1783_v62 = vpop.f32.mrf.mxu0  ;;  %v3219_v49 = vpop.f32.mrf.mxu1  ;;  %8766 = vmatmul.mubr.msk.f32.gmra.mxu1 %vm16885_vm12, %v17050_v3  ;;  %17447 = vst [vmem:[#allocation355_spill] sm:$0xff] %v12173_v60  ;;  %vm16905_vm12 = vcmp.eq.s32.totalorder %v12173_v60, %v9708_v53 }
 0x24a   : > { %17443 = vst [vmem:[#allocation352_spill] sm:$0xff] %v12151_v47  ;;  %v12164_v45 = vadd.f32 %v3200_v10, %v1783_v62  ;;  %3559 = vmatprep.mubr.f32.mxu1 %v17044_v61  ;;  %v12179_v10 = vsub.f32 %v8640_v0, %v8640_v0  ;;  %v17450_v47 = vand.u32 4294901760, %v12131_v58 }
 0x24b   : > { %v1792_v11 = vpop.f32.mrf.mxu0  ;;  %2319 = vmatmul.mubr.f32.gmra.mxu0 %v2318_v37  ;;  %v3221_v17 = vpop.f32.mrf.mxu1  ;;  %v8641_v37 = vsel %vm16900_vm15, 1.0, %v17044_v61 }
 0x24c   : > { %17446 = vst [vmem:[#allocation354_spill] sm:$0xff] %v12164_v45  ;;  %v12175_v28 = vadd.f32 %v3205_v36, %v1792_v11  ;;  %2324 = vmatprep.mubr.f32.mxu0 %v17044_v61  ;;  %17449 = vst [vmem:[#allocation357_spill] sm:$0xff] %v12179_v10  ;;  %v2329_v45 = vand.u32 4294901760, %v2328_v23  ;;  %v2339_v27 = vsub.f32 %v12131_v58, %v17450_v47  ;;  %v12197_v47 = vpop.permute.xlu1 %623 }
 0x24d   : > { %v1794_v1 = vpop.f32.mrf.mxu0  ;;  %v3226_v11 = vpop.f32.mrf.mxu1  ;;  %8767 = vmatmul.mubr.msk.f32.gmra.mxu1 %vm16890_vm13, %v17050_v3  ;;  %17452 = vst [vmem:[#allocation359_spill] sm:$0xff] %v12197_v47  ;;  %vm16910_vm13 = vcmp.eq.s32.totalorder %v12197_v47, %v9708_v53 }
 0x24e   : > { %17448 = vst [vmem:[#allocation356_spill] sm:$0xff] %v12175_v28  ;;  %v12188_v36 = vadd.f32 %v3207_v59, %v1794_v1  ;;  %3566 = vmatprep.mubr.f32.mxu1 %v17044_v61  ;;  %v12202_v1 = vsub.f32 %v8641_v37, %v8641_v37  ;;  %v17455_v28 = vand.u32 4294901760, %v12154_v57 }
 0x24f   : > { %v1803_v23 = vpop.f32.mrf.mxu0  ;;  %2330 = vmatmul.mubr.f32.gmra.mxu0 %v2329_v45  ;;  %v3228_v62 = vpop.f32.mrf.mxu1  ;;  %v8642_v45 = vsel %vm16905_vm12, 1.0, %v17044_v61 }
 0x250   : > { %17451 = vst [vmem:[#allocation358_spill] sm:$0xff] %v12188_v36  ;;  %v12199_v0 = vadd.f32 %v3212_v25, %v1803_v23  ;;  %2335 = vmatprep.mubr.f32.mxu0 %v17044_v61  ;;  %17454 = vst [vmem:[#allocation361_spill] sm:$0xff] %v12202_v1  ;;  %v2340_v36 = vand.u32 4294901760, %v2339_v27  ;;  %v2350_v58 = vsub.f32 %v12154_v57, %v17455_v28  ;;  %v12221_v28 = vpop.permute.xlu0 %626 }
 0x251   : > { %v1805_v50 = vpop.f32.mrf.mxu0  ;;  %v3233_v23 = vpop.f32.mrf.mxu1  ;;  %8768 = vmatmul.mubr.msk.f32.gmra.mxu1 %vm16895_vm14, %v17050_v3  ;;  %17457 = vst [vmem:[#allocation363_spill] sm:$0xff] %v12221_v28  ;;  %vm16915_vm14 = vcmp.eq.s32.totalorder %v12221_v28, %v9708_v53 }
 0x252   : > { %17453 = vst [vmem:[#allocation360_spill] sm:$0xff] %v12199_v0  ;;  %v12212_v25 = vadd.f32 %v3214_v18, %v1805_v50  ;;  %3573 = vmatprep.mubr.f32.mxu1 %v17044_v61  ;;  %v12227_v18 = vsub.f32 %v8642_v45, %v8642_v45  ;;  %v17460_v0 = vand.u32 4294901760, %v12179_v10 }
 0x253   : > { %v1814_v27 = vpop.f32.mrf.mxu0  ;;  %2341 = vmatmul.mubr.f32.gmra.mxu0 %v2340_v36  ;;  %v3235_v59 = vpop.f32.mrf.mxu1  ;;  %v8643_v36 = vsel %vm16910_vm13, 1.0, %v17044_v61 }
 0x254   : > { %17456 = vst [vmem:[#allocation362_spill] sm:$0xff] %v12212_v25  ;;  %v12223_v37 = vadd.f32 %v3219_v49, %v1814_v27  ;;  %2346 = vmatprep.mubr.f32.mxu0 %v17044_v61  ;;  %17459 = vst [vmem:[#allocation365_spill] sm:$0xff] %v12227_v18  ;;  %v2351_v25 = vand.u32 4294901760, %v2350_v58  ;;  %v2361_v57 = vsub.f32 %v12179_v10, %v17460_v0  ;;  %v12245_v0 = vpop.permute.xlu1 %629 }
 0x255   : > { %v1816_v51 = vpop.f32.mrf.mxu0  ;;  %v3240_v27 = vpop.f32.mrf.mxu1  ;;  %8769 = vmatmul.mubr.msk.f32.gmra.mxu1 %vm16900_vm15, %v17050_v3  ;;  %17462 = vst [vmem:[#allocation367_spill] sm:$0xff] %v12245_v0  ;;  %vm16920_vm15 = vcmp.eq.s32.totalorder %v12245_v0, %v9708_v53 }
 0x256   : > { %17458 = vst [vmem:[#allocation364_spill] sm:$0xff] %v12223_v37  ;;  %v12236_v49 = vadd.f32 %v3221_v17, %v1816_v51  ;;  %3580 = vmatprep.mubr.f32.mxu1 %v17044_v61  ;;  %v12250_v51 = vsub.f32 %v8643_v36, %v8643_v36  ;;  %v17465_v37 = vand.u32 4294901760, %v12202_v1 }
 0x257   : > { %v1825_v58 = vpop.f32.mrf.mxu0  ;;  %2352 = vmatmul.mubr.f32.gmra.mxu0 %v2351_v25  ;;  %v3242_v50 = vpop.f32.mrf.mxu1  ;;  %v8644_v25 = vsel %vm16915_vm14, 1.0, %v17044_v61 }
 0x258   : > { %17461 = vst [vmem:[#allocation366_spill] sm:$0xff] %v12236_v49  ;;  %v12247_v45 = vadd.f32 %v3226_v11, %v1825_v58  ;;  %2357 = vmatprep.mubr.f32.mxu0 %v17044_v61  ;;  %17464 = vst [vmem:[#allocation369_spill] sm:$0xff] %v12250_v51  ;;  %v2362_v49 = vand.u32 4294901760, %v2361_v57  ;;  %v2372_v10 = vsub.f32 %v12202_v1, %v17465_v37  ;;  %v12269_v37 = vpop.permute.xlu0 %632 }
 0x259   : > { %v1827_v5 = vpop.f32.mrf.mxu0  ;;  %v3247_v58 = vpop.f32.mrf.mxu1  ;;  %8770 = vmatmul.mubr.msk.f32.gmra.mxu1 %vm16905_vm12, %v17050_v3  ;;  %17467 = vst [vmem:[#allocation371_spill] sm:$0xff] %v12269_v37  ;;  %vm16925_vm12 = vcmp.eq.s32.totalorder %v12269_v37, %v9708_v53 }
 0x25a   : > { %17463 = vst [vmem:[#allocation368_spill] sm:$0xff] %v12247_v45  ;;  %v12260_v11 = vadd.f32 %v3228_v62, %v1827_v5  ;;  %3587 = vmatprep.mubr.f32.mxu1 %v17044_v61  ;;  %v12275_v62 = vsub.f32 %v8644_v25, %v8644_v25  ;;  %v17470_v45 = vand.u32 4294901760, %v12227_v18 }
 0x25b   : > { %v1836_v57 = vpop.f32.mrf.mxu0  ;;  %2363 = vmatmul.mubr.f32.gmra.mxu0 %v2362_v49  ;;  %v3249_v17 = vpop.f32.mrf.mxu1  ;;  %v8645_v49 = vsel %vm16920_vm15, 1.0, %v17044_v61 }
 0x25c   : > { %17466 = vst [vmem:[#allocation370_spill] sm:$0xff] %v12260_v11  ;;  %v12271_v36 = vadd.f32 %v3233_v23, %v1836_v57  ;;  %2368 = vmatprep.mubr.f32.mxu0 %v17044_v61  ;;  %17469 = vst [vmem:[#allocation373_spill] sm:$0xff] %v12275_v62  ;;  %v2373_v11 = vand.u32 4294901760, %v2372_v10  ;;  %v2383_v1 = vsub.f32 %v12227_v18, %v17470_v45  ;;  %v12293_v45 = vpop.permute.xlu1 %635 }
 0x25d   : > { %v1838_v60 = vpop.f32.mrf.mxu0  ;;  %v3254_v57 = vpop.f32.mrf.mxu1  ;;  %8771 = vmatmul.mubr.msk.f32.gmra.mxu1 %vm16910_vm13, %v17050_v3  ;;  %17472 = vst [vmem:[#allocation375_spill] sm:$0xff] %v12293_v45  ;;  %vm16930_vm13 = vcmp.eq.s32.totalorder %v12293_v45, %v9708_v53 }
 0x25e   : > { %17468 = vst [vmem:[#allocation372_spill] sm:$0xff] %v12271_v36  ;;  %v12284_v23 = vadd.f32 %v3235_v59, %v1838_v60  ;;  %3594 = vmatprep.mubr.f32.mxu1 %v17044_v61  ;;  %v12298_v60 = vsub.f32 %v8645_v49, %v8645_v49  ;;  %v17475_v36 = vand.u32 4294901760, %v12250_v51 }
 0x25f   : > { %v1847_v10 = vpop.f32.mrf.mxu0  ;;  %2374 = vmatmul.mubr.f32.gmra.mxu0 %v2373_v11  ;;  %v3256_v5 = vpop.f32.mrf.mxu1  ;;  %v8646_v11 = vsel %vm16925_vm12, 1.0, %v17044_v61 }
 0x260   : > { %17471 = vst [vmem:[#allocation374_spill] sm:$0xff] %v12284_v23  ;;  %v12295_v25 = vadd.f32 %v3240_v27, %v1847_v10  ;;  %2379 = vmatprep.mubr.f32.mxu0 %v17044_v61  ;;  %17474 = vst [vmem:[#allocation377_spill] sm:$0xff] %v12298_v60  ;;  %v2384_v23 = vand.u32 4294901760, %v2383_v1  ;;  %v2394_v18 = vsub.f32 %v12250_v51, %v17475_v36  ;;  %v12317_v36 = vpop.permute.xlu0 %638 }
 0x261   : > { %v1849_v47 = vpop.f32.mrf.mxu0  ;;  %v3261_v10 = vpop.f32.mrf.mxu1  ;;  %8772 = vmatmul.mubr.msk.f32.gmra.mxu1 %vm16915_vm14, %v17050_v3  ;;  %17477 = vst [vmem:[#allocation379_spill] sm:$0xff] %v12317_v36  ;;  %vm16935_vm14 = vcmp.eq.s32.totalorder %v12317_v36, %v9708_v53 }
 0x262   : > { %17473 = vst [vmem:[#allocation376_spill] sm:$0xff] %v12295_v25  ;;  %v12308_v27 = vadd.f32 %v3242_v50, %v1849_v47  ;;  %3601 = vmatprep.mubr.f32.mxu1 %v17044_v61  ;;  %v12323_v50 = vsub.f32 %v8646_v11, %v8646_v11  ;;  %v17480_v25 = vand.u32 4294901760, %v12275_v62 }
 0x263   : > { %v1858_v1 = vpop.f32.mrf.mxu0  ;;  %2385 = vmatmul.mubr.f32.gmra.mxu0 %v2384_v23  ;;  %v3263_v59 = vpop.f32.mrf.mxu1  ;;  %v8647_v23 = vsel %vm16930_vm13, 1.0, %v17044_v61 }
 0x264   : > { %17476 = vst [vmem:[#allocation378_spill] sm:$0xff] %v12308_v27  ;;  %v12319_v49 = vadd.f32 %v3247_v58, %v1858_v1  ;;  %2390 = vmatprep.mubr.f32.mxu0 %v17044_v61  ;;  %17479 = vst [vmem:[#allocation381_spill] sm:$0xff] %v12323_v50  ;;  %v2395_v27 = vand.u32 4294901760, %v2394_v18  ;;  %v2405_v51 = vsub.f32 %v12275_v62, %v17480_v25  ;;  %v12341_v25 = vpop.permute.xlu1 %641 }
 0x265   : > { %v1860_v28 = vpop.f32.mrf.mxu0  ;;  %v3268_v1 = vpop.f32.mrf.mxu1  ;;  %8773 = vmatmul.mubr.msk.f32.gmra.mxu1 %vm16920_vm15, %v17050_v3  ;;  %17482 = vst [vmem:[#allocation383_spill] sm:$0xff] %v12341_v25  ;;  %vm16940_vm15 = vcmp.eq.s32.totalorder %v12341_v25, %v9708_v53 }
 0x266   : > { %17478 = vst [vmem:[#allocation380_spill] sm:$0xff] %v12319_v49  ;;  %v12332_v58 = vadd.f32 %v3249_v17, %v1860_v28  ;;  %3608 = vmatprep.mubr.f32.mxu1 %v17044_v61  ;;  %v12346_v28 = vsub.f32 %v8647_v23, %v8647_v23  ;;  %v17485_v49 = vand.u32 4294901760, %v12298_v60 }
 0x267   : > { %v1869_v18 = vpop.f32.mrf.mxu0  ;;  %2396 = vmatmul.mubr.f32.gmra.mxu0 %v2395_v27  ;;  %v3270_v47 = vpop.f32.mrf.mxu1  ;;  %v8648_v27 = vsel %vm16935_vm14, 1.0, %v17044_v61 }
 0x268   : > { %17481 = vst [vmem:[#allocation382_spill] sm:$0xff] %v12332_v58  ;;  %v12343_v11 = vadd.f32 %v3254_v57, %v1869_v18  ;;  %2401 = vmatprep.mubr.f32.mxu0 %v17044_v61  ;;  %17484 = vst [vmem:[#allocation385_spill] sm:$0xff] %v12346_v28  ;;  %v2406_v58 = vand.u32 4294901760, %v2405_v51  ;;  %v2416_v62 = vsub.f32 %v12298_v60, %v17485_v49  ;;  %v12365_v49 = vpop.permute.xlu0 %644 }
 0x269   : > { %v1871_v0 = vpop.f32.mrf.mxu0  ;;  %v3275_v18 = vpop.f32.mrf.mxu1  ;;  %8774 = vmatmul.mubr.msk.f32.gmra.mxu1 %vm16925_vm12, %v17050_v3  ;;  %17487 = vst [vmem:[#allocation387_spill] sm:$0xff] %v12365_v49  ;;  %vm16945_vm12 = vcmp.eq.s32.totalorder %v12365_v49, %v9708_v53 }
 0x26a   : > { %17483 = vst [vmem:[#allocation384_spill] sm:$0xff] %v12343_v11  ;;  %v12356_v57 = vadd.f32 %v3256_v5, %v1871_v0  ;;  %3615 = vmatprep.mubr.f32.mxu1 %v17044_v61  ;;  %v12371_v5 = vsub.f32 %v8648_v27, %v8648_v27  ;;  %v17490_v11 = vand.u32 4294901760, %v12323_v50 }
 0x26b   : > { %v1880_v51 = vpop.f32.mrf.mxu0  ;;  %2407 = vmatmul.mubr.f32.gmra.mxu0 %v2406_v58  ;;  %v3277_v17 = vpop.f32.mrf.mxu1  ;;  %v8649_v58 = vsel %vm16940_vm15, 1.0, %v17044_v61 }
 0x26c   : > { %17486 = vst [vmem:[#allocation386_spill] sm:$0xff] %v12356_v57  ;;  %v12367_v23 = vadd.f32 %v3261_v10, %v1880_v51  ;;  %2412 = vmatprep.mubr.f32.mxu0 %v17044_v61  ;;  %17489 = vst [vmem:[#allocation389_spill] sm:$0xff] %v12371_v5  ;;  %v2417_v57 = vand.u32 4294901760, %v2416_v62  ;;  %v2427_v60 = vsub.f32 %v12323_v50, %v17490_v11  ;;  %v12389_v11 = vpop.permute.xlu1 %647 }
 0x26d   : > { %v1882_v37 = vpop.f32.mrf.mxu0  ;;  %v3282_v51 = vpop.f32.mrf.mxu1  ;;  %8775 = vmatmul.mubr.msk.f32.gmra.mxu1 %vm16930_vm13, %v17050_v3  ;;  %17492 = vst [vmem:[#allocation391_spill] sm:$0xff] %v12389_v11  ;;  %vm16950_vm13 = vcmp.eq.s32.totalorder %v12389_v11, %v9708_v53 }
 0x26e   : > { %17488 = vst [vmem:[#allocation388_spill] sm:$0xff] %v12367_v23  ;;  %v12380_v10 = vadd.f32 %v3263_v59, %v1882_v37  ;;  %3622 = vmatprep.mubr.f32.mxu1 %v17044_v61  ;;  %v12394_v37 = vsub.f32 %v8649_v58, %v8649_v58  ;;  %v17495_v23 = vand.u32 4294901760, %v12346_v28 }
 0x26f   : > { %v1891_v62 = vpop.f32.mrf.mxu0  ;;  %2418 = vmatmul.mubr.f32.gmra.mxu0 %v2417_v57  ;;  %v3284_v0 = vpop.f32.mrf.mxu1  ;;  %v8650_v57 = vsel %vm16945_vm12, 1.0, %v17044_v61 }
 0x270   : > { %17491 = vst [vmem:[#allocation390_spill] sm:$0xff] %v12380_v10  ;;  %v12391_v27 = vadd.f32 %v3268_v1, %v1891_v62  ;;  %2423 = vmatprep.mubr.f32.mxu0 %v17044_v61  ;;  %17494 = vst [vmem:[#allocation393_spill] sm:$0xff] %v12394_v37  ;;  %v2428_v10 = vand.u32 4294901760, %v2427_v60  ;;  %v2438_v50 = vsub.f32 %v12346_v28, %v17495_v23  ;;  %v12413_v23 = vpop.permute.xlu0 %650 }
 0x271   : > { %v1893_v45 = vpop.f32.mrf.mxu0  ;;  %v3289_v62 = vpop.f32.mrf.mxu1  ;;  %8776 = vmatmul.mubr.msk.f32.gmra.mxu1 %vm16935_vm14, %v17050_v3  ;;  %17497 = vst [vmem:[#allocation395_spill] sm:$0xff] %v12413_v23  ;;  %vm16955_vm14 = vcmp.eq.s32.totalorder %v12413_v23, %v9708_v53 }
 0x272   : > { %17493 = vst [vmem:[#allocation392_spill] sm:$0xff] %v12391_v27  ;;  %v12404_v1 = vadd.f32 %v3270_v47, %v1893_v45  ;;  %3629 = vmatprep.mubr.f32.mxu1 %v17044_v61  ;;  %v12419_v47 = vsub.f32 %v8650_v57, %v8650_v57  ;;  %v17500_v27 = vand.u32 4294901760, %v12371_v5 }
 0x273   : > { %v1902_v60 = vpop.f32.mrf.mxu0  ;;  %2429 = vmatmul.mubr.f32.gmra.mxu0 %v2428_v10  ;;  %v3291_v59 = vpop.f32.mrf.mxu1  ;;  %v8651_v10 = vsel %vm16950_vm13, 1.0, %v17044_v61 }
 0x274   : > { %17496 = vst [vmem:[#allocation394_spill] sm:$0xff] %v12404_v1  ;;  %v12415_v58 = vadd.f32 %v3275_v18, %v1902_v60  ;;  %2434 = vmatprep.mubr.f32.mxu0 %v17044_v61  ;;  %17499 = vst [vmem:[#allocation397_spill] sm:$0xff] %v12419_v47  ;;  %v2439_v1 = vand.u32 4294901760, %v2438_v50  ;;  %v2449_v28 = vsub.f32 %v12371_v5, %v17500_v27  ;;  %v12437_v27 = vpop.permute.xlu1 %653 }
 0x275   : > { %v1904_v36 = vpop.f32.mrf.mxu0  ;;  %v3296_v60 = vpop.f32.mrf.mxu1  ;;  %8777 = vmatmul.mubr.msk.f32.gmra.mxu1 %vm16940_vm15, %v17050_v3  ;;  %17502 = vst [vmem:[#allocation399_spill] sm:$0xff] %v12437_v27  ;;  %vm16960_vm15 = vcmp.eq.s32.totalorder %v12437_v27, %v9708_v53 }
 0x276   : > { %17498 = vst [vmem:[#allocation396_spill] sm:$0xff] %v12415_v58  ;;  %v12428_v18 = vadd.f32 %v3277_v17, %v1904_v36  ;;  %3636 = vmatprep.mubr.f32.mxu1 %v17044_v61  ;;  %v12442_v36 = vsub.f32 %v8651_v10, %v8651_v10  ;;  %v17505_v58 = vand.u32 4294901760, %v12394_v37 }
 0x277   : > { %v1913_v50 = vpop.f32.mrf.mxu0  ;;  %2440 = vmatmul.mubr.f32.gmra.mxu0 %v2439_v1  ;;  %v3298_v45 = vpop.f32.mrf.mxu1  ;;  %v8652_v1 = vsel %vm16955_vm14, 1.0, %v17044_v61 }
 0x278   : > { %17501 = vst [vmem:[#allocation398_spill] sm:$0xff] %v12428_v18  ;;  %v12439_v57 = vadd.f32 %v3282_v51, %v1913_v50  ;;  %2445 = vmatprep.mubr.f32.mxu0 %v17044_v61  ;;  %17504 = vst [vmem:[#allocation401_spill] sm:$0xff] %v12442_v36  ;;  %v2450_v18 = vand.u32 4294901760, %v2449_v28  ;;  %v2460_v5 = vsub.f32 %v12394_v37, %v17505_v58  ;;  %v12461_v58 = vpop.permute.xlu0 %656 }
 0x279   : > { %v1915_v25 = vpop.f32.mrf.mxu0  ;;  %v3303_v50 = vpop.f32.mrf.mxu1  ;;  %8778 = vmatmul.mubr.msk.f32.gmra.mxu1 %vm16945_vm12, %v17050_v3  ;;  %17507 = vst [vmem:[#allocation403_spill] sm:$0xff] %v12461_v58  ;;  %vm16965_vm12 = vcmp.eq.s32.totalorder %v12461_v58, %v9708_v53 }
 0x27a   : > { %17503 = vst [vmem:[#allocation400_spill] sm:$0xff] %v12439_v57  ;;  %v12452_v51 = vadd.f32 %v3284_v0, %v1915_v25  ;;  %3643 = vmatprep.mubr.f32.mxu1 %v17044_v61  ;;  %v12467_v0 = vsub.f32 %v8652_v1, %v8652_v1  ;;  %v17510_v57 = vand.u32 4294901760, %v12419_v47 }
 0x27b   : > { %v1924_v28 = vpop.f32.mrf.mxu0  ;;  %2451 = vmatmul.mubr.f32.gmra.mxu0 %v2450_v18  ;;  %v3305_v17 = vpop.f32.mrf.mxu1  ;;  %v8653_v18 = vsel %vm16960_vm15, 1.0, %v17044_v61 }
 0x27c   : > { %17506 = vst [vmem:[#allocation402_spill] sm:$0xff] %v12452_v51  ;;  %v12463_v10 = vadd.f32 %v3289_v62, %v1924_v28  ;;  %2456 = vmatprep.mubr.f32.mxu0 %v17044_v61  ;;  %17509 = vst [vmem:[#allocation405_spill] sm:$0xff] %v12467_v0  ;;  %v2461_v51 = vand.u32 4294901760, %v2460_v5  ;;  %v2471_v37 = vsub.f32 %v12419_v47, %v17510_v57  ;;  %v12485_v57 = vpop.permute.xlu1 %659 }
 0x27d   : > { %v1926_v49 = vpop.f32.mrf.mxu0  ;;  %v3310_v28 = vpop.f32.mrf.mxu1  ;;  %8779 = vmatmul.mubr.msk.f32.gmra.mxu1 %vm16950_vm13, %v17050_v3  ;;  %17512 = vst [vmem:[#allocation407_spill] sm:$0xff] %v12485_v57  ;;  %vm16970_vm13 = vcmp.eq.s32.totalorder %v12485_v57, %v9708_v53 }
 0x27e   : > { %17508 = vst [vmem:[#allocation404_spill] sm:$0xff] %v12463_v10  ;;  %v12476_v62 = vadd.f32 %v3291_v59, %v1926_v49  ;;  %3650 = vmatprep.mubr.f32.mxu1 %v17044_v61  ;;  %v12490_v49 = vsub.f32 %v8653_v18, %v8653_v18  ;;  %v17515_v10 = vand.u32 4294901760, %v12442_v36 }
 0x27f   : > { %v1935_v5 = vpop.f32.mrf.mxu0  ;;  %2462 = vmatmul.mubr.f32.gmra.mxu0 %v2461_v51  ;;  %v3312_v25 = vpop.f32.mrf.mxu1  ;;  %v8654_v51 = vsel %vm16965_vm12, 1.0, %v17044_v61 }
 0x280   : > { %17511 = vst [vmem:[#allocation406_spill] sm:$0xff] %v12476_v62  ;;  %v12487_v1 = vadd.f32 %v3296_v60, %v1935_v5  ;;  %2467 = vmatprep.mubr.f32.mxu0 %v17044_v61  ;;  %17514 = vst [vmem:[#allocation409_spill] sm:$0xff] %v12490_v49  ;;  %v2472_v62 = vand.u32 4294901760, %v2471_v37  ;;  %v2482_v47 = vsub.f32 %v12442_v36, %v17515_v10  ;;  %v12509_v10 = vpop.permute.xlu0 %662 }
 0x281   : > { %v1937_v11 = vpop.f32.mrf.mxu0  ;;  %v3317_v5 = vpop.f32.mrf.mxu1  ;;  %8780 = vmatmul.mubr.msk.f32.gmra.mxu1 %vm16955_vm14, %v17050_v3  ;;  %17517 = vst [vmem:[#allocation411_spill] sm:$0xff] %v12509_v10  ;;  %vm16975_vm14 = vcmp.eq.s32.totalorder %v12509_v10, %v9708_v53 }
 0x282   : > { %17513 = vst [vmem:[#allocation408_spill] sm:$0xff] %v12487_v1  ;;  %v12500_v60 = vadd.f32 %v3298_v45, %v1937_v11  ;;  %3657 = vmatprep.mubr.f32.mxu1 %v17044_v61  ;;  %v12515_v45 = vsub.f32 %v8654_v51, %v8654_v51  ;;  %v17520_v1 = vand.u32 4294901760, %v12467_v0 }
 0x283   : > { %v1946_v37 = vpop.f32.mrf.mxu0  ;;  %2473 = vmatmul.mubr.f32.gmra.mxu0 %v2472_v62  ;;  %v3319_v59 = vpop.f32.mrf.mxu1  ;;  %v8655_v62 = vsel %vm16970_vm13, 1.0, %v17044_v61 }
 0x284   : > { %17516 = vst [vmem:[#allocation410_spill] sm:$0xff] %v12500_v60  ;;  %v12511_v18 = vadd.f32 %v3303_v50, %v1946_v37  ;;  %2478 = vmatprep.mubr.f32.mxu0 %v17044_v61  ;;  %17519 = vst [vmem:[#allocation413_spill] sm:$0xff] %v12515_v45  ;;  %v2483_v60 = vand.u32 4294901760, %v2482_v47  ;;  %v2493_v36 = vsub.f32 %v12467_v0, %v17520_v1  ;;  %v12533_v1 = vpop.permute.xlu1 %665 }
 0x285   : > { %v1948_v23 = vpop.f32.mrf.mxu0  ;;  %v3324_v37 = vpop.f32.mrf.mxu1  ;;  %8781 = vmatmul.mubr.msk.f32.gmra.mxu1 %vm16960_vm15, %v17050_v3  ;;  %17522 = vst [vmem:[#allocation415_spill] sm:$0xff] %v12533_v1  ;;  %vm16980_vm15 = vcmp.eq.s32.totalorder %v12533_v1, %v9708_v53 }
 0x286   : > { %17518 = vst [vmem:[#allocation412_spill] sm:$0xff] %v12511_v18  ;;  %v12524_v50 = vadd.f32 %v3305_v17, %v1948_v23  ;;  %3664 = vmatprep.mubr.f32.mxu1 %v17044_v61  ;;  %v12538_v23 = vsub.f32 %v8655_v62, %v8655_v62  ;;  %v17525_v18 = vand.u32 4294901760, %v12490_v49 }
 0x287   : > { %v1957_v47 = vpop.f32.mrf.mxu0  ;;  %2484 = vmatmul.mubr.f32.gmra.mxu0 %v2483_v60  ;;  %v3326_v11 = vpop.f32.mrf.mxu1  ;;  %v8656_v60 = vsel %vm16975_vm14, 1.0, %v17044_v61 }
 0x288   : > { %17521 = vst [vmem:[#allocation414_spill] sm:$0xff] %v12524_v50  ;;  %v12535_v51 = vadd.f32 %v3310_v28, %v1957_v47  ;;  %2489 = vmatprep.mubr.f32.mxu0 %v17044_v61  ;;  %17524 = vst [vmem:[#allocation417_spill] sm:$0xff] %v12538_v23  ;;  %v2494_v50 = vand.u32 4294901760, %v2493_v36  ;;  %v2504_v0 = vsub.f32 %v12490_v49, %v17525_v18  ;;  %v12557_v18 = vpop.permute.xlu0 %668 }
 0x289   : > { %v1959_v27 = vpop.f32.mrf.mxu0  ;;  %v3331_v47 = vpop.f32.mrf.mxu1  ;;  %8782 = vmatmul.mubr.msk.f32.gmra.mxu1 %vm16965_vm12, %v17050_v3  ;;  %17527 = vst [vmem:[#allocation419_spill] sm:$0xff] %v12557_v18  ;;  %vm803_vm12 = vcmp.eq.s32.totalorder %v12557_v18, %v9708_v53 }
 0x28a   : > { %17523 = vst [vmem:[#allocation416_spill] sm:$0xff] %v12535_v51  ;;  %v12548_v28 = vadd.f32 %v3312_v25, %v1959_v27  ;;  %3671 = vmatprep.mubr.f32.mxu1 %v17044_v61  ;;  %v12563_v25 = vsub.f32 %v8656_v60, %v8656_v60  ;;  %v17530_v51 = vand.u32 4294901760, %v12515_v45 }
 0x28b   : > { %v1968_v36 = vpop.f32.mrf.mxu0  ;;  %2495 = vmatmul.mubr.f32.gmra.mxu0 %v2494_v50  ;;  %v3333_v17 = vpop.f32.mrf.mxu1  ;;  %v8657_v50 = vsel %vm16980_vm15, 1.0, %v17044_v61 }
 0x28c   : > { %17526 = vst [vmem:[#allocation418_spill] sm:$0xff] %v12548_v28  ;;  %v12559_v62 = vadd.f32 %v3317_v5, %v1968_v36  ;;  %2500 = vmatprep.mubr.f32.mxu0 %v17044_v61  ;;  %17529 = vst [vmem:[#allocation421_spill] sm:$0xff] %v12563_v25  ;;  %v2505_v28 = vand.u32 4294901760, %v2504_v0  ;;  %v2515_v49 = vsub.f32 %v12515_v45, %v17530_v51  ;;  %v12581_v51 = vpop.permute.xlu1 %671 }
 0x28d   : > { %v1970_v58 = vpop.f32.mrf.mxu0  ;;  %v3338_v36 = vpop.f32.mrf.mxu1  ;;  %8783 = vmatmul.mubr.msk.f32.gmra.mxu1 %vm16970_vm13, %v17050_v3  ;;  %17532 = vst [vmem:[#allocation423_spill] sm:$0xff] %v12581_v51  ;;  %vm804_vm13 = vcmp.eq.s32.totalorder %v12581_v51, %v9708_v53 }
 0x28e   : > { %17528 = vst [vmem:[#allocation420_spill] sm:$0xff] %v12559_v62  ;;  %v12572_v5 = vadd.f32 %v3319_v59, %v1970_v58  ;;  %3678 = vmatprep.mubr.f32.mxu1 %v17044_v61  ;;  %v12586_v58 = vsub.f32 %v8657_v50, %v8657_v50  ;;  %v17534_v62 = vand.u32 4294901760, %v12538_v23 }
 0x28f   : > { %v1979_v0 = vpop.f32.mrf.mxu0  ;;  %2506 = vmatmul.mubr.f32.gmra.mxu0 %v2505_v28  ;;  %v3340_v27 = vpop.f32.mrf.mxu1  ;;  %v8658_v28 = vsel %vm803_vm12, 1.0, %v17044_v61 }
 0x290   : > { %17531 = vst [vmem:[#allocation422_spill] sm:$0xff] %v12572_v5  ;;  %v12583_v60 = vadd.f32 %v3324_v37, %v1979_v0  ;;  %2511 = vmatprep.mubr.f32.mxu0 %v17044_v61  ;;  %v2516_v5 = vand.u32 4294901760, %v2515_v49  ;;  %v2526_v45 = vsub.f32 %v12538_v23, %v17534_v62  ;;  %v12605_v62 = vpop.permute.xlu0 %674 }
 0x291   : > { %v1981_v57 = vpop.f32.mrf.mxu0  ;;  %v3345_v0 = vpop.f32.mrf.mxu1  ;;  %8784 = vmatmul.mubr.msk.f32.gmra.mxu1 %vm16975_vm14, %v17050_v3  ;;  %17536 = vst [vmem:[#allocation426_spill] sm:$0xff] %v12605_v62  ;;  %vm805_vm14 = vcmp.eq.s32.totalorder %v12605_v62, %v9708_v53 }
 0x292   : > { %17533 = vst [vmem:[#allocation424_spill] sm:$0xff] %v12583_v60  ;;  %v12596_v37 = vadd.f32 %v3326_v11, %v1981_v57  ;;  %3685 = vmatprep.mubr.f32.mxu1 %v17044_v61  ;;  %v12611_v11 = vsub.f32 %v8658_v28, %v8658_v28  ;;  %v17539_v60 = vand.u32 4294901760, %v12563_v25 }
 0x293   : > { %v1990_v49 = vpop.f32.mrf.mxu0  ;;  %2517 = vmatmul.mubr.f32.gmra.mxu0 %v2516_v5  ;;  %v3347_v59 = vpop.f32.mrf.mxu1  ;;  %v8659_v5 = vsel %vm804_vm13, 1.0, %v17044_v61 }
 0x294   : > { %17535 = vst [vmem:[#allocation425_spill] sm:$0xff] %v12596_v37  ;;  %v12607_v50 = vadd.f32 %v3331_v47, %v1990_v49  ;;  %2522 = vmatprep.mubr.f32.mxu0 %v17044_v61  ;;  %17538 = vst [vmem:[#allocation428_spill] sm:$0xff] %v12611_v11  ;;  %v2527_v37 = vand.u32 4294901760, %v2526_v45  ;;  %v2537_v23 = vsub.f32 %v12563_v25, %v17539_v60  ;;  %v12629_v60 = vpop.permute.xlu1 %677  ;;  %v17546_v18 = vand.u32 4294901760, %v12611_v11 }
 0x295   : > { %v1992_v10 = vpop.f32.mrf.mxu0  ;;  %v3352_v49 = vpop.f32.mrf.mxu1  ;;  %8785 = vmatmul.mubr.msk.f32.gmra.mxu1 %vm16980_vm15, %v17050_v3  ;;  %17541 = vst [vmem:[#allocation430_spill] sm:$0xff] %v12629_v60  ;;  %vm806_vm15 = vcmp.eq.s32.totalorder %v12629_v60, %v9708_v53  ;;  %v17553_v60 = vld [vmem:[#allocation43_spill] sm:$0xff] }
 0x296   : > { %17537 = vst [vmem:[#allocation427_spill] sm:$0xff] %v12607_v50  ;;  %v12620_v47 = vadd.f32 %v3333_v17, %v1992_v10  ;;  %3692 = vmatprep.mubr.f32.mxu1 %v17044_v61  ;;  %v12634_v10 = vsub.f32 %v8659_v5, %v8659_v5  ;;  %v17543_v50 = vand.u32 4294901760, %v12586_v58  ;;  %v17554_v53 = vand.u32 4294901760, %v17553_v60 }
 0x297   : > { %v2001_v45 = vpop.f32.mrf.mxu0  ;;  %2528 = vmatmul.mubr.f32.gmra.mxu0 %v2527_v37  ;;  %v3354_v57 = vpop.f32.mrf.mxu1  ;;  %v8660_v37 = vsel %vm805_vm14, 1.0, %v17044_v61 }
 0x298   : > { %17540 = vst [vmem:[#allocation429_spill] sm:$0xff] %v12620_v47  ;;  %v12631_v28 = vadd.f32 %v3338_v36, %v2001_v45  ;;  %2533 = vmatprep.mubr.f32.mxu0 %v17044_v61  ;;  %v2538_v47 = vand.u32 4294901760, %v2537_v23  ;;  %v2548_v25 = vsub.f32 %v12586_v58, %v17543_v50 }
 0x299   : > { %v2003_v1 = vpop.f32.mrf.mxu0  ;;  %v3359_v45 = vpop.f32.mrf.mxu1  ;;  %8786 = vmatmul.mubr.msk.f32.gmra.mxu1 %vm803_vm12, %v17050_v3 }
 0x29a   : > { %17542 = vst [vmem:[#allocation431_spill] sm:$0xff] %v12631_v28  ;;  %v12644_v36 = vadd.f32 %v3340_v27, %v2003_v1  ;;  %3699 = vmatprep.mubr.f32.mxu1 %v17044_v61  ;;  %v12657_v27 = vsub.f32 %v8660_v37, %v8660_v37  ;;  %v2559_v28 = vsub.f32 %v12611_v11, %v17546_v18 }
 0x29b   : > { %v2012_v23 = vpop.f32.mrf.mxu0  ;;  %2539 = vmatmul.mubr.f32.gmra.mxu0 %v2538_v47  ;;  %v3361_v5 = vpop.f32.mrf.mxu1  ;;  %v8661_v47 = vsel %vm806_vm15, 1.0, %v17044_v61 }
 0x29c   : > { %17544 = vst [vmem:[#allocation432_spill] sm:$0xff] %v12644_v36  ;;  %v12653_v50 = vadd.f32 %v3345_v0, %v2012_v23  ;;  %2544 = vmatprep.mubr.f32.mxu0 %v17044_v61  ;;  %v2549_v36 = vand.u32 4294901760, %v2548_v25  ;;  %v12676_v1 = vsub.f32 %v8661_v47, %v8661_v47 }
 0x29d   : > { %v2014_v17 = vpop.f32.mrf.mxu0  ;;  %v3366_v23 = vpop.f32.mrf.mxu1  ;;  %8787 = vmatmul.mubr.msk.f32.gmra.mxu1 %vm804_vm13, %v17050_v3 }
 0x29e   : > { %17545 = vst [vmem:[#allocation433_spill] sm:$0xff] %v12653_v50  ;;  %v12666_v0 = vadd.f32 %v3347_v59, %v2014_v17  ;;  %3706 = vmatprep.mubr.f32.mxu1 %v17044_v61  ;;  %v16989_v59 = vand.u32 4294901760, %v12657_v27  ;;  %v17548_v50 = vand.u32 4294901760, %v12634_v10 }
 0x29f   : > { %v2023_v37 = vpop.f32.mrf.mxu0  ;;  %2550 = vmatmul.mubr.f32.gmra.mxu0 %v2549_v36  ;;  %v3368_v18 = vpop.f32.mrf.mxu1 }
 0x2a0   : > { %17547 = vst [vmem:[#allocation434_spill] sm:$0xff] %v12666_v0  ;;  %v12673_v25 = vadd.f32 %v3352_v49, %v2023_v37  ;;  %2555 = vmatprep.mubr.f32.mxu0 %v17044_v61  ;;  %v2560_v0 = vand.u32 4294901760, %v2559_v28  ;;  %v2570_v51 = vsub.f32 %v12634_v10, %v17548_v50 }
 0x2a1   : > { %v2025_v17 = vpop.f32.mrf.mxu0  ;;  %v3373_v36 = vpop.f32.mrf.mxu1  ;;  %8788 = vmatmul.mubr.msk.f32.gmra.mxu1 %vm805_vm14, %v17050_v3 }
 0x2a2   : > { %v12682_v11 = vadd.f32 %v3354_v57, %v2025_v17  ;;  %3713 = vmatprep.mubr.f32.mxu1 %v17044_v61  ;;  %v2571_v57 = vand.u32 4294901760, %v2570_v51  ;;  %v2581_v17 = vsub.f32 %v12657_v27, %v16989_v59 }
 0x2a3   : > { %v2034_v49 = vpop.f32.mrf.mxu0  ;;  %2561 = vmatmul.mubr.f32.gmra.mxu0 %v2560_v0  ;;  %v3375_v37 = vpop.f32.mrf.mxu1 }
 0x2a4   : > { %17549 = vst [vmem:[#allocation435_spill] sm:$0xff] %v12682_v11  ;;  %v12689_v47 = vadd.f32 %v3359_v45, %v2034_v49  ;;  %2566 = vmatprep.mubr.f32.mxu0 %v17044_v61  ;;  %v2582_v28 = vand.u32 4294901760, %v2581_v17  ;;  %v17556_v17 = vld [vmem:[#allocation8_spill] sm:$0xff] }
 0x2a5   : > { %v2036_v50 = vpop.f32.mrf.mxu0  ;;  %v3380_v62 = vpop.f32.mrf.mxu1  ;;  %8789 = vmatmul.mubr.msk.f32.gmra.mxu1 %vm806_vm15, %v17050_v3 }
 0x2a6   : > { %v12696_v11 = vadd.f32 %v3361_v5, %v2036_v50  ;;  %4970 = vmatprep.mubr.f32.mxu1 %v17044_v61  ;;  %v17552_v5 = vand.u32 4294901760, %v12676_v1 }
 0x2a7   : > { %v2045_v45 = vpop.f32.mrf.mxu0  ;;  %2572 = vmatmul.mubr.f32.gmra.mxu0 %v2571_v57  ;;  %v3382_v49 = vpop.f32.mrf.mxu1 }
 0x2a8   : > { %17550 = vst [vmem:[#allocation436_spill] sm:$0xff] %v12696_v11  ;;  %v12703_v0 = vadd.f32 %v3366_v23, %v2045_v45  ;;  %2577 = vmatprep.mubr.f32.mxu0 %v17044_v61  ;;  %v2592_v50 = vsub.f32 %v12676_v1, %v17552_v5  ;;  %v17557_v5 = vld [vmem:[#allocation9_spill] sm:$0xff] }
 0x2a9   : > { %v2047_v51 = vpop.f32.mrf.mxu0  ;;  %v3387_v11 = vpop.f32.mrf.mxu1  ;;  %4974 = vmatmul.mubr.f32.vlgmr.msra.gmra.mxu1 %v17554_v53  ;;  %v17558_v53 = vand.u32 4294901760, %v9764_v48 }
 0x2aa   : > { %17551 = vst [vmem:[#allocation437_spill] sm:$0xff] %v12703_v0  ;;  %v12709_v59 = vadd.f32 %v3368_v18, %v2047_v51  ;;  %4979 = vmatprep.mubr.f32.mxu1 %v17044_v61  ;;  %7183 = vmatpush1.msra.mxu1 %v17556_v17  ;;  %v2593_v0 = vand.u32 4294901760, %v2592_v50  ;;  %v17559_v17 = vld [vmem:[#allocation10_spill] sm:$0xff] }
 0x2ab   : > { %v2056_v57 = vpop.f32.mrf.mxu0  ;;  %2583 = vmatmul.mubr.f32.gmra.mxu0 %v2582_v28  ;;  %v3389_v45 = vpop.f32.mrf.mxu1  ;;  %7185 = vmatprep.subr.mxu1 %v17557_v5  ;;  %v17561_v5 = vand.u32 4294901760, %v9738_v40 }
 0x2ac   : > { %v12714_v23 = vadd.f32 %v3373_v36, %v2056_v57  ;;  %2588 = vmatprep.mubr.f32.mxu0 %v17044_v61  ;;  %7187 = vmatpush1.msra.mxu1 %v17559_v17 }
 0x2ad   : > { %v2058_v3 = vpop.f32.mrf.mxu0  ;;  %v3394_v51 = vpop.f32.mrf.mxu1  ;;  %4983 = vmatmul.mubr.f32.gmra.mxu1 %v17558_v53 }
 0x2ae   : > { %17555 = vst [vmem:[#allocation43_spill] sm:$0xff] %v12714_v23  ;;  %v12719_v18 = vadd.f32 %v3375_v37, %v2058_v3  ;;  %4988 = vmatprep.mubr.f32.mxu1 %v17044_v61  ;;  %v17560_v23 = vld [vmem:[#allocation12_spill] sm:$0xff] }
 0x2af   : > { %v2067_v28 = vpop.f32.mrf.mxu0  ;;  %2594 = vmatmul.mubr.f32.gmra.mxu0 %v2593_v0  ;;  %v3396_v57 = vpop.f32.mrf.mxu1  ;;  %7189 = vmatprep.subr.mxu1 %v17560_v23  ;;  %v17562_v0 = vand.u32 4294901760, %v9336_v26 }
 0x2b0   : > { %v12724_v36 = vadd.f32 %v3380_v62, %v2067_v28  ;;  %3849 = vmatprep.mubr.f32.mxu0 %v17044_v61  ;;  %7191 = vmatpush1.msra.mxu1 %v9347_v31  ;;  %v17567_v31 = vld [vmem:[#allocation13_spill] sm:$0xff] }
 0x2b1   : > { %v2069_v50 = vpop.f32.mrf.mxu0  ;;  %v3401_v37 = vpop.f32.mrf.mxu1  ;;  %4992 = vmatmul.mubr.f32.gmra.mxu1 %v17561_v5  ;;  %7193 = vmatprep.subr.mxu1 %v9349_v32  ;;  %v17573_v32 = vand.u32 4294901760, %v9370_v43 }
 0x2b2   : > { %v12729_v3 = vadd.f32 %v3382_v49, %v2069_v50  ;;  %4997 = vmatprep.mubr.f32.mxu1 %v17044_v61  ;;  %v17563_v49 = vld [vmem:[#allocation11_spill] sm:$0xff]  ;;  %7195 = vmatpush1.msra.mxu1 %v9351_v33 }
 0x2b3   : > { %v2078_v53 = vpop.f32.mrf.mxu0  ;;  %3852 = vmatmul.mubr.f32.vlgmr.msra.gmra.mxu0 %v17553_v60  ;;  %v3403_v28 = vpop.f32.mrf.mxu1  ;;  %v17564_v17 = vand.u32 4294901760, %v17563_v49  ;;  %v17565_v60 = vand.u32 4294901760, %v9776_v46  ;;  %v17569_v49 = vand.u32 4294901760, %v9364_v41  ;;  %7197 = vmatprep.subr.mxu1 %v9408_v6 }
 0x2b4   : > { %v12735_v62 = vadd.f32 %v3387_v11, %v2078_v53  ;;  %6130 = vmatpush1.msra.mxu0 %v17562_v0  ;;  %3857 = vmatprep.mubr.f32.mxu0 %v17044_v61  ;;  %v17566_v11 = vand.u32 4294901760, %v9345_v30 }
 0x2b5   : > { %v2080_v23 = vpop.f32.mrf.mxu0  ;;  %6134 = vmatprep.subr.mxu0 %v17564_v17  ;;  %v3408_v5 = vpop.f32.mrf.mxu1  ;;  %5001 = vmatmul.mubr.f32.gmra.mxu1 %v17565_v60 }
 0x2b6   : > { %v12743_v50 = vadd.f32 %v3389_v45, %v2080_v23  ;;  %6138 = vmatpush1.msra.mxu0 %v17566_v11  ;;  %5006 = vmatprep.mubr.f32.mxu1 %v17044_v61  ;;  %v17568_v45 = vand.u32 4294901760, %v17567_v31  ;;  %v17574_v31 = vand.u32 4294901760, %v9420_v15 }
 0x2b7   : > { %v2089_v26 = vpop.f32.mrf.mxu0  ;;  %3860 = vmatmul.mubr.f32.gmra.mxu0 %v9764_v48  ;;  %v3410_v0 = vpop.f32.mrf.mxu1  ;;  %v17570_v48 = vand.u32 4294901760, %v9802_v63  ;;  %7199 = vmatpush1.msra.mxu1 %v9410_v7 }
 0x2b8   : > { %v12751_v53 = vadd.f32 %v3394_v51, %v2089_v26  ;;  %3865 = vmatprep.mubr.f32.mxu0 %v17044_v61  ;;  %6142 = vmatprep.subr.mxu0 %v17568_v45  ;;  %v17571_v51 = vld [vmem:[#allocation14_spill] sm:$0xff] }
 0x2b9   : > { %v2091_v23 = vpop.f32.mrf.mxu0  ;;  %6146 = vmatpush1.msra.mxu0 %v17569_v49  ;;  %v3415_v17 = vpop.f32.mrf.mxu1  ;;  %5010 = vmatmul.mubr.f32.gmra.mxu1 %v17570_v48  ;;  %v17572_v60 = vand.u32 4294901760, %v17571_v51 }
 0x2ba   : > { %v12759_v30 = vadd.f32 %v3396_v57, %v2091_v23  ;;  %5015 = vmatprep.mubr.f32.mxu1 %v17044_v61  ;;  %7201 = vmatprep.subr.mxu1 %v9412_v8 }
 0x2bb   : > { %6150 = vmatprep.subr.mxu0 %v17572_v60  ;;  %v2100_v11 = vpop.f32.mrf.mxu0  ;;  %3868 = vmatmul.mubr.f32.gmra.mxu0 %v9738_v40  ;;  %v3417_v41 = vpop.f32.mrf.mxu1  ;;  %v17575_v40 = vld [vmem:[#allocation50_spill] sm:$0xff]  ;;  %v17579_v60 = vld [vmem:[#allocation52_spill] sm:$0xff] }
 0x2bc   : > { %v12767_v26 = vadd.f32 %v3401_v37, %v2100_v11  ;;  %3873 = vmatprep.mubr.f32.mxu0 %v17044_v61  ;;  %6154 = vmatpush1.msra.mxu0 %v17573_v32  ;;  %v17576_v49 = vand.u32 4294901760, %v17575_v40  ;;  %v17577_v37 = vand.u32 4294901760, %v9423_v16 }
 0x2bd   : > { %v2102_v57 = vpop.f32.mrf.mxu0  ;;  %6158 = vmatprep.subr.mxu0 %v17574_v31  ;;  %v3422_v23 = vpop.f32.mrf.mxu1  ;;  %7203 = vmatpush1.msra.mxu1 %v9416_v14 }
 0x2be   : > { %v12775_v45 = vadd.f32 %v3403_v28, %v2102_v57  ;;  %5019 = vmatmul.mubr.f32.gmra.mxu1 %v17576_v49  ;;  %6162 = vmatpush1.msra.mxu0 %v17577_v37  ;;  %v17578_v28 = vand.u32 4294901760, %v9426_v20  ;;  %v17583_v57 = vld [vmem:[#allocation54_spill] sm:$0xff]  ;;  %v17587_v37 = vld [vmem:[#allocation56_spill] sm:$0xff] }
 0x2bf   : > { %v2111_v48 = vpop.f32.mrf.mxu0  ;;  %3876 = vmatmul.mubr.f32.gmra.mxu0 %v9776_v46  ;;  %5024 = vmatprep.mubr.f32.mxu1 %v17044_v61  ;;  %v3424_v33 = vpop.f32.mrf.mxu1  ;;  %v17580_v46 = vand.u32 4294901760, %v17579_v60 }
 0x2c0   : > { %v12783_v43 = vadd.f32 %v3408_v5, %v2111_v48  ;;  %3881 = vmatprep.mubr.f32.mxu0 %v17044_v61  ;;  %6166 = vmatprep.subr.mxu0 %v17578_v28  ;;  %v17581_v5 = vand.u32 4294901760, %v9433_v29 }
 0x2c1   : > { %v2113_v15 = vpop.f32.mrf.mxu0  ;;  %v3429_v51 = vpop.f32.mrf.mxu1  ;;  %7205 = vmatprep.subr.mxu1 %v9428_v22 }
 0x2c2   : > { %v12790_v16 = vadd.f32 %v3410_v0, %v2113_v15  ;;  %5028 = vmatmul.mubr.f32.gmra.mxu1 %v17580_v46  ;;  %6170 = vmatpush1.msra.mxu0 %v17581_v5  ;;  %v17582_v0 = vand.u32 4294901760, %v9446_v52  ;;  %v17592_v46 = vld [vmem:[#allocation58_spill] sm:$0xff]  ;;  %v17594_v5 = vld [vmem:[#allocation20_spill] sm:$0xff] }
 0x2c3   : > { %v2122_v11 = vpop.f32.mrf.mxu0  ;;  %3884 = vmatmul.mubr.f32.gmra.mxu0 %v9802_v63  ;;  %5033 = vmatprep.mubr.f32.mxu1 %v17044_v61  ;;  %v3431_v7 = vpop.f32.mrf.mxu1  ;;  %v17584_v63 = vand.u32 4294901760, %v17583_v57 }
 0x2c4   : > { %v12798_v6 = vadd.f32 %v3415_v17, %v2122_v11  ;;  %3889 = vmatprep.mubr.f32.mxu0 %v17044_v61  ;;  %6174 = vmatprep.subr.mxu0 %v17582_v0  ;;  %v17585_v17 = vand.u32 4294901760, %v9451_v54  ;;  %v17597_v0 = vld [vmem:[#allocation16_spill] sm:$0xff] }
 0x2c5   : > { %v2124_v20 = vpop.f32.mrf.mxu0  ;;  %v3436_v32 = vpop.f32.mrf.mxu1  ;;  %7207 = vmatpush1.msra.mxu1 %v9435_v38 }
 0x2c6   : > { %v12805_v29 = vadd.f32 %v3417_v41, %v2124_v20  ;;  %5037 = vmatmul.mubr.f32.gmra.mxu1 %v17584_v63  ;;  %6178 = vmatpush1.msra.mxu0 %v17585_v17  ;;  %v17586_v41 = vand.u32 4294901760, %v9454_v55  ;;  %v17596_v20 = vld [vmem:[#allocation15_spill] sm:$0xff]  ;;  %v17598_v63 = vld [vmem:[#allocation21_spill] sm:$0xff] }
 0x2c7   : > { %v2133_v31 = vpop.f32.mrf.mxu0  ;;  %3892 = vmatmul.mubr.f32.gmra.mxu0 %v17575_v40  ;;  %5042 = vmatprep.mubr.f32.mxu1 %v17044_v61  ;;  %v3438_v14 = vpop.f32.mrf.mxu1  ;;  %v17588_v40 = vand.u32 4294901760, %v17587_v37  ;;  %v17599_v17 = vand.u32 4294901760, %v17598_v63 }
 0x2c8   : > { %v12813_v8 = vadd.f32 %v3422_v23, %v2133_v31  ;;  %3897 = vmatprep.mubr.f32.mxu0 %v17044_v61  ;;  %6182 = vmatprep.subr.mxu0 %v17586_v41  ;;  %v17589_v23 = vand.u32 4294901760, %v9457_v56  ;;  %v17600_v41 = vld [vmem:[#allocation60_spill] sm:$0xff] }
 0x2c9   : > { %v2135_v52 = vpop.f32.mrf.mxu0  ;;  %v3443_v49 = vpop.f32.mrf.mxu1  ;;  %7209 = vmatprep.subr.mxu1 %v9437_v39 }
 0x2ca   : > { %v12820_v54 = vadd.f32 %v3424_v33, %v2135_v52  ;;  %5046 = vmatmul.mubr.f32.gmra.mxu1 %v17588_v40  ;;  %6186 = vmatpush1.msra.mxu0 %v17589_v23  ;;  %v17590_v33 = vld [vmem:[#allocation19_spill] sm:$0xff] }
 0x2cb   : > { %v2144_v48 = vpop.f32.mrf.mxu0  ;;  %3900 = vmatmul.mubr.f32.gmra.mxu0 %v17579_v60  ;;  %5051 = vmatprep.mubr.f32.mxu1 %v17044_v61  ;;  %v3445_v38 = vpop.f32.mrf.mxu1  ;;  %v17591_v15 = vand.u32 4294901760, %v17590_v33  ;;  %v17593_v60 = vand.u32 4294901760, %v17592_v46  ;;  %v17602_v40 = vld [vmem:[#allocation23_spill] sm:$0xff]  ;;  %v17604_v33 = vld [vmem:[#allocation17_spill] sm:$0xff] }
 0x2cc   : > { %v12828_v22 = vadd.f32 %v3429_v51, %v2144_v48  ;;  %3905 = vmatprep.mubr.f32.mxu0 %v17044_v61  ;;  %7211 = vmatpush1.msra.mxu1 %v9439_v44  ;;  %v17595_v51 = vand.u32 4294901760, %v17594_v5 }
 0x2cd   : > { %v2146_v55 = vpop.f32.mrf.mxu0  ;;  %6190 = vmatprep.subr.mxu0 %v17591_v15  ;;  %v3450_v28 = vpop.f32.mrf.mxu1  ;;  %7213 = vmatprep.subr.mxu1 %v17596_v20  ;;  %v17605_v15 = vld [vmem:[#allocation18_spill] sm:$0xff] }
 0x2ce   : > { %v12835_v56 = vadd.f32 %v3431_v7, %v2146_v55  ;;  %5055 = vmatmul.mubr.f32.gmra.mxu1 %v17593_v60  ;;  %6194 = vmatpush1.msra.mxu0 %v17595_v51  ;;  %v17606_v60 = vld [vmem:[#allocation26_spill] sm:$0xff] }
 0x2cf   : > { %v2155_v11 = vpop.f32.mrf.mxu0  ;;  %3908 = vmatmul.mubr.f32.gmra.mxu0 %v17583_v57  ;;  %5060 = vmatprep.mubr.f32.mxu1 %v17044_v61  ;;  %v3452_v44 = vpop.f32.mrf.mxu1  ;;  %v17601_v57 = vand.u32 4294901760, %v17600_v41  ;;  %v17607_v5 = vand.u32 4294901760, %v17606_v60  ;;  %v17608_v20 = vld [vmem:[#allocation62_spill] sm:$0xff] }
 0x2d0   : > { %v12843_v39 = vadd.f32 %v3436_v32, %v2155_v11  ;;  %3913 = vmatprep.mubr.f32.mxu0 %v17044_v61  ;;  %7215 = vmatpush1.msra.mxu1 %v17597_v0  ;;  %v17603_v32 = vand.u32 4294901760, %v17602_v40  ;;  %v17613_v40 = vld [vmem:[#allocation28_spill] sm:$0xff] }
 0x2d1   : > { %v2157_v7 = vpop.f32.mrf.mxu0  ;;  %6198 = vmatprep.subr.mxu0 %v17599_v17  ;;  %v3457_v52 = vpop.f32.mrf.mxu1  ;;  %7217 = vmatprep.subr.mxu1 %v17604_v33 }
 0x2d2   : > { %v12850_v31 = vadd.f32 %v3438_v14, %v2157_v7  ;;  %5064 = vmatmul.mubr.f32.gmra.mxu1 %v17601_v57  ;;  %6202 = vmatpush1.msra.mxu0 %v17603_v32  ;;  %v17610_v7 = vld [vmem:[#allocation27_spill] sm:$0xff]  ;;  %v17612_v57 = vld [vmem:[#allocation22_spill] sm:$0xff]  ;;  %v17614_v32 = vand.u32 4294901760, %v17613_v40 }
 0x2d3   : > { %v2166_v23 = vpop.f32.mrf.mxu0  ;;  %3916 = vmatmul.mubr.f32.gmra.mxu0 %v17587_v37  ;;  %5069 = vmatprep.mubr.f32.mxu1 %v17044_v61  ;;  %v3459_v55 = vpop.f32.mrf.mxu1  ;;  %v17609_v37 = vand.u32 4294901760, %v17608_v20 }
 0x2d4   : > { %v12858_v48 = vadd.f32 %v3443_v49, %v2166_v23  ;;  %3921 = vmatprep.mubr.f32.mxu0 %v17044_v61  ;;  %7219 = vmatpush1.msra.mxu1 %v17605_v15  ;;  %v17611_v49 = vand.u32 4294901760, %v17610_v7  ;;  %v17617_v15 = vld [vmem:[#allocation29_spill] sm:$0xff] }
 0x2d5   : > { %v2168_v14 = vpop.f32.mrf.mxu0  ;;  %6206 = vmatprep.subr.mxu0 %v17607_v5  ;;  %v3464_v11 = vpop.f32.mrf.mxu1  ;;  %7221 = vmatprep.subr.mxu1 %v17612_v57  ;;  %v17621_v57 = vld [vmem:[#allocation66_spill] sm:$0xff] }
 0x2d6   : > { %v12865_v51 = vadd.f32 %v3445_v38, %v2168_v14  ;;  %5073 = vmatmul.mubr.f32.gmra.mxu1 %v17609_v37  ;;  %6210 = vmatpush1.msra.mxu0 %v17611_v49  ;;  %v17615_v14 = vld [vmem:[#allocation64_spill] sm:$0xff] }
 0x2d7   : > { %v2177_v0 = vpop.f32.mrf.mxu0  ;;  %3924 = vmatmul.mubr.f32.gmra.mxu0 %v17592_v46  ;;  %5078 = vmatprep.mubr.f32.mxu1 %v17044_v61  ;;  %v3466_v17 = vpop.f32.mrf.mxu1  ;;  %v17616_v46 = vand.u32 4294901760, %v17615_v14  ;;  %v17619_v37 = vld [vmem:[#allocation32_spill] sm:$0xff] }
 0x2d8   : > { %v12873_v63 = vadd.f32 %v3450_v28, %v2177_v0  ;;  %3929 = vmatprep.mubr.f32.mxu0 %v17044_v61  ;;  %7223 = vmatpush1.msra.mxu1 %v17106_v21  ;;  %v17618_v28 = vand.u32 4294901760, %v17617_v15  ;;  %v17620_v7 = vand.u32 4294901760, %v17619_v37  ;;  %v17630_v37 = vand.u32 4294901760, %v9623_v35 }
 0x2d9   : > { %v2179_v38 = vpop.f32.mrf.mxu0  ;;  %6214 = vmatprep.subr.mxu0 %v17614_v32  ;;  %v3471_v33 = vpop.f32.mrf.mxu1  ;;  %7225 = vmatprep.subr.mxu1 %v9527_v4  ;;  %v17625_v32 = vld [vmem:[#allocation34_spill] sm:$0xff] }
 0x2da   : > { %v12880_v23 = vadd.f32 %v3452_v44, %v2179_v38  ;;  %5082 = vmatmul.mubr.f32.gmra.mxu1 %v17616_v46  ;;  %6218 = vmatpush1.msra.mxu0 %v17618_v28  ;;  %v17623_v38 = vld [vmem:[#allocation33_spill] sm:$0xff]  ;;  %v17626_v46 = vand.u32 4294901760, %v17625_v32  ;;  %v17637_v32 = vld [vmem:[#allocation72_spill] sm:$0xff] }
 0x2db   : > { %v2188_v60 = vpop.f32.mrf.mxu0  ;;  %3932 = vmatmul.mubr.f32.gmra.mxu0 %v17600_v41  ;;  %5087 = vmatprep.mubr.f32.mxu1 %v17044_v61  ;;  %v3473_v21 = vpop.f32.mrf.mxu1  ;;  %v17622_v41 = vand.u32 4294901760, %v17621_v57 }
 0x2dc   : > { %v12888_v5 = vadd.f32 %v3457_v52, %v2188_v60  ;;  %3937 = vmatprep.mubr.f32.mxu0 %v17044_v61  ;;  %7227 = vmatpush1.msra.mxu1 %v17114_v19  ;;  %v17624_v52 = vand.u32 4294901760, %v17623_v38  ;;  %v17627_v60 = vld [vmem:[#allocation68_spill] sm:$0xff] }
 0x2dd   : > { %v2190_v44 = vpop.f32.mrf.mxu0  ;;  %6222 = vmatprep.subr.mxu0 %v17620_v7  ;;  %v3478_v0 = vpop.f32.mrf.mxu1  ;;  %7229 = vmatprep.subr.mxu1 %v17118_v9 }
 0x2de   : > { %v12895_v49 = vadd.f32 %v3459_v55, %v2190_v44  ;;  %5091 = vmatmul.mubr.f32.gmra.mxu1 %v17622_v41  ;;  %6226 = vmatpush1.msra.mxu0 %v17624_v52  ;;  %v17631_v41 = vld [vmem:[#allocation70_spill] sm:$0xff] }
 0x2df   : > { %v2199_v40 = vpop.f32.mrf.mxu0  ;;  %3940 = vmatmul.mubr.f32.gmra.mxu0 %v17608_v20  ;;  %5096 = vmatprep.mubr.f32.mxu1 %v17044_v61  ;;  %v3480_v19 = vpop.f32.mrf.mxu1  ;;  %v17628_v20 = vand.u32 4294901760, %v17627_v60  ;;  %v17635_v52 = vld [vmem:[#allocation38_spill] sm:$0xff] }
 0x2e0   : > { %v12903_v4 = vadd.f32 %v3464_v11, %v2199_v40  ;;  %3945 = vmatprep.mubr.f32.mxu0 %v17044_v61  ;;  %7231 = vmatpush1.msra.mxu1 %v17122_v42  ;;  %v17629_v11 = vand.u32 4294901760, %v9610_v2  ;;  %v17636_v40 = vand.u32 4294901760, %v17635_v52 }
 0x2e1   : > { %v2201_v55 = vpop.f32.mrf.mxu0  ;;  %6230 = vmatprep.subr.mxu0 %v17626_v46  ;;  %v3485_v28 = vpop.f32.mrf.mxu1  ;;  %7233 = vmatprep.subr.mxu1 %v9590_v13  ;;  %v17639_v46 = vld [vmem:[#allocation39_spill] sm:$0xff] }
 0x2e2   : > { %v12910_v15 = vadd.f32 %v3466_v17, %v2201_v55  ;;  %5100 = vmatmul.mubr.f32.gmra.mxu1 %v17628_v20  ;;  %6234 = vmatpush1.msra.mxu0 %v17629_v11 }
 0x2e3   : > { %v2210_v44 = vpop.f32.mrf.mxu0  ;;  %3948 = vmatmul.mubr.f32.gmra.mxu0 %v17615_v14  ;;  %5105 = vmatprep.mubr.f32.mxu1 %v17044_v61  ;;  %v3487_v42 = vpop.f32.mrf.mxu1  ;;  %v17632_v14 = vand.u32 4294901760, %v17631_v41 }
 0x2e4   : > { %v12918_v9 = vadd.f32 %v3471_v33, %v2210_v44  ;;  %3953 = vmatprep.mubr.f32.mxu0 %v17044_v61  ;;  %7235 = vmatpush1.msra.mxu1 %v9593_v34  ;;  %v17633_v33 = vand.u32 4294901760, %v9628_v12  ;;  %v17641_v44 = vld [vmem:[#allocation36_spill] sm:$0xff] }
 0x2e5   : > { %v2212_v17 = vpop.f32.mrf.mxu0  ;;  %6238 = vmatprep.subr.mxu0 %v17630_v37  ;;  %v3492_v7 = vpop.f32.mrf.mxu1  ;;  %7237 = vmatprep.subr.mxu1 %v9605_v24 }
 0x2e6   : > { %v12925_v2 = vadd.f32 %v3473_v21, %v2212_v17  ;;  %5109 = vmatmul.mubr.f32.gmra.mxu1 %v17632_v14  ;;  %6242 = vmatpush1.msra.mxu0 %v17633_v33  ;;  %v17634_v21 = vld [vmem:[#allocation35_spill] sm:$0xff]  ;;  %v17642_v17 = vld [vmem:[#allocation37_spill] sm:$0xff]  ;;  %v17644_v33 = vld [vmem:[#allocation74_spill] sm:$0xff] }
 0x2e7   : > { %v2221_v38 = vpop.f32.mrf.mxu0  ;;  %3956 = vmatmul.mubr.f32.gmra.mxu0 %v17621_v57  ;;  %5114 = vmatprep.mubr.f32.mxu1 %v17044_v61  ;;  %v3494_v34 = vpop.f32.mrf.mxu1  ;;  %v17638_v57 = vand.u32 4294901760, %v17637_v32 }
 0x2e8   : > { %v12933_v13 = vadd.f32 %v3478_v0, %v2221_v38  ;;  %3961 = vmatprep.mubr.f32.mxu0 %v17044_v61  ;;  %7239 = vmatpush1.msra.mxu1 %v17634_v21  ;;  %v17640_v0 = vand.u32 4294901760, %v17639_v46  ;;  %v17645_v38 = vand.u32 4294901760, %v17644_v33 }
 0x2e9   : > { %v2223_v35 = vpop.f32.mrf.mxu0  ;;  %6246 = vmatprep.subr.mxu0 %v17636_v40  ;;  %v3499_v55 = vpop.f32.mrf.mxu1  ;;  %7241 = vmatprep.subr.mxu1 %v17641_v44 }
 0x2ea   : > { %v12940_v12 = vadd.f32 %v3480_v19, %v2223_v35  ;;  %5118 = vmatmul.mubr.f32.gmra.mxu1 %v17638_v57  ;;  %6250 = vmatpush1.msra.mxu0 %v17640_v0 }
 0x2eb   : > { %v2232_v20 = vpop.f32.mrf.mxu0  ;;  %3964 = vmatmul.mubr.f32.gmra.mxu0 %v17627_v60  ;;  %5123 = vmatprep.mubr.f32.mxu1 %v17044_v61  ;;  %v3501_v11 = vpop.f32.mrf.mxu1 }
 0x2ec   : > { %v12948_v24 = vadd.f32 %v3485_v28, %v2232_v20  ;;  %3969 = vmatprep.mubr.f32.mxu0 %v17044_v61  ;;  %7243 = vmatpush1.msra.mxu1 %v17642_v17 }
 0x2ed   : > { %v2234_v19 = vpop.f32.mrf.mxu0  ;;  %v3506_v14 = vpop.f32.mrf.mxu1 }
 0x2ee   : > { %v12953_v37 = vadd.f32 %v3487_v42, %v2234_v19  ;;  %5127 = vmatmul.mubr.f32.gmra.mxu1 %v17645_v38  ;;  %v17648_v42 = vld [vmem:[#allocation76_spill] sm:$0xff] }
 0x2ef   : > { %v2243_v35 = vpop.f32.mrf.mxu0  ;;  %3972 = vmatmul.mubr.f32.gmra.mxu0 %v17631_v41  ;;  %5132 = vmatprep.mubr.f32.mxu1 %v17044_v61  ;;  %v3508_v60 = vpop.f32.mrf.mxu1  ;;  %v17649_v57 = vand.u32 4294901760, %v17648_v42 }
 0x2f0   : > { %17643 = vst [vmem:[#allocation8_spill] sm:$0xff] %v12953_v37  ;;  %v12959_v28 = vadd.f32 %v3492_v7, %v2243_v35  ;;  %3977 = vmatprep.mubr.f32.mxu0 %v17044_v61  ;;  %v17786_v37 = vld [vmem:[#allocation141_spill] sm:$0xff] }
 0x2f1   : > { %v2245_v21 = vpop.f32.mrf.mxu0  ;;  %v3513_v40 = vpop.f32.mrf.mxu1 }
 0x2f2   : > { %17646 = vst [vmem:[#allocation9_spill] sm:$0xff] %v12959_v28  ;;  %v12962_v52 = vadd.f32 %v3494_v34, %v2245_v21  ;;  %5136 = vmatmul.mubr.f32.gmra.mxu1 %v17649_v57  ;;  %v17652_v34 = vld [vmem:[#allocation78_spill] sm:$0xff] }
 0x2f3   : > { %v2254_v46 = vpop.f32.mrf.mxu0  ;;  %3980 = vmatmul.mubr.f32.gmra.mxu0 %v17637_v32  ;;  %5141 = vmatprep.mubr.f32.mxu1 %v17044_v61  ;;  %v3515_v0 = vpop.f32.mrf.mxu1  ;;  %v17653_v19 = vand.u32 4294901760, %v17652_v34 }
 0x2f4   : > { %17647 = vst [vmem:[#allocation10_spill] sm:$0xff] %v12962_v52  ;;  %v12968_v41 = vadd.f32 %v3499_v55, %v2254_v46  ;;  %3985 = vmatprep.mubr.f32.mxu0 %v17044_v61 }
 0x2f5   : > { %v2256_v7 = vpop.f32.mrf.mxu0  ;;  %v3520_v44 = vpop.f32.mrf.mxu1 }
 0x2f6   : > { %17650 = vst [vmem:[#allocation12_spill] sm:$0xff] %v12968_v41  ;;  %v12971_v20 = vadd.f32 %v3501_v11, %v2256_v7  ;;  %5145 = vmatmul.mubr.f32.gmra.mxu1 %v17653_v19  ;;  %v17656_v11 = vld [vmem:[#allocation80_spill] sm:$0xff] }
 0x2f7   : > { %v2265_v17 = vpop.f32.mrf.mxu0  ;;  %3988 = vmatmul.mubr.f32.gmra.mxu0 %v17644_v33  ;;  %5150 = vmatprep.mubr.f32.mxu1 %v17044_v61  ;;  %v3522_v38 = vpop.f32.mrf.mxu1  ;;  %v17657_v57 = vand.u32 4294901760, %v17656_v11 }
 0x2f8   : > { %17651 = vst [vmem:[#allocation11_spill] sm:$0xff] %v12971_v20  ;;  %v12977_v32 = vadd.f32 %v3506_v14, %v2265_v17  ;;  %3993 = vmatprep.mubr.f32.mxu0 %v17044_v61 }
 0x2f9   : > { %v2267_v55 = vpop.f32.mrf.mxu0  ;;  %v3527_v21 = vpop.f32.mrf.mxu1 }
 0x2fa   : > { %17654 = vst [vmem:[#allocation13_spill] sm:$0xff] %v12977_v32  ;;  %v12980_v35 = vadd.f32 %v3508_v60, %v2267_v55  ;;  %5154 = vmatmul.mubr.f32.gmra.mxu1 %v17657_v57  ;;  %v17660_v60 = vld [vmem:[#allocation82_spill] sm:$0xff] }
 0x2fb   : > { %v2276_v46 = vpop.f32.mrf.mxu0  ;;  %3996 = vmatmul.mubr.f32.gmra.mxu0 %v17648_v42  ;;  %5159 = vmatprep.mubr.f32.mxu1 %v17044_v61  ;;  %v3529_v7 = vpop.f32.mrf.mxu1  ;;  %v17661_v55 = vand.u32 4294901760, %v17660_v60 }
 0x2fc   : > { %17655 = vst [vmem:[#allocation14_spill] sm:$0xff] %v12980_v35  ;;  %v12986_v33 = vadd.f32 %v3513_v40, %v2276_v46  ;;  %4001 = vmatprep.mubr.f32.mxu0 %v17044_v61 }
 0x2fd   : > { %v2278_v14 = vpop.f32.mrf.mxu0  ;;  %v3534_v17 = vpop.f32.mrf.mxu1 }
 0x2fe   : > { %17658 = vst [vmem:[#allocation50_spill] sm:$0xff] %v12986_v33  ;;  %v12989_v19 = vadd.f32 %v3515_v0, %v2278_v14  ;;  %5163 = vmatmul.mubr.f32.gmra.mxu1 %v17661_v55  ;;  %v17664_v0 = vld [vmem:[#allocation84_spill] sm:$0xff] }
 0x2ff   : > { %v2287_v35 = vpop.f32.mrf.mxu0  ;;  %4004 = vmatmul.mubr.f32.gmra.mxu0 %v17652_v34  ;;  %5168 = vmatprep.mubr.f32.mxu1 %v17044_v61  ;;  %v3536_v57 = vpop.f32.mrf.mxu1  ;;  %v17665_v14 = vand.u32 4294901760, %v17664_v0 }
 0x300   : > { %17659 = vst [vmem:[#allocation52_spill] sm:$0xff] %v12989_v19  ;;  %v12995_v42 = vadd.f32 %v3520_v44, %v2287_v35  ;;  %4009 = vmatprep.mubr.f32.mxu0 %v17044_v61 }
 0x301   : > { %v2289_v40 = vpop.f32.mrf.mxu0  ;;  %v3541_v33 = vpop.f32.mrf.mxu1 }
 0x302   : > { %17662 = vst [vmem:[#allocation54_spill] sm:$0xff] %v12995_v42  ;;  %v12998_v46 = vadd.f32 %v3522_v38, %v2289_v40  ;;  %5172 = vmatmul.mubr.f32.gmra.mxu1 %v17665_v14  ;;  %v17668_v38 = vld [vmem:[#allocation24_spill] sm:$0xff] }
 0x303   : > { %v2298_v19 = vpop.f32.mrf.mxu0  ;;  %4012 = vmatmul.mubr.f32.gmra.mxu0 %v17656_v11  ;;  %5177 = vmatprep.mubr.f32.mxu1 %v17044_v61  ;;  %v3543_v55 = vpop.f32.mrf.mxu1  ;;  %v17669_v40 = vand.u32 4294901760, %v17668_v38 }
 0x304   : > { %17663 = vst [vmem:[#allocation56_spill] sm:$0xff] %v12998_v46  ;;  %v13004_v34 = vadd.f32 %v3527_v21, %v2298_v19  ;;  %4017 = vmatprep.mubr.f32.mxu0 %v17044_v61 }
 0x305   : > { %v2300_v44 = vpop.f32.mrf.mxu0  ;;  %v3548_v42 = vpop.f32.mrf.mxu1 }
 0x306   : > { %17666 = vst [vmem:[#allocation19_spill] sm:$0xff] %v13004_v34  ;;  %v13007_v35 = vadd.f32 %v3529_v7, %v2300_v44  ;;  %5181 = vmatmul.mubr.f32.gmra.mxu1 %v17669_v40  ;;  %v17672_v7 = vld [vmem:[#allocation87_spill] sm:$0xff] }
 0x307   : > { %v2309_v46 = vpop.f32.mrf.mxu0  ;;  %4020 = vmatmul.mubr.f32.gmra.mxu0 %v17660_v60  ;;  %5186 = vmatprep.mubr.f32.mxu1 %v17044_v61  ;;  %v3550_v14 = vpop.f32.mrf.mxu1  ;;  %v17673_v44 = vand.u32 4294901760, %v17672_v7 }
 0x308   : > { %17667 = vst [vmem:[#allocation58_spill] sm:$0xff] %v13007_v35  ;;  %v13013_v11 = vadd.f32 %v3534_v17, %v2309_v46  ;;  %4025 = vmatprep.mubr.f32.mxu0 %v17044_v61 }
 0x309   : > { %v2311_v21 = vpop.f32.mrf.mxu0  ;;  %v3555_v34 = vpop.f32.mrf.mxu1 }
 0x30a   : > { %17670 = vst [vmem:[#allocation20_spill] sm:$0xff] %v13013_v11  ;;  %v13016_v19 = vadd.f32 %v3536_v57, %v2311_v21  ;;  %5190 = vmatmul.mubr.f32.gmra.mxu1 %v17673_v44  ;;  %v17676_v57 = vld [vmem:[#allocation25_spill] sm:$0xff] }
 0x30b   : > { %v2320_v35 = vpop.f32.mrf.mxu0  ;;  %4028 = vmatmul.mubr.f32.gmra.mxu0 %v17664_v0  ;;  %5195 = vmatprep.mubr.f32.mxu1 %v17044_v61  ;;  %v3557_v40 = vpop.f32.mrf.mxu1  ;;  %v17677_v21 = vand.u32 4294901760, %v17676_v57 }
 0x30c   : > { %17671 = vst [vmem:[#allocation15_spill] sm:$0xff] %v13016_v19  ;;  %v13022_v60 = vadd.f32 %v3541_v33, %v2320_v35  ;;  %4033 = vmatprep.mubr.f32.mxu0 %v17044_v61 }
 0x30d   : > { %v2322_v17 = vpop.f32.mrf.mxu0  ;;  %v3562_v11 = vpop.f32.mrf.mxu1 }
 0x30e   : > { %17674 = vst [vmem:[#allocation16_spill] sm:$0xff] %v13022_v60  ;;  %v13025_v46 = vadd.f32 %v3543_v55, %v2322_v17  ;;  %5199 = vmatmul.mubr.f32.gmra.mxu1 %v17677_v21  ;;  %v17680_v55 = vld [vmem:[#allocation30_spill] sm:$0xff] }
 0x30f   : > { %v2331_v19 = vpop.f32.mrf.mxu0  ;;  %4036 = vmatmul.mubr.f32.gmra.mxu0 %v17668_v38  ;;  %5204 = vmatprep.mubr.f32.mxu1 %v17044_v61  ;;  %v3564_v44 = vpop.f32.mrf.mxu1  ;;  %v17681_v17 = vand.u32 4294901760, %v17680_v55 }
 0x310   : > { %17675 = vst [vmem:[#allocation21_spill] sm:$0xff] %v13025_v46  ;;  %v13031_v0 = vadd.f32 %v3548_v42, %v2331_v19  ;;  %4041 = vmatprep.mubr.f32.mxu0 %v17044_v61 }
 0x311   : > { %v2333_v33 = vpop.f32.mrf.mxu0  ;;  %v3569_v60 = vpop.f32.mrf.mxu1 }
 0x312   : > { %17678 = vst [vmem:[#allocation60_spill] sm:$0xff] %v13031_v0  ;;  %v13034_v35 = vadd.f32 %v3550_v14, %v2333_v33  ;;  %5208 = vmatmul.mubr.f32.gmra.mxu1 %v17681_v17  ;;  %v17684_v14 = vld [vmem:[#allocation31_spill] sm:$0xff] }
 0x313   : > { %v2342_v46 = vpop.f32.mrf.mxu0  ;;  %4044 = vmatmul.mubr.f32.gmra.mxu0 %v17672_v7  ;;  %5213 = vmatprep.mubr.f32.mxu1 %v17044_v61  ;;  %v3571_v21 = vpop.f32.mrf.mxu1  ;;  %v17685_v33 = vand.u32 4294901760, %v17684_v14 }
 0x314   : > { %17679 = vst [vmem:[#allocation23_spill] sm:$0xff] %v13034_v35  ;;  %v13040_v38 = vadd.f32 %v3555_v34, %v2342_v46  ;;  %4049 = vmatprep.mubr.f32.mxu0 %v17044_v61 }
 0x315   : > { %v2344_v42 = vpop.f32.mrf.mxu0  ;;  %v3576_v0 = vpop.f32.mrf.mxu1 }
 0x316   : > { %17682 = vst [vmem:[#allocation17_spill] sm:$0xff] %v13040_v38  ;;  %v13043_v19 = vadd.f32 %v3557_v40, %v2344_v42  ;;  %5217 = vmatmul.mubr.f32.gmra.mxu1 %v17685_v33  ;;  %v17688_v40 = vld [vmem:[#allocation92_spill] sm:$0xff] }
 0x317   : > { %v2353_v35 = vpop.f32.mrf.mxu0  ;;  %4052 = vmatmul.mubr.f32.gmra.mxu0 %v17676_v57  ;;  %5222 = vmatprep.mubr.f32.mxu1 %v17044_v61  ;;  %v3578_v17 = vpop.f32.mrf.mxu1  ;;  %v17689_v42 = vand.u32 4294901760, %v17688_v40 }
 0x318   : > { %17683 = vst [vmem:[#allocation18_spill] sm:$0xff] %v13043_v19  ;;  %v13049_v7 = vadd.f32 %v3562_v11, %v2353_v35  ;;  %4057 = vmatprep.mubr.f32.mxu0 %v17044_v61 }
 0x319   : > { %v2355_v34 = vpop.f32.mrf.mxu0  ;;  %v3583_v38 = vpop.f32.mrf.mxu1 }
 0x31a   : > { %17686 = vst [vmem:[#allocation26_spill] sm:$0xff] %v13049_v7  ;;  %v13052_v46 = vadd.f32 %v3564_v44, %v2355_v34  ;;  %5226 = vmatmul.mubr.f32.gmra.mxu1 %v17689_v42  ;;  %v17692_v44 = vld [vmem:[#allocation94_spill] sm:$0xff] }
 0x31b   : > { %v2364_v19 = vpop.f32.mrf.mxu0  ;;  %4060 = vmatmul.mubr.f32.gmra.mxu0 %v17680_v55  ;;  %5231 = vmatprep.mubr.f32.mxu1 %v17044_v61  ;;  %v3585_v33 = vpop.f32.mrf.mxu1  ;;  %v17693_v34 = vand.u32 4294901760, %v17692_v44 }
 0x31c   : > { %17687 = vst [vmem:[#allocation62_spill] sm:$0xff] %v13052_v46  ;;  %v13058_v57 = vadd.f32 %v3569_v60, %v2364_v19  ;;  %4065 = vmatprep.mubr.f32.mxu0 %v17044_v61 }
 0x31d   : > { %v2366_v11 = vpop.f32.mrf.mxu0  ;;  %v3590_v7 = vpop.f32.mrf.mxu1 }
 0x31e   : > { %17690 = vst [vmem:[#allocation27_spill] sm:$0xff] %v13058_v57  ;;  %v13061_v35 = vadd.f32 %v3571_v21, %v2366_v11  ;;  %5235 = vmatmul.mubr.f32.gmra.mxu1 %v17693_v34  ;;  %v17696_v21 = vld [vmem:[#allocation96_spill] sm:$0xff] }
 0x31f   : > { %v2375_v46 = vpop.f32.mrf.mxu0  ;;  %4068 = vmatmul.mubr.f32.gmra.mxu0 %v17684_v14  ;;  %5240 = vmatprep.mubr.f32.mxu1 %v17044_v61  ;;  %v3592_v42 = vpop.f32.mrf.mxu1  ;;  %v17697_v11 = vand.u32 4294901760, %v17696_v21 }
 0x320   : > { %17691 = vst [vmem:[#allocation22_spill] sm:$0xff] %v13061_v35  ;;  %v13067_v55 = vadd.f32 %v3576_v0, %v2375_v46  ;;  %4073 = vmatprep.mubr.f32.mxu0 %v17044_v61 }
 0x321   : > { %v2377_v60 = vpop.f32.mrf.mxu0  ;;  %v3597_v57 = vpop.f32.mrf.mxu1 }
 0x322   : > { %17694 = vst [vmem:[#allocation28_spill] sm:$0xff] %v13067_v55  ;;  %v13070_v19 = vadd.f32 %v3578_v17, %v2377_v60  ;;  %5244 = vmatmul.mubr.f32.gmra.mxu1 %v17697_v11  ;;  %v17700_v17 = vld [vmem:[#allocation98_spill] sm:$0xff] }
 0x323   : > { %v2386_v35 = vpop.f32.mrf.mxu0  ;;  %4076 = vmatmul.mubr.f32.gmra.mxu0 %v17688_v40  ;;  %5249 = vmatprep.mubr.f32.mxu1 %v17044_v61  ;;  %v3599_v34 = vpop.f32.mrf.mxu1  ;;  %v17701_v60 = vand.u32 4294901760, %v17700_v17 }
 0x324   : > { %17695 = vst [vmem:[#allocation64_spill] sm:$0xff] %v13070_v19  ;;  %v13076_v14 = vadd.f32 %v3583_v38, %v2386_v35  ;;  %4081 = vmatprep.mubr.f32.mxu0 %v17044_v61 }
 0x325   : > { %v2388_v0 = vpop.f32.mrf.mxu0  ;;  %v3604_v55 = vpop.f32.mrf.mxu1 }
 0x326   : > { %17698 = vst [vmem:[#allocation29_spill] sm:$0xff] %v13076_v14  ;;  %v13079_v46 = vadd.f32 %v3585_v33, %v2388_v0  ;;  %5253 = vmatmul.mubr.f32.gmra.mxu1 %v17701_v60  ;;  %v17704_v33 = vld [vmem:[#allocation100_spill] sm:$0xff] }
 0x327   : > { %v2397_v19 = vpop.f32.mrf.mxu0  ;;  %4084 = vmatmul.mubr.f32.gmra.mxu0 %v17692_v44  ;;  %5258 = vmatprep.mubr.f32.mxu1 %v17044_v61  ;;  %v3606_v11 = vpop.f32.mrf.mxu1  ;;  %v17705_v0 = vand.u32 4294901760, %v17704_v33 }
 0x328   : > { %17699 = vst [vmem:[#allocation32_spill] sm:$0xff] %v13079_v46  ;;  %v13085_v40 = vadd.f32 %v3590_v7, %v2397_v19  ;;  %4089 = vmatprep.mubr.f32.mxu0 %v17044_v61 }
 0x329   : > { %v2399_v38 = vpop.f32.mrf.mxu0  ;;  %v3611_v14 = vpop.f32.mrf.mxu1 }
 0x32a   : > { %17702 = vst [vmem:[#allocation66_spill] sm:$0xff] %v13085_v40  ;;  %v13088_v35 = vadd.f32 %v3592_v42, %v2399_v38  ;;  %5262 = vmatmul.mubr.f32.gmra.mxu1 %v17705_v0  ;;  %v17708_v42 = vld [vmem:[#allocation102_spill] sm:$0xff] }
 0x32b   : > { %v2408_v46 = vpop.f32.mrf.mxu0  ;;  %4092 = vmatmul.mubr.f32.gmra.mxu0 %v17696_v21  ;;  %5267 = vmatprep.mubr.f32.mxu1 %v17044_v61  ;;  %v3613_v60 = vpop.f32.mrf.mxu1  ;;  %v17709_v38 = vand.u32 4294901760, %v17708_v42 }
 0x32c   : > { %17703 = vst [vmem:[#allocation33_spill] sm:$0xff] %v13088_v35  ;;  %v13094_v44 = vadd.f32 %v3597_v57, %v2408_v46  ;;  %4097 = vmatprep.mubr.f32.mxu0 %v17044_v61 }
 0x32d   : > { %v2410_v7 = vpop.f32.mrf.mxu0  ;;  %v3618_v40 = vpop.f32.mrf.mxu1 }
 0x32e   : > { %17706 = vst [vmem:[#allocation34_spill] sm:$0xff] %v13094_v44  ;;  %v13097_v19 = vadd.f32 %v3599_v34, %v2410_v7  ;;  %5271 = vmatmul.mubr.f32.gmra.mxu1 %v17709_v38  ;;  %v17712_v34 = vld [vmem:[#allocation104_spill] sm:$0xff] }
 0x32f   : > { %v2419_v35 = vpop.f32.mrf.mxu0  ;;  %4100 = vmatmul.mubr.f32.gmra.mxu0 %v17700_v17  ;;  %5276 = vmatprep.mubr.f32.mxu1 %v17044_v61  ;;  %v3620_v0 = vpop.f32.mrf.mxu1  ;;  %v17713_v7 = vand.u32 4294901760, %v17712_v34 }
 0x330   : > { %17707 = vst [vmem:[#allocation68_spill] sm:$0xff] %v13097_v19  ;;  %v13103_v21 = vadd.f32 %v3604_v55, %v2419_v35  ;;  %4105 = vmatprep.mubr.f32.mxu0 %v17044_v61 }
 0x331   : > { %v2421_v57 = vpop.f32.mrf.mxu0  ;;  %v3625_v44 = vpop.f32.mrf.mxu1 }
 0x332   : > { %17710 = vst [vmem:[#allocation70_spill] sm:$0xff] %v13103_v21  ;;  %v13106_v46 = vadd.f32 %v3606_v11, %v2421_v57  ;;  %5280 = vmatmul.mubr.f32.gmra.mxu1 %v17713_v7  ;;  %v17716_v11 = vld [vmem:[#allocation106_spill] sm:$0xff] }
 0x333   : > { %v2430_v19 = vpop.f32.mrf.mxu0  ;;  %4108 = vmatmul.mubr.f32.gmra.mxu0 %v17704_v33  ;;  %5285 = vmatprep.mubr.f32.mxu1 %v17044_v61  ;;  %v3627_v38 = vpop.f32.mrf.mxu1  ;;  %v17717_v57 = vand.u32 4294901760, %v17716_v11 }
 0x334   : > { %17711 = vst [vmem:[#allocation35_spill] sm:$0xff] %v13106_v46  ;;  %v13112_v17 = vadd.f32 %v3611_v14, %v2430_v19  ;;  %4113 = vmatprep.mubr.f32.mxu0 %v17044_v61 }
 0x335   : > { %v2432_v55 = vpop.f32.mrf.mxu0  ;;  %v3632_v21 = vpop.f32.mrf.mxu1 }
 0x336   : > { %17714 = vst [vmem:[#allocation38_spill] sm:$0xff] %v13112_v17  ;;  %v13115_v35 = vadd.f32 %v3613_v60, %v2432_v55  ;;  %5289 = vmatmul.mubr.f32.gmra.mxu1 %v17717_v57  ;;  %v17720_v60 = vld [vmem:[#allocation108_spill] sm:$0xff] }
 0x337   : > { %v2441_v46 = vpop.f32.mrf.mxu0  ;;  %4116 = vmatmul.mubr.f32.gmra.mxu0 %v17708_v42  ;;  %5294 = vmatprep.mubr.f32.mxu1 %v17044_v61  ;;  %v3634_v7 = vpop.f32.mrf.mxu1  ;;  %v17721_v55 = vand.u32 4294901760, %v17720_v60 }
 0x338   : > { %17715 = vst [vmem:[#allocation72_spill] sm:$0xff] %v13115_v35  ;;  %v13121_v33 = vadd.f32 %v3618_v40, %v2441_v46  ;;  %4121 = vmatprep.mubr.f32.mxu0 %v17044_v61 }
 0x339   : > { %v2443_v14 = vpop.f32.mrf.mxu0  ;;  %v3639_v17 = vpop.f32.mrf.mxu1 }
 0x33a   : > { %17718 = vst [vmem:[#allocation39_spill] sm:$0xff] %v13121_v33  ;;  %v13124_v19 = vadd.f32 %v3620_v0, %v2443_v14  ;;  %5298 = vmatmul.mubr.f32.gmra.mxu1 %v17721_v55  ;;  %v17724_v0 = vld [vmem:[#allocation110_spill] sm:$0xff] }
 0x33b   : > { %v2452_v35 = vpop.f32.mrf.mxu0  ;;  %4124 = vmatmul.mubr.f32.gmra.mxu0 %v17712_v34  ;;  %5303 = vmatprep.mubr.f32.mxu1 %v17044_v61  ;;  %v3641_v57 = vpop.f32.mrf.mxu1  ;;  %v17725_v14 = vand.u32 4294901760, %v17724_v0 }
 0x33c   : > { %17719 = vst [vmem:[#allocation36_spill] sm:$0xff] %v13124_v19  ;;  %v13130_v42 = vadd.f32 %v3625_v44, %v2452_v35  ;;  %4129 = vmatprep.mubr.f32.mxu0 %v17044_v61 }
 0x33d   : > { %v2454_v40 = vpop.f32.mrf.mxu0  ;;  %v3646_v33 = vpop.f32.mrf.mxu1 }
 0x33e   : > { %17722 = vst [vmem:[#allocation37_spill] sm:$0xff] %v13130_v42  ;;  %v13133_v46 = vadd.f32 %v3627_v38, %v2454_v40  ;;  %5307 = vmatmul.mubr.f32.gmra.mxu1 %v17725_v14  ;;  %v17728_v38 = vld [vmem:[#allocation112_spill] sm:$0xff] }
 0x33f   : > { %v2463_v19 = vpop.f32.mrf.mxu0  ;;  %4132 = vmatmul.mubr.f32.gmra.mxu0 %v17716_v11  ;;  %5312 = vmatprep.mubr.f32.mxu1 %v17044_v61  ;;  %v3648_v55 = vpop.f32.mrf.mxu1  ;;  %v17729_v40 = vand.u32 4294901760, %v17728_v38 }
 0x340   : > { %17723 = vst [vmem:[#allocation74_spill] sm:$0xff] %v13133_v46  ;;  %v13139_v34 = vadd.f32 %v3632_v21, %v2463_v19  ;;  %4137 = vmatprep.mubr.f32.mxu0 %v17044_v61 }
 0x341   : > { %v2465_v44 = vpop.f32.mrf.mxu0  ;;  %v3653_v42 = vpop.f32.mrf.mxu1 }
 0x342   : > { %17726 = vst [vmem:[#allocation76_spill] sm:$0xff] %v13139_v34  ;;  %v13142_v35 = vadd.f32 %v3634_v7, %v2465_v44  ;;  %5316 = vmatmul.mubr.f32.gmra.mxu1 %v17729_v40  ;;  %v17732_v7 = vld [vmem:[#allocation114_spill] sm:$0xff] }
 0x343   : > { %v2474_v46 = vpop.f32.mrf.mxu0  ;;  %4140 = vmatmul.mubr.f32.gmra.mxu0 %v17720_v60  ;;  %5321 = vmatprep.mubr.f32.mxu1 %v17044_v61  ;;  %v3655_v14 = vpop.f32.mrf.mxu1  ;;  %v17733_v44 = vand.u32 4294901760, %v17732_v7 }
 0x344   : > { %17727 = vst [vmem:[#allocation78_spill] sm:$0xff] %v13142_v35  ;;  %v13148_v11 = vadd.f32 %v3639_v17, %v2474_v46  ;;  %4145 = vmatprep.mubr.f32.mxu0 %v17044_v61 }
 0x345   : > { %v2476_v21 = vpop.f32.mrf.mxu0  ;;  %v3660_v34 = vpop.f32.mrf.mxu1 }
 0x346   : > { %17730 = vst [vmem:[#allocation80_spill] sm:$0xff] %v13148_v11  ;;  %v13151_v19 = vadd.f32 %v3641_v57, %v2476_v21  ;;  %5325 = vmatmul.mubr.f32.gmra.mxu1 %v17733_v44  ;;  %v17736_v57 = vld [vmem:[#allocation116_spill] sm:$0xff] }
 0x347   : > { %v2485_v35 = vpop.f32.mrf.mxu0  ;;  %4148 = vmatmul.mubr.f32.gmra.mxu0 %v17724_v0  ;;  %5330 = vmatprep.mubr.f32.mxu1 %v17044_v61  ;;  %v3662_v40 = vpop.f32.mrf.mxu1  ;;  %v17737_v21 = vand.u32 4294901760, %v17736_v57 }
 0x348   : > { %17731 = vst [vmem:[#allocation82_spill] sm:$0xff] %v13151_v19  ;;  %v13157_v60 = vadd.f32 %v3646_v33, %v2485_v35  ;;  %4153 = vmatprep.mubr.f32.mxu0 %v17044_v61 }
 0x349   : > { %v2487_v17 = vpop.f32.mrf.mxu0  ;;  %v3667_v11 = vpop.f32.mrf.mxu1 }
 0x34a   : > { %17734 = vst [vmem:[#allocation84_spill] sm:$0xff] %v13157_v60  ;;  %v13160_v46 = vadd.f32 %v3648_v55, %v2487_v17  ;;  %5334 = vmatmul.mubr.f32.gmra.mxu1 %v17737_v21  ;;  %v17740_v55 = vld [vmem:[#allocation118_spill] sm:$0xff] }
 0x34b   : > { %v2496_v19 = vpop.f32.mrf.mxu0  ;;  %4156 = vmatmul.mubr.f32.gmra.mxu0 %v17728_v38  ;;  %5339 = vmatprep.mubr.f32.mxu1 %v17044_v61  ;;  %v3669_v44 = vpop.f32.mrf.mxu1  ;;  %v17741_v17 = vand.u32 4294901760, %v17740_v55 }
 0x34c   : > { %17735 = vst [vmem:[#allocation24_spill] sm:$0xff] %v13160_v46  ;;  %v13166_v0 = vadd.f32 %v3653_v42, %v2496_v19  ;;  %4161 = vmatprep.mubr.f32.mxu0 %v17044_v61 }
 0x34d   : > { %v2498_v33 = vpop.f32.mrf.mxu0  ;;  %v3674_v60 = vpop.f32.mrf.mxu1 }
 0x34e   : > { %17738 = vst [vmem:[#allocation87_spill] sm:$0xff] %v13166_v0  ;;  %v13169_v35 = vadd.f32 %v3655_v14, %v2498_v33  ;;  %5343 = vmatmul.mubr.f32.gmra.mxu1 %v17741_v17  ;;  %v17744_v14 = vld [vmem:[#allocation120_spill] sm:$0xff] }
 0x34f   : > { %v2507_v46 = vpop.f32.mrf.mxu0  ;;  %4164 = vmatmul.mubr.f32.gmra.mxu0 %v17732_v7  ;;  %5348 = vmatprep.mubr.f32.mxu1 %v17044_v61  ;;  %v3676_v21 = vpop.f32.mrf.mxu1  ;;  %v17745_v33 = vand.u32 4294901760, %v17744_v14 }
 0x350   : > { %17739 = vst [vmem:[#allocation25_spill] sm:$0xff] %v13169_v35  ;;  %v13175_v38 = vadd.f32 %v3660_v34, %v2507_v46  ;;  %4169 = vmatprep.mubr.f32.mxu0 %v17044_v61 }
 0x351   : > { %v2509_v42 = vpop.f32.mrf.mxu0  ;;  %v3681_v0 = vpop.f32.mrf.mxu1 }
 0x352   : > { %17742 = vst [vmem:[#allocation30_spill] sm:$0xff] %v13175_v38  ;;  %v13178_v19 = vadd.f32 %v3662_v40, %v2509_v42  ;;  %5352 = vmatmul.mubr.f32.gmra.mxu1 %v17745_v33  ;;  %v17748_v40 = vld [vmem:[#allocation122_spill] sm:$0xff] }
 0x353   : > { %v2518_v35 = vpop.f32.mrf.mxu0  ;;  %4172 = vmatmul.mubr.f32.gmra.mxu0 %v17736_v57  ;;  %5357 = vmatprep.mubr.f32.mxu1 %v17044_v61  ;;  %v3683_v17 = vpop.f32.mrf.mxu1  ;;  %v17749_v42 = vand.u32 4294901760, %v17748_v40 }
 0x354   : > { %17743 = vst [vmem:[#allocation31_spill] sm:$0xff] %v13178_v19  ;;  %v13184_v7 = vadd.f32 %v3667_v11, %v2518_v35  ;;  %4177 = vmatprep.mubr.f32.mxu0 %v17044_v61 }
 0x355   : > { %v2520_v34 = vpop.f32.mrf.mxu0  ;;  %v3688_v38 = vpop.f32.mrf.mxu1 }
 0x356   : > { %17746 = vst [vmem:[#allocation92_spill] sm:$0xff] %v13184_v7  ;;  %v13187_v46 = vadd.f32 %v3669_v44, %v2520_v34  ;;  %5361 = vmatmul.mubr.f32.gmra.mxu1 %v17749_v42  ;;  %v17752_v44 = vld [vmem:[#allocation124_spill] sm:$0xff] }
 0x357   : > { %v2529_v19 = vpop.f32.mrf.mxu0  ;;  %4180 = vmatmul.mubr.f32.gmra.mxu0 %v17740_v55  ;;  %5366 = vmatprep.mubr.f32.mxu1 %v17044_v61  ;;  %v3690_v33 = vpop.f32.mrf.mxu1  ;;  %v17753_v34 = vand.u32 4294901760, %v17752_v44 }
 0x358   : > { %17747 = vst [vmem:[#allocation94_spill] sm:$0xff] %v13187_v46  ;;  %v13193_v57 = vadd.f32 %v3674_v60, %v2529_v19  ;;  %4185 = vmatprep.mubr.f32.mxu0 %v17044_v61 }
 0x359   : > { %v2531_v11 = vpop.f32.mrf.mxu0  ;;  %v3695_v7 = vpop.f32.mrf.mxu1 }
 0x35a   : > { %17750 = vst [vmem:[#allocation96_spill] sm:$0xff] %v13193_v57  ;;  %v13196_v35 = vadd.f32 %v3676_v21, %v2531_v11  ;;  %5370 = vmatmul.mubr.f32.gmra.mxu1 %v17753_v34  ;;  %v17756_v21 = vld [vmem:[#allocation126_spill] sm:$0xff] }
 0x35b   : > { %v2540_v46 = vpop.f32.mrf.mxu0  ;;  %4188 = vmatmul.mubr.f32.gmra.mxu0 %v17744_v14  ;;  %5375 = vmatprep.mubr.f32.mxu1 %v17044_v61  ;;  %v3697_v42 = vpop.f32.mrf.mxu1  ;;  %v17757_v11 = vand.u32 4294901760, %v17756_v21 }
 0x35c   : > { %17751 = vst [vmem:[#allocation98_spill] sm:$0xff] %v13196_v35  ;;  %v13202_v55 = vadd.f32 %v3681_v0, %v2540_v46  ;;  %4193 = vmatprep.mubr.f32.mxu0 %v17044_v61 }
 0x35d   : > { %v2542_v60 = vpop.f32.mrf.mxu0  ;;  %v3702_v57 = vpop.f32.mrf.mxu1 }
 0x35e   : > { %17754 = vst [vmem:[#allocation100_spill] sm:$0xff] %v13202_v55  ;;  %v13205_v19 = vadd.f32 %v3683_v17, %v2542_v60  ;;  %5379 = vmatmul.mubr.f32.gmra.mxu1 %v17757_v11  ;;  %v17760_v17 = vld [vmem:[#allocation128_spill] sm:$0xff] }
 0x35f   : > { %v2551_v35 = vpop.f32.mrf.mxu0  ;;  %4196 = vmatmul.mubr.f32.gmra.mxu0 %v17748_v40  ;;  %5384 = vmatprep.mubr.f32.mxu1 %v17044_v61  ;;  %v3704_v34 = vpop.f32.mrf.mxu1  ;;  %v17761_v60 = vand.u32 4294901760, %v17760_v17 }
 0x360   : > { %17755 = vst [vmem:[#allocation102_spill] sm:$0xff] %v13205_v19  ;;  %v13211_v14 = vadd.f32 %v3688_v38, %v2551_v35  ;;  %4201 = vmatprep.mubr.f32.mxu0 %v17044_v61 }
 0x361   : > { %v2553_v0 = vpop.f32.mrf.mxu0  ;;  %v3709_v55 = vpop.f32.mrf.mxu1 }
 0x362   : > { %17758 = vst [vmem:[#allocation104_spill] sm:$0xff] %v13211_v14  ;;  %v13214_v46 = vadd.f32 %v3690_v33, %v2553_v0  ;;  %5388 = vmatmul.mubr.f32.gmra.mxu1 %v17761_v60  ;;  %v17764_v33 = vld [vmem:[#allocation130_spill] sm:$0xff] }
 0x363   : > { %v2562_v19 = vpop.f32.mrf.mxu0  ;;  %4204 = vmatmul.mubr.f32.gmra.mxu0 %v17752_v44  ;;  %5393 = vmatprep.mubr.f32.mxu1 %v17044_v61  ;;  %v3711_v11 = vpop.f32.mrf.mxu1  ;;  %v17765_v0 = vand.u32 4294901760, %v17764_v33 }
 0x364   : > { %17759 = vst [vmem:[#allocation106_spill] sm:$0xff] %v13214_v46  ;;  %v13220_v40 = vadd.f32 %v3695_v7, %v2562_v19  ;;  %4209 = vmatprep.mubr.f32.mxu0 %v17044_v61 }
 0x365   : > { %v2564_v38 = vpop.f32.mrf.mxu0  ;;  %v3716_v14 = vpop.f32.mrf.mxu1 }
 0x366   : > { %17762 = vst [vmem:[#allocation108_spill] sm:$0xff] %v13220_v40  ;;  %v13223_v35 = vadd.f32 %v3697_v42, %v2564_v38  ;;  %5397 = vmatmul.mubr.f32.gmra.mxu1 %v17765_v0  ;;  %v17768_v42 = vld [vmem:[#allocation132_spill] sm:$0xff] }
 0x367   : > { %v2573_v46 = vpop.f32.mrf.mxu0  ;;  %4212 = vmatmul.mubr.f32.gmra.mxu0 %v17756_v21  ;;  %5402 = vmatprep.mubr.f32.mxu1 %v17044_v61  ;;  %v3718_v60 = vpop.f32.mrf.mxu1  ;;  %v17769_v38 = vand.u32 4294901760, %v17768_v42 }
 0x368   : > { %17763 = vst [vmem:[#allocation110_spill] sm:$0xff] %v13223_v35  ;;  %v13229_v44 = vadd.f32 %v3702_v57, %v2573_v46  ;;  %4217 = vmatprep.mubr.f32.mxu0 %v17044_v61 }
 0x369   : > { %v2575_v7 = vpop.f32.mrf.mxu0  ;;  %v4975_v40 = vpop.f32.mrf.mxu1 }
 0x36a   : > { %17766 = vst [vmem:[#allocation112_spill] sm:$0xff] %v13229_v44  ;;  %v13232_v19 = vadd.f32 %v3704_v34, %v2575_v7  ;;  %5406 = vmatmul.mubr.f32.gmra.mxu1 %v17769_v38  ;;  %v17772_v34 = vld [vmem:[#allocation134_spill] sm:$0xff] }
 0x36b   : > { %v2584_v35 = vpop.f32.mrf.mxu0  ;;  %4220 = vmatmul.mubr.f32.gmra.mxu0 %v17760_v17  ;;  %5411 = vmatprep.mubr.f32.mxu1 %v17044_v61  ;;  %v4977_v0 = vpop.f32.mrf.mxu1  ;;  %v17773_v7 = vand.u32 4294901760, %v17772_v34 }
 0x36c   : > { %17767 = vst [vmem:[#allocation114_spill] sm:$0xff] %v13232_v19  ;;  %v13238_v21 = vadd.f32 %v3709_v55, %v2584_v35  ;;  %4225 = vmatprep.mubr.f32.mxu0 %v17044_v61 }
 0x36d   : > { %v2586_v57 = vpop.f32.mrf.mxu0  ;;  %v4984_v44 = vpop.f32.mrf.mxu1 }
 0x36e   : > { %17770 = vst [vmem:[#allocation116_spill] sm:$0xff] %v13238_v21  ;;  %v13241_v46 = vadd.f32 %v3711_v11, %v2586_v57  ;;  %5415 = vmatmul.mubr.f32.gmra.mxu1 %v17773_v7  ;;  %v17776_v11 = vld [vmem:[#allocation136_spill] sm:$0xff] }
 0x36f   : > { %v2595_v19 = vpop.f32.mrf.mxu0  ;;  %4228 = vmatmul.mubr.f32.gmra.mxu0 %v17764_v33  ;;  %5420 = vmatprep.mubr.f32.mxu1 %v17044_v61  ;;  %v4986_v38 = vpop.f32.mrf.mxu1  ;;  %v17777_v57 = vand.u32 4294901760, %v17776_v11  ;;  %v17778_v33 = vld [vmem:[#allocation140_spill] sm:$0xff] }
 0x370   : > { %17771 = vst [vmem:[#allocation118_spill] sm:$0xff] %v13241_v46  ;;  %v13247_v17 = vadd.f32 %v3716_v14, %v2595_v19  ;;  %4233 = vmatprep.mubr.f32.mxu0 %v17044_v61  ;;  %v17779_v19 = vld [vmem:[#allocation142_spill] sm:$0xff] }
 0x371   : > { %v2597_v55 = vpop.f32.mrf.mxu0  ;;  %v4993_v21 = vpop.f32.mrf.mxu1 }
 0x372   : > { %17774 = vst [vmem:[#allocation120_spill] sm:$0xff] %v13247_v17  ;;  %v13250_v35 = vadd.f32 %v3718_v60, %v2597_v55  ;;  %5424 = vmatmul.mubr.f32.gmra.mxu1 %v17777_v57  ;;  %v17780_v60 = vld [vmem:[#allocation138_spill] sm:$0xff] }
 0x373   : > { %v3853_v46 = vpop.f32.mrf.mxu0  ;;  %4236 = vmatmul.mubr.f32.gmra.mxu0 %v17768_v42  ;;  %5429 = vmatprep.mubr.f32.mxu1 %v17044_v61  ;;  %v4995_v32 = vpop.f32.mrf.mxu1  ;;  %v17781_v55 = vand.u32 4294901760, %v17780_v60  ;;  %v17783_v42 = vld [vmem:[#allocation144_spill] sm:$0xff] }
 0x374   : > { %17775 = vst [vmem:[#allocation122_spill] sm:$0xff] %v13250_v35  ;;  %v3854_v7 = vadd.f32 %v3853_v46, %v17778_v33  ;;  %4241 = vmatprep.mubr.f32.mxu0 %v17044_v61 }
 0x375   : > { %v3855_v14 = vpop.f32.mrf.mxu0  ;;  %v5002_v20 = vpop.f32.mrf.mxu1 }
 0x376   : > { %v3856_v17 = vadd.f32 %v3855_v14, %v17779_v19  ;;  %5433 = vmatmul.mubr.f32.gmra.mxu1 %v17781_v55  ;;  %v13261_v35 = vadd.f32 %v4975_v40, %v3854_v7  ;;  %v17785_v14 = vld [vmem:[#allocation146_spill] sm:$0xff]  ;;  %v17787_v55 = vand.u32 4294901760, %v17786_v37 }
 0x377   : > { %v3861_v57 = vpop.f32.mrf.mxu0  ;;  %4244 = vmatmul.mubr.f32.gmra.mxu0 %v17772_v34  ;;  %5438 = vmatprep.mubr.f32.mxu1 %v17044_v61  ;;  %v5004_v46 = vpop.f32.mrf.mxu1  ;;  %v17789_v34 = vld [vmem:[#allocation148_spill] sm:$0xff] }
 0x378   : > { %17782 = vst [vmem:[#allocation124_spill] sm:$0xff] %v13261_v35  ;;  %v3862_v41 = vadd.f32 %v3861_v57, %v17783_v42  ;;  %4249 = vmatprep.mubr.f32.mxu0 %v17044_v61  ;;  %v13267_v33 = vadd.f32 %v4977_v0, %v3856_v17  ;;  %v17792_v35 = vld [vmem:[#allocation145_spill] sm:$0xff] }
 0x379   : > { %v3863_v52 = vpop.f32.mrf.mxu0  ;;  %v5011_v28 = vpop.f32.mrf.mxu1 }
 0x37a   : > { %17784 = vst [vmem:[#allocation126_spill] sm:$0xff] %v13267_v33  ;;  %v3864_v19 = vadd.f32 %v3863_v52, %v17785_v14  ;;  %5442 = vmatmul.mubr.f32.gmra.mxu1 %v17787_v55  ;;  %v13272_v40 = vadd.f32 %v4984_v44, %v3862_v41  ;;  %v17791_v52 = vld [vmem:[#allocation150_spill] sm:$0xff]  ;;  %v17793_v55 = vand.u32 4294901760, %v17792_v35 }
 0x37b   : > { %v3869_v7 = vpop.f32.mrf.mxu0  ;;  %4252 = vmatmul.mubr.f32.gmra.mxu0 %v17776_v11  ;;  %5447 = vmatprep.mubr.f32.mxu1 %v17044_v61  ;;  %v5013_v42 = vpop.f32.mrf.mxu1  ;;  %v17795_v11 = vld [vmem:[#allocation152_spill] sm:$0xff] }
 0x37c   : > { %17788 = vst [vmem:[#allocation128_spill] sm:$0xff] %v13272_v40  ;;  %v3870_v57 = vadd.f32 %v3869_v7, %v17789_v34  ;;  %4257 = vmatprep.mubr.f32.mxu0 %v17044_v61  ;;  %v13278_v0 = vadd.f32 %v4986_v38, %v3864_v19  ;;  %v17798_v40 = vld [vmem:[#allocation149_spill] sm:$0xff] }
 0x37d   : > { %v3871_v17 = vpop.f32.mrf.mxu0 }
 0x37e   : > { %17790 = vst [vmem:[#allocation130_spill] sm:$0xff] %v13278_v0  ;;  %v3872_v14 = vadd.f32 %v3871_v17, %v17791_v52  ;;  %v5020_v33 = vpop.f32.mrf.mxu1  ;;  %5451 = vmatmul.mubr.f32.gmra.mxu1 %v17793_v55  ;;  %v13283_v41 = vadd.f32 %v4993_v21, %v3870_v57  ;;  %v17797_v17 = vld [vmem:[#allocation154_spill] sm:$0xff]  ;;  %v17799_v55 = vand.u32 4294901760, %v17798_v40 }
 0x37f   : > { %v3877_v44 = vpop.f32.mrf.mxu0  ;;  %4260 = vmatmul.mubr.f32.gmra.mxu0 %v17780_v60  ;;  %5456 = vmatprep.mubr.f32.mxu1 %v17044_v61  ;;  %v17801_v60 = vld [vmem:[#allocation156_spill] sm:$0xff] }
 0x380   : > { %17794 = vst [vmem:[#allocation132_spill] sm:$0xff] %v13283_v41  ;;  %v3878_v7 = vadd.f32 %v3877_v44, %v17795_v11  ;;  %v5022_v34 = vpop.f32.mrf.mxu1  ;;  %4265 = vmatprep.mubr.f32.mxu0 %v17044_v61  ;;  %v13289_v38 = vadd.f32 %v4995_v32, %v3872_v14  ;;  %v17804_v41 = vld [vmem:[#allocation153_spill] sm:$0xff] }
 0x381   : > { %v3879_v19 = vpop.f32.mrf.mxu0 }
 0x382   : > { %17796 = vst [vmem:[#allocation134_spill] sm:$0xff] %v13289_v38  ;;  %v3880_v52 = vadd.f32 %v3879_v19, %v17797_v17  ;;  %v5029_v0 = vpop.f32.mrf.mxu1  ;;  %5460 = vmatmul.mubr.f32.gmra.mxu1 %v17799_v55  ;;  %v13294_v21 = vadd.f32 %v5002_v20, %v3878_v7  ;;  %v17803_v19 = vld [vmem:[#allocation158_spill] sm:$0xff]  ;;  %v17805_v55 = vand.u32 4294901760, %v17804_v41 }
 0x383   : > { %v3885_v57 = vpop.f32.mrf.mxu0  ;;  %4268 = vmatmul.mubr.f32.gmra.mxu0 %v17786_v37  ;;  %5465 = vmatprep.mubr.f32.mxu1 %v17044_v61  ;;  %v17807_v37 = vld [vmem:[#allocation160_spill] sm:$0xff] }
 0x384   : > { %17800 = vst [vmem:[#allocation136_spill] sm:$0xff] %v13294_v21  ;;  %v3886_v44 = vadd.f32 %v3885_v57, %v17801_v60  ;;  %v5031_v11 = vpop.f32.mrf.mxu1  ;;  %4273 = vmatprep.mubr.f32.mxu0 %v17044_v61  ;;  %v13300_v32 = vadd.f32 %v5004_v46, %v3880_v52  ;;  %v17810_v21 = vld [vmem:[#allocation157_spill] sm:$0xff] }
 0x385   : > { %v3887_v14 = vpop.f32.mrf.mxu0 }
 0x386   : > { %17802 = vst [vmem:[#allocation140_spill] sm:$0xff] %v13300_v32  ;;  %v3888_v17 = vadd.f32 %v3887_v14, %v17803_v19  ;;  %v5038_v38 = vpop.f32.mrf.mxu1  ;;  %5469 = vmatmul.mubr.f32.gmra.mxu1 %v17805_v55  ;;  %v13305_v20 = vadd.f32 %v5011_v28, %v3886_v44  ;;  %v17809_v14 = vld [vmem:[#allocation162_spill] sm:$0xff]  ;;  %v17811_v55 = vand.u32 4294901760, %v17810_v21 }
 0x387   : > { %v3893_v7 = vpop.f32.mrf.mxu0  ;;  %4276 = vmatmul.mubr.f32.gmra.mxu0 %v17792_v35  ;;  %5474 = vmatprep.mubr.f32.mxu1 %v17044_v61  ;;  %v17813_v35 = vld [vmem:[#allocation164_spill] sm:$0xff] }
 0x388   : > { %17806 = vst [vmem:[#allocation142_spill] sm:$0xff] %v13305_v20  ;;  %v3894_v57 = vadd.f32 %v3893_v7, %v17807_v37  ;;  %v5040_v60 = vpop.f32.mrf.mxu1  ;;  %4281 = vmatprep.mubr.f32.mxu0 %v17044_v61  ;;  %v13311_v46 = vadd.f32 %v5013_v42, %v3888_v17  ;;  %v17816_v20 = vld [vmem:[#allocation161_spill] sm:$0xff] }
 0x389   : > { %v3895_v52 = vpop.f32.mrf.mxu0 }
 0x38a   : > { %17808 = vst [vmem:[#allocation138_spill] sm:$0xff] %v13311_v46  ;;  %v3896_v19 = vadd.f32 %v3895_v52, %v17809_v14  ;;  %v5047_v32 = vpop.f32.mrf.mxu1  ;;  %5478 = vmatmul.mubr.f32.gmra.mxu1 %v17811_v55  ;;  %v13316_v28 = vadd.f32 %v5020_v33, %v3894_v57  ;;  %v17815_v52 = vld [vmem:[#allocation166_spill] sm:$0xff]  ;;  %v17817_v55 = vand.u32 4294901760, %v17816_v20 }
 0x38b   : > { %v3901_v44 = vpop.f32.mrf.mxu0  ;;  %4284 = vmatmul.mubr.f32.gmra.mxu0 %v17798_v40  ;;  %5483 = vmatprep.mubr.f32.mxu1 %v17044_v61  ;;  %v17819_v40 = vld [vmem:[#allocation168_spill] sm:$0xff] }
 0x38c   : > { %17812 = vst [vmem:[#allocation144_spill] sm:$0xff] %v13316_v28  ;;  %v3902_v7 = vadd.f32 %v3901_v44, %v17813_v35  ;;  %v5049_v37 = vpop.f32.mrf.mxu1  ;;  %4289 = vmatprep.mubr.f32.mxu0 %v17044_v61  ;;  %v13322_v42 = vadd.f32 %v5022_v34, %v3896_v19  ;;  %v17822_v28 = vld [vmem:[#allocation165_spill] sm:$0xff] }
 0x38d   : > { %v3903_v17 = vpop.f32.mrf.mxu0 }
 0x38e   : > { %17814 = vst [vmem:[#allocation146_spill] sm:$0xff] %v13322_v42  ;;  %v3904_v14 = vadd.f32 %v3903_v17, %v17815_v52  ;;  %v5056_v46 = vpop.f32.mrf.mxu1  ;;  %5487 = vmatmul.mubr.f32.gmra.mxu1 %v17817_v55  ;;  %v13327_v33 = vadd.f32 %v5029_v0, %v3902_v7  ;;  %v17821_v17 = vld [vmem:[#allocation170_spill] sm:$0xff]  ;;  %v17823_v55 = vand.u32 4294901760, %v17822_v28 }
 0x38f   : > { %v3909_v57 = vpop.f32.mrf.mxu0  ;;  %4292 = vmatmul.mubr.f32.gmra.mxu0 %v17804_v41  ;;  %5492 = vmatprep.mubr.f32.mxu1 %v17044_v61  ;;  %v17825_v41 = vld [vmem:[#allocation172_spill] sm:$0xff] }
 0x390   : > { %17818 = vst [vmem:[#allocation141_spill] sm:$0xff] %v13327_v33  ;;  %v3910_v44 = vadd.f32 %v3909_v57, %v17819_v40  ;;  %v5058_v35 = vpop.f32.mrf.mxu1  ;;  %4297 = vmatprep.mubr.f32.mxu0 %v17044_v61  ;;  %v13333_v34 = vadd.f32 %v5031_v11, %v3904_v14  ;;  %v17828_v33 = vld [vmem:[#allocation169_spill] sm:$0xff] }
 0x391   : > { %v3911_v19 = vpop.f32.mrf.mxu0 }
 0x392   : > { %17820 = vst [vmem:[#allocation148_spill] sm:$0xff] %v13333_v34  ;;  %v3912_v52 = vadd.f32 %v3911_v19, %v17821_v17  ;;  %v5065_v42 = vpop.f32.mrf.mxu1  ;;  %5496 = vmatmul.mubr.f32.gmra.mxu1 %v17823_v55  ;;  %v13338_v0 = vadd.f32 %v5038_v38, %v3910_v44  ;;  %v17827_v19 = vld [vmem:[#allocation174_spill] sm:$0xff]  ;;  %v17829_v55 = vand.u32 4294901760, %v17828_v33 }
 0x393   : > { %v3917_v7 = vpop.f32.mrf.mxu0  ;;  %4300 = vmatmul.mubr.f32.gmra.mxu0 %v17810_v21  ;;  %5501 = vmatprep.mubr.f32.mxu1 %v17044_v61  ;;  %v17831_v21 = vld [vmem:[#allocation176_spill] sm:$0xff] }
 0x394   : > { %17824 = vst [vmem:[#allocation150_spill] sm:$0xff] %v13338_v0  ;;  %v3918_v57 = vadd.f32 %v3917_v7, %v17825_v41  ;;  %v5067_v40 = vpop.f32.mrf.mxu1  ;;  %4305 = vmatprep.mubr.f32.mxu0 %v17044_v61  ;;  %v13344_v11 = vadd.f32 %v5040_v60, %v3912_v52  ;;  %v17834_v0 = vld [vmem:[#allocation173_spill] sm:$0xff] }
 0x395   : > { %v3919_v14 = vpop.f32.mrf.mxu0 }
 0x396   : > { %17826 = vst [vmem:[#allocation145_spill] sm:$0xff] %v13344_v11  ;;  %v3920_v17 = vadd.f32 %v3919_v14, %v17827_v19  ;;  %v5074_v34 = vpop.f32.mrf.mxu1  ;;  %5505 = vmatmul.mubr.f32.gmra.mxu1 %v17829_v55  ;;  %v13349_v38 = vadd.f32 %v5047_v32, %v3918_v57  ;;  %v17833_v14 = vld [vmem:[#allocation178_spill] sm:$0xff]  ;;  %v17835_v55 = vand.u32 4294901760, %v17834_v0 }
 0x397   : > { %v3925_v44 = vpop.f32.mrf.mxu0  ;;  %4308 = vmatmul.mubr.f32.gmra.mxu0 %v17816_v20  ;;  %5510 = vmatprep.mubr.f32.mxu1 %v17044_v61  ;;  %v17837_v20 = vld [vmem:[#allocation180_spill] sm:$0xff] }
 0x398   : > { %17830 = vst [vmem:[#allocation152_spill] sm:$0xff] %v13349_v38  ;;  %v3926_v7 = vadd.f32 %v3925_v44, %v17831_v21  ;;  %v5076_v41 = vpop.f32.mrf.mxu1  ;;  %4313 = vmatprep.mubr.f32.mxu0 %v17044_v61  ;;  %v13355_v60 = vadd.f32 %v5049_v37, %v3920_v17  ;;  %v17840_v38 = vld [vmem:[#allocation177_spill] sm:$0xff] }
 0x399   : > { %v3927_v52 = vpop.f32.mrf.mxu0 }
 0x39a   : > { %17832 = vst [vmem:[#allocation154_spill] sm:$0xff] %v13355_v60  ;;  %v3928_v19 = vadd.f32 %v3927_v52, %v17833_v14  ;;  %v5083_v11 = vpop.f32.mrf.mxu1  ;;  %5514 = vmatmul.mubr.f32.gmra.mxu1 %v17835_v55  ;;  %v13360_v32 = vadd.f32 %v5056_v46, %v3926_v7  ;;  %v17839_v52 = vld [vmem:[#allocation182_spill] sm:$0xff]  ;;  %v17841_v55 = vand.u32 4294901760, %v17840_v38 }
 0x39b   : > { %v3933_v57 = vpop.f32.mrf.mxu0  ;;  %4316 = vmatmul.mubr.f32.gmra.mxu0 %v17822_v28  ;;  %5519 = vmatprep.mubr.f32.mxu1 %v17044_v61  ;;  %v17843_v28 = vld [vmem:[#allocation184_spill] sm:$0xff] }
 0x39c   : > { %17836 = vst [vmem:[#allocation149_spill] sm:$0xff] %v13360_v32  ;;  %v3934_v44 = vadd.f32 %v3933_v57, %v17837_v20  ;;  %v5085_v21 = vpop.f32.mrf.mxu1  ;;  %4321 = vmatprep.mubr.f32.mxu0 %v17044_v61  ;;  %v13366_v37 = vadd.f32 %v5058_v35, %v3928_v19  ;;  %v17846_v32 = vld [vmem:[#allocation181_spill] sm:$0xff] }
 0x39d   : > { %v3935_v17 = vpop.f32.mrf.mxu0 }
 0x39e   : > { %17838 = vst [vmem:[#allocation156_spill] sm:$0xff] %v13366_v37  ;;  %v3936_v14 = vadd.f32 %v3935_v17, %v17839_v52  ;;  %v5092_v60 = vpop.f32.mrf.mxu1  ;;  %5523 = vmatmul.mubr.f32.gmra.mxu1 %v17841_v55  ;;  %v13371_v46 = vadd.f32 %v5065_v42, %v3934_v44  ;;  %v17845_v17 = vld [vmem:[#allocation186_spill] sm:$0xff]  ;;  %v17847_v55 = vand.u32 4294901760, %v17846_v32 }
 0x39f   : > { %v3941_v7 = vpop.f32.mrf.mxu0  ;;  %4324 = vmatmul.mubr.f32.gmra.mxu0 %v17828_v33  ;;  %5528 = vmatprep.mubr.f32.mxu1 %v17044_v61  ;;  %v17849_v33 = vld [vmem:[#allocation188_spill] sm:$0xff] }
 0x3a0   : > { %17842 = vst [vmem:[#allocation158_spill] sm:$0xff] %v13371_v46  ;;  %v3942_v57 = vadd.f32 %v3941_v7, %v17843_v28  ;;  %v5094_v20 = vpop.f32.mrf.mxu1  ;;  %4329 = vmatprep.mubr.f32.mxu0 %v17044_v61  ;;  %v13377_v35 = vadd.f32 %v5067_v40, %v3936_v14  ;;  %v17852_v46 = vld [vmem:[#allocation185_spill] sm:$0xff] }
 0x3a1   : > { %v3943_v19 = vpop.f32.mrf.mxu0 }
 0x3a2   : > { %17844 = vst [vmem:[#allocation153_spill] sm:$0xff] %v13377_v35  ;;  %v3944_v52 = vadd.f32 %v3943_v19, %v17845_v17  ;;  %v5101_v37 = vpop.f32.mrf.mxu1  ;;  %5532 = vmatmul.mubr.f32.gmra.mxu1 %v17847_v55  ;;  %v13382_v42 = vadd.f32 %v5074_v34, %v3942_v57  ;;  %v17851_v19 = vld [vmem:[#allocation190_spill] sm:$0xff]  ;;  %v17853_v55 = vand.u32 4294901760, %v17852_v46 }
 0x3a3   : > { %v3949_v44 = vpop.f32.mrf.mxu0  ;;  %4332 = vmatmul.mubr.f32.gmra.mxu0 %v17834_v0  ;;  %5537 = vmatprep.mubr.f32.mxu1 %v17044_v61  ;;  %v17855_v0 = vld [vmem:[#allocation192_spill] sm:$0xff] }
 0x3a4   : > { %17848 = vst [vmem:[#allocation160_spill] sm:$0xff] %v13382_v42  ;;  %v3950_v7 = vadd.f32 %v3949_v44, %v17849_v33  ;;  %v5103_v28 = vpop.f32.mrf.mxu1  ;;  %4337 = vmatprep.mubr.f32.mxu0 %v17044_v61  ;;  %v13388_v40 = vadd.f32 %v5076_v41, %v3944_v52  ;;  %v17858_v42 = vld [vmem:[#allocation189_spill] sm:$0xff] }
 0x3a5   : > { %v3951_v14 = vpop.f32.mrf.mxu0 }
 0x3a6   : > { %17850 = vst [vmem:[#allocation162_spill] sm:$0xff] %v13388_v40  ;;  %v3952_v17 = vadd.f32 %v3951_v14, %v17851_v19  ;;  %v5110_v35 = vpop.f32.mrf.mxu1  ;;  %5541 = vmatmul.mubr.f32.gmra.mxu1 %v17853_v55  ;;  %v13393_v34 = vadd.f32 %v5083_v11, %v3950_v7  ;;  %v17857_v14 = vld [vmem:[#allocation194_spill] sm:$0xff]  ;;  %v17859_v55 = vand.u32 4294901760, %v17858_v42 }
 0x3a7   : > { %v3957_v57 = vpop.f32.mrf.mxu0  ;;  %4340 = vmatmul.mubr.f32.gmra.mxu0 %v17840_v38  ;;  %5546 = vmatprep.mubr.f32.mxu1 %v17044_v61  ;;  %v17861_v38 = vld [vmem:[#allocation196_spill] sm:$0xff] }
 0x3a8   : > { %17854 = vst [vmem:[#allocation157_spill] sm:$0xff] %v13393_v34  ;;  %v3958_v44 = vadd.f32 %v3957_v57, %v17855_v0  ;;  %v5112_v33 = vpop.f32.mrf.mxu1  ;;  %4345 = vmatprep.mubr.f32.mxu0 %v17044_v61  ;;  %v13399_v41 = vadd.f32 %v5085_v21, %v3952_v17  ;;  %v17864_v34 = vld [vmem:[#allocation193_spill] sm:$0xff] }
 0x3a9   : > { %v3959_v52 = vpop.f32.mrf.mxu0 }
 0x3aa   : > { %17856 = vst [vmem:[#allocation164_spill] sm:$0xff] %v13399_v41  ;;  %v3960_v19 = vadd.f32 %v3959_v52, %v17857_v14  ;;  %v5119_v40 = vpop.f32.mrf.mxu1  ;;  %5550 = vmatmul.mubr.f32.gmra.mxu1 %v17859_v55  ;;  %v13404_v11 = vadd.f32 %v5092_v60, %v3958_v44  ;;  %v17863_v52 = vld [vmem:[#allocation198_spill] sm:$0xff]  ;;  %v17865_v55 = vand.u32 4294901760, %v17864_v34 }
 0x3ab   : > { %v3965_v7 = vpop.f32.mrf.mxu0  ;;  %4348 = vmatmul.mubr.f32.gmra.mxu0 %v17846_v32  ;;  %5555 = vmatprep.mubr.f32.mxu1 %v17044_v61  ;;  %v17867_v32 = vld [vmem:[#allocation200_spill] sm:$0xff] }
 0x3ac   : > { %17860 = vst [vmem:[#allocation166_spill] sm:$0xff] %v13404_v11  ;;  %v3966_v57 = vadd.f32 %v3965_v7, %v17861_v38  ;;  %v5121_v0 = vpop.f32.mrf.mxu1  ;;  %4353 = vmatprep.mubr.f32.mxu0 %v17044_v61  ;;  %v13410_v21 = vadd.f32 %v5094_v20, %v3960_v19  ;;  %v17870_v11 = vld [vmem:[#allocation197_spill] sm:$0xff] }
 0x3ad   : > { %v3967_v17 = vpop.f32.mrf.mxu0 }
 0x3ae   : > { %17862 = vst [vmem:[#allocation161_spill] sm:$0xff] %v13410_v21  ;;  %v3968_v14 = vadd.f32 %v3967_v17, %v17863_v52  ;;  %v5128_v41 = vpop.f32.mrf.mxu1  ;;  %5559 = vmatmul.mubr.f32.gmra.mxu1 %v17865_v55  ;;  %v13415_v60 = vadd.f32 %v5101_v37, %v3966_v57  ;;  %v17869_v17 = vld [vmem:[#allocation202_spill] sm:$0xff]  ;;  %v17871_v55 = vand.u32 4294901760, %v17870_v11 }
 0x3af   : > { %v3973_v44 = vpop.f32.mrf.mxu0  ;;  %4356 = vmatmul.mubr.f32.gmra.mxu0 %v17852_v46  ;;  %5564 = vmatprep.mubr.f32.mxu1 %v17044_v61  ;;  %v17873_v46 = vld [vmem:[#allocation204_spill] sm:$0xff] }
 0x3b0   : > { %17866 = vst [vmem:[#allocation168_spill] sm:$0xff] %v13415_v60  ;;  %v3974_v7 = vadd.f32 %v3973_v44, %v17867_v32  ;;  %v5130_v38 = vpop.f32.mrf.mxu1  ;;  %4361 = vmatprep.mubr.f32.mxu0 %v17044_v61  ;;  %v13421_v20 = vadd.f32 %v5103_v28, %v3968_v14  ;;  %v17876_v60 = vld [vmem:[#allocation201_spill] sm:$0xff] }
 0x3b1   : > { %v3975_v19 = vpop.f32.mrf.mxu0 }
 0x3b2   : > { %17868 = vst [vmem:[#allocation170_spill] sm:$0xff] %v13421_v20  ;;  %v3976_v52 = vadd.f32 %v3975_v19, %v17869_v17  ;;  %v5137_v21 = vpop.f32.mrf.mxu1  ;;  %5568 = vmatmul.mubr.f32.gmra.mxu1 %v17871_v55  ;;  %v13426_v37 = vadd.f32 %v5110_v35, %v3974_v7  ;;  %v17875_v19 = vld [vmem:[#allocation206_spill] sm:$0xff]  ;;  %v17877_v55 = vand.u32 4294901760, %v17876_v60 }
 0x3b3   : > { %v3981_v57 = vpop.f32.mrf.mxu0  ;;  %4364 = vmatmul.mubr.f32.gmra.mxu0 %v17858_v42  ;;  %5573 = vmatprep.mubr.f32.mxu1 %v17044_v61  ;;  %v17879_v42 = vld [vmem:[#allocation208_spill] sm:$0xff] }
 0x3b4   : > { %17872 = vst [vmem:[#allocation165_spill] sm:$0xff] %v13426_v37  ;;  %v3982_v44 = vadd.f32 %v3981_v57, %v17873_v46  ;;  %v5139_v32 = vpop.f32.mrf.mxu1  ;;  %4369 = vmatprep.mubr.f32.mxu0 %v17044_v61  ;;  %v13432_v28 = vadd.f32 %v5112_v33, %v3976_v52  ;;  %v17882_v37 = vld [vmem:[#allocation205_spill] sm:$0xff] }
 0x3b5   : > { %v3983_v14 = vpop.f32.mrf.mxu0 }
 0x3b6   : > { %17874 = vst [vmem:[#allocation172_spill] sm:$0xff] %v13432_v28  ;;  %v3984_v17 = vadd.f32 %v3983_v14, %v17875_v19  ;;  %v5146_v20 = vpop.f32.mrf.mxu1  ;;  %5577 = vmatmul.mubr.f32.gmra.mxu1 %v17877_v55  ;;  %v13437_v35 = vadd.f32 %v5119_v40, %v3982_v44  ;;  %v17881_v14 = vld [vmem:[#allocation210_spill] sm:$0xff]  ;;  %v17883_v55 = vand.u32 4294901760, %v17882_v37 }
 0x3b7   : > { %v3989_v7 = vpop.f32.mrf.mxu0  ;;  %4372 = vmatmul.mubr.f32.gmra.mxu0 %v17864_v34  ;;  %5582 = vmatprep.mubr.f32.mxu1 %v17044_v61  ;;  %v17885_v34 = vld [vmem:[#allocation212_spill] sm:$0xff] }
 0x3b8   : > { %17878 = vst [vmem:[#allocation174_spill] sm:$0xff] %v13437_v35  ;;  %v3990_v57 = vadd.f32 %v3989_v7, %v17879_v42  ;;  %v5148_v46 = vpop.f32.mrf.mxu1  ;;  %4377 = vmatprep.mubr.f32.mxu0 %v17044_v61  ;;  %v13443_v33 = vadd.f32 %v5121_v0, %v3984_v17  ;;  %v17888_v35 = vld [vmem:[#allocation209_spill] sm:$0xff] }
 0x3b9   : > { %v3991_v52 = vpop.f32.mrf.mxu0 }
 0x3ba   : > { %17880 = vst [vmem:[#allocation169_spill] sm:$0xff] %v13443_v33  ;;  %v3992_v19 = vadd.f32 %v3991_v52, %v17881_v14  ;;  %v5155_v28 = vpop.f32.mrf.mxu1  ;;  %5586 = vmatmul.mubr.f32.gmra.mxu1 %v17883_v55  ;;  %v13448_v40 = vadd.f32 %v5128_v41, %v3990_v57  ;;  %v17887_v52 = vld [vmem:[#allocation214_spill] sm:$0xff]  ;;  %v17889_v55 = vand.u32 4294901760, %v17888_v35 }
 0x3bb   : > { %v3997_v44 = vpop.f32.mrf.mxu0  ;;  %4380 = vmatmul.mubr.f32.gmra.mxu0 %v17870_v11  ;;  %5591 = vmatprep.mubr.f32.mxu1 %v17044_v61  ;;  %v17891_v11 = vld [vmem:[#allocation216_spill] sm:$0xff] }
 0x3bc   : > { %17884 = vst [vmem:[#allocation176_spill] sm:$0xff] %v13448_v40  ;;  %v3998_v7 = vadd.f32 %v3997_v44, %v17885_v34  ;;  %v5157_v42 = vpop.f32.mrf.mxu1  ;;  %4385 = vmatprep.mubr.f32.mxu0 %v17044_v61  ;;  %v13454_v0 = vadd.f32 %v5130_v38, %v3992_v19  ;;  %v17894_v40 = vld [vmem:[#allocation213_spill] sm:$0xff] }
 0x3bd   : > { %v3999_v17 = vpop.f32.mrf.mxu0 }
 0x3be   : > { %17886 = vst [vmem:[#allocation178_spill] sm:$0xff] %v13454_v0  ;;  %v4000_v14 = vadd.f32 %v3999_v17, %v17887_v52  ;;  %v5164_v33 = vpop.f32.mrf.mxu1  ;;  %5595 = vmatmul.mubr.f32.gmra.mxu1 %v17889_v55  ;;  %v13459_v41 = vadd.f32 %v5137_v21, %v3998_v7  ;;  %v17893_v17 = vld [vmem:[#allocation218_spill] sm:$0xff]  ;;  %v17895_v55 = vand.u32 4294901760, %v17894_v40 }
 0x3bf   : > { %v4005_v57 = vpop.f32.mrf.mxu0  ;;  %4388 = vmatmul.mubr.f32.gmra.mxu0 %v17876_v60  ;;  %5600 = vmatprep.mubr.f32.mxu1 %v17044_v61  ;;  %v17897_v60 = vld [vmem:[#allocation220_spill] sm:$0xff] }
 0x3c0   : > { %17890 = vst [vmem:[#allocation173_spill] sm:$0xff] %v13459_v41  ;;  %v4006_v44 = vadd.f32 %v4005_v57, %v17891_v11  ;;  %v5166_v34 = vpop.f32.mrf.mxu1  ;;  %4393 = vmatprep.mubr.f32.mxu0 %v17044_v61  ;;  %v13465_v38 = vadd.f32 %v5139_v32, %v4000_v14  ;;  %v17900_v41 = vld [vmem:[#allocation217_spill] sm:$0xff] }
 0x3c1   : > { %v4007_v19 = vpop.f32.mrf.mxu0 }
 0x3c2   : > { %17892 = vst [vmem:[#allocation180_spill] sm:$0xff] %v13465_v38  ;;  %v4008_v52 = vadd.f32 %v4007_v19, %v17893_v17  ;;  %v5173_v0 = vpop.f32.mrf.mxu1  ;;  %5604 = vmatmul.mubr.f32.gmra.mxu1 %v17895_v55  ;;  %v13470_v21 = vadd.f32 %v5146_v20, %v4006_v44  ;;  %v17899_v19 = vld [vmem:[#allocation222_spill] sm:$0xff]  ;;  %v17901_v55 = vand.u32 4294901760, %v17900_v41 }
 0x3c3   : > { %v4013_v7 = vpop.f32.mrf.mxu0  ;;  %4396 = vmatmul.mubr.f32.gmra.mxu0 %v17882_v37  ;;  %5609 = vmatprep.mubr.f32.mxu1 %v17044_v61  ;;  %v17903_v37 = vld [vmem:[#allocation224_spill] sm:$0xff] }
 0x3c4   : > { %17896 = vst [vmem:[#allocation182_spill] sm:$0xff] %v13470_v21  ;;  %v4014_v57 = vadd.f32 %v4013_v7, %v17897_v60  ;;  %v5175_v11 = vpop.f32.mrf.mxu1  ;;  %4401 = vmatprep.mubr.f32.mxu0 %v17044_v61  ;;  %v13476_v32 = vadd.f32 %v5148_v46, %v4008_v52  ;;  %v17906_v21 = vld [vmem:[#allocation221_spill] sm:$0xff] }
 0x3c5   : > { %v4015_v14 = vpop.f32.mrf.mxu0 }
 0x3c6   : > { %17898 = vst [vmem:[#allocation177_spill] sm:$0xff] %v13476_v32  ;;  %v4016_v17 = vadd.f32 %v4015_v14, %v17899_v19  ;;  %v5182_v38 = vpop.f32.mrf.mxu1  ;;  %5613 = vmatmul.mubr.f32.gmra.mxu1 %v17901_v55  ;;  %v13481_v20 = vadd.f32 %v5155_v28, %v4014_v57  ;;  %v17905_v14 = vld [vmem:[#allocation226_spill] sm:$0xff]  ;;  %v17907_v55 = vand.u32 4294901760, %v17906_v21 }
 0x3c7   : > { %v4021_v44 = vpop.f32.mrf.mxu0  ;;  %4404 = vmatmul.mubr.f32.gmra.mxu0 %v17888_v35  ;;  %5618 = vmatprep.mubr.f32.mxu1 %v17044_v61  ;;  %v17909_v35 = vld [vmem:[#allocation228_spill] sm:$0xff] }
 0x3c8   : > { %17902 = vst [vmem:[#allocation184_spill] sm:$0xff] %v13481_v20  ;;  %v4022_v7 = vadd.f32 %v4021_v44, %v17903_v37  ;;  %v5184_v60 = vpop.f32.mrf.mxu1  ;;  %4409 = vmatprep.mubr.f32.mxu0 %v17044_v61  ;;  %v13487_v46 = vadd.f32 %v5157_v42, %v4016_v17  ;;  %v17912_v20 = vld [vmem:[#allocation225_spill] sm:$0xff] }
 0x3c9   : > { %v4023_v52 = vpop.f32.mrf.mxu0 }
 0x3ca   : > { %17904 = vst [vmem:[#allocation186_spill] sm:$0xff] %v13487_v46  ;;  %v4024_v19 = vadd.f32 %v4023_v52, %v17905_v14  ;;  %v5191_v32 = vpop.f32.mrf.mxu1  ;;  %5622 = vmatmul.mubr.f32.gmra.mxu1 %v17907_v55  ;;  %v13492_v28 = vadd.f32 %v5164_v33, %v4022_v7  ;;  %v17911_v52 = vld [vmem:[#allocation230_spill] sm:$0xff]  ;;  %v17913_v55 = vand.u32 4294901760, %v17912_v20 }
 0x3cb   : > { %v4029_v57 = vpop.f32.mrf.mxu0  ;;  %4412 = vmatmul.mubr.f32.gmra.mxu0 %v17894_v40  ;;  %5627 = vmatprep.mubr.f32.mxu1 %v17044_v61  ;;  %v17915_v40 = vld [vmem:[#allocation232_spill] sm:$0xff] }
 0x3cc   : > { %17908 = vst [vmem:[#allocation181_spill] sm:$0xff] %v13492_v28  ;;  %v4030_v44 = vadd.f32 %v4029_v57, %v17909_v35  ;;  %v5193_v37 = vpop.f32.mrf.mxu1  ;;  %4417 = vmatprep.mubr.f32.mxu0 %v17044_v61  ;;  %v13498_v42 = vadd.f32 %v5166_v34, %v4024_v19  ;;  %v17918_v28 = vld [vmem:[#allocation229_spill] sm:$0xff] }
 0x3cd   : > { %v4031_v17 = vpop.f32.mrf.mxu0 }
 0x3ce   : > { %17910 = vst [vmem:[#allocation188_spill] sm:$0xff] %v13498_v42  ;;  %v4032_v14 = vadd.f32 %v4031_v17, %v17911_v52  ;;  %v5200_v46 = vpop.f32.mrf.mxu1  ;;  %5631 = vmatmul.mubr.f32.gmra.mxu1 %v17913_v55  ;;  %v13503_v33 = vadd.f32 %v5173_v0, %v4030_v44  ;;  %v17917_v17 = vld [vmem:[#allocation234_spill] sm:$0xff]  ;;  %v17919_v55 = vand.u32 4294901760, %v17918_v28 }
 0x3cf   : > { %v4037_v7 = vpop.f32.mrf.mxu0  ;;  %4420 = vmatmul.mubr.f32.gmra.mxu0 %v17900_v41  ;;  %5636 = vmatprep.mubr.f32.mxu1 %v17044_v61  ;;  %v17921_v41 = vld [vmem:[#allocation236_spill] sm:$0xff] }
 0x3d0   : > { %17914 = vst [vmem:[#allocation190_spill] sm:$0xff] %v13503_v33  ;;  %v4038_v57 = vadd.f32 %v4037_v7, %v17915_v40  ;;  %v5202_v35 = vpop.f32.mrf.mxu1  ;;  %4425 = vmatprep.mubr.f32.mxu0 %v17044_v61  ;;  %v13509_v34 = vadd.f32 %v5175_v11, %v4032_v14  ;;  %v17924_v33 = vld [vmem:[#allocation233_spill] sm:$0xff] }
 0x3d1   : > { %v4039_v19 = vpop.f32.mrf.mxu0 }
 0x3d2   : > { %17916 = vst [vmem:[#allocation185_spill] sm:$0xff] %v13509_v34  ;;  %v4040_v52 = vadd.f32 %v4039_v19, %v17917_v17  ;;  %v5209_v42 = vpop.f32.mrf.mxu1  ;;  %5640 = vmatmul.mubr.f32.gmra.mxu1 %v17919_v55  ;;  %v13514_v0 = vadd.f32 %v5182_v38, %v4038_v57  ;;  %v17923_v19 = vld [vmem:[#allocation238_spill] sm:$0xff]  ;;  %v17925_v55 = vand.u32 4294901760, %v17924_v33 }
 0x3d3   : > { %v4045_v44 = vpop.f32.mrf.mxu0  ;;  %4428 = vmatmul.mubr.f32.gmra.mxu0 %v17906_v21  ;;  %5645 = vmatprep.mubr.f32.mxu1 %v17044_v61  ;;  %v17927_v21 = vld [vmem:[#allocation240_spill] sm:$0xff] }
 0x3d4   : > { %17920 = vst [vmem:[#allocation192_spill] sm:$0xff] %v13514_v0  ;;  %v4046_v7 = vadd.f32 %v4045_v44, %v17921_v41  ;;  %v5211_v40 = vpop.f32.mrf.mxu1  ;;  %4433 = vmatprep.mubr.f32.mxu0 %v17044_v61  ;;  %v13520_v11 = vadd.f32 %v5184_v60, %v4040_v52  ;;  %v17930_v0 = vld [vmem:[#allocation237_spill] sm:$0xff] }
 0x3d5   : > { %v4047_v14 = vpop.f32.mrf.mxu0 }
 0x3d6   : > { %17922 = vst [vmem:[#allocation194_spill] sm:$0xff] %v13520_v11  ;;  %v4048_v17 = vadd.f32 %v4047_v14, %v17923_v19  ;;  %v5218_v34 = vpop.f32.mrf.mxu1  ;;  %5649 = vmatmul.mubr.f32.gmra.mxu1 %v17925_v55  ;;  %v13525_v38 = vadd.f32 %v5191_v32, %v4046_v7  ;;  %v17929_v14 = vld [vmem:[#allocation242_spill] sm:$0xff]  ;;  %v17931_v55 = vand.u32 4294901760, %v17930_v0 }
 0x3d7   : > { %v4053_v57 = vpop.f32.mrf.mxu0  ;;  %4436 = vmatmul.mubr.f32.gmra.mxu0 %v17912_v20  ;;  %5654 = vmatprep.mubr.f32.mxu1 %v17044_v61  ;;  %v17933_v20 = vld [vmem:[#allocation244_spill] sm:$0xff] }
 0x3d8   : > { %17926 = vst [vmem:[#allocation189_spill] sm:$0xff] %v13525_v38  ;;  %v4054_v44 = vadd.f32 %v4053_v57, %v17927_v21  ;;  %v5220_v41 = vpop.f32.mrf.mxu1  ;;  %4441 = vmatprep.mubr.f32.mxu0 %v17044_v61  ;;  %v13531_v60 = vadd.f32 %v5193_v37, %v4048_v17  ;;  %v17936_v38 = vld [vmem:[#allocation241_spill] sm:$0xff] }
 0x3d9   : > { %v4055_v52 = vpop.f32.mrf.mxu0 }
 0x3da   : > { %17928 = vst [vmem:[#allocation196_spill] sm:$0xff] %v13531_v60  ;;  %v4056_v19 = vadd.f32 %v4055_v52, %v17929_v14  ;;  %v5227_v11 = vpop.f32.mrf.mxu1  ;;  %5658 = vmatmul.mubr.f32.gmra.mxu1 %v17931_v55  ;;  %v13536_v32 = vadd.f32 %v5200_v46, %v4054_v44  ;;  %v17935_v52 = vld [vmem:[#allocation246_spill] sm:$0xff]  ;;  %v17937_v55 = vand.u32 4294901760, %v17936_v38 }
 0x3db   : > { %v4061_v7 = vpop.f32.mrf.mxu0  ;;  %4444 = vmatmul.mubr.f32.gmra.mxu0 %v17918_v28  ;;  %5663 = vmatprep.mubr.f32.mxu1 %v17044_v61  ;;  %v17939_v28 = vld [vmem:[#allocation248_spill] sm:$0xff] }
 0x3dc   : > { %17932 = vst [vmem:[#allocation198_spill] sm:$0xff] %v13536_v32  ;;  %v4062_v57 = vadd.f32 %v4061_v7, %v17933_v20  ;;  %v5229_v21 = vpop.f32.mrf.mxu1  ;;  %4449 = vmatprep.mubr.f32.mxu0 %v17044_v61  ;;  %v13542_v37 = vadd.f32 %v5202_v35, %v4056_v19  ;;  %v17942_v32 = vld [vmem:[#allocation245_spill] sm:$0xff] }
 0x3dd   : > { %v4063_v17 = vpop.f32.mrf.mxu0 }
 0x3de   : > { %17934 = vst [vmem:[#allocation193_spill] sm:$0xff] %v13542_v37  ;;  %v4064_v14 = vadd.f32 %v4063_v17, %v17935_v52  ;;  %v5236_v60 = vpop.f32.mrf.mxu1  ;;  %5667 = vmatmul.mubr.f32.gmra.mxu1 %v17937_v55  ;;  %v13547_v46 = vadd.f32 %v5209_v42, %v4062_v57  ;;  %v17941_v17 = vld [vmem:[#allocation250_spill] sm:$0xff]  ;;  %v17943_v55 = vand.u32 4294901760, %v17942_v32 }
 0x3df   : > { %v4069_v44 = vpop.f32.mrf.mxu0  ;;  %4452 = vmatmul.mubr.f32.gmra.mxu0 %v17924_v33  ;;  %5672 = vmatprep.mubr.f32.mxu1 %v17044_v61  ;;  %v17945_v33 = vld [vmem:[#allocation252_spill] sm:$0xff] }
 0x3e0   : > { %17938 = vst [vmem:[#allocation200_spill] sm:$0xff] %v13547_v46  ;;  %v4070_v7 = vadd.f32 %v4069_v44, %v17939_v28  ;;  %v5238_v20 = vpop.f32.mrf.mxu1  ;;  %4457 = vmatprep.mubr.f32.mxu0 %v17044_v61  ;;  %v13553_v35 = vadd.f32 %v5211_v40, %v4064_v14  ;;  %v17948_v46 = vld [vmem:[#allocation249_spill] sm:$0xff] }
 0x3e1   : > { %v4071_v19 = vpop.f32.mrf.mxu0 }
 0x3e2   : > { %17940 = vst [vmem:[#allocation202_spill] sm:$0xff] %v13553_v35  ;;  %v4072_v52 = vadd.f32 %v4071_v19, %v17941_v17  ;;  %v5245_v37 = vpop.f32.mrf.mxu1  ;;  %5676 = vmatmul.mubr.f32.gmra.mxu1 %v17943_v55  ;;  %v13558_v42 = vadd.f32 %v5218_v34, %v4070_v7  ;;  %v17947_v19 = vld [vmem:[#allocation254_spill] sm:$0xff]  ;;  %v17949_v55 = vand.u32 4294901760, %v17948_v46 }
 0x3e3   : > { %v4077_v57 = vpop.f32.mrf.mxu0  ;;  %4460 = vmatmul.mubr.f32.gmra.mxu0 %v17930_v0  ;;  %5681 = vmatprep.mubr.f32.mxu1 %v17044_v61  ;;  %v17951_v0 = vld [vmem:[#allocation256_spill] sm:$0xff] }
 0x3e4   : > { %17944 = vst [vmem:[#allocation197_spill] sm:$0xff] %v13558_v42  ;;  %v4078_v44 = vadd.f32 %v4077_v57, %v17945_v33  ;;  %v5247_v28 = vpop.f32.mrf.mxu1  ;;  %4465 = vmatprep.mubr.f32.mxu0 %v17044_v61  ;;  %v13564_v40 = vadd.f32 %v5220_v41, %v4072_v52  ;;  %v17954_v42 = vld [vmem:[#allocation253_spill] sm:$0xff] }
 0x3e5   : > { %v4079_v14 = vpop.f32.mrf.mxu0 }
 0x3e6   : > { %17946 = vst [vmem:[#allocation204_spill] sm:$0xff] %v13564_v40  ;;  %v4080_v17 = vadd.f32 %v4079_v14, %v17947_v19  ;;  %v5254_v35 = vpop.f32.mrf.mxu1  ;;  %5685 = vmatmul.mubr.f32.gmra.mxu1 %v17949_v55  ;;  %v13569_v34 = vadd.f32 %v5227_v11, %v4078_v44  ;;  %v17953_v14 = vld [vmem:[#allocation258_spill] sm:$0xff]  ;;  %v17955_v55 = vand.u32 4294901760, %v17954_v42 }
 0x3e7   : > { %v4085_v7 = vpop.f32.mrf.mxu0  ;;  %4468 = vmatmul.mubr.f32.gmra.mxu0 %v17936_v38  ;;  %5690 = vmatprep.mubr.f32.mxu1 %v17044_v61  ;;  %v17957_v38 = vld [vmem:[#allocation260_spill] sm:$0xff] }
 0x3e8   : > { %17950 = vst [vmem:[#allocation206_spill] sm:$0xff] %v13569_v34  ;;  %v4086_v57 = vadd.f32 %v4085_v7, %v17951_v0  ;;  %v5256_v33 = vpop.f32.mrf.mxu1  ;;  %4473 = vmatprep.mubr.f32.mxu0 %v17044_v61  ;;  %v13575_v41 = vadd.f32 %v5229_v21, %v4080_v17  ;;  %v17960_v34 = vld [vmem:[#allocation257_spill] sm:$0xff] }
 0x3e9   : > { %v4087_v52 = vpop.f32.mrf.mxu0 }
 0x3ea   : > { %17952 = vst [vmem:[#allocation201_spill] sm:$0xff] %v13575_v41  ;;  %v4088_v19 = vadd.f32 %v4087_v52, %v17953_v14  ;;  %v5263_v40 = vpop.f32.mrf.mxu1  ;;  %5694 = vmatmul.mubr.f32.gmra.mxu1 %v17955_v55  ;;  %v13580_v11 = vadd.f32 %v5236_v60, %v4086_v57  ;;  %v17959_v52 = vld [vmem:[#allocation262_spill] sm:$0xff]  ;;  %v17961_v55 = vand.u32 4294901760, %v17960_v34 }
 0x3eb   : > { %v4093_v44 = vpop.f32.mrf.mxu0  ;;  %4476 = vmatmul.mubr.f32.gmra.mxu0 %v17942_v32  ;;  %5699 = vmatprep.mubr.f32.mxu1 %v17044_v61  ;;  %v17963_v32 = vld [vmem:[#allocation264_spill] sm:$0xff] }
 0x3ec   : > { %17956 = vst [vmem:[#allocation208_spill] sm:$0xff] %v13580_v11  ;;  %v4094_v7 = vadd.f32 %v4093_v44, %v17957_v38  ;;  %v5265_v0 = vpop.f32.mrf.mxu1  ;;  %4481 = vmatprep.mubr.f32.mxu0 %v17044_v61  ;;  %v13586_v21 = vadd.f32 %v5238_v20, %v4088_v19  ;;  %v17966_v11 = vld [vmem:[#allocation261_spill] sm:$0xff] }
 0x3ed   : > { %v4095_v17 = vpop.f32.mrf.mxu0 }
 0x3ee   : > { %17958 = vst [vmem:[#allocation210_spill] sm:$0xff] %v13586_v21  ;;  %v4096_v14 = vadd.f32 %v4095_v17, %v17959_v52  ;;  %v5272_v41 = vpop.f32.mrf.mxu1  ;;  %5703 = vmatmul.mubr.f32.gmra.mxu1 %v17961_v55  ;;  %v13591_v60 = vadd.f32 %v5245_v37, %v4094_v7  ;;  %v17965_v17 = vld [vmem:[#allocation266_spill] sm:$0xff]  ;;  %v17967_v55 = vand.u32 4294901760, %v17966_v11 }
 0x3ef   : > { %v4101_v57 = vpop.f32.mrf.mxu0  ;;  %4484 = vmatmul.mubr.f32.gmra.mxu0 %v17948_v46  ;;  %5708 = vmatprep.mubr.f32.mxu1 %v17044_v61  ;;  %v17969_v46 = vld [vmem:[#allocation268_spill] sm:$0xff] }
 0x3f0   : > { %17962 = vst [vmem:[#allocation205_spill] sm:$0xff] %v13591_v60  ;;  %v4102_v44 = vadd.f32 %v4101_v57, %v17963_v32  ;;  %v5274_v38 = vpop.f32.mrf.mxu1  ;;  %4489 = vmatprep.mubr.f32.mxu0 %v17044_v61  ;;  %v13597_v20 = vadd.f32 %v5247_v28, %v4096_v14  ;;  %v17972_v60 = vld [vmem:[#allocation265_spill] sm:$0xff] }
 0x3f1   : > { %v4103_v19 = vpop.f32.mrf.mxu0 }
 0x3f2   : > { %17964 = vst [vmem:[#allocation212_spill] sm:$0xff] %v13597_v20  ;;  %v4104_v52 = vadd.f32 %v4103_v19, %v17965_v17  ;;  %v5281_v21 = vpop.f32.mrf.mxu1  ;;  %5712 = vmatmul.mubr.f32.gmra.mxu1 %v17967_v55  ;;  %v13602_v37 = vadd.f32 %v5254_v35, %v4102_v44  ;;  %v17971_v19 = vld [vmem:[#allocation270_spill] sm:$0xff]  ;;  %v17973_v55 = vand.u32 4294901760, %v17972_v60 }
 0x3f3   : > { %v4109_v7 = vpop.f32.mrf.mxu0  ;;  %4492 = vmatmul.mubr.f32.gmra.mxu0 %v17954_v42  ;;  %5717 = vmatprep.mubr.f32.mxu1 %v17044_v61  ;;  %v17975_v42 = vld [vmem:[#allocation272_spill] sm:$0xff] }
 0x3f4   : > { %17968 = vst [vmem:[#allocation214_spill] sm:$0xff] %v13602_v37  ;;  %v4110_v57 = vadd.f32 %v4109_v7, %v17969_v46  ;;  %v5283_v32 = vpop.f32.mrf.mxu1  ;;  %4497 = vmatprep.mubr.f32.mxu0 %v17044_v61  ;;  %v13608_v28 = vadd.f32 %v5256_v33, %v4104_v52  ;;  %v17978_v37 = vld [vmem:[#allocation269_spill] sm:$0xff] }
 0x3f5   : > { %v4111_v14 = vpop.f32.mrf.mxu0 }
 0x3f6   : > { %17970 = vst [vmem:[#allocation209_spill] sm:$0xff] %v13608_v28  ;;  %v4112_v17 = vadd.f32 %v4111_v14, %v17971_v19  ;;  %v5290_v20 = vpop.f32.mrf.mxu1  ;;  %5721 = vmatmul.mubr.f32.gmra.mxu1 %v17973_v55  ;;  %v13613_v35 = vadd.f32 %v5263_v40, %v4110_v57  ;;  %v17977_v14 = vld [vmem:[#allocation274_spill] sm:$0xff]  ;;  %v17979_v55 = vand.u32 4294901760, %v17978_v37 }
 0x3f7   : > { %v4117_v44 = vpop.f32.mrf.mxu0  ;;  %4500 = vmatmul.mubr.f32.gmra.mxu0 %v17960_v34  ;;  %5726 = vmatprep.mubr.f32.mxu1 %v17044_v61  ;;  %v17981_v34 = vld [vmem:[#allocation276_spill] sm:$0xff] }
 0x3f8   : > { %17974 = vst [vmem:[#allocation216_spill] sm:$0xff] %v13613_v35  ;;  %v4118_v7 = vadd.f32 %v4117_v44, %v17975_v42  ;;  %v5292_v46 = vpop.f32.mrf.mxu1  ;;  %4505 = vmatprep.mubr.f32.mxu0 %v17044_v61  ;;  %v13619_v33 = vadd.f32 %v5265_v0, %v4112_v17  ;;  %v17984_v35 = vld [vmem:[#allocation273_spill] sm:$0xff] }
 0x3f9   : > { %v4119_v52 = vpop.f32.mrf.mxu0 }
 0x3fa   : > { %17976 = vst [vmem:[#allocation218_spill] sm:$0xff] %v13619_v33  ;;  %v4120_v19 = vadd.f32 %v4119_v52, %v17977_v14  ;;  %v5299_v28 = vpop.f32.mrf.mxu1  ;;  %5730 = vmatmul.mubr.f32.gmra.mxu1 %v17979_v55  ;;  %v13624_v40 = vadd.f32 %v5272_v41, %v4118_v7  ;;  %v17983_v52 = vld [vmem:[#allocation278_spill] sm:$0xff]  ;;  %v17985_v55 = vand.u32 4294901760, %v17984_v35 }
 0x3fb   : > { %v4125_v57 = vpop.f32.mrf.mxu0  ;;  %4508 = vmatmul.mubr.f32.gmra.mxu0 %v17966_v11  ;;  %5735 = vmatprep.mubr.f32.mxu1 %v17044_v61  ;;  %v17987_v11 = vld [vmem:[#allocation280_spill] sm:$0xff] }
 0x3fc   : > { %17980 = vst [vmem:[#allocation213_spill] sm:$0xff] %v13624_v40  ;;  %v4126_v44 = vadd.f32 %v4125_v57, %v17981_v34  ;;  %v5301_v42 = vpop.f32.mrf.mxu1  ;;  %4513 = vmatprep.mubr.f32.mxu0 %v17044_v61  ;;  %v13630_v0 = vadd.f32 %v5274_v38, %v4120_v19  ;;  %v17990_v40 = vld [vmem:[#allocation277_spill] sm:$0xff] }
 0x3fd   : > { %v4127_v17 = vpop.f32.mrf.mxu0 }
 0x3fe   : > { %17982 = vst [vmem:[#allocation220_spill] sm:$0xff] %v13630_v0  ;;  %v4128_v14 = vadd.f32 %v4127_v17, %v17983_v52  ;;  %v5308_v33 = vpop.f32.mrf.mxu1  ;;  %5739 = vmatmul.mubr.f32.gmra.mxu1 %v17985_v55  ;;  %v13635_v41 = vadd.f32 %v5281_v21, %v4126_v44  ;;  %v17989_v17 = vld [vmem:[#allocation282_spill] sm:$0xff]  ;;  %v17991_v55 = vand.u32 4294901760, %v17990_v40 }
 0x3ff   : > { %v4133_v7 = vpop.f32.mrf.mxu0  ;;  %4516 = vmatmul.mubr.f32.gmra.mxu0 %v17972_v60  ;;  %5744 = vmatprep.mubr.f32.mxu1 %v17044_v61  ;;  %v17993_v60 = vld [vmem:[#allocation284_spill] sm:$0xff] }
 0x400   : > { %17986 = vst [vmem:[#allocation222_spill] sm:$0xff] %v13635_v41  ;;  %v4134_v57 = vadd.f32 %v4133_v7, %v17987_v11  ;;  %v5310_v34 = vpop.f32.mrf.mxu1  ;;  %4521 = vmatprep.mubr.f32.mxu0 %v17044_v61  ;;  %v13641_v38 = vadd.f32 %v5283_v32, %v4128_v14  ;;  %v17996_v41 = vld [vmem:[#allocation281_spill] sm:$0xff] }
 0x401   : > { %v4135_v19 = vpop.f32.mrf.mxu0 }
 0x402   : > { %17988 = vst [vmem:[#allocation217_spill] sm:$0xff] %v13641_v38  ;;  %v4136_v52 = vadd.f32 %v4135_v19, %v17989_v17  ;;  %v5317_v0 = vpop.f32.mrf.mxu1  ;;  %5748 = vmatmul.mubr.f32.gmra.mxu1 %v17991_v55  ;;  %v13646_v21 = vadd.f32 %v5290_v20, %v4134_v57  ;;  %v17995_v19 = vld [vmem:[#allocation286_spill] sm:$0xff]  ;;  %v17997_v55 = vand.u32 4294901760, %v17996_v41 }
 0x403   : > { %v4141_v44 = vpop.f32.mrf.mxu0  ;;  %4524 = vmatmul.mubr.f32.gmra.mxu0 %v17978_v37  ;;  %5753 = vmatprep.mubr.f32.mxu1 %v17044_v61  ;;  %v17999_v37 = vld [vmem:[#allocation288_spill] sm:$0xff] }
 0x404   : > { %17992 = vst [vmem:[#allocation224_spill] sm:$0xff] %v13646_v21  ;;  %v4142_v7 = vadd.f32 %v4141_v44, %v17993_v60  ;;  %v5319_v11 = vpop.f32.mrf.mxu1  ;;  %4529 = vmatprep.mubr.f32.mxu0 %v17044_v61  ;;  %v13652_v32 = vadd.f32 %v5292_v46, %v4136_v52  ;;  %v18002_v21 = vld [vmem:[#allocation285_spill] sm:$0xff] }
 0x405   : > { %v4143_v14 = vpop.f32.mrf.mxu0 }
 0x406   : > { %17994 = vst [vmem:[#allocation226_spill] sm:$0xff] %v13652_v32  ;;  %v4144_v17 = vadd.f32 %v4143_v14, %v17995_v19  ;;  %v5326_v38 = vpop.f32.mrf.mxu1  ;;  %5757 = vmatmul.mubr.f32.gmra.mxu1 %v17997_v55  ;;  %v13657_v20 = vadd.f32 %v5299_v28, %v4142_v7  ;;  %v18001_v14 = vld [vmem:[#allocation290_spill] sm:$0xff]  ;;  %v18003_v55 = vand.u32 4294901760, %v18002_v21 }
 0x407   : > { %v4149_v57 = vpop.f32.mrf.mxu0  ;;  %4532 = vmatmul.mubr.f32.gmra.mxu0 %v17984_v35  ;;  %5762 = vmatprep.mubr.f32.mxu1 %v17044_v61  ;;  %v18005_v35 = vld [vmem:[#allocation292_spill] sm:$0xff] }
 0x408   : > { %17998 = vst [vmem:[#allocation221_spill] sm:$0xff] %v13657_v20  ;;  %v4150_v44 = vadd.f32 %v4149_v57, %v17999_v37  ;;  %v5328_v60 = vpop.f32.mrf.mxu1  ;;  %4537 = vmatprep.mubr.f32.mxu0 %v17044_v61  ;;  %v13663_v46 = vadd.f32 %v5301_v42, %v4144_v17  ;;  %v18008_v20 = vld [vmem:[#allocation289_spill] sm:$0xff] }
 0x409   : > { %v4151_v52 = vpop.f32.mrf.mxu0 }
 0x40a   : > { %18000 = vst [vmem:[#allocation228_spill] sm:$0xff] %v13663_v46  ;;  %v4152_v19 = vadd.f32 %v4151_v52, %v18001_v14  ;;  %v5335_v32 = vpop.f32.mrf.mxu1  ;;  %5766 = vmatmul.mubr.f32.gmra.mxu1 %v18003_v55  ;;  %v13668_v28 = vadd.f32 %v5308_v33, %v4150_v44  ;;  %v18007_v52 = vld [vmem:[#allocation294_spill] sm:$0xff]  ;;  %v18009_v55 = vand.u32 4294901760, %v18008_v20 }
 0x40b   : > { %v4157_v7 = vpop.f32.mrf.mxu0  ;;  %4540 = vmatmul.mubr.f32.gmra.mxu0 %v17990_v40  ;;  %5771 = vmatprep.mubr.f32.mxu1 %v17044_v61  ;;  %v18011_v40 = vld [vmem:[#allocation296_spill] sm:$0xff] }
 0x40c   : > { %18004 = vst [vmem:[#allocation230_spill] sm:$0xff] %v13668_v28  ;;  %v4158_v57 = vadd.f32 %v4157_v7, %v18005_v35  ;;  %v5337_v37 = vpop.f32.mrf.mxu1  ;;  %4545 = vmatprep.mubr.f32.mxu0 %v17044_v61  ;;  %v13674_v42 = vadd.f32 %v5310_v34, %v4152_v19  ;;  %v18014_v28 = vld [vmem:[#allocation293_spill] sm:$0xff] }
 0x40d   : > { %v4159_v17 = vpop.f32.mrf.mxu0 }
 0x40e   : > { %18006 = vst [vmem:[#allocation225_spill] sm:$0xff] %v13674_v42  ;;  %v4160_v14 = vadd.f32 %v4159_v17, %v18007_v52  ;;  %v5344_v46 = vpop.f32.mrf.mxu1  ;;  %5775 = vmatmul.mubr.f32.gmra.mxu1 %v18009_v55  ;;  %v13679_v33 = vadd.f32 %v5317_v0, %v4158_v57  ;;  %v18013_v17 = vld [vmem:[#allocation298_spill] sm:$0xff]  ;;  %v18015_v55 = vand.u32 4294901760, %v18014_v28 }
 0x40f   : > { %v4165_v44 = vpop.f32.mrf.mxu0  ;;  %4548 = vmatmul.mubr.f32.gmra.mxu0 %v17996_v41  ;;  %5780 = vmatprep.mubr.f32.mxu1 %v17044_v61  ;;  %v18017_v41 = vld [vmem:[#allocation300_spill] sm:$0xff] }
 0x410   : > { %18010 = vst [vmem:[#allocation232_spill] sm:$0xff] %v13679_v33  ;;  %v4166_v7 = vadd.f32 %v4165_v44, %v18011_v40  ;;  %v5346_v35 = vpop.f32.mrf.mxu1  ;;  %4553 = vmatprep.mubr.f32.mxu0 %v17044_v61  ;;  %v13685_v34 = vadd.f32 %v5319_v11, %v4160_v14  ;;  %v18020_v33 = vld [vmem:[#allocation297_spill] sm:$0xff] }
 0x411   : > { %v4167_v19 = vpop.f32.mrf.mxu0 }
 0x412   : > { %18012 = vst [vmem:[#allocation234_spill] sm:$0xff] %v13685_v34  ;;  %v4168_v52 = vadd.f32 %v4167_v19, %v18013_v17  ;;  %v5353_v42 = vpop.f32.mrf.mxu1  ;;  %5784 = vmatmul.mubr.f32.gmra.mxu1 %v18015_v55  ;;  %v13690_v0 = vadd.f32 %v5326_v38, %v4166_v7  ;;  %v18019_v19 = vld [vmem:[#allocation302_spill] sm:$0xff]  ;;  %v18021_v55 = vand.u32 4294901760, %v18020_v33 }
 0x413   : > { %v4173_v57 = vpop.f32.mrf.mxu0  ;;  %4556 = vmatmul.mubr.f32.gmra.mxu0 %v18002_v21  ;;  %5789 = vmatprep.mubr.f32.mxu1 %v17044_v61  ;;  %v18023_v21 = vld [vmem:[#allocation304_spill] sm:$0xff] }
 0x414   : > { %18016 = vst [vmem:[#allocation229_spill] sm:$0xff] %v13690_v0  ;;  %v4174_v44 = vadd.f32 %v4173_v57, %v18017_v41  ;;  %v5355_v40 = vpop.f32.mrf.mxu1  ;;  %4561 = vmatprep.mubr.f32.mxu0 %v17044_v61  ;;  %v13696_v11 = vadd.f32 %v5328_v60, %v4168_v52  ;;  %v18026_v0 = vld [vmem:[#allocation301_spill] sm:$0xff] }
 0x415   : > { %v4175_v14 = vpop.f32.mrf.mxu0 }
 0x416   : > { %18018 = vst [vmem:[#allocation236_spill] sm:$0xff] %v13696_v11  ;;  %v4176_v17 = vadd.f32 %v4175_v14, %v18019_v19  ;;  %v5362_v34 = vpop.f32.mrf.mxu1  ;;  %5793 = vmatmul.mubr.f32.gmra.mxu1 %v18021_v55  ;;  %v13701_v38 = vadd.f32 %v5335_v32, %v4174_v44  ;;  %v18025_v14 = vld [vmem:[#allocation306_spill] sm:$0xff]  ;;  %v18027_v55 = vand.u32 4294901760, %v18026_v0 }
 0x417   : > { %v4181_v7 = vpop.f32.mrf.mxu0  ;;  %4564 = vmatmul.mubr.f32.gmra.mxu0 %v18008_v20  ;;  %5798 = vmatprep.mubr.f32.mxu1 %v17044_v61  ;;  %v18029_v20 = vld [vmem:[#allocation308_spill] sm:$0xff] }
 0x418   : > { %18022 = vst [vmem:[#allocation238_spill] sm:$0xff] %v13701_v38  ;;  %v4182_v57 = vadd.f32 %v4181_v7, %v18023_v21  ;;  %v5364_v41 = vpop.f32.mrf.mxu1  ;;  %4569 = vmatprep.mubr.f32.mxu0 %v17044_v61  ;;  %v13707_v60 = vadd.f32 %v5337_v37, %v4176_v17  ;;  %v18032_v38 = vld [vmem:[#allocation305_spill] sm:$0xff] }
 0x419   : > { %v4183_v52 = vpop.f32.mrf.mxu0 }
 0x41a   : > { %18024 = vst [vmem:[#allocation233_spill] sm:$0xff] %v13707_v60  ;;  %v4184_v19 = vadd.f32 %v4183_v52, %v18025_v14  ;;  %v5371_v11 = vpop.f32.mrf.mxu1  ;;  %5802 = vmatmul.mubr.f32.gmra.mxu1 %v18027_v55  ;;  %v13712_v32 = vadd.f32 %v5344_v46, %v4182_v57  ;;  %v18031_v52 = vld [vmem:[#allocation310_spill] sm:$0xff]  ;;  %v18033_v55 = vand.u32 4294901760, %v18032_v38 }
 0x41b   : > { %v4189_v44 = vpop.f32.mrf.mxu0  ;;  %4572 = vmatmul.mubr.f32.gmra.mxu0 %v18014_v28  ;;  %5807 = vmatprep.mubr.f32.mxu1 %v17044_v61  ;;  %v18035_v28 = vld [vmem:[#allocation312_spill] sm:$0xff] }
 0x41c   : > { %18028 = vst [vmem:[#allocation240_spill] sm:$0xff] %v13712_v32  ;;  %v4190_v7 = vadd.f32 %v4189_v44, %v18029_v20  ;;  %v5373_v21 = vpop.f32.mrf.mxu1  ;;  %4577 = vmatprep.mubr.f32.mxu0 %v17044_v61  ;;  %v13718_v37 = vadd.f32 %v5346_v35, %v4184_v19  ;;  %v18038_v32 = vld [vmem:[#allocation309_spill] sm:$0xff] }
 0x41d   : > { %v4191_v17 = vpop.f32.mrf.mxu0 }
 0x41e   : > { %18030 = vst [vmem:[#allocation242_spill] sm:$0xff] %v13718_v37  ;;  %v4192_v14 = vadd.f32 %v4191_v17, %v18031_v52  ;;  %v5380_v60 = vpop.f32.mrf.mxu1  ;;  %5811 = vmatmul.mubr.f32.gmra.mxu1 %v18033_v55  ;;  %v13723_v46 = vadd.f32 %v5353_v42, %v4190_v7  ;;  %v18037_v17 = vld [vmem:[#allocation314_spill] sm:$0xff]  ;;  %v18039_v55 = vand.u32 4294901760, %v18038_v32 }
 0x41f   : > { %v4197_v57 = vpop.f32.mrf.mxu0  ;;  %4580 = vmatmul.mubr.f32.gmra.mxu0 %v18020_v33  ;;  %5816 = vmatprep.mubr.f32.mxu1 %v17044_v61  ;;  %v18041_v33 = vld [vmem:[#allocation316_spill] sm:$0xff] }
 0x420   : > { %18034 = vst [vmem:[#allocation237_spill] sm:$0xff] %v13723_v46  ;;  %v4198_v44 = vadd.f32 %v4197_v57, %v18035_v28  ;;  %v5382_v20 = vpop.f32.mrf.mxu1  ;;  %4585 = vmatprep.mubr.f32.mxu0 %v17044_v61  ;;  %v13729_v35 = vadd.f32 %v5355_v40, %v4192_v14  ;;  %v18044_v46 = vld [vmem:[#allocation313_spill] sm:$0xff] }
 0x421   : > { %v4199_v19 = vpop.f32.mrf.mxu0 }
 0x422   : > { %18036 = vst [vmem:[#allocation244_spill] sm:$0xff] %v13729_v35  ;;  %v4200_v52 = vadd.f32 %v4199_v19, %v18037_v17  ;;  %v5389_v37 = vpop.f32.mrf.mxu1  ;;  %5820 = vmatmul.mubr.f32.gmra.mxu1 %v18039_v55  ;;  %v13734_v42 = vadd.f32 %v5362_v34, %v4198_v44  ;;  %v18043_v19 = vld [vmem:[#allocation318_spill] sm:$0xff]  ;;  %v18045_v55 = vand.u32 4294901760, %v18044_v46 }
 0x423   : > { %v4205_v7 = vpop.f32.mrf.mxu0  ;;  %4588 = vmatmul.mubr.f32.gmra.mxu0 %v18026_v0  ;;  %5825 = vmatprep.mubr.f32.mxu1 %v17044_v61  ;;  %v18047_v0 = vld [vmem:[#allocation320_spill] sm:$0xff] }
 0x424   : > { %18040 = vst [vmem:[#allocation246_spill] sm:$0xff] %v13734_v42  ;;  %v4206_v57 = vadd.f32 %v4205_v7, %v18041_v33  ;;  %v5391_v28 = vpop.f32.mrf.mxu1  ;;  %4593 = vmatprep.mubr.f32.mxu0 %v17044_v61  ;;  %v13740_v40 = vadd.f32 %v5364_v41, %v4200_v52  ;;  %v18050_v42 = vld [vmem:[#allocation317_spill] sm:$0xff] }
 0x425   : > { %v4207_v14 = vpop.f32.mrf.mxu0 }
 0x426   : > { %18042 = vst [vmem:[#allocation241_spill] sm:$0xff] %v13740_v40  ;;  %v4208_v17 = vadd.f32 %v4207_v14, %v18043_v19  ;;  %v5398_v35 = vpop.f32.mrf.mxu1  ;;  %5829 = vmatmul.mubr.f32.gmra.mxu1 %v18045_v55  ;;  %v13745_v34 = vadd.f32 %v5371_v11, %v4206_v57  ;;  %v18049_v14 = vld [vmem:[#allocation322_spill] sm:$0xff]  ;;  %v18051_v55 = vand.u32 4294901760, %v18050_v42 }
 0x427   : > { %v4213_v44 = vpop.f32.mrf.mxu0  ;;  %4596 = vmatmul.mubr.f32.gmra.mxu0 %v18032_v38  ;;  %5834 = vmatprep.mubr.f32.mxu1 %v17044_v61  ;;  %v18053_v38 = vld [vmem:[#allocation324_spill] sm:$0xff] }
 0x428   : > { %18046 = vst [vmem:[#allocation248_spill] sm:$0xff] %v13745_v34  ;;  %v4214_v7 = vadd.f32 %v4213_v44, %v18047_v0  ;;  %v5400_v33 = vpop.f32.mrf.mxu1  ;;  %4601 = vmatprep.mubr.f32.mxu0 %v17044_v61  ;;  %v13751_v41 = vadd.f32 %v5373_v21, %v4208_v17  ;;  %v18056_v34 = vld [vmem:[#allocation321_spill] sm:$0xff] }
 0x429   : > { %v4215_v52 = vpop.f32.mrf.mxu0 }
 0x42a   : > { %18048 = vst [vmem:[#allocation250_spill] sm:$0xff] %v13751_v41  ;;  %v4216_v19 = vadd.f32 %v4215_v52, %v18049_v14  ;;  %v5407_v40 = vpop.f32.mrf.mxu1  ;;  %5838 = vmatmul.mubr.f32.gmra.mxu1 %v18051_v55  ;;  %v13756_v11 = vadd.f32 %v5380_v60, %v4214_v7  ;;  %v18055_v52 = vld [vmem:[#allocation326_spill] sm:$0xff]  ;;  %v18057_v55 = vand.u32 4294901760, %v18056_v34 }
 0x42b   : > { %v4221_v57 = vpop.f32.mrf.mxu0  ;;  %4604 = vmatmul.mubr.f32.gmra.mxu0 %v18038_v32  ;;  %5843 = vmatprep.mubr.f32.mxu1 %v17044_v61  ;;  %v18059_v32 = vld [vmem:[#allocation328_spill] sm:$0xff] }
 0x42c   : > { %18052 = vst [vmem:[#allocation245_spill] sm:$0xff] %v13756_v11  ;;  %v4222_v44 = vadd.f32 %v4221_v57, %v18053_v38  ;;  %v5409_v0 = vpop.f32.mrf.mxu1  ;;  %4609 = vmatprep.mubr.f32.mxu0 %v17044_v61  ;;  %v13762_v21 = vadd.f32 %v5382_v20, %v4216_v19  ;;  %v18062_v11 = vld [vmem:[#allocation325_spill] sm:$0xff] }
 0x42d   : > { %v4223_v17 = vpop.f32.mrf.mxu0 }
 0x42e   : > { %18054 = vst [vmem:[#allocation252_spill] sm:$0xff] %v13762_v21  ;;  %v4224_v14 = vadd.f32 %v4223_v17, %v18055_v52  ;;  %v5416_v41 = vpop.f32.mrf.mxu1  ;;  %5847 = vmatmul.mubr.f32.gmra.mxu1 %v18057_v55  ;;  %v13767_v60 = vadd.f32 %v5389_v37, %v4222_v44  ;;  %v18061_v17 = vld [vmem:[#allocation330_spill] sm:$0xff]  ;;  %v18063_v55 = vand.u32 4294901760, %v18062_v11 }
 0x42f   : > { %v4229_v7 = vpop.f32.mrf.mxu0  ;;  %4612 = vmatmul.mubr.f32.gmra.mxu0 %v18044_v46  ;;  %5852 = vmatprep.mubr.f32.mxu1 %v17044_v61  ;;  %v18065_v46 = vld [vmem:[#allocation332_spill] sm:$0xff] }
 0x430   : > { %18058 = vst [vmem:[#allocation254_spill] sm:$0xff] %v13767_v60  ;;  %v4230_v57 = vadd.f32 %v4229_v7, %v18059_v32  ;;  %v5418_v38 = vpop.f32.mrf.mxu1  ;;  %4617 = vmatprep.mubr.f32.mxu0 %v17044_v61  ;;  %v13773_v20 = vadd.f32 %v5391_v28, %v4224_v14  ;;  %v18068_v60 = vld [vmem:[#allocation329_spill] sm:$0xff] }
 0x431   : > { %v4231_v19 = vpop.f32.mrf.mxu0 }
 0x432   : > { %18060 = vst [vmem:[#allocation249_spill] sm:$0xff] %v13773_v20  ;;  %v4232_v52 = vadd.f32 %v4231_v19, %v18061_v17  ;;  %v5425_v21 = vpop.f32.mrf.mxu1  ;;  %5856 = vmatmul.mubr.f32.gmra.mxu1 %v18063_v55  ;;  %v13778_v37 = vadd.f32 %v5398_v35, %v4230_v57  ;;  %v18067_v19 = vld [vmem:[#allocation334_spill] sm:$0xff]  ;;  %v18069_v55 = vand.u32 4294901760, %v18068_v60 }
 0x433   : > { %v4237_v44 = vpop.f32.mrf.mxu0  ;;  %4620 = vmatmul.mubr.f32.gmra.mxu0 %v18050_v42  ;;  %5861 = vmatprep.mubr.f32.mxu1 %v17044_v61  ;;  %v18071_v42 = vld [vmem:[#allocation336_spill] sm:$0xff] }
 0x434   : > { %18064 = vst [vmem:[#allocation256_spill] sm:$0xff] %v13778_v37  ;;  %v4238_v7 = vadd.f32 %v4237_v44, %v18065_v46  ;;  %v5427_v32 = vpop.f32.mrf.mxu1  ;;  %4625 = vmatprep.mubr.f32.mxu0 %v17044_v61  ;;  %v13784_v28 = vadd.f32 %v5400_v33, %v4232_v52  ;;  %v18074_v37 = vld [vmem:[#allocation333_spill] sm:$0xff] }
 0x435   : > { %v4239_v14 = vpop.f32.mrf.mxu0 }
 0x436   : > { %18066 = vst [vmem:[#allocation258_spill] sm:$0xff] %v13784_v28  ;;  %v4240_v17 = vadd.f32 %v4239_v14, %v18067_v19  ;;  %v5434_v20 = vpop.f32.mrf.mxu1  ;;  %5865 = vmatmul.mubr.f32.gmra.mxu1 %v18069_v55  ;;  %v13789_v35 = vadd.f32 %v5407_v40, %v4238_v7  ;;  %v18073_v14 = vld [vmem:[#allocation338_spill] sm:$0xff]  ;;  %v18075_v55 = vand.u32 4294901760, %v18074_v37 }
 0x437   : > { %v4245_v57 = vpop.f32.mrf.mxu0  ;;  %4628 = vmatmul.mubr.f32.gmra.mxu0 %v18056_v34  ;;  %5870 = vmatprep.mubr.f32.mxu1 %v17044_v61  ;;  %v18077_v34 = vld [vmem:[#allocation340_spill] sm:$0xff] }
 0x438   : > { %18070 = vst [vmem:[#allocation253_spill] sm:$0xff] %v13789_v35  ;;  %v4246_v44 = vadd.f32 %v4245_v57, %v18071_v42  ;;  %v5436_v46 = vpop.f32.mrf.mxu1  ;;  %4633 = vmatprep.mubr.f32.mxu0 %v17044_v61  ;;  %v13795_v33 = vadd.f32 %v5409_v0, %v4240_v17  ;;  %v18080_v35 = vld [vmem:[#allocation337_spill] sm:$0xff] }
 0x439   : > { %v4247_v52 = vpop.f32.mrf.mxu0 }
 0x43a   : > { %18072 = vst [vmem:[#allocation260_spill] sm:$0xff] %v13795_v33  ;;  %v4248_v19 = vadd.f32 %v4247_v52, %v18073_v14  ;;  %v5443_v28 = vpop.f32.mrf.mxu1  ;;  %5874 = vmatmul.mubr.f32.gmra.mxu1 %v18075_v55  ;;  %v13800_v40 = vadd.f32 %v5416_v41, %v4246_v44  ;;  %v18079_v52 = vld [vmem:[#allocation342_spill] sm:$0xff]  ;;  %v18081_v55 = vand.u32 4294901760, %v18080_v35 }
 0x43b   : > { %v4253_v7 = vpop.f32.mrf.mxu0  ;;  %4636 = vmatmul.mubr.f32.gmra.mxu0 %v18062_v11  ;;  %5879 = vmatprep.mubr.f32.mxu1 %v17044_v61  ;;  %v18083_v11 = vld [vmem:[#allocation344_spill] sm:$0xff] }
 0x43c   : > { %18076 = vst [vmem:[#allocation262_spill] sm:$0xff] %v13800_v40  ;;  %v4254_v57 = vadd.f32 %v4253_v7, %v18077_v34  ;;  %v5445_v42 = vpop.f32.mrf.mxu1  ;;  %4641 = vmatprep.mubr.f32.mxu0 %v17044_v61  ;;  %v13806_v0 = vadd.f32 %v5418_v38, %v4248_v19  ;;  %v18086_v40 = vld [vmem:[#allocation341_spill] sm:$0xff] }
 0x43d   : > { %v4255_v17 = vpop.f32.mrf.mxu0 }
 0x43e   : > { %18078 = vst [vmem:[#allocation257_spill] sm:$0xff] %v13806_v0  ;;  %v4256_v14 = vadd.f32 %v4255_v17, %v18079_v52  ;;  %v5452_v33 = vpop.f32.mrf.mxu1  ;;  %5883 = vmatmul.mubr.f32.gmra.mxu1 %v18081_v55  ;;  %v13811_v41 = vadd.f32 %v5425_v21, %v4254_v57  ;;  %v18085_v17 = vld [vmem:[#allocation346_spill] sm:$0xff]  ;;  %v18087_v55 = vand.u32 4294901760, %v18086_v40 }
 0x43f   : > { %v4261_v44 = vpop.f32.mrf.mxu0  ;;  %4644 = vmatmul.mubr.f32.gmra.mxu0 %v18068_v60  ;;  %5888 = vmatprep.mubr.f32.mxu1 %v17044_v61  ;;  %v18089_v60 = vld [vmem:[#allocation348_spill] sm:$0xff] }
 0x440   : > { %18082 = vst [vmem:[#allocation264_spill] sm:$0xff] %v13811_v41  ;;  %v4262_v7 = vadd.f32 %v4261_v44, %v18083_v11  ;;  %v5454_v34 = vpop.f32.mrf.mxu1  ;;  %4649 = vmatprep.mubr.f32.mxu0 %v17044_v61  ;;  %v13817_v38 = vadd.f32 %v5427_v32, %v4256_v14  ;;  %v18092_v41 = vld [vmem:[#allocation345_spill] sm:$0xff] }
 0x441   : > { %v4263_v19 = vpop.f32.mrf.mxu0 }
 0x442   : > { %18084 = vst [vmem:[#allocation266_spill] sm:$0xff] %v13817_v38  ;;  %v4264_v52 = vadd.f32 %v4263_v19, %v18085_v17  ;;  %v5461_v0 = vpop.f32.mrf.mxu1  ;;  %5892 = vmatmul.mubr.f32.gmra.mxu1 %v18087_v55  ;;  %v13822_v21 = vadd.f32 %v5434_v20, %v4262_v7  ;;  %v18091_v19 = vld [vmem:[#allocation350_spill] sm:$0xff]  ;;  %v18093_v55 = vand.u32 4294901760, %v18092_v41 }
 0x443   : > { %v4269_v57 = vpop.f32.mrf.mxu0  ;;  %4652 = vmatmul.mubr.f32.gmra.mxu0 %v18074_v37  ;;  %5897 = vmatprep.mubr.f32.mxu1 %v17044_v61  ;;  %v18095_v37 = vld [vmem:[#allocation352_spill] sm:$0xff] }
 0x444   : > { %18088 = vst [vmem:[#allocation261_spill] sm:$0xff] %v13822_v21  ;;  %v4270_v44 = vadd.f32 %v4269_v57, %v18089_v60  ;;  %v5463_v11 = vpop.f32.mrf.mxu1  ;;  %4657 = vmatprep.mubr.f32.mxu0 %v17044_v61  ;;  %v13828_v32 = vadd.f32 %v5436_v46, %v4264_v52  ;;  %v18098_v21 = vld [vmem:[#allocation349_spill] sm:$0xff] }
 0x445   : > { %v4271_v14 = vpop.f32.mrf.mxu0 }
 0x446   : > { %18090 = vst [vmem:[#allocation268_spill] sm:$0xff] %v13828_v32  ;;  %v4272_v17 = vadd.f32 %v4271_v14, %v18091_v19  ;;  %v5470_v38 = vpop.f32.mrf.mxu1  ;;  %5901 = vmatmul.mubr.f32.gmra.mxu1 %v18093_v55  ;;  %v13833_v20 = vadd.f32 %v5443_v28, %v4270_v44  ;;  %v18097_v14 = vld [vmem:[#allocation354_spill] sm:$0xff]  ;;  %v18099_v55 = vand.u32 4294901760, %v18098_v21 }
 0x447   : > { %v4277_v7 = vpop.f32.mrf.mxu0  ;;  %4660 = vmatmul.mubr.f32.gmra.mxu0 %v18080_v35  ;;  %5906 = vmatprep.mubr.f32.mxu1 %v17044_v61  ;;  %v18101_v35 = vld [vmem:[#allocation356_spill] sm:$0xff] }
 0x448   : > { %18094 = vst [vmem:[#allocation270_spill] sm:$0xff] %v13833_v20  ;;  %v4278_v57 = vadd.f32 %v4277_v7, %v18095_v37  ;;  %v5472_v60 = vpop.f32.mrf.mxu1  ;;  %4665 = vmatprep.mubr.f32.mxu0 %v17044_v61  ;;  %v13839_v46 = vadd.f32 %v5445_v42, %v4272_v17  ;;  %v18104_v20 = vld [vmem:[#allocation353_spill] sm:$0xff] }
 0x449   : > { %v4279_v52 = vpop.f32.mrf.mxu0 }
 0x44a   : > { %18096 = vst [vmem:[#allocation265_spill] sm:$0xff] %v13839_v46  ;;  %v4280_v19 = vadd.f32 %v4279_v52, %v18097_v14  ;;  %v5479_v32 = vpop.f32.mrf.mxu1  ;;  %5910 = vmatmul.mubr.f32.gmra.mxu1 %v18099_v55  ;;  %v13844_v28 = vadd.f32 %v5452_v33, %v4278_v57  ;;  %v18103_v52 = vld [vmem:[#allocation358_spill] sm:$0xff]  ;;  %v18105_v55 = vand.u32 4294901760, %v18104_v20 }
 0x44b   : > { %v4285_v44 = vpop.f32.mrf.mxu0  ;;  %4668 = vmatmul.mubr.f32.gmra.mxu0 %v18086_v40  ;;  %5915 = vmatprep.mubr.f32.mxu1 %v17044_v61  ;;  %v18107_v40 = vld [vmem:[#allocation360_spill] sm:$0xff] }
 0x44c   : > { %18100 = vst [vmem:[#allocation272_spill] sm:$0xff] %v13844_v28  ;;  %v4286_v7 = vadd.f32 %v4285_v44, %v18101_v35  ;;  %v5481_v37 = vpop.f32.mrf.mxu1  ;;  %4673 = vmatprep.mubr.f32.mxu0 %v17044_v61  ;;  %v13850_v42 = vadd.f32 %v5454_v34, %v4280_v19  ;;  %v18110_v28 = vld [vmem:[#allocation357_spill] sm:$0xff] }
 0x44d   : > { %v4287_v17 = vpop.f32.mrf.mxu0 }
 0x44e   : > { %18102 = vst [vmem:[#allocation274_spill] sm:$0xff] %v13850_v42  ;;  %v4288_v14 = vadd.f32 %v4287_v17, %v18103_v52  ;;  %v5488_v46 = vpop.f32.mrf.mxu1  ;;  %5919 = vmatmul.mubr.f32.gmra.mxu1 %v18105_v55  ;;  %v13855_v33 = vadd.f32 %v5461_v0, %v4286_v7  ;;  %v18109_v17 = vld [vmem:[#allocation362_spill] sm:$0xff]  ;;  %v18111_v55 = vand.u32 4294901760, %v18110_v28 }
 0x44f   : > { %v4293_v57 = vpop.f32.mrf.mxu0  ;;  %4676 = vmatmul.mubr.f32.gmra.mxu0 %v18092_v41  ;;  %5924 = vmatprep.mubr.f32.mxu1 %v17044_v61  ;;  %v18113_v41 = vld [vmem:[#allocation364_spill] sm:$0xff] }
 0x450   : > { %18106 = vst [vmem:[#allocation269_spill] sm:$0xff] %v13855_v33  ;;  %v4294_v44 = vadd.f32 %v4293_v57, %v18107_v40  ;;  %v5490_v35 = vpop.f32.mrf.mxu1  ;;  %4681 = vmatprep.mubr.f32.mxu0 %v17044_v61  ;;  %v13861_v34 = vadd.f32 %v5463_v11, %v4288_v14  ;;  %v18116_v33 = vld [vmem:[#allocation361_spill] sm:$0xff] }
 0x451   : > { %v4295_v19 = vpop.f32.mrf.mxu0 }
 0x452   : > { %18108 = vst [vmem:[#allocation276_spill] sm:$0xff] %v13861_v34  ;;  %v4296_v52 = vadd.f32 %v4295_v19, %v18109_v17  ;;  %v5497_v42 = vpop.f32.mrf.mxu1  ;;  %5928 = vmatmul.mubr.f32.gmra.mxu1 %v18111_v55  ;;  %v13866_v0 = vadd.f32 %v5470_v38, %v4294_v44  ;;  %v18115_v19 = vld [vmem:[#allocation366_spill] sm:$0xff]  ;;  %v18117_v55 = vand.u32 4294901760, %v18116_v33 }
 0x453   : > { %v4301_v7 = vpop.f32.mrf.mxu0  ;;  %4684 = vmatmul.mubr.f32.gmra.mxu0 %v18098_v21  ;;  %5933 = vmatprep.mubr.f32.mxu1 %v17044_v61  ;;  %v18119_v21 = vld [vmem:[#allocation368_spill] sm:$0xff] }
 0x454   : > { %18112 = vst [vmem:[#allocation278_spill] sm:$0xff] %v13866_v0  ;;  %v4302_v57 = vadd.f32 %v4301_v7, %v18113_v41  ;;  %v5499_v40 = vpop.f32.mrf.mxu1  ;;  %4689 = vmatprep.mubr.f32.mxu0 %v17044_v61  ;;  %v13872_v11 = vadd.f32 %v5472_v60, %v4296_v52  ;;  %v18122_v0 = vld [vmem:[#allocation365_spill] sm:$0xff] }
 0x455   : > { %v4303_v14 = vpop.f32.mrf.mxu0 }
 0x456   : > { %18114 = vst [vmem:[#allocation273_spill] sm:$0xff] %v13872_v11  ;;  %v4304_v17 = vadd.f32 %v4303_v14, %v18115_v19  ;;  %v5506_v34 = vpop.f32.mrf.mxu1  ;;  %5937 = vmatmul.mubr.f32.gmra.mxu1 %v18117_v55  ;;  %v13877_v38 = vadd.f32 %v5479_v32, %v4302_v57  ;;  %v18121_v14 = vld [vmem:[#allocation370_spill] sm:$0xff]  ;;  %v18123_v55 = vand.u32 4294901760, %v18122_v0 }
 0x457   : > { %v4309_v44 = vpop.f32.mrf.mxu0  ;;  %4692 = vmatmul.mubr.f32.gmra.mxu0 %v18104_v20  ;;  %5942 = vmatprep.mubr.f32.mxu1 %v17044_v61  ;;  %v18125_v20 = vld [vmem:[#allocation372_spill] sm:$0xff] }
 0x458   : > { %18118 = vst [vmem:[#allocation280_spill] sm:$0xff] %v13877_v38  ;;  %v4310_v7 = vadd.f32 %v4309_v44, %v18119_v21  ;;  %v5508_v41 = vpop.f32.mrf.mxu1  ;;  %4697 = vmatprep.mubr.f32.mxu0 %v17044_v61  ;;  %v13883_v60 = vadd.f32 %v5481_v37, %v4304_v17  ;;  %v18128_v38 = vld [vmem:[#allocation369_spill] sm:$0xff] }
 0x459   : > { %v4311_v52 = vpop.f32.mrf.mxu0 }
 0x45a   : > { %18120 = vst [vmem:[#allocation282_spill] sm:$0xff] %v13883_v60  ;;  %v4312_v19 = vadd.f32 %v4311_v52, %v18121_v14  ;;  %v5515_v11 = vpop.f32.mrf.mxu1  ;;  %5946 = vmatmul.mubr.f32.gmra.mxu1 %v18123_v55  ;;  %v13888_v32 = vadd.f32 %v5488_v46, %v4310_v7  ;;  %v18127_v52 = vld [vmem:[#allocation374_spill] sm:$0xff]  ;;  %v18129_v55 = vand.u32 4294901760, %v18128_v38 }
 0x45b   : > { %v4317_v57 = vpop.f32.mrf.mxu0  ;;  %4700 = vmatmul.mubr.f32.gmra.mxu0 %v18110_v28  ;;  %5951 = vmatprep.mubr.f32.mxu1 %v17044_v61  ;;  %v18131_v28 = vld [vmem:[#allocation376_spill] sm:$0xff] }
 0x45c   : > { %18124 = vst [vmem:[#allocation277_spill] sm:$0xff] %v13888_v32  ;;  %v4318_v44 = vadd.f32 %v4317_v57, %v18125_v20  ;;  %v5517_v21 = vpop.f32.mrf.mxu1  ;;  %4705 = vmatprep.mubr.f32.mxu0 %v17044_v61  ;;  %v13894_v37 = vadd.f32 %v5490_v35, %v4312_v19  ;;  %v18134_v32 = vld [vmem:[#allocation373_spill] sm:$0xff] }
 0x45d   : > { %v4319_v17 = vpop.f32.mrf.mxu0 }
 0x45e   : > { %18126 = vst [vmem:[#allocation284_spill] sm:$0xff] %v13894_v37  ;;  %v4320_v14 = vadd.f32 %v4319_v17, %v18127_v52  ;;  %v5524_v60 = vpop.f32.mrf.mxu1  ;;  %5955 = vmatmul.mubr.f32.gmra.mxu1 %v18129_v55  ;;  %v13899_v46 = vadd.f32 %v5497_v42, %v4318_v44  ;;  %v18133_v17 = vld [vmem:[#allocation378_spill] sm:$0xff]  ;;  %v18135_v55 = vand.u32 4294901760, %v18134_v32 }
 0x45f   : > { %v4325_v7 = vpop.f32.mrf.mxu0  ;;  %4708 = vmatmul.mubr.f32.gmra.mxu0 %v18116_v33  ;;  %5960 = vmatprep.mubr.f32.mxu1 %v17044_v61  ;;  %v18137_v33 = vld [vmem:[#allocation380_spill] sm:$0xff] }
 0x460   : > { %18130 = vst [vmem:[#allocation286_spill] sm:$0xff] %v13899_v46  ;;  %v4326_v57 = vadd.f32 %v4325_v7, %v18131_v28  ;;  %v5526_v20 = vpop.f32.mrf.mxu1  ;;  %4713 = vmatprep.mubr.f32.mxu0 %v17044_v61  ;;  %v13905_v35 = vadd.f32 %v5499_v40, %v4320_v14  ;;  %v18140_v46 = vld [vmem:[#allocation377_spill] sm:$0xff] }
 0x461   : > { %v4327_v19 = vpop.f32.mrf.mxu0 }
 0x462   : > { %18132 = vst [vmem:[#allocation281_spill] sm:$0xff] %v13905_v35  ;;  %v4328_v52 = vadd.f32 %v4327_v19, %v18133_v17  ;;  %v5533_v37 = vpop.f32.mrf.mxu1  ;;  %5964 = vmatmul.mubr.f32.gmra.mxu1 %v18135_v55  ;;  %v13910_v42 = vadd.f32 %v5506_v34, %v4326_v57  ;;  %v18139_v19 = vld [vmem:[#allocation382_spill] sm:$0xff]  ;;  %v18141_v55 = vand.u32 4294901760, %v18140_v46 }
 0x463   : > { %v4333_v44 = vpop.f32.mrf.mxu0  ;;  %4716 = vmatmul.mubr.f32.gmra.mxu0 %v18122_v0  ;;  %5969 = vmatprep.mubr.f32.mxu1 %v17044_v61  ;;  %v18143_v0 = vld [vmem:[#allocation384_spill] sm:$0xff] }
 0x464   : > { %18136 = vst [vmem:[#allocation288_spill] sm:$0xff] %v13910_v42  ;;  %v4334_v7 = vadd.f32 %v4333_v44, %v18137_v33  ;;  %v5535_v28 = vpop.f32.mrf.mxu1  ;;  %4721 = vmatprep.mubr.f32.mxu0 %v17044_v61  ;;  %v13916_v40 = vadd.f32 %v5508_v41, %v4328_v52  ;;  %v18146_v42 = vld [vmem:[#allocation381_spill] sm:$0xff] }
 0x465   : > { %v4335_v14 = vpop.f32.mrf.mxu0 }
 0x466   : > { %18138 = vst [vmem:[#allocation290_spill] sm:$0xff] %v13916_v40  ;;  %v4336_v17 = vadd.f32 %v4335_v14, %v18139_v19  ;;  %v5542_v35 = vpop.f32.mrf.mxu1  ;;  %5973 = vmatmul.mubr.f32.gmra.mxu1 %v18141_v55  ;;  %v13921_v34 = vadd.f32 %v5515_v11, %v4334_v7  ;;  %v18145_v14 = vld [vmem:[#allocation386_spill] sm:$0xff]  ;;  %v18147_v55 = vand.u32 4294901760, %v18146_v42 }
 0x467   : > { %v4341_v57 = vpop.f32.mrf.mxu0  ;;  %4724 = vmatmul.mubr.f32.gmra.mxu0 %v18128_v38  ;;  %5978 = vmatprep.mubr.f32.mxu1 %v17044_v61  ;;  %v18149_v38 = vld [vmem:[#allocation388_spill] sm:$0xff] }
 0x468   : > { %18142 = vst [vmem:[#allocation285_spill] sm:$0xff] %v13921_v34  ;;  %v4342_v44 = vadd.f32 %v4341_v57, %v18143_v0  ;;  %v5544_v33 = vpop.f32.mrf.mxu1  ;;  %4729 = vmatprep.mubr.f32.mxu0 %v17044_v61  ;;  %v13927_v41 = vadd.f32 %v5517_v21, %v4336_v17  ;;  %v18152_v34 = vld [vmem:[#allocation385_spill] sm:$0xff] }
 0x469   : > { %v4343_v52 = vpop.f32.mrf.mxu0 }
 0x46a   : > { %18144 = vst [vmem:[#allocation292_spill] sm:$0xff] %v13927_v41  ;;  %v4344_v19 = vadd.f32 %v4343_v52, %v18145_v14  ;;  %v5551_v40 = vpop.f32.mrf.mxu1  ;;  %5982 = vmatmul.mubr.f32.gmra.mxu1 %v18147_v55  ;;  %v13932_v11 = vadd.f32 %v5524_v60, %v4342_v44  ;;  %v18151_v52 = vld [vmem:[#allocation390_spill] sm:$0xff]  ;;  %v18153_v55 = vand.u32 4294901760, %v18152_v34 }
 0x46b   : > { %v4349_v7 = vpop.f32.mrf.mxu0  ;;  %4732 = vmatmul.mubr.f32.gmra.mxu0 %v18134_v32  ;;  %5987 = vmatprep.mubr.f32.mxu1 %v17044_v61  ;;  %v18155_v32 = vld [vmem:[#allocation392_spill] sm:$0xff] }
 0x46c   : > { %18148 = vst [vmem:[#allocation294_spill] sm:$0xff] %v13932_v11  ;;  %v4350_v57 = vadd.f32 %v4349_v7, %v18149_v38  ;;  %v5553_v0 = vpop.f32.mrf.mxu1  ;;  %4737 = vmatprep.mubr.f32.mxu0 %v17044_v61  ;;  %v13938_v21 = vadd.f32 %v5526_v20, %v4344_v19  ;;  %v18158_v11 = vld [vmem:[#allocation389_spill] sm:$0xff] }
 0x46d   : > { %v4351_v17 = vpop.f32.mrf.mxu0 }
 0x46e   : > { %18150 = vst [vmem:[#allocation289_spill] sm:$0xff] %v13938_v21  ;;  %v4352_v14 = vadd.f32 %v4351_v17, %v18151_v52  ;;  %v5560_v41 = vpop.f32.mrf.mxu1  ;;  %5991 = vmatmul.mubr.f32.gmra.mxu1 %v18153_v55  ;;  %v13943_v60 = vadd.f32 %v5533_v37, %v4350_v57  ;;  %v18157_v17 = vld [vmem:[#allocation394_spill] sm:$0xff]  ;;  %v18159_v55 = vand.u32 4294901760, %v18158_v11 }
 0x46f   : > { %v4357_v44 = vpop.f32.mrf.mxu0  ;;  %4740 = vmatmul.mubr.f32.gmra.mxu0 %v18140_v46  ;;  %5996 = vmatprep.mubr.f32.mxu1 %v17044_v61  ;;  %v18161_v46 = vld [vmem:[#allocation396_spill] sm:$0xff] }
 0x470   : > { %18154 = vst [vmem:[#allocation296_spill] sm:$0xff] %v13943_v60  ;;  %v4358_v7 = vadd.f32 %v4357_v44, %v18155_v32  ;;  %v5562_v38 = vpop.f32.mrf.mxu1  ;;  %4745 = vmatprep.mubr.f32.mxu0 %v17044_v61  ;;  %v13949_v20 = vadd.f32 %v5535_v28, %v4352_v14  ;;  %v18164_v60 = vld [vmem:[#allocation393_spill] sm:$0xff] }
 0x471   : > { %v4359_v19 = vpop.f32.mrf.mxu0 }
 0x472   : > { %18156 = vst [vmem:[#allocation298_spill] sm:$0xff] %v13949_v20  ;;  %v4360_v52 = vadd.f32 %v4359_v19, %v18157_v17  ;;  %v5569_v21 = vpop.f32.mrf.mxu1  ;;  %6000 = vmatmul.mubr.f32.gmra.mxu1 %v18159_v55  ;;  %v13954_v37 = vadd.f32 %v5542_v35, %v4358_v7  ;;  %v18163_v19 = vld [vmem:[#allocation398_spill] sm:$0xff]  ;;  %v18165_v55 = vand.u32 4294901760, %v18164_v60 }
 0x473   : > { %v4365_v57 = vpop.f32.mrf.mxu0  ;;  %4748 = vmatmul.mubr.f32.gmra.mxu0 %v18146_v42  ;;  %6005 = vmatprep.mubr.f32.mxu1 %v17044_v61  ;;  %v18167_v42 = vld [vmem:[#allocation400_spill] sm:$0xff] }
 0x474   : > { %18160 = vst [vmem:[#allocation293_spill] sm:$0xff] %v13954_v37  ;;  %v4366_v44 = vadd.f32 %v4365_v57, %v18161_v46  ;;  %v5571_v32 = vpop.f32.mrf.mxu1  ;;  %4753 = vmatprep.mubr.f32.mxu0 %v17044_v61  ;;  %v13960_v28 = vadd.f32 %v5544_v33, %v4360_v52  ;;  %v18170_v37 = vld [vmem:[#allocation397_spill] sm:$0xff] }
 0x475   : > { %v4367_v14 = vpop.f32.mrf.mxu0 }
 0x476   : > { %18162 = vst [vmem:[#allocation300_spill] sm:$0xff] %v13960_v28  ;;  %v4368_v17 = vadd.f32 %v4367_v14, %v18163_v19  ;;  %v5578_v20 = vpop.f32.mrf.mxu1  ;;  %6009 = vmatmul.mubr.f32.gmra.mxu1 %v18165_v55  ;;  %v13965_v35 = vadd.f32 %v5551_v40, %v4366_v44  ;;  %v18169_v14 = vld [vmem:[#allocation402_spill] sm:$0xff]  ;;  %v18171_v55 = vand.u32 4294901760, %v18170_v37 }
 0x477   : > { %v4373_v7 = vpop.f32.mrf.mxu0  ;;  %4756 = vmatmul.mubr.f32.gmra.mxu0 %v18152_v34  ;;  %6014 = vmatprep.mubr.f32.mxu1 %v17044_v61  ;;  %v18173_v34 = vld [vmem:[#allocation404_spill] sm:$0xff] }
 0x478   : > { %18166 = vst [vmem:[#allocation302_spill] sm:$0xff] %v13965_v35  ;;  %v4374_v57 = vadd.f32 %v4373_v7, %v18167_v42  ;;  %v5580_v46 = vpop.f32.mrf.mxu1  ;;  %4761 = vmatprep.mubr.f32.mxu0 %v17044_v61  ;;  %v13971_v33 = vadd.f32 %v5553_v0, %v4368_v17  ;;  %v18176_v35 = vld [vmem:[#allocation401_spill] sm:$0xff] }
 0x479   : > { %v4375_v52 = vpop.f32.mrf.mxu0 }
 0x47a   : > { %18168 = vst [vmem:[#allocation297_spill] sm:$0xff] %v13971_v33  ;;  %v4376_v19 = vadd.f32 %v4375_v52, %v18169_v14  ;;  %v5587_v28 = vpop.f32.mrf.mxu1  ;;  %6018 = vmatmul.mubr.f32.gmra.mxu1 %v18171_v55  ;;  %v13976_v40 = vadd.f32 %v5560_v41, %v4374_v57  ;;  %v18175_v52 = vld [vmem:[#allocation406_spill] sm:$0xff]  ;;  %v18177_v55 = vand.u32 4294901760, %v18176_v35 }
 0x47b   : > { %v4381_v44 = vpop.f32.mrf.mxu0  ;;  %4764 = vmatmul.mubr.f32.gmra.mxu0 %v18158_v11  ;;  %6023 = vmatprep.mubr.f32.mxu1 %v17044_v61  ;;  %v18179_v11 = vld [vmem:[#allocation408_spill] sm:$0xff] }
 0x47c   : > { %18172 = vst [vmem:[#allocation304_spill] sm:$0xff] %v13976_v40  ;;  %v4382_v7 = vadd.f32 %v4381_v44, %v18173_v34  ;;  %v5589_v42 = vpop.f32.mrf.mxu1  ;;  %4769 = vmatprep.mubr.f32.mxu0 %v17044_v61  ;;  %v13982_v0 = vadd.f32 %v5562_v38, %v4376_v19  ;;  %v18182_v40 = vld [vmem:[#allocation405_spill] sm:$0xff] }
 0x47d   : > { %v4383_v17 = vpop.f32.mrf.mxu0 }
 0x47e   : > { %18174 = vst [vmem:[#allocation306_spill] sm:$0xff] %v13982_v0  ;;  %v4384_v14 = vadd.f32 %v4383_v17, %v18175_v52  ;;  %v5596_v33 = vpop.f32.mrf.mxu1  ;;  %6027 = vmatmul.mubr.f32.gmra.mxu1 %v18177_v55  ;;  %v13987_v41 = vadd.f32 %v5569_v21, %v4382_v7  ;;  %v18181_v17 = vld [vmem:[#allocation410_spill] sm:$0xff]  ;;  %v18183_v55 = vand.u32 4294901760, %v18182_v40 }
 0x47f   : > { %v4389_v57 = vpop.f32.mrf.mxu0  ;;  %4772 = vmatmul.mubr.f32.gmra.mxu0 %v18164_v60  ;;  %6032 = vmatprep.mubr.f32.mxu1 %v17044_v61  ;;  %v18185_v60 = vld [vmem:[#allocation412_spill] sm:$0xff] }
 0x480   : > { %18178 = vst [vmem:[#allocation301_spill] sm:$0xff] %v13987_v41  ;;  %v4390_v44 = vadd.f32 %v4389_v57, %v18179_v11  ;;  %v5598_v34 = vpop.f32.mrf.mxu1  ;;  %4777 = vmatprep.mubr.f32.mxu0 %v17044_v61  ;;  %v13993_v38 = vadd.f32 %v5571_v32, %v4384_v14  ;;  %v18188_v41 = vld [vmem:[#allocation409_spill] sm:$0xff] }
 0x481   : > { %v4391_v19 = vpop.f32.mrf.mxu0 }
 0x482   : > { %18180 = vst [vmem:[#allocation308_spill] sm:$0xff] %v13993_v38  ;;  %v4392_v52 = vadd.f32 %v4391_v19, %v18181_v17  ;;  %v5605_v0 = vpop.f32.mrf.mxu1  ;;  %6036 = vmatmul.mubr.f32.gmra.mxu1 %v18183_v55  ;;  %v13998_v21 = vadd.f32 %v5578_v20, %v4390_v44  ;;  %v18187_v19 = vld [vmem:[#allocation414_spill] sm:$0xff]  ;;  %v18189_v55 = vand.u32 4294901760, %v18188_v41 }
 0x483   : > { %v4397_v7 = vpop.f32.mrf.mxu0  ;;  %4780 = vmatmul.mubr.f32.gmra.mxu0 %v18170_v37  ;;  %6041 = vmatprep.mubr.f32.mxu1 %v17044_v61  ;;  %v18191_v37 = vld [vmem:[#allocation416_spill] sm:$0xff] }
 0x484   : > { %18184 = vst [vmem:[#allocation310_spill] sm:$0xff] %v13998_v21  ;;  %v4398_v57 = vadd.f32 %v4397_v7, %v18185_v60  ;;  %v5607_v11 = vpop.f32.mrf.mxu1  ;;  %4785 = vmatprep.mubr.f32.mxu0 %v17044_v61  ;;  %v14004_v32 = vadd.f32 %v5580_v46, %v4392_v52  ;;  %v18194_v21 = vld [vmem:[#allocation413_spill] sm:$0xff] }
 0x485   : > { %v4399_v14 = vpop.f32.mrf.mxu0 }
 0x486   : > { %18186 = vst [vmem:[#allocation305_spill] sm:$0xff] %v14004_v32  ;;  %v4400_v17 = vadd.f32 %v4399_v14, %v18187_v19  ;;  %v5614_v38 = vpop.f32.mrf.mxu1  ;;  %6045 = vmatmul.mubr.f32.gmra.mxu1 %v18189_v55  ;;  %v14009_v20 = vadd.f32 %v5587_v28, %v4398_v57  ;;  %v18193_v14 = vld [vmem:[#allocation418_spill] sm:$0xff]  ;;  %v18195_v55 = vand.u32 4294901760, %v18194_v21 }
 0x487   : > { %v4405_v44 = vpop.f32.mrf.mxu0  ;;  %4788 = vmatmul.mubr.f32.gmra.mxu0 %v18176_v35  ;;  %6050 = vmatprep.mubr.f32.mxu1 %v17044_v61  ;;  %v18197_v35 = vld [vmem:[#allocation420_spill] sm:$0xff] }
 0x488   : > { %18190 = vst [vmem:[#allocation312_spill] sm:$0xff] %v14009_v20  ;;  %v4406_v7 = vadd.f32 %v4405_v44, %v18191_v37  ;;  %v5616_v60 = vpop.f32.mrf.mxu1  ;;  %4793 = vmatprep.mubr.f32.mxu0 %v17044_v61  ;;  %v14015_v46 = vadd.f32 %v5589_v42, %v4400_v17  ;;  %v18200_v20 = vld [vmem:[#allocation417_spill] sm:$0xff] }
 0x489   : > { %v4407_v52 = vpop.f32.mrf.mxu0 }
 0x48a   : > { %18192 = vst [vmem:[#allocation314_spill] sm:$0xff] %v14015_v46  ;;  %v4408_v19 = vadd.f32 %v4407_v52, %v18193_v14  ;;  %v5623_v32 = vpop.f32.mrf.mxu1  ;;  %6054 = vmatmul.mubr.f32.gmra.mxu1 %v18195_v55  ;;  %v14020_v28 = vadd.f32 %v5596_v33, %v4406_v7  ;;  %v18199_v52 = vld [vmem:[#allocation422_spill] sm:$0xff]  ;;  %v18201_v55 = vand.u32 4294901760, %v18200_v20 }
 0x48b   : > { %v4413_v57 = vpop.f32.mrf.mxu0  ;;  %4796 = vmatmul.mubr.f32.gmra.mxu0 %v18182_v40  ;;  %6059 = vmatprep.mubr.f32.mxu1 %v17044_v61  ;;  %v18202_v40 = vld [vmem:[#allocation424_spill] sm:$0xff] }
 0x48c   : > { %18196 = vst [vmem:[#allocation309_spill] sm:$0xff] %v14020_v28  ;;  %v4414_v44 = vadd.f32 %v4413_v57, %v18197_v35  ;;  %v5625_v37 = vpop.f32.mrf.mxu1  ;;  %4801 = vmatprep.mubr.f32.mxu0 %v17044_v61  ;;  %v14026_v42 = vadd.f32 %v5598_v34, %v4408_v19  ;;  %v18205_v28 = vld [vmem:[#allocation421_spill] sm:$0xff] }
 0x48d   : > { %v4415_v17 = vpop.f32.mrf.mxu0 }
 0x48e   : > { %18198 = vst [vmem:[#allocation316_spill] sm:$0xff] %v14026_v42  ;;  %v4416_v14 = vadd.f32 %v4415_v17, %v18199_v52  ;;  %v5632_v46 = vpop.f32.mrf.mxu1  ;;  %6063 = vmatmul.mubr.f32.gmra.mxu1 %v18201_v55  ;;  %v14031_v33 = vadd.f32 %v5605_v0, %v4414_v44  ;;  %v18204_v17 = vld [vmem:[#allocation425_spill] sm:$0xff]  ;;  %v18206_v55 = vand.u32 4294901760, %v18205_v28 }
 0x48f   : > { %v4421_v7 = vpop.f32.mrf.mxu0  ;;  %4804 = vmatmul.mubr.f32.gmra.mxu0 %v18188_v41  ;;  %6068 = vmatprep.mubr.f32.mxu1 %v17044_v61  ;;  %v18208_v41 = vld [vmem:[#allocation427_spill] sm:$0xff] }
 0x490   : > { %v4422_v57 = vadd.f32 %v4421_v7, %v18202_v40  ;;  %v5634_v35 = vpop.f32.mrf.mxu1  ;;  %4809 = vmatprep.mubr.f32.mxu0 %v17044_v61  ;;  %v14037_v34 = vadd.f32 %v5607_v11, %v4416_v14 }
 0x491   : > { %v4423_v19 = vpop.f32.mrf.mxu0 }
 0x492   : > { %18203 = vst [vmem:[#allocation318_spill] sm:$0xff] %v14037_v34  ;;  %v4424_v52 = vadd.f32 %v4423_v19, %v18204_v17  ;;  %v5641_v42 = vpop.f32.mrf.mxu1  ;;  %6072 = vmatmul.mubr.f32.gmra.mxu1 %v18206_v55  ;;  %v14042_v0 = vadd.f32 %v5614_v38, %v4422_v57  ;;  %v18210_v19 = vld [vmem:[#allocation429_spill] sm:$0xff]  ;;  %v18211_v55 = vand.u32 4294901760, %v12586_v58 }
 0x493   : > { %v4429_v44 = vpop.f32.mrf.mxu0  ;;  %4812 = vmatmul.mubr.f32.gmra.mxu0 %v18194_v21  ;;  %6077 = vmatprep.mubr.f32.mxu1 %v17044_v61  ;;  %v18212_v21 = vld [vmem:[#allocation431_spill] sm:$0xff] }
 0x494   : > { %18207 = vst [vmem:[#allocation313_spill] sm:$0xff] %v14042_v0  ;;  %v4430_v7 = vadd.f32 %v4429_v44, %v18208_v41  ;;  %v5643_v40 = vpop.f32.mrf.mxu1  ;;  %4817 = vmatprep.mubr.f32.mxu0 %v17044_v61  ;;  %v14048_v11 = vadd.f32 %v5616_v60, %v4424_v52  ;;  %v18215_v0 = vld [vmem:[#allocation428_spill] sm:$0xff] }
 0x495   : > { %v4431_v14 = vpop.f32.mrf.mxu0 }
 0x496   : > { %18209 = vst [vmem:[#allocation320_spill] sm:$0xff] %v14048_v11  ;;  %v4432_v17 = vadd.f32 %v4431_v14, %v18210_v19  ;;  %v5650_v34 = vpop.f32.mrf.mxu1  ;;  %6081 = vmatmul.mubr.f32.gmra.mxu1 %v18211_v55  ;;  %v14053_v38 = vadd.f32 %v5623_v32, %v4430_v7  ;;  %v18214_v14 = vld [vmem:[#allocation432_spill] sm:$0xff]  ;;  %v18216_v55 = vand.u32 4294901760, %v18215_v0 }
 0x497   : > { %v4437_v57 = vpop.f32.mrf.mxu0  ;;  %4820 = vmatmul.mubr.f32.gmra.mxu0 %v18200_v20  ;;  %6086 = vmatprep.mubr.f32.mxu1 %v17044_v61  ;;  %v18217_v20 = vld [vmem:[#allocation433_spill] sm:$0xff] }
 0x498   : > { %v4438_v44 = vadd.f32 %v4437_v57, %v18212_v21  ;;  %v5652_v41 = vpop.f32.mrf.mxu1  ;;  %4825 = vmatprep.mubr.f32.mxu0 %v17044_v61  ;;  %v14059_v60 = vadd.f32 %v5625_v37, %v4432_v17 }
 0x499   : > { %v4439_v52 = vpop.f32.mrf.mxu0 }
 0x49a   : > { %18213 = vst [vmem:[#allocation322_spill] sm:$0xff] %v14059_v60  ;;  %v4440_v19 = vadd.f32 %v4439_v52, %v18214_v14  ;;  %v5659_v11 = vpop.f32.mrf.mxu1  ;;  %6090 = vmatmul.mubr.f32.gmra.mxu1 %v18216_v55  ;;  %v14064_v32 = vadd.f32 %v5632_v46, %v4438_v44  ;;  %v18218_v52 = vld [vmem:[#allocation434_spill] sm:$0xff]  ;;  %v18219_v55 = vand.u32 4294901760, %v12634_v10 }
 0x49b   : > { %v4445_v7 = vpop.f32.mrf.mxu0  ;;  %4828 = vmatmul.mubr.f32.gmra.mxu0 %v18205_v28  ;;  %6095 = vmatprep.mubr.f32.mxu1 %v17044_v61 }
 0x49c   : > { %v4446_v57 = vadd.f32 %v4445_v7, %v18217_v20  ;;  %v5661_v21 = vpop.f32.mrf.mxu1  ;;  %4833 = vmatprep.mubr.f32.mxu0 %v17044_v61  ;;  %v14070_v37 = vadd.f32 %v5634_v35, %v4440_v19  ;;  %v18220_v20 = vld [vmem:[#allocation435_spill] sm:$0xff] }
 0x49d   : > { %v4447_v17 = vpop.f32.mrf.mxu0 }
 0x49e   : > { %v4448_v14 = vadd.f32 %v4447_v17, %v18218_v52  ;;  %v5668_v60 = vpop.f32.mrf.mxu1  ;;  %6099 = vmatmul.mubr.f32.gmra.mxu1 %v18219_v55  ;;  %v14075_v46 = vadd.f32 %v5641_v42, %v4446_v57  ;;  %v18221_v55 = vand.u32 4294901760, %v12657_v27 }
 0x49f   : > { %v4453_v44 = vpop.f32.mrf.mxu0  ;;  %4836 = vmatmul.mubr.f32.gmra.mxu0 %v12586_v58  ;;  %6104 = vmatprep.mubr.f32.mxu1 %v17044_v61 }
 0x4a0   : > { %v4454_v28 = vadd.f32 %v4453_v44, %v12673_v25  ;;  %v5670_v7 = vpop.f32.mrf.mxu1  ;;  %4841 = vmatprep.mubr.f32.mxu0 %v17044_v61  ;;  %v14081_v35 = vadd.f32 %v5643_v40, %v4448_v14  ;;  %v18223_v44 = vld [vmem:[#allocation436_spill] sm:$0xff] }
 0x4a1   : > { %v4455_v19 = vpop.f32.mrf.mxu0 }
 0x4a2   : > { %v4456_v17 = vadd.f32 %v4455_v19, %v18220_v20  ;;  %v5677_v52 = vpop.f32.mrf.mxu1  ;;  %6108 = vmatmul.mubr.f32.gmra.mxu1 %v18221_v55  ;;  %v14086_v42 = vadd.f32 %v5650_v34, %v4454_v28  ;;  %v18224_v55 = vand.u32 4294901760, %v12676_v1 }
 0x4a3   : > { %v4461_v57 = vpop.f32.mrf.mxu0  ;;  %4844 = vmatmul.mubr.f32.gmra.mxu0 %v18215_v0  ;;  %6113 = vmatprep.mubr.f32.mxu1 %v17044_v61 }
 0x4a4   : > { %v4462_v58 = vadd.f32 %v4461_v57, %v12689_v47  ;;  %v5679_v25 = vpop.f32.mrf.mxu1  ;;  %4849 = vmatprep.mubr.f32.mxu0 %v17044_v61  ;;  %v14092_v40 = vadd.f32 %v5652_v41, %v4456_v17  ;;  %v18226_v47 = vld [vmem:[#allocation437_spill] sm:$0xff] }
 0x4a5   : > { %v4463_v14 = vpop.f32.mrf.mxu0 }
 0x4a6   : > { %18222 = vst [vmem:[#allocation317_spill] sm:$0xff] %v14092_v40  ;;  %v4464_v19 = vadd.f32 %v4463_v14, %v18223_v44  ;;  %v5686_v20 = vpop.f32.mrf.mxu1  ;;  %6117 = vmatmul.mubr.f32.gmra.mxu1 %v18224_v55  ;;  %v14097_v34 = vadd.f32 %v5659_v11, %v4462_v58  ;;  %v18228_v40 = vmov 1.0   ;;  %v18230_v11 = vld [vmem:[#allocation40_spill] sm:$0xff] }
 0x4a7   : > { %v4469_v28 = vpop.f32.mrf.mxu0  ;;  %4852 = vmatmul.mubr.f32.gmra.mxu0 %v12634_v10  ;;  %7276 = vmatprep.mubr.f32.mxu1 %v17044_v61 }
 0x4a8   : > { %18225 = vst [vmem:[#allocation324_spill] sm:$0xff] %v14097_v34  ;;  %v4470_v0 = vadd.f32 %v4469_v28, %v18226_v47  ;;  %v5688_v57 = vpop.f32.mrf.mxu1  ;;  %4857 = vmatprep.mubr.f32.mxu0 %v17044_v61  ;;  %v14103_v41 = vadd.f32 %v5661_v21, %v4464_v19  ;;  %v18231_v28 = vld [vmem:[#allocation43_spill] sm:$0xff] }
 0x4a9   : > { %v4471_v17 = vpop.f32.mrf.mxu0 }
 0x4aa   : > { %18227 = vst [vmem:[#allocation326_spill] sm:$0xff] %v14103_v41  ;;  %v4472_v14 = vadd.f32 %v4471_v17, %v12709_v59  ;;  %v5695_v44 = vpop.f32.mrf.mxu1  ;;  %8918 = vmatmul.mubr.msk.f32.vlgmr.msra.gmra.mxu1 %vm679_vm1, %v18228_v40  ;;  %v14110_v58 = vadd.f32 %v5668_v60, %v4470_v0 }
 0x4ab   : > { %v4477_v10 = vpop.f32.mrf.mxu0  ;;  %4860 = vmatmul.mubr.f32.gmra.mxu0 %v12657_v27  ;;  %7283 = vmatprep.mubr.f32.mxu1 %v17044_v61 }
 0x4ac   : > { %v4478_v47 = vadd.f32 %v4477_v10, %v18231_v28  ;;  %v5697_v21 = vpop.f32.mrf.mxu1  ;;  %4865 = vmatprep.mubr.f32.mxu0 %v17044_v61  ;;  %v14116_v19 = vadd.f32 %v5670_v7, %v4472_v14 }
 0x4ad   : > { %v4479_v59 = vpop.f32.mrf.mxu0 }
 0x4ae   : > { %v4480_v17 = vadd.f32 %v4479_v59, %v12719_v18  ;;  %v5704_v41 = vpop.f32.mrf.mxu1  ;;  %8919 = vmatmul.mubr.msk.f32.gmra.mxu1 %vm680_vm3, %v18228_v40  ;;  %v14123_v60 = vadd.f32 %v5677_v52, %v4478_v47 }
 0x4af   : > { %v4485_v27 = vpop.f32.mrf.mxu0  ;;  %4868 = vmatmul.mubr.f32.gmra.mxu0 %v12676_v1  ;;  %7290 = vmatprep.mubr.f32.mxu1 %v17044_v61 }
 0x4b0   : > { %v4486_v0 = vadd.f32 %v4485_v27, %v12724_v36  ;;  %v5706_v7 = vpop.f32.mrf.mxu1  ;;  %6283 = vmatprep.mubr.f32.mxu0 %v17044_v61  ;;  %v14129_v14 = vadd.f32 %v5679_v25, %v4480_v17 }
 0x4b1   : > { %v4487_v18 = vpop.f32.mrf.mxu0 }
 0x4b2   : > { %v4488_v10 = vadd.f32 %v4487_v18, %v12729_v3  ;;  %v5713_v28 = vpop.f32.mrf.mxu1  ;;  %8920 = vmatmul.mubr.msk.f32.gmra.mxu1 %vm681_vm0, %v18228_v40  ;;  %v14136_v52 = vadd.f32 %v5686_v20, %v4486_v0 }
 0x4b3   : > { %v4493_v1 = vpop.f32.mrf.mxu0  ;;  %8790 = vmatmul.mubr.msk.f32.vlgmr.msra.gmra.mxu0 %vm679_vm1, %v18228_v40  ;;  %7297 = vmatprep.mubr.f32.mxu1 %v17044_v61 }
 0x4b4   : > { %v4494_v36 = vadd.f32 %v4493_v1, %v12735_v62  ;;  %v5715_v25 = vpop.f32.mrf.mxu1  ;;  %6290 = vmatprep.mubr.f32.mxu0 %v17044_v61  ;;  %v14145_v3 = vadd.f32 %v5688_v57, %v4488_v10 }
 0x4b5   : > { %v4495_v47 = vpop.f32.mrf.mxu0 }
 0x4b6   : > { %v4496_v17 = vadd.f32 %v4495_v47, %v12743_v50  ;;  %v5722_v20 = vpop.f32.mrf.mxu1  ;;  %8921 = vmatmul.mubr.msk.f32.gmra.mxu1 %vm682_vm2, %v18228_v40  ;;  %v14152_v55 = vadd.f32 %v5695_v44, %v4494_v36 }
 0x4b7   : > { %v4501_v0 = vpop.f32.mrf.mxu0  ;;  %8791 = vmatmul.mubr.msk.f32.gmra.mxu0 %vm680_vm3, %v18228_v40  ;;  %7304 = vmatprep.mubr.f32.mxu1 %v17044_v61 }
 0x4b8   : > { %v4502_v62 = vadd.f32 %v4501_v0, %v12751_v53  ;;  %v5724_v57 = vpop.f32.mrf.mxu1  ;;  %6297 = vmatprep.mubr.f32.mxu0 %v17044_v61  ;;  %v14161_v50 = vadd.f32 %v5697_v21, %v4496_v17 }
 0x4b9   : > { %v4503_v18 = vpop.f32.mrf.mxu0 }
 0x4ba   : > { %v4504_v10 = vadd.f32 %v4503_v18, %v12759_v30  ;;  %v5731_v44 = vpop.f32.mrf.mxu1  ;;  %8922 = vmatmul.mubr.msk.f32.gmra.mxu1 %vm683_vm4, %v18228_v40  ;;  %v14168_v34 = vadd.f32 %v5704_v41, %v4502_v62 }
 0x4bb   : > { %v4509_v36 = vpop.f32.mrf.mxu0  ;;  %8792 = vmatmul.mubr.msk.f32.gmra.mxu0 %vm681_vm0, %v18228_v40  ;;  %7311 = vmatprep.mubr.f32.mxu1 %v17044_v61 }
 0x4bc   : > { %v4510_v53 = vadd.f32 %v4509_v36, %v12767_v26  ;;  %v5733_v21 = vpop.f32.mrf.mxu1  ;;  %6304 = vmatprep.mubr.f32.mxu0 %v17044_v61  ;;  %v14177_v30 = vadd.f32 %v5706_v7, %v4504_v10 }
 0x4bd   : > { %v4511_v47 = vpop.f32.mrf.mxu0 }
 0x4be   : > { %v4512_v17 = vadd.f32 %v4511_v47, %v12775_v45  ;;  %v5740_v41 = vpop.f32.mrf.mxu1  ;;  %8923 = vmatmul.mubr.msk.f32.gmra.mxu1 %vm684_vm5, %v18228_v40  ;;  %v14184_v59 = vadd.f32 %v5713_v28, %v4510_v53 }
 0x4bf   : > { %v4517_v62 = vpop.f32.mrf.mxu0  ;;  %8793 = vmatmul.mubr.msk.f32.gmra.mxu0 %vm682_vm2, %v18228_v40  ;;  %7318 = vmatprep.mubr.f32.mxu1 %v17044_v61 }
 0x4c0   : > { %v4518_v26 = vadd.f32 %v4517_v62, %v12783_v43  ;;  %v5742_v7 = vpop.f32.mrf.mxu1  ;;  %6311 = vmatprep.mubr.f32.mxu0 %v17044_v61  ;;  %v14193_v45 = vadd.f32 %v5715_v25, %v4512_v17 }
 0x4c1   : > { %v4519_v18 = vpop.f32.mrf.mxu0 }
 0x4c2   : > { %v4520_v10 = vadd.f32 %v4519_v18, %v12790_v16  ;;  %v5749_v28 = vpop.f32.mrf.mxu1  ;;  %8924 = vmatmul.mubr.msk.f32.gmra.mxu1 %vm685_vm6, %v18228_v40  ;;  %v14200_v27 = vadd.f32 %v5722_v20, %v4518_v26 }
 0x4c3   : > { %v4525_v53 = vpop.f32.mrf.mxu0  ;;  %8794 = vmatmul.mubr.msk.f32.gmra.mxu0 %vm683_vm4, %v18228_v40  ;;  %7325 = vmatprep.mubr.f32.mxu1 %v17044_v61 }
 0x4c4   : > { %v4526_v43 = vadd.f32 %v4525_v53, %v12798_v6  ;;  %v5751_v25 = vpop.f32.mrf.mxu1  ;;  %6318 = vmatprep.mubr.f32.mxu0 %v17044_v61  ;;  %v14209_v16 = vadd.f32 %v5724_v57, %v4520_v10 }
 0x4c5   : > { %v4527_v47 = vpop.f32.mrf.mxu0 }
 0x4c6   : > { %v4528_v17 = vadd.f32 %v4527_v47, %v12805_v29  ;;  %v5758_v20 = vpop.f32.mrf.mxu1  ;;  %8925 = vmatmul.mubr.msk.f32.gmra.mxu1 %vm686_vm7, %v18228_v40  ;;  %v14216_v1 = vadd.f32 %v5731_v44, %v4526_v43 }
 0x4c7   : > { %v4533_v26 = vpop.f32.mrf.mxu0  ;;  %8795 = vmatmul.mubr.msk.f32.gmra.mxu0 %vm684_vm5, %v18228_v40  ;;  %7332 = vmatprep.mubr.f32.mxu1 %v17044_v61 }
 0x4c8   : > { %v4534_v6 = vadd.f32 %v4533_v26, %v12813_v8  ;;  %v5760_v57 = vpop.f32.mrf.mxu1  ;;  %6325 = vmatprep.mubr.f32.mxu0 %v17044_v61  ;;  %v14225_v29 = vadd.f32 %v5733_v21, %v4528_v17 }
 0x4c9   : > { %v4535_v18 = vpop.f32.mrf.mxu0 }
 0x4ca   : > { %v4536_v10 = vadd.f32 %v4535_v18, %v12820_v54  ;;  %v5767_v44 = vpop.f32.mrf.mxu1  ;;  %8926 = vmatmul.mubr.msk.f32.gmra.mxu1 %vm687_vm8, %v18228_v40  ;;  %v14232_v0 = vadd.f32 %v5740_v41, %v4534_v6 }
 0x4cb   : > { %v4541_v43 = vpop.f32.mrf.mxu0  ;;  %8796 = vmatmul.mubr.msk.f32.gmra.mxu0 %vm685_vm6, %v18228_v40  ;;  %7339 = vmatprep.mubr.f32.mxu1 %v17044_v61 }
 0x4cc   : > { %v4542_v8 = vadd.f32 %v4541_v43, %v12828_v22  ;;  %v5769_v21 = vpop.f32.mrf.mxu1  ;;  %6332 = vmatprep.mubr.f32.mxu0 %v17044_v61  ;;  %v14241_v54 = vadd.f32 %v5742_v7, %v4536_v10 }
 0x4cd   : > { %v4543_v47 = vpop.f32.mrf.mxu0 }
 0x4ce   : > { %v4544_v17 = vadd.f32 %v4543_v47, %v12835_v56  ;;  %v5776_v41 = vpop.f32.mrf.mxu1  ;;  %8927 = vmatmul.mubr.msk.f32.gmra.mxu1 %vm688_vm9, %v18228_v40  ;;  %v14248_v36 = vadd.f32 %v5749_v28, %v4542_v8 }
 0x4cf   : > { %v4549_v6 = vpop.f32.mrf.mxu0  ;;  %8797 = vmatmul.mubr.msk.f32.gmra.mxu0 %vm686_vm7, %v18228_v40  ;;  %7346 = vmatprep.mubr.f32.mxu1 %v17044_v61 }
 0x4d0   : > { %v4550_v22 = vadd.f32 %v4549_v6, %v12843_v39  ;;  %v5778_v7 = vpop.f32.mrf.mxu1  ;;  %6339 = vmatprep.mubr.f32.mxu0 %v17044_v61  ;;  %v14257_v56 = vadd.f32 %v5751_v25, %v4544_v17 }
 0x4d1   : > { %v4551_v18 = vpop.f32.mrf.mxu0 }
 0x4d2   : > { %v4552_v10 = vadd.f32 %v4551_v18, %v12850_v31  ;;  %v5785_v28 = vpop.f32.mrf.mxu1  ;;  %8928 = vmatmul.mubr.msk.f32.gmra.mxu1 %vm689_vm10, %v18228_v40  ;;  %v14264_v62 = vadd.f32 %v5758_v20, %v4550_v22 }
 0x4d3   : > { %v4557_v8 = vpop.f32.mrf.mxu0  ;;  %8798 = vmatmul.mubr.msk.f32.gmra.mxu0 %vm687_vm8, %v18228_v40  ;;  %7353 = vmatprep.mubr.f32.mxu1 %v17044_v61 }
 0x4d4   : > { %v4558_v39 = vadd.f32 %v4557_v8, %v12858_v48  ;;  %v5787_v25 = vpop.f32.mrf.mxu1  ;;  %6346 = vmatprep.mubr.f32.mxu0 %v17044_v61  ;;  %v14273_v31 = vadd.f32 %v5760_v57, %v4552_v10  ;;  %v18243_v8 = vld [vmem:[#allocation59_spill] sm:$0xff] }
 0x4d5   : > { %v4559_v47 = vpop.f32.mrf.mxu0  ;;  %vm18244_vm0 = vcmp.eq.s32.totalorder %v18243_v8, %v18230_v11 }
 0x4d6   : > { %v4560_v17 = vadd.f32 %v4559_v47, %v12865_v51  ;;  %v5794_v20 = vpop.f32.mrf.mxu1  ;;  %8929 = vmatmul.mubr.msk.f32.gmra.mxu1 %vm690_vm11, %v18228_v40  ;;  %v14280_v53 = vadd.f32 %v5767_v44, %v4558_v39  ;;  %vm18249_vm3 = vmmov %vm18244_vm0 }
 0x4d7   : > { %v4565_v22 = vpop.f32.mrf.mxu0  ;;  %8799 = vmatmul.mubr.msk.f32.gmra.mxu0 %vm688_vm9, %v18228_v40  ;;  %7360 = vmatprep.mubr.f32.mxu1 %v17044_v61 }
 0x4d8   : > { %v4566_v48 = vadd.f32 %v4565_v22, %v12873_v63  ;;  %v5796_v57 = vpop.f32.mrf.mxu1  ;;  %6353 = vmatprep.mubr.f32.mxu0 %v17044_v61  ;;  %v14289_v51 = vadd.f32 %v5769_v21, %v4560_v17  ;;  %v18245_v22 = vld [vmem:[#allocation61_spill] sm:$0xff] }
 0x4d9   : > { %v4567_v18 = vpop.f32.mrf.mxu0  ;;  %vm18246_vm1 = vcmp.eq.s32.totalorder %v18245_v22, %v18230_v11 }
 0x4da   : > { %v4568_v10 = vadd.f32 %v4567_v18, %v12880_v23  ;;  %v5803_v44 = vpop.f32.mrf.mxu1  ;;  %8930 = vmatmul.mubr.msk.f32.gmra.mxu1 %vm18244_vm0, %v18228_v40  ;;  %v14296_v26 = vadd.f32 %v5776_v41, %v4566_v48  ;;  %vm18252_vm5 = vmmov %vm18246_vm1 }
 0x4db   : > { %v4573_v39 = vpop.f32.mrf.mxu0  ;;  %8800 = vmatmul.mubr.msk.f32.gmra.mxu0 %vm689_vm10, %v18228_v40  ;;  %7367 = vmatprep.mubr.f32.mxu1 %v17044_v61 }
 0x4dc   : > { %v4574_v63 = vadd.f32 %v4573_v39, %v12888_v5  ;;  %v5805_v21 = vpop.f32.mrf.mxu1  ;;  %6360 = vmatprep.mubr.f32.mxu0 %v17044_v61  ;;  %v14305_v23 = vadd.f32 %v5778_v7, %v4568_v10  ;;  %v18247_v39 = vld [vmem:[#allocation63_spill] sm:$0xff] }
 0x4dd   : > { %v4575_v47 = vpop.f32.mrf.mxu0  ;;  %vm18248_vm2 = vcmp.eq.s32.totalorder %v18247_v39, %v18230_v11 }
 0x4de   : > { %v4576_v17 = vadd.f32 %v4575_v47, %v12895_v49  ;;  %v5812_v41 = vpop.f32.mrf.mxu1  ;;  %8931 = vmatmul.mubr.msk.f32.gmra.mxu1 %vm18246_vm1, %v18228_v40  ;;  %v14312_v43 = vadd.f32 %v5785_v28, %v4574_v63  ;;  %vm18256_vm7 = vmmov %vm18248_vm2 }
 0x4df   : > { %v4581_v48 = vpop.f32.mrf.mxu0  ;;  %8801 = vmatmul.mubr.msk.f32.gmra.mxu0 %vm690_vm11, %v18228_v40  ;;  %7374 = vmatprep.mubr.f32.mxu1 %v17044_v61 }
 0x4e0   : > { %v4582_v5 = vadd.f32 %v4581_v48, %v12903_v4  ;;  %v5814_v7 = vpop.f32.mrf.mxu1  ;;  %6367 = vmatprep.mubr.f32.mxu0 %v17044_v61  ;;  %v14321_v49 = vadd.f32 %v5787_v25, %v4576_v17  ;;  %v18250_v48 = vld [vmem:[#allocation65_spill] sm:$0xff] }
 0x4e1   : > { %v4583_v18 = vpop.f32.mrf.mxu0  ;;  %vm18251_vm4 = vcmp.eq.s32.totalorder %v18250_v48, %v18230_v11 }
 0x4e2   : > { %v4584_v10 = vadd.f32 %v4583_v18, %v12910_v15  ;;  %v5821_v28 = vpop.f32.mrf.mxu1  ;;  %8932 = vmatmul.mubr.msk.f32.gmra.mxu1 %vm18248_vm2, %v18228_v40  ;;  %v14328_v6 = vadd.f32 %v5794_v20, %v4582_v5  ;;  %vm18262_vm9 = vmmov %vm18251_vm4 }
 0x4e3   : > { %v4589_v63 = vpop.f32.mrf.mxu0  ;;  %8802 = vmatmul.mubr.msk.f32.gmra.mxu0 %vm18249_vm3, %v18228_v40  ;;  %7381 = vmatprep.mubr.f32.mxu1 %v17044_v61 }
 0x4e4   : > { %v4590_v4 = vadd.f32 %v4589_v63, %v12918_v9  ;;  %v5823_v25 = vpop.f32.mrf.mxu1  ;;  %6374 = vmatprep.mubr.f32.mxu0 %v17044_v61  ;;  %v14337_v15 = vadd.f32 %v5796_v57, %v4584_v10  ;;  %v18253_v63 = vld [vmem:[#allocation67_spill] sm:$0xff] }
 0x4e5   : > { %v4591_v47 = vpop.f32.mrf.mxu0  ;;  %vm18254_vm6 = vcmp.eq.s32.totalorder %v18253_v63, %v18230_v11 }
 0x4e6   : > { %v4592_v17 = vadd.f32 %v4591_v47, %v12925_v2  ;;  %v5830_v20 = vpop.f32.mrf.mxu1  ;;  %8933 = vmatmul.mubr.msk.f32.gmra.mxu1 %vm18251_vm4, %v18228_v40  ;;  %v14344_v8 = vadd.f32 %v5803_v44, %v4590_v4  ;;  %vm18269_vm11 = vmmov %vm18254_vm6 }
 0x4e7   : > { %v4597_v5 = vpop.f32.mrf.mxu0  ;;  %8803 = vmatmul.mubr.msk.f32.gmra.mxu0 %vm18252_vm5, %v18228_v40  ;;  %7388 = vmatprep.mubr.f32.mxu1 %v17044_v61 }
 0x4e8   : > { %v4598_v9 = vadd.f32 %v4597_v5, %v12933_v13  ;;  %v5832_v57 = vpop.f32.mrf.mxu1  ;;  %6381 = vmatprep.mubr.f32.mxu0 %v17044_v61  ;;  %v14353_v2 = vadd.f32 %v5805_v21, %v4592_v17  ;;  %v18258_v17 = vld [vmem:[#allocation8_spill] sm:$0xff] }
 0x4e9   : > { %v4599_v18 = vpop.f32.mrf.mxu0 }
 0x4ea   : > { %v4600_v10 = vadd.f32 %v4599_v18, %v12940_v12  ;;  %v5839_v44 = vpop.f32.mrf.mxu1  ;;  %8934 = vmatmul.mubr.msk.f32.gmra.mxu1 %vm18254_vm6, %v18228_v40  ;;  %v14360_v22 = vadd.f32 %v5812_v41, %v4598_v9  ;;  %v18259_v9 = vld [vmem:[#allocation69_spill] sm:$0xff] }
 0x4eb   : > { %v4605_v4 = vpop.f32.mrf.mxu0  ;;  %8804 = vmatmul.mubr.msk.f32.gmra.mxu0 %vm18256_vm7, %v18228_v40  ;;  %7395 = vmatprep.mubr.f32.mxu1 %v17044_v61  ;;  %vm18260_vm8 = vcmp.eq.s32.totalorder %v18259_v9, %v18230_v11 }
 0x4ec   : > { %18255 = vst [vmem:[#allocation321_spill] sm:$0xff] %v14360_v22  ;;  %v4606_v13 = vadd.f32 %v4605_v4, %v12948_v24  ;;  %v5841_v21 = vpop.f32.mrf.mxu1  ;;  %6388 = vmatprep.mubr.f32.mxu0 %v17044_v61  ;;  %v14369_v12 = vadd.f32 %v5814_v7, %v4600_v10  ;;  %v18263_v24 = vld [vmem:[#allocation9_spill] sm:$0xff]  ;;  %vm18276_vm1 = vmmov %vm18260_vm8 }
 0x4ed   : > { %v4607_v47 = vpop.f32.mrf.mxu0 }
 0x4ee   : > { %18257 = vst [vmem:[#allocation328_spill] sm:$0xff] %v14369_v12  ;;  %v4608_v5 = vadd.f32 %v4607_v47, %v18258_v17  ;;  %v5848_v41 = vpop.f32.mrf.mxu1  ;;  %8935 = vmatmul.mubr.msk.f32.gmra.mxu1 %vm18260_vm8, %v18228_v40  ;;  %v14376_v39 = vadd.f32 %v5821_v28, %v4606_v13  ;;  %v18265_v17 = vld [vmem:[#allocation10_spill] sm:$0xff]  ;;  %v18266_v13 = vld [vmem:[#allocation71_spill] sm:$0xff] }
 0x4ef   : > { %v4613_v18 = vpop.f32.mrf.mxu0  ;;  %8805 = vmatmul.mubr.msk.f32.gmra.mxu0 %vm18262_vm9, %v18228_v40  ;;  %7402 = vmatprep.mubr.f32.mxu1 %v17044_v61  ;;  %vm18267_vm10 = vcmp.eq.s32.totalorder %v18266_v13, %v18230_v11 }
 0x4f0   : > { %18261 = vst [vmem:[#allocation330_spill] sm:$0xff] %v14376_v39  ;;  %v4614_v7 = vadd.f32 %v4613_v18, %v18263_v24  ;;  %v5850_v10 = vpop.f32.mrf.mxu1  ;;  %6395 = vmatprep.mubr.f32.mxu0 %v17044_v61  ;;  %v14385_v4 = vadd.f32 %v5823_v25, %v4608_v5  ;;  %v18270_v25 = vld [vmem:[#allocation12_spill] sm:$0xff]  ;;  %vm18283_vm3 = vmmov %vm18267_vm10 }
 0x4f1   : > { %v4615_v47 = vpop.f32.mrf.mxu0 }
 0x4f2   : > { %18264 = vst [vmem:[#allocation325_spill] sm:$0xff] %v14385_v4  ;;  %v4616_v12 = vadd.f32 %v4615_v47, %v18265_v17  ;;  %v5857_v28 = vpop.f32.mrf.mxu1  ;;  %8936 = vmatmul.mubr.msk.f32.gmra.mxu1 %vm18267_vm10, %v18228_v40  ;;  %v14392_v48 = vadd.f32 %v5830_v20, %v4614_v7  ;;  %v18272_v17 = vld [vmem:[#allocation11_spill] sm:$0xff]  ;;  %v18273_v7 = vld [vmem:[#allocation73_spill] sm:$0xff] }
 0x4f3   : > { %v4621_v39 = vpop.f32.mrf.mxu0  ;;  %8806 = vmatmul.mubr.msk.f32.gmra.mxu0 %vm18269_vm11, %v18228_v40  ;;  %7409 = vmatprep.mubr.f32.mxu1 %v17044_v61  ;;  %vm18274_vm0 = vcmp.eq.s32.totalorder %v18273_v7, %v18230_v11 }
 0x4f4   : > { %18268 = vst [vmem:[#allocation332_spill] sm:$0xff] %v14392_v48  ;;  %v4622_v5 = vadd.f32 %v4621_v39, %v18270_v25  ;;  %v5859_v18 = vpop.f32.mrf.mxu1  ;;  %6402 = vmatprep.mubr.f32.mxu0 %v17044_v61  ;;  %v14401_v24 = vadd.f32 %v5832_v57, %v4616_v12  ;;  %v18277_v57 = vld [vmem:[#allocation13_spill] sm:$0xff]  ;;  %vm18290_vm5 = vmmov %vm18274_vm0 }
 0x4f5   : > { %v4623_v47 = vpop.f32.mrf.mxu0 }
 0x4f6   : > { %18271 = vst [vmem:[#allocation334_spill] sm:$0xff] %v14401_v24  ;;  %v4624_v4 = vadd.f32 %v4623_v47, %v18272_v17  ;;  %v5866_v20 = vpop.f32.mrf.mxu1  ;;  %8937 = vmatmul.mubr.msk.f32.gmra.mxu1 %vm18274_vm0, %v18228_v40  ;;  %v14408_v63 = vadd.f32 %v5839_v44, %v4622_v5  ;;  %v18279_v17 = vld [vmem:[#allocation14_spill] sm:$0xff]  ;;  %v18280_v5 = vld [vmem:[#allocation75_spill] sm:$0xff] }
 0x4f7   : > { %v4629_v48 = vpop.f32.mrf.mxu0  ;;  %8807 = vmatmul.mubr.msk.f32.gmra.mxu0 %vm18276_vm1, %v18228_v40  ;;  %7416 = vmatprep.mubr.f32.mxu1 %v17044_v61  ;;  %vm18281_vm2 = vcmp.eq.s32.totalorder %v18280_v5, %v18230_v11 }
 0x4f8   : > { %18275 = vst [vmem:[#allocation329_spill] sm:$0xff] %v14408_v63  ;;  %v4630_v12 = vadd.f32 %v4629_v48, %v18277_v57  ;;  %v5868_v39 = vpop.f32.mrf.mxu1  ;;  %6409 = vmatprep.mubr.f32.mxu0 %v17044_v61  ;;  %v14417_v25 = vadd.f32 %v5841_v21, %v4624_v4  ;;  %v18284_v21 = vld [vmem:[#allocation50_spill] sm:$0xff]  ;;  %vm18297_vm7 = vmmov %vm18281_vm2 }
 0x4f9   : > { %v4631_v47 = vpop.f32.mrf.mxu0 }
 0x4fa   : > { %18278 = vst [vmem:[#allocation336_spill] sm:$0xff] %v14417_v25  ;;  %v4632_v24 = vadd.f32 %v4631_v47, %v18279_v17  ;;  %v5875_v44 = vpop.f32.mrf.mxu1  ;;  %8938 = vmatmul.mubr.msk.f32.gmra.mxu1 %vm18281_vm2, %v18228_v40  ;;  %v14424_v9 = vadd.f32 %v5848_v41, %v4630_v12  ;;  %v18286_v17 = vld [vmem:[#allocation52_spill] sm:$0xff]  ;;  %v18287_v12 = vld [vmem:[#allocation77_spill] sm:$0xff] }
 0x4fb   : > { %v4637_v63 = vpop.f32.mrf.mxu0  ;;  %8808 = vmatmul.mubr.msk.f32.gmra.mxu0 %vm18283_vm3, %v18228_v40  ;;  %7423 = vmatprep.mubr.f32.mxu1 %v17044_v61  ;;  %vm18288_vm4 = vcmp.eq.s32.totalorder %v18287_v12, %v18230_v11 }
 0x4fc   : > { %18282 = vst [vmem:[#allocation338_spill] sm:$0xff] %v14424_v9  ;;  %v4638_v4 = vadd.f32 %v4637_v63, %v18284_v21  ;;  %v5877_v48 = vpop.f32.mrf.mxu1  ;;  %6416 = vmatprep.mubr.f32.mxu0 %v17044_v61  ;;  %v14433_v57 = vadd.f32 %v5850_v10, %v4632_v24  ;;  %v18291_v10 = vld [vmem:[#allocation54_spill] sm:$0xff]  ;;  %vm18304_vm9 = vmmov %vm18288_vm4 }
 0x4fd   : > { %v4639_v47 = vpop.f32.mrf.mxu0 }
 0x4fe   : > { %18285 = vst [vmem:[#allocation333_spill] sm:$0xff] %v14433_v57  ;;  %v4640_v25 = vadd.f32 %v4639_v47, %v18286_v17  ;;  %v5884_v41 = vpop.f32.mrf.mxu1  ;;  %8939 = vmatmul.mubr.msk.f32.gmra.mxu1 %vm18288_vm4, %v18228_v40  ;;  %v14440_v13 = vadd.f32 %v5857_v28, %v4638_v4  ;;  %v18293_v17 = vld [vmem:[#allocation56_spill] sm:$0xff]  ;;  %v18294_v4 = vld [vmem:[#allocation79_spill] sm:$0xff] }
 0x4ff   : > { %v4645_v9 = vpop.f32.mrf.mxu0  ;;  %8809 = vmatmul.mubr.msk.f32.gmra.mxu0 %vm18290_vm5, %v18228_v40  ;;  %7430 = vmatprep.mubr.f32.mxu1 %v17044_v61  ;;  %vm18295_vm6 = vcmp.eq.s32.totalorder %v18294_v4, %v18230_v11 }
 0x500   : > { %18289 = vst [vmem:[#allocation340_spill] sm:$0xff] %v14440_v13  ;;  %v4646_v24 = vadd.f32 %v4645_v9, %v18291_v10  ;;  %v5886_v63 = vpop.f32.mrf.mxu1  ;;  %6423 = vmatprep.mubr.f32.mxu0 %v17044_v61  ;;  %v14449_v21 = vadd.f32 %v5859_v18, %v4640_v25  ;;  %v18298_v18 = vld [vmem:[#allocation19_spill] sm:$0xff]  ;;  %vm18311_vm11 = vmmov %vm18295_vm6 }
 0x501   : > { %v4647_v47 = vpop.f32.mrf.mxu0 }
 0x502   : > { %18292 = vst [vmem:[#allocation342_spill] sm:$0xff] %v14449_v21  ;;  %v4648_v57 = vadd.f32 %v4647_v47, %v18293_v17  ;;  %v5893_v28 = vpop.f32.mrf.mxu1  ;;  %8940 = vmatmul.mubr.msk.f32.gmra.mxu1 %vm18295_vm6, %v18228_v40  ;;  %v14456_v7 = vadd.f32 %v5866_v20, %v4646_v24  ;;  %v18300_v17 = vld [vmem:[#allocation58_spill] sm:$0xff]  ;;  %v18301_v24 = vld [vmem:[#allocation81_spill] sm:$0xff] }
 0x503   : > { %v4653_v13 = vpop.f32.mrf.mxu0  ;;  %8810 = vmatmul.mubr.msk.f32.gmra.mxu0 %vm18297_vm7, %v18228_v40  ;;  %7437 = vmatprep.mubr.f32.mxu1 %v17044_v61  ;;  %vm18302_vm8 = vcmp.eq.s32.totalorder %v18301_v24, %v18230_v11 }
 0x504   : > { %18296 = vst [vmem:[#allocation337_spill] sm:$0xff] %v14456_v7  ;;  %v4654_v25 = vadd.f32 %v4653_v13, %v18298_v18  ;;  %v5895_v9 = vpop.f32.mrf.mxu1  ;;  %6430 = vmatprep.mubr.f32.mxu0 %v17044_v61  ;;  %v14465_v10 = vadd.f32 %v5868_v39, %v4648_v57  ;;  %v18305_v39 = vld [vmem:[#allocation20_spill] sm:$0xff]  ;;  %vm18318_vm1 = vmmov %vm18302_vm8 }
 0x505   : > { %v4655_v47 = vpop.f32.mrf.mxu0 }
 0x506   : > { %18299 = vst [vmem:[#allocation344_spill] sm:$0xff] %v14465_v10  ;;  %v4656_v21 = vadd.f32 %v4655_v47, %v18300_v17  ;;  %v5902_v20 = vpop.f32.mrf.mxu1  ;;  %8941 = vmatmul.mubr.msk.f32.gmra.mxu1 %vm18302_vm8, %v18228_v40  ;;  %v14472_v5 = vadd.f32 %v5875_v44, %v4654_v25  ;;  %v18307_v17 = vld [vmem:[#allocation15_spill] sm:$0xff] }
 0x507   : > { %v4661_v7 = vpop.f32.mrf.mxu0  ;;  %8811 = vmatmul.mubr.msk.f32.gmra.mxu0 %vm18304_vm9, %v18228_v40  ;;  %7444 = vmatprep.mubr.f32.mxu1 %v17044_v61  ;;  %v18308_v25 = vld [vmem:[#allocation83_spill] sm:$0xff] }
 0x508   : > { %18303 = vst [vmem:[#allocation346_spill] sm:$0xff] %v14472_v5  ;;  %v4662_v57 = vadd.f32 %v4661_v7, %v18305_v39  ;;  %v5904_v13 = vpop.f32.mrf.mxu1  ;;  %6437 = vmatprep.mubr.f32.mxu0 %v17044_v61  ;;  %v14481_v18 = vadd.f32 %v5877_v48, %v4656_v21  ;;  %vm18309_vm10 = vcmp.eq.s32.totalorder %v18308_v25, %v18230_v11  ;;  %v18312_v48 = vld [vmem:[#allocation16_spill] sm:$0xff] }
 0x509   : > { %v4663_v47 = vpop.f32.mrf.mxu0  ;;  %vm18325_vm3 = vmmov %vm18309_vm10 }
 0x50a   : > { %18306 = vst [vmem:[#allocation341_spill] sm:$0xff] %v14481_v18  ;;  %v4664_v10 = vadd.f32 %v4663_v47, %v18307_v17  ;;  %v5911_v44 = vpop.f32.mrf.mxu1  ;;  %8942 = vmatmul.mubr.msk.f32.gmra.mxu1 %vm18309_vm10, %v18228_v40  ;;  %v14488_v12 = vadd.f32 %v5884_v41, %v4662_v57  ;;  %v18314_v17 = vld [vmem:[#allocation21_spill] sm:$0xff] }
 0x50b   : > { %v4669_v5 = vpop.f32.mrf.mxu0  ;;  %8812 = vmatmul.mubr.msk.f32.gmra.mxu0 %vm18311_vm11, %v18228_v40  ;;  %7451 = vmatprep.mubr.f32.mxu1 %v17044_v61  ;;  %v18315_v57 = vld [vmem:[#allocation85_spill] sm:$0xff] }
 0x50c   : > { %18310 = vst [vmem:[#allocation348_spill] sm:$0xff] %v14488_v12  ;;  %v4670_v21 = vadd.f32 %v4669_v5, %v18312_v48  ;;  %v5913_v7 = vpop.f32.mrf.mxu1  ;;  %6444 = vmatprep.mubr.f32.mxu0 %v17044_v61  ;;  %v14497_v39 = vadd.f32 %v5886_v63, %v4664_v10  ;;  %vm18316_vm0 = vcmp.eq.s32.totalorder %v18315_v57, %v18230_v11  ;;  %v18319_v63 = vld [vmem:[#allocation60_spill] sm:$0xff] }
 0x50d   : > { %v4671_v47 = vpop.f32.mrf.mxu0  ;;  %vm18332_vm5 = vmmov %vm18316_vm0 }
 0x50e   : > { %18313 = vst [vmem:[#allocation350_spill] sm:$0xff] %v14497_v39  ;;  %v4672_v18 = vadd.f32 %v4671_v47, %v18314_v17  ;;  %v5920_v41 = vpop.f32.mrf.mxu1  ;;  %8943 = vmatmul.mubr.msk.f32.gmra.mxu1 %vm18316_vm0, %v18228_v40  ;;  %v14504_v4 = vadd.f32 %v5893_v28, %v4670_v21  ;;  %v18321_v17 = vld [vmem:[#allocation23_spill] sm:$0xff]  ;;  %v18322_v21 = vld [vmem:[#allocation86_spill] sm:$0xff] }
 0x50f   : > { %v4677_v12 = vpop.f32.mrf.mxu0  ;;  %8813 = vmatmul.mubr.msk.f32.gmra.mxu0 %vm18318_vm1, %v18228_v40  ;;  %7458 = vmatprep.mubr.f32.mxu1 %v17044_v61  ;;  %vm18323_vm2 = vcmp.eq.s32.totalorder %v18322_v21, %v18230_v11 }
 0x510   : > { %18317 = vst [vmem:[#allocation345_spill] sm:$0xff] %v14504_v4  ;;  %v4678_v10 = vadd.f32 %v4677_v12, %v18319_v63  ;;  %v5922_v5 = vpop.f32.mrf.mxu1  ;;  %6451 = vmatprep.mubr.f32.mxu0 %v17044_v61  ;;  %v14513_v48 = vadd.f32 %v5895_v9, %v4672_v18  ;;  %v18326_v9 = vld [vmem:[#allocation17_spill] sm:$0xff]  ;;  %vm18339_vm7 = vmmov %vm18323_vm2 }
 0x511   : > { %v4679_v47 = vpop.f32.mrf.mxu0 }
 0x512   : > { %18320 = vst [vmem:[#allocation352_spill] sm:$0xff] %v14513_v48  ;;  %v4680_v39 = vadd.f32 %v4679_v47, %v18321_v17  ;;  %v5929_v28 = vpop.f32.mrf.mxu1  ;;  %8944 = vmatmul.mubr.msk.f32.gmra.mxu1 %vm18323_vm2, %v18228_v40  ;;  %v14520_v24 = vadd.f32 %v5902_v20, %v4678_v10  ;;  %v18328_v17 = vld [vmem:[#allocation18_spill] sm:$0xff]  ;;  %v18329_v10 = vld [vmem:[#allocation88_spill] sm:$0xff] }
 0x513   : > { %v4685_v4 = vpop.f32.mrf.mxu0  ;;  %8814 = vmatmul.mubr.msk.f32.gmra.mxu0 %vm18325_vm3, %v18228_v40  ;;  %7465 = vmatprep.mubr.f32.mxu1 %v17044_v61  ;;  %vm18330_vm4 = vcmp.eq.s32.totalorder %v18329_v10, %v18230_v11 }
 0x514   : > { %18324 = vst [vmem:[#allocation354_spill] sm:$0xff] %v14520_v24  ;;  %v4686_v18 = vadd.f32 %v4685_v4, %v18326_v9  ;;  %v5931_v12 = vpop.f32.mrf.mxu1  ;;  %6458 = vmatprep.mubr.f32.mxu0 %v17044_v61  ;;  %v14529_v63 = vadd.f32 %v5904_v13, %v4680_v39  ;;  %v18333_v13 = vld [vmem:[#allocation26_spill] sm:$0xff]  ;;  %vm18346_vm9 = vmmov %vm18330_vm4 }
 0x515   : > { %v4687_v47 = vpop.f32.mrf.mxu0 }
 0x516   : > { %18327 = vst [vmem:[#allocation349_spill] sm:$0xff] %v14529_v63  ;;  %v4688_v48 = vadd.f32 %v4687_v47, %v18328_v17  ;;  %v5938_v20 = vpop.f32.mrf.mxu1  ;;  %8945 = vmatmul.mubr.msk.f32.gmra.mxu1 %vm18330_vm4, %v18228_v40  ;;  %v14536_v25 = vadd.f32 %v5911_v44, %v4686_v18  ;;  %v18335_v17 = vld [vmem:[#allocation62_spill] sm:$0xff]  ;;  %v18336_v18 = vld [vmem:[#allocation89_spill] sm:$0xff] }
 0x517   : > { %v4693_v24 = vpop.f32.mrf.mxu0  ;;  %8815 = vmatmul.mubr.msk.f32.gmra.mxu0 %vm18332_vm5, %v18228_v40  ;;  %7472 = vmatprep.mubr.f32.mxu1 %v17044_v61  ;;  %vm18337_vm6 = vcmp.eq.s32.totalorder %v18336_v18, %v18230_v11 }
 0x518   : > { %18331 = vst [vmem:[#allocation356_spill] sm:$0xff] %v14536_v25  ;;  %v4694_v39 = vadd.f32 %v4693_v24, %v18333_v13  ;;  %v5940_v4 = vpop.f32.mrf.mxu1  ;;  %6465 = vmatprep.mubr.f32.mxu0 %v17044_v61  ;;  %v14545_v9 = vadd.f32 %v5913_v7, %v4688_v48  ;;  %v18340_v7 = vld [vmem:[#allocation27_spill] sm:$0xff]  ;;  %vm18353_vm11 = vmmov %vm18337_vm6 }
 0x519   : > { %v4695_v47 = vpop.f32.mrf.mxu0 }
 0x51a   : > { %18334 = vst [vmem:[#allocation358_spill] sm:$0xff] %v14545_v9  ;;  %v4696_v63 = vadd.f32 %v4695_v47, %v18335_v17  ;;  %v5947_v44 = vpop.f32.mrf.mxu1  ;;  %8946 = vmatmul.mubr.msk.f32.gmra.mxu1 %vm18337_vm6, %v18228_v40  ;;  %v14552_v57 = vadd.f32 %v5920_v41, %v4694_v39  ;;  %v18342_v17 = vld [vmem:[#allocation22_spill] sm:$0xff] }
 0x51b   : > { %v4701_v25 = vpop.f32.mrf.mxu0  ;;  %8816 = vmatmul.mubr.msk.f32.gmra.mxu0 %vm18339_vm7, %v18228_v40  ;;  %7479 = vmatprep.mubr.f32.mxu1 %v17044_v61  ;;  %v18343_v39 = vld [vmem:[#allocation90_spill] sm:$0xff] }
 0x51c   : > { %18338 = vst [vmem:[#allocation353_spill] sm:$0xff] %v14552_v57  ;;  %v4702_v48 = vadd.f32 %v4701_v25, %v18340_v7  ;;  %v5949_v24 = vpop.f32.mrf.mxu1  ;;  %6472 = vmatprep.mubr.f32.mxu0 %v17044_v61  ;;  %v14561_v13 = vadd.f32 %v5922_v5, %v4696_v63  ;;  %vm18344_vm8 = vcmp.eq.s32.totalorder %v18343_v39, %v18230_v11  ;;  %v18347_v5 = vld [vmem:[#allocation28_spill] sm:$0xff] }
 0x51d   : > { %v4703_v47 = vpop.f32.mrf.mxu0  ;;  %vm18360_vm1 = vmmov %vm18344_vm8 }
 0x51e   : > { %18341 = vst [vmem:[#allocation360_spill] sm:$0xff] %v14561_v13  ;;  %v4704_v9 = vadd.f32 %v4703_v47, %v18342_v17  ;;  %v5956_v41 = vpop.f32.mrf.mxu1  ;;  %8947 = vmatmul.mubr.msk.f32.gmra.mxu1 %vm18344_vm8, %v18228_v40  ;;  %v14568_v21 = vadd.f32 %v5929_v28, %v4702_v48  ;;  %v18349_v17 = vld [vmem:[#allocation64_spill] sm:$0xff]  ;;  %v18350_v48 = vld [vmem:[#allocation91_spill] sm:$0xff] }
 0x51f   : > { %v4709_v57 = vpop.f32.mrf.mxu0  ;;  %8817 = vmatmul.mubr.msk.f32.gmra.mxu0 %vm18346_vm9, %v18228_v40  ;;  %7486 = vmatprep.mubr.f32.mxu1 %v17044_v61  ;;  %vm18351_vm10 = vcmp.eq.s32.totalorder %v18350_v48, %v18230_v11 }
 0x520   : > { %18345 = vst [vmem:[#allocation362_spill] sm:$0xff] %v14568_v21  ;;  %v4710_v63 = vadd.f32 %v4709_v57, %v18347_v5  ;;  %v5958_v25 = vpop.f32.mrf.mxu1  ;;  %6479 = vmatprep.mubr.f32.mxu0 %v17044_v61  ;;  %v14577_v7 = vadd.f32 %v5931_v12, %v4704_v9  ;;  %v18354_v12 = vld [vmem:[#allocation29_spill] sm:$0xff]  ;;  %vm18367_vm3 = vmmov %vm18351_vm10 }
 0x521   : > { %v4711_v47 = vpop.f32.mrf.mxu0 }
 0x522   : > { %18348 = vst [vmem:[#allocation357_spill] sm:$0xff] %v14577_v7  ;;  %v4712_v13 = vadd.f32 %v4711_v47, %v18349_v17  ;;  %v5965_v28 = vpop.f32.mrf.mxu1  ;;  %8948 = vmatmul.mubr.msk.f32.gmra.mxu1 %vm18351_vm10, %v18228_v40  ;;  %v14584_v10 = vadd.f32 %v5938_v20, %v4710_v63  ;;  %v18356_v17 = vld [vmem:[#allocation32_spill] sm:$0xff]  ;;  %v18357_v63 = vld [vmem:[#allocation93_spill] sm:$0xff] }
 0x523   : > { %v4717_v21 = vpop.f32.mrf.mxu0  ;;  %8818 = vmatmul.mubr.msk.f32.gmra.mxu0 %vm18353_vm11, %v18228_v40  ;;  %7493 = vmatprep.mubr.f32.mxu1 %v17044_v61  ;;  %vm18358_vm0 = vcmp.eq.s32.totalorder %v18357_v63, %v18230_v11 }
 0x524   : > { %18352 = vst [vmem:[#allocation364_spill] sm:$0xff] %v14584_v10  ;;  %v4718_v9 = vadd.f32 %v4717_v21, %v18354_v12  ;;  %v5967_v57 = vpop.f32.mrf.mxu1  ;;  %6486 = vmatprep.mubr.f32.mxu0 %v17044_v61  ;;  %v14593_v5 = vadd.f32 %v5940_v4, %v4712_v13  ;;  %v18361_v4 = vld [vmem:[#allocation66_spill] sm:$0xff]  ;;  %vm18374_vm5 = vmmov %vm18358_vm0 }
 0x525   : > { %v4719_v47 = vpop.f32.mrf.mxu0 }
 0x526   : > { %18355 = vst [vmem:[#allocation366_spill] sm:$0xff] %v14593_v5  ;;  %v4720_v7 = vadd.f32 %v4719_v47, %v18356_v17  ;;  %v5974_v20 = vpop.f32.mrf.mxu1  ;;  %8949 = vmatmul.mubr.msk.f32.gmra.mxu1 %vm18358_vm0, %v18228_v40  ;;  %v14600_v18 = vadd.f32 %v5947_v44, %v4718_v9  ;;  %v18363_v17 = vld [vmem:[#allocation33_spill] sm:$0xff]  ;;  %v18364_v9 = vld [vmem:[#allocation95_spill] sm:$0xff] }
 0x527   : > { %v4725_v10 = vpop.f32.mrf.mxu0  ;;  %8819 = vmatmul.mubr.msk.f32.gmra.mxu0 %vm18360_vm1, %v18228_v40  ;;  %7500 = vmatprep.mubr.f32.mxu1 %v17044_v61  ;;  %vm18365_vm2 = vcmp.eq.s32.totalorder %v18364_v9, %v18230_v11 }
 0x528   : > { %18359 = vst [vmem:[#allocation361_spill] sm:$0xff] %v14600_v18  ;;  %v4726_v13 = vadd.f32 %v4725_v10, %v18361_v4  ;;  %v5976_v21 = vpop.f32.mrf.mxu1  ;;  %6493 = vmatprep.mubr.f32.mxu0 %v17044_v61  ;;  %v14609_v12 = vadd.f32 %v5949_v24, %v4720_v7  ;;  %v18368_v24 = vld [vmem:[#allocation34_spill] sm:$0xff]  ;;  %vm18381_vm7 = vmmov %vm18365_vm2 }
 0x529   : > { %v4727_v47 = vpop.f32.mrf.mxu0 }
 0x52a   : > { %18362 = vst [vmem:[#allocation368_spill] sm:$0xff] %v14609_v12  ;;  %v4728_v5 = vadd.f32 %v4727_v47, %v18363_v17  ;;  %v5983_v44 = vpop.f32.mrf.mxu1  ;;  %8950 = vmatmul.mubr.msk.f32.gmra.mxu1 %vm18365_vm2, %v18228_v40  ;;  %v14616_v39 = vadd.f32 %v5956_v41, %v4726_v13  ;;  %v18370_v17 = vld [vmem:[#allocation68_spill] sm:$0xff]  ;;  %v18371_v13 = vld [vmem:[#allocation97_spill] sm:$0xff] }
 0x52b   : > { %v4733_v18 = vpop.f32.mrf.mxu0  ;;  %8820 = vmatmul.mubr.msk.f32.gmra.mxu0 %vm18367_vm3, %v18228_v40  ;;  %7507 = vmatprep.mubr.f32.mxu1 %v17044_v61  ;;  %vm18372_vm4 = vcmp.eq.s32.totalorder %v18371_v13, %v18230_v11 }
 0x52c   : > { %18366 = vst [vmem:[#allocation370_spill] sm:$0xff] %v14616_v39  ;;  %v4734_v7 = vadd.f32 %v4733_v18, %v18368_v24  ;;  %v5985_v10 = vpop.f32.mrf.mxu1  ;;  %6500 = vmatprep.mubr.f32.mxu0 %v17044_v61  ;;  %v14625_v4 = vadd.f32 %v5958_v25, %v4728_v5  ;;  %v18375_v25 = vld [vmem:[#allocation70_spill] sm:$0xff]  ;;  %vm18388_vm9 = vmmov %vm18372_vm4 }
 0x52d   : > { %v4735_v47 = vpop.f32.mrf.mxu0 }
 0x52e   : > { %18369 = vst [vmem:[#allocation365_spill] sm:$0xff] %v14625_v4  ;;  %v4736_v12 = vadd.f32 %v4735_v47, %v18370_v17  ;;  %v5992_v41 = vpop.f32.mrf.mxu1  ;;  %8951 = vmatmul.mubr.msk.f32.gmra.mxu1 %vm18372_vm4, %v18228_v40  ;;  %v14632_v48 = vadd.f32 %v5965_v28, %v4734_v7  ;;  %v18377_v17 = vld [vmem:[#allocation35_spill] sm:$0xff] }
 0x52f   : > { %v4741_v39 = vpop.f32.mrf.mxu0  ;;  %8821 = vmatmul.mubr.msk.f32.gmra.mxu0 %vm18374_vm5, %v18228_v40  ;;  %7514 = vmatprep.mubr.f32.mxu1 %v17044_v61  ;;  %v18378_v7 = vld [vmem:[#allocation99_spill] sm:$0xff] }
 0x530   : > { %18373 = vst [vmem:[#allocation372_spill] sm:$0xff] %v14632_v48  ;;  %v4742_v5 = vadd.f32 %v4741_v39, %v18375_v25  ;;  %v5994_v18 = vpop.f32.mrf.mxu1  ;;  %6507 = vmatprep.mubr.f32.mxu0 %v17044_v61  ;;  %v14641_v24 = vadd.f32 %v5967_v57, %v4736_v12  ;;  %vm18379_vm6 = vcmp.eq.s32.totalorder %v18378_v7, %v18230_v11  ;;  %v18382_v57 = vld [vmem:[#allocation38_spill] sm:$0xff] }
 0x531   : > { %v4743_v47 = vpop.f32.mrf.mxu0  ;;  %vm18395_vm11 = vmmov %vm18379_vm6 }
 0x532   : > { %18376 = vst [vmem:[#allocation374_spill] sm:$0xff] %v14641_v24  ;;  %v4744_v4 = vadd.f32 %v4743_v47, %v18377_v17  ;;  %v6001_v28 = vpop.f32.mrf.mxu1  ;;  %8952 = vmatmul.mubr.msk.f32.gmra.mxu1 %vm18379_vm6, %v18228_v40  ;;  %v14648_v63 = vadd.f32 %v5974_v20, %v4742_v5  ;;  %v18384_v17 = vld [vmem:[#allocation72_spill] sm:$0xff]  ;;  %v18385_v5 = vld [vmem:[#allocation101_spill] sm:$0xff] }
 0x533   : > { %v4749_v48 = vpop.f32.mrf.mxu0  ;;  %8822 = vmatmul.mubr.msk.f32.gmra.mxu0 %vm18381_vm7, %v18228_v40  ;;  %7521 = vmatprep.mubr.f32.mxu1 %v17044_v61  ;;  %vm18386_vm8 = vcmp.eq.s32.totalorder %v18385_v5, %v18230_v11 }
 0x534   : > { %18380 = vst [vmem:[#allocation369_spill] sm:$0xff] %v14648_v63  ;;  %v4750_v12 = vadd.f32 %v4749_v48, %v18382_v57  ;;  %v6003_v39 = vpop.f32.mrf.mxu1  ;;  %6514 = vmatprep.mubr.f32.mxu0 %v17044_v61  ;;  %v14657_v25 = vadd.f32 %v5976_v21, %v4744_v4  ;;  %v18389_v21 = vld [vmem:[#allocation39_spill] sm:$0xff]  ;;  %vm18402_vm1 = vmmov %vm18386_vm8 }
 0x535   : > { %v4751_v47 = vpop.f32.mrf.mxu0 }
 0x536   : > { %18383 = vst [vmem:[#allocation376_spill] sm:$0xff] %v14657_v25  ;;  %v4752_v24 = vadd.f32 %v4751_v47, %v18384_v17  ;;  %v6010_v20 = vpop.f32.mrf.mxu1  ;;  %8953 = vmatmul.mubr.msk.f32.gmra.mxu1 %vm18386_vm8, %v18228_v40  ;;  %v14664_v9 = vadd.f32 %v5983_v44, %v4750_v12  ;;  %v18391_v17 = vld [vmem:[#allocation36_spill] sm:$0xff]  ;;  %v18392_v12 = vld [vmem:[#allocation103_spill] sm:$0xff] }
 0x537   : > { %v4757_v63 = vpop.f32.mrf.mxu0  ;;  %8823 = vmatmul.mubr.msk.f32.gmra.mxu0 %vm18388_vm9, %v18228_v40  ;;  %7528 = vmatprep.mubr.f32.mxu1 %v17044_v61  ;;  %vm18393_vm10 = vcmp.eq.s32.totalorder %v18392_v12, %v18230_v11 }
 0x538   : > { %18387 = vst [vmem:[#allocation378_spill] sm:$0xff] %v14664_v9  ;;  %v4758_v4 = vadd.f32 %v4757_v63, %v18389_v21  ;;  %v6012_v48 = vpop.f32.mrf.mxu1  ;;  %6521 = vmatprep.mubr.f32.mxu0 %v17044_v61  ;;  %v14673_v57 = vadd.f32 %v5985_v10, %v4752_v24  ;;  %v18396_v10 = vld [vmem:[#allocation37_spill] sm:$0xff]  ;;  %vm18409_vm3 = vmmov %vm18393_vm10 }
 0x539   : > { %v4759_v47 = vpop.f32.mrf.mxu0 }
 0x53a   : > { %18390 = vst [vmem:[#allocation373_spill] sm:$0xff] %v14673_v57  ;;  %v4760_v25 = vadd.f32 %v4759_v47, %v18391_v17  ;;  %v6019_v44 = vpop.f32.mrf.mxu1  ;;  %8954 = vmatmul.mubr.msk.f32.gmra.mxu1 %vm18393_vm10, %v18228_v40  ;;  %v14680_v13 = vadd.f32 %v5992_v41, %v4758_v4  ;;  %v18398_v17 = vld [vmem:[#allocation74_spill] sm:$0xff]  ;;  %v18399_v4 = vld [vmem:[#allocation105_spill] sm:$0xff] }
 0x53b   : > { %v4765_v9 = vpop.f32.mrf.mxu0  ;;  %8824 = vmatmul.mubr.msk.f32.gmra.mxu0 %vm18395_vm11, %v18228_v40  ;;  %7535 = vmatprep.mubr.f32.mxu1 %v17044_v61  ;;  %vm18400_vm0 = vcmp.eq.s32.totalorder %v18399_v4, %v18230_v11 }
 0x53c   : > { %18394 = vst [vmem:[#allocation380_spill] sm:$0xff] %v14680_v13  ;;  %v4766_v24 = vadd.f32 %v4765_v9, %v18396_v10  ;;  %v6021_v63 = vpop.f32.mrf.mxu1  ;;  %6528 = vmatprep.mubr.f32.mxu0 %v17044_v61  ;;  %v14689_v21 = vadd.f32 %v5994_v18, %v4760_v25  ;;  %v18403_v18 = vld [vmem:[#allocation76_spill] sm:$0xff]  ;;  %vm18416_vm5 = vmmov %vm18400_vm0 }
 0x53d   : > { %v4767_v47 = vpop.f32.mrf.mxu0 }
 0x53e   : > { %18397 = vst [vmem:[#allocation382_spill] sm:$0xff] %v14689_v21  ;;  %v4768_v57 = vadd.f32 %v4767_v47, %v18398_v17  ;;  %v6028_v41 = vpop.f32.mrf.mxu1  ;;  %8955 = vmatmul.mubr.msk.f32.gmra.mxu1 %vm18400_vm0, %v18228_v40  ;;  %v14696_v7 = vadd.f32 %v6001_v28, %v4766_v24  ;;  %v18405_v17 = vld [vmem:[#allocation78_spill] sm:$0xff]  ;;  %v18406_v24 = vld [vmem:[#allocation107_spill] sm:$0xff] }
 0x53f   : > { %v4773_v13 = vpop.f32.mrf.mxu0  ;;  %8825 = vmatmul.mubr.msk.f32.gmra.mxu0 %vm18402_vm1, %v18228_v40  ;;  %7542 = vmatprep.mubr.f32.mxu1 %v17044_v61  ;;  %vm18407_vm2 = vcmp.eq.s32.totalorder %v18406_v24, %v18230_v11 }
 0x540   : > { %18401 = vst [vmem:[#allocation377_spill] sm:$0xff] %v14696_v7  ;;  %v4774_v25 = vadd.f32 %v4773_v13, %v18403_v18  ;;  %v6030_v9 = vpop.f32.mrf.mxu1  ;;  %6535 = vmatprep.mubr.f32.mxu0 %v17044_v61  ;;  %v14705_v10 = vadd.f32 %v6003_v39, %v4768_v57  ;;  %v18410_v39 = vld [vmem:[#allocation80_spill] sm:$0xff]  ;;  %vm18423_vm7 = vmmov %vm18407_vm2 }
 0x541   : > { %v4775_v47 = vpop.f32.mrf.mxu0 }
 0x542   : > { %18404 = vst [vmem:[#allocation384_spill] sm:$0xff] %v14705_v10  ;;  %v4776_v21 = vadd.f32 %v4775_v47, %v18405_v17  ;;  %v6037_v28 = vpop.f32.mrf.mxu1  ;;  %8956 = vmatmul.mubr.msk.f32.gmra.mxu1 %vm18407_vm2, %v18228_v40  ;;  %v14712_v5 = vadd.f32 %v6010_v20, %v4774_v25  ;;  %v18412_v17 = vld [vmem:[#allocation82_spill] sm:$0xff]  ;;  %v18413_v25 = vld [vmem:[#allocation109_spill] sm:$0xff] }
 0x543   : > { %v4781_v7 = vpop.f32.mrf.mxu0  ;;  %8826 = vmatmul.mubr.msk.f32.gmra.mxu0 %vm18409_vm3, %v18228_v40  ;;  %7549 = vmatprep.mubr.f32.mxu1 %v17044_v61  ;;  %vm18414_vm4 = vcmp.eq.s32.totalorder %v18413_v25, %v18230_v11 }
 0x544   : > { %18408 = vst [vmem:[#allocation386_spill] sm:$0xff] %v14712_v5  ;;  %v4782_v57 = vadd.f32 %v4781_v7, %v18410_v39  ;;  %v6039_v13 = vpop.f32.mrf.mxu1  ;;  %6542 = vmatprep.mubr.f32.mxu0 %v17044_v61  ;;  %v14721_v18 = vadd.f32 %v6012_v48, %v4776_v21  ;;  %v18417_v48 = vld [vmem:[#allocation84_spill] sm:$0xff]  ;;  %vm18430_vm9 = vmmov %vm18414_vm4 }
 0x545   : > { %v4783_v47 = vpop.f32.mrf.mxu0 }
 0x546   : > { %18411 = vst [vmem:[#allocation381_spill] sm:$0xff] %v14721_v18  ;;  %v4784_v10 = vadd.f32 %v4783_v47, %v18412_v17  ;;  %v6046_v20 = vpop.f32.mrf.mxu1  ;;  %8957 = vmatmul.mubr.msk.f32.gmra.mxu1 %vm18414_vm4, %v18228_v40  ;;  %v14728_v12 = vadd.f32 %v6019_v44, %v4782_v57  ;;  %v18419_v17 = vld [vmem:[#allocation24_spill] sm:$0xff]  ;;  %v18420_v57 = vld [vmem:[#allocation111_spill] sm:$0xff] }
 0x547   : > { %v4789_v5 = vpop.f32.mrf.mxu0  ;;  %8827 = vmatmul.mubr.msk.f32.gmra.mxu0 %vm18416_vm5, %v18228_v40  ;;  %7556 = vmatprep.mubr.f32.mxu1 %v17044_v61  ;;  %vm18421_vm6 = vcmp.eq.s32.totalorder %v18420_v57, %v18230_v11 }
 0x548   : > { %18415 = vst [vmem:[#allocation388_spill] sm:$0xff] %v14728_v12  ;;  %v4790_v21 = vadd.f32 %v4789_v5, %v18417_v48  ;;  %v6048_v7 = vpop.f32.mrf.mxu1  ;;  %6549 = vmatprep.mubr.f32.mxu0 %v17044_v61  ;;  %v14737_v39 = vadd.f32 %v6021_v63, %v4784_v10  ;;  %v18424_v63 = vld [vmem:[#allocation87_spill] sm:$0xff]  ;;  %vm18437_vm11 = vmmov %vm18421_vm6 }
 0x549   : > { %v4791_v47 = vpop.f32.mrf.mxu0 }
 0x54a   : > { %18418 = vst [vmem:[#allocation390_spill] sm:$0xff] %v14737_v39  ;;  %v4792_v18 = vadd.f32 %v4791_v47, %v18419_v17  ;;  %v6055_v44 = vpop.f32.mrf.mxu1  ;;  %8958 = vmatmul.mubr.msk.f32.gmra.mxu1 %vm18421_vm6, %v18228_v40  ;;  %v14744_v4 = vadd.f32 %v6028_v41, %v4790_v21  ;;  %v18426_v17 = vld [vmem:[#allocation25_spill] sm:$0xff] }
 0x54b   : > { %v4797_v12 = vpop.f32.mrf.mxu0  ;;  %8828 = vmatmul.mubr.msk.f32.gmra.mxu0 %vm18423_vm7, %v18228_v40  ;;  %7563 = vmatprep.mubr.f32.mxu1 %v17044_v61  ;;  %v18427_v21 = vld [vmem:[#allocation113_spill] sm:$0xff] }
 0x54c   : > { %18422 = vst [vmem:[#allocation385_spill] sm:$0xff] %v14744_v4  ;;  %v4798_v10 = vadd.f32 %v4797_v12, %v18424_v63  ;;  %v6057_v5 = vpop.f32.mrf.mxu1  ;;  %6556 = vmatprep.mubr.f32.mxu0 %v17044_v61  ;;  %v14753_v48 = vadd.f32 %v6030_v9, %v4792_v18  ;;  %vm18428_vm8 = vcmp.eq.s32.totalorder %v18427_v21, %v18230_v11  ;;  %v18431_v9 = vld [vmem:[#allocation30_spill] sm:$0xff] }
 0x54d   : > { %v4799_v47 = vpop.f32.mrf.mxu0  ;;  %vm18444_vm1 = vmmov %vm18428_vm8 }
 0x54e   : > { %18425 = vst [vmem:[#allocation392_spill] sm:$0xff] %v14753_v48  ;;  %v4800_v39 = vadd.f32 %v4799_v47, %v18426_v17  ;;  %v6064_v41 = vpop.f32.mrf.mxu1  ;;  %8959 = vmatmul.mubr.msk.f32.gmra.mxu1 %vm18428_vm8, %v18228_v40  ;;  %v14760_v24 = vadd.f32 %v6037_v28, %v4798_v10  ;;  %v18433_v17 = vld [vmem:[#allocation31_spill] sm:$0xff] }
 0x54f   : > { %v4805_v4 = vpop.f32.mrf.mxu0  ;;  %8829 = vmatmul.mubr.msk.f32.gmra.mxu0 %vm18430_vm9, %v18228_v40  ;;  %7570 = vmatprep.mubr.f32.mxu1 %v17044_v61  ;;  %v18434_v10 = vld [vmem:[#allocation115_spill] sm:$0xff] }
 0x550   : > { %18429 = vst [vmem:[#allocation394_spill] sm:$0xff] %v14760_v24  ;;  %v4806_v18 = vadd.f32 %v4805_v4, %v18431_v9  ;;  %v6066_v12 = vpop.f32.mrf.mxu1  ;;  %6563 = vmatprep.mubr.f32.mxu0 %v17044_v61  ;;  %v14769_v63 = vadd.f32 %v6039_v13, %v4800_v39  ;;  %vm18435_vm10 = vcmp.eq.s32.totalorder %v18434_v10, %v18230_v11  ;;  %v18438_v13 = vld [vmem:[#allocation92_spill] sm:$0xff] }
 0x551   : > { %v4807_v47 = vpop.f32.mrf.mxu0  ;;  %vm18451_vm3 = vmmov %vm18435_vm10 }
 0x552   : > { %18432 = vst [vmem:[#allocation389_spill] sm:$0xff] %v14769_v63  ;;  %v4808_v48 = vadd.f32 %v4807_v47, %v18433_v17  ;;  %v6073_v28 = vpop.f32.mrf.mxu1  ;;  %8960 = vmatmul.mubr.msk.f32.gmra.mxu1 %vm18435_vm10, %v18228_v40  ;;  %v14776_v25 = vadd.f32 %v6046_v20, %v4806_v18  ;;  %v18440_v17 = vld [vmem:[#allocation94_spill] sm:$0xff]  ;;  %v18441_v18 = vld [vmem:[#allocation117_spill] sm:$0xff] }
 0x553   : > { %v4813_v24 = vpop.f32.mrf.mxu0  ;;  %8830 = vmatmul.mubr.msk.f32.gmra.mxu0 %vm18437_vm11, %v18228_v40  ;;  %7577 = vmatprep.mubr.f32.mxu1 %v17044_v61  ;;  %vm18442_vm0 = vcmp.eq.s32.totalorder %v18441_v18, %v18230_v11 }
 0x554   : > { %18436 = vst [vmem:[#allocation396_spill] sm:$0xff] %v14776_v25  ;;  %v4814_v39 = vadd.f32 %v4813_v24, %v18438_v13  ;;  %v6075_v4 = vpop.f32.mrf.mxu1  ;;  %6570 = vmatprep.mubr.f32.mxu0 %v17044_v61  ;;  %v14785_v9 = vadd.f32 %v6048_v7, %v4808_v48  ;;  %v18445_v7 = vld [vmem:[#allocation96_spill] sm:$0xff]  ;;  %vm18458_vm5 = vmmov %vm18442_vm0 }
 0x555   : > { %v4815_v47 = vpop.f32.mrf.mxu0 }
 0x556   : > { %18439 = vst [vmem:[#allocation398_spill] sm:$0xff] %v14785_v9  ;;  %v4816_v63 = vadd.f32 %v4815_v47, %v18440_v17  ;;  %v6082_v20 = vpop.f32.mrf.mxu1  ;;  %8961 = vmatmul.mubr.msk.f32.gmra.mxu1 %vm18442_vm0, %v18228_v40  ;;  %v14792_v57 = vadd.f32 %v6055_v44, %v4814_v39  ;;  %v18447_v17 = vld [vmem:[#allocation98_spill] sm:$0xff]  ;;  %v18448_v39 = vld [vmem:[#allocation119_spill] sm:$0xff] }
 0x557   : > { %v4821_v25 = vpop.f32.mrf.mxu0  ;;  %8831 = vmatmul.mubr.msk.f32.gmra.mxu0 %vm18444_vm1, %v18228_v40  ;;  %7584 = vmatprep.mubr.f32.mxu1 %v17044_v61  ;;  %vm18449_vm2 = vcmp.eq.s32.totalorder %v18448_v39, %v18230_v11 }
 0x558   : > { %18443 = vst [vmem:[#allocation393_spill] sm:$0xff] %v14792_v57  ;;  %v4822_v48 = vadd.f32 %v4821_v25, %v18445_v7  ;;  %v6084_v24 = vpop.f32.mrf.mxu1  ;;  %6577 = vmatprep.mubr.f32.mxu0 %v17044_v61  ;;  %v14801_v13 = vadd.f32 %v6057_v5, %v4816_v63  ;;  %v18452_v5 = vld [vmem:[#allocation100_spill] sm:$0xff]  ;;  %vm18465_vm7 = vmmov %vm18449_vm2 }
 0x559   : > { %v4823_v47 = vpop.f32.mrf.mxu0 }
 0x55a   : > { %18446 = vst [vmem:[#allocation400_spill] sm:$0xff] %v14801_v13  ;;  %v4824_v9 = vadd.f32 %v4823_v47, %v18447_v17  ;;  %v6091_v44 = vpop.f32.mrf.mxu1  ;;  %8962 = vmatmul.mubr.msk.f32.gmra.mxu1 %vm18449_vm2, %v18228_v40  ;;  %v14808_v21 = vadd.f32 %v6064_v41, %v4822_v48  ;;  %v18454_v17 = vld [vmem:[#allocation102_spill] sm:$0xff]  ;;  %v18455_v48 = vld [vmem:[#allocation121_spill] sm:$0xff] }
 0x55b   : > { %v4829_v57 = vpop.f32.mrf.mxu0  ;;  %8832 = vmatmul.mubr.msk.f32.gmra.mxu0 %vm18451_vm3, %v18228_v40  ;;  %7591 = vmatprep.mubr.f32.mxu1 %v17044_v61  ;;  %vm18456_vm4 = vcmp.eq.s32.totalorder %v18455_v48, %v18230_v11 }
 0x55c   : > { %18450 = vst [vmem:[#allocation402_spill] sm:$0xff] %v14808_v21  ;;  %v4830_v63 = vadd.f32 %v4829_v57, %v18452_v5  ;;  %v6093_v25 = vpop.f32.mrf.mxu1  ;;  %6584 = vmatprep.mubr.f32.mxu0 %v17044_v61  ;;  %v14817_v7 = vadd.f32 %v6066_v12, %v4824_v9  ;;  %v18459_v12 = vld [vmem:[#allocation104_spill] sm:$0xff]  ;;  %vm18472_vm9 = vmmov %vm18456_vm4 }
 0x55d   : > { %v4831_v47 = vpop.f32.mrf.mxu0 }
 0x55e   : > { %18453 = vst [vmem:[#allocation397_spill] sm:$0xff] %v14817_v7  ;;  %v4832_v13 = vadd.f32 %v4831_v47, %v18454_v17  ;;  %v6100_v41 = vpop.f32.mrf.mxu1  ;;  %8963 = vmatmul.mubr.msk.f32.gmra.mxu1 %vm18456_vm4, %v18228_v40  ;;  %v14824_v10 = vadd.f32 %v6073_v28, %v4830_v63  ;;  %v18461_v17 = vld [vmem:[#allocation106_spill] sm:$0xff]  ;;  %v18462_v63 = vld [vmem:[#allocation123_spill] sm:$0xff] }
 0x55f   : > { %v4837_v21 = vpop.f32.mrf.mxu0  ;;  %8833 = vmatmul.mubr.msk.f32.gmra.mxu0 %vm18458_vm5, %v18228_v40  ;;  %7598 = vmatprep.mubr.f32.mxu1 %v17044_v61  ;;  %vm18463_vm6 = vcmp.eq.s32.totalorder %v18462_v63, %v18230_v11 }
 0x560   : > { %18457 = vst [vmem:[#allocation404_spill] sm:$0xff] %v14824_v10  ;;  %v4838_v9 = vadd.f32 %v4837_v21, %v18459_v12  ;;  %v6102_v57 = vpop.f32.mrf.mxu1  ;;  %6591 = vmatprep.mubr.f32.mxu0 %v17044_v61  ;;  %v14833_v5 = vadd.f32 %v6075_v4, %v4832_v13  ;;  %v18466_v4 = vld [vmem:[#allocation108_spill] sm:$0xff]  ;;  %vm18479_vm11 = vmmov %vm18463_vm6 }
 0x561   : > { %v4839_v47 = vpop.f32.mrf.mxu0 }
 0x562   : > { %18460 = vst [vmem:[#allocation406_spill] sm:$0xff] %v14833_v5  ;;  %v4840_v7 = vadd.f32 %v4839_v47, %v18461_v17  ;;  %v6109_v28 = vpop.f32.mrf.mxu1  ;;  %8964 = vmatmul.mubr.msk.f32.gmra.mxu1 %vm18463_vm6, %v18228_v40  ;;  %v14840_v18 = vadd.f32 %v6082_v20, %v4838_v9  ;;  %v18468_v17 = vld [vmem:[#allocation110_spill] sm:$0xff]  ;;  %v18469_v9 = vld [vmem:[#allocation125_spill] sm:$0xff] }
 0x563   : > { %v4845_v10 = vpop.f32.mrf.mxu0  ;;  %8834 = vmatmul.mubr.msk.f32.gmra.mxu0 %vm18465_vm7, %v18228_v40  ;;  %7605 = vmatprep.mubr.f32.mxu1 %v17044_v61  ;;  %vm18470_vm8 = vcmp.eq.s32.totalorder %v18469_v9, %v18230_v11 }
 0x564   : > { %18464 = vst [vmem:[#allocation401_spill] sm:$0xff] %v14840_v18  ;;  %v4846_v13 = vadd.f32 %v4845_v10, %v18466_v4  ;;  %v6111_v21 = vpop.f32.mrf.mxu1  ;;  %6598 = vmatprep.mubr.f32.mxu0 %v17044_v61  ;;  %v14849_v12 = vadd.f32 %v6084_v24, %v4840_v7  ;;  %v18473_v24 = vld [vmem:[#allocation112_spill] sm:$0xff]  ;;  %vm18486_vm1 = vmmov %vm18470_vm8 }
 0x565   : > { %v4847_v47 = vpop.f32.mrf.mxu0 }
 0x566   : > { %18467 = vst [vmem:[#allocation408_spill] sm:$0xff] %v14849_v12  ;;  %v4848_v5 = vadd.f32 %v4847_v47, %v18468_v17  ;;  %v6118_v20 = vpop.f32.mrf.mxu1  ;;  %8965 = vmatmul.mubr.msk.f32.gmra.mxu1 %vm18470_vm8, %v18228_v40  ;;  %v14856_v39 = vadd.f32 %v6091_v44, %v4846_v13  ;;  %v18475_v17 = vld [vmem:[#allocation114_spill] sm:$0xff]  ;;  %v18476_v13 = vld [vmem:[#allocation127_spill] sm:$0xff] }
 0x567   : > { %v4853_v18 = vpop.f32.mrf.mxu0  ;;  %8835 = vmatmul.mubr.msk.f32.gmra.mxu0 %vm18472_vm9, %v18228_v40  ;;  %7612 = vmatprep.mubr.f32.mxu1 %v17044_v61  ;;  %vm18477_vm10 = vcmp.eq.s32.totalorder %v18476_v13, %v18230_v11 }
 0x568   : > { %18471 = vst [vmem:[#allocation410_spill] sm:$0xff] %v14856_v39  ;;  %v4854_v7 = vadd.f32 %v4853_v18, %v18473_v24  ;;  %v6120_v10 = vpop.f32.mrf.mxu1  ;;  %6605 = vmatprep.mubr.f32.mxu0 %v17044_v61  ;;  %v14865_v4 = vadd.f32 %v6093_v25, %v4848_v5  ;;  %v18480_v25 = vld [vmem:[#allocation116_spill] sm:$0xff]  ;;  %vm18493_vm3 = vmmov %vm18477_vm10 }
 0x569   : > { %v4855_v47 = vpop.f32.mrf.mxu0 }
 0x56a   : > { %18474 = vst [vmem:[#allocation405_spill] sm:$0xff] %v14865_v4  ;;  %v4856_v12 = vadd.f32 %v4855_v47, %v18475_v17  ;;  %v7279_v44 = vpop.f32.mrf.mxu1  ;;  %8966 = vmatmul.mubr.msk.f32.gmra.mxu1 %vm18477_vm10, %v18228_v40  ;;  %v14872_v48 = vadd.f32 %v6100_v41, %v4854_v7  ;;  %v18482_v17 = vld [vmem:[#allocation118_spill] sm:$0xff] }
 0x56b   : > { %v4861_v39 = vpop.f32.mrf.mxu0  ;;  %8836 = vmatmul.mubr.msk.f32.gmra.mxu0 %vm18479_vm11, %v18228_v40  ;;  %7619 = vmatprep.mubr.f32.mxu1 %v17044_v61 }
 0x56c   : > { %18478 = vst [vmem:[#allocation412_spill] sm:$0xff] %v14872_v48  ;;  %v4862_v5 = vadd.f32 %v4861_v39, %v18480_v25  ;;  %v7281_v18 = vpop.f32.mrf.mxu1  ;;  %6612 = vmatprep.mubr.f32.mxu0 %v17044_v61  ;;  %v14881_v24 = vadd.f32 %v6102_v57, %v4856_v12  ;;  %v18483_v48 = vld [vmem:[#allocation129_spill] sm:$0xff]  ;;  %v18487_v57 = vld [vmem:[#allocation120_spill] sm:$0xff] }
 0x56d   : > { %v4863_v47 = vpop.f32.mrf.mxu0  ;;  %vm18484_vm0 = vcmp.eq.s32.totalorder %v18483_v48, %v18230_v11  ;;  %v18501_v48 = vld [vmem:[#allocation130_spill] sm:$0xff] }
 0x56e   : > { %18481 = vst [vmem:[#allocation414_spill] sm:$0xff] %v14881_v24  ;;  %v4864_v41 = vadd.f32 %v4863_v47, %v18482_v17  ;;  %v7286_v7 = vpop.f32.mrf.mxu1  ;;  %8967 = vmatmul.mubr.msk.f32.gmra.mxu1 %vm18484_vm0, %v18228_v40  ;;  %v14888_v63 = vadd.f32 %v6109_v28, %v4862_v5  ;;  %v18489_v17 = vld [vmem:[#allocation122_spill] sm:$0xff]  ;;  %vm18499_vm5 = vmmov %vm18484_vm0 }
 0x56f   : > { %v4869_v4 = vpop.f32.mrf.mxu0  ;;  %8837 = vmatmul.mubr.msk.f32.gmra.mxu0 %vm18486_vm1, %v18228_v40  ;;  %7626 = vmatprep.mubr.f32.mxu1 %v17044_v61 }
 0x570   : > { %18485 = vst [vmem:[#allocation409_spill] sm:$0xff] %v14888_v63  ;;  %v4870_v12 = vadd.f32 %v4869_v4, %v18487_v57  ;;  %v7288_v39 = vpop.f32.mrf.mxu1  ;;  %6619 = vmatprep.mubr.f32.mxu0 %v17044_v61  ;;  %v14898_v25 = vadd.f32 %v6111_v21, %v4864_v41  ;;  %v18490_v63 = vld [vmem:[#allocation131_spill] sm:$0xff]  ;;  %v18494_v21 = vld [vmem:[#allocation124_spill] sm:$0xff] }
 0x571   : > { %v4871_v47 = vpop.f32.mrf.mxu0  ;;  %vm18491_vm2 = vcmp.eq.s32.totalorder %v18490_v63, %v18230_v11  ;;  %v18507_v63 = vld [vmem:[#allocation137_spill] sm:$0xff] }
 0x572   : > { %18488 = vst [vmem:[#allocation416_spill] sm:$0xff] %v14898_v25  ;;  %v4872_v28 = vadd.f32 %v4871_v47, %v18489_v17  ;;  %v7293_v5 = vpop.f32.mrf.mxu1  ;;  %8968 = vmatmul.mubr.msk.f32.gmra.mxu1 %vm18491_vm2, %v18228_v40  ;;  %v14907_v9 = vadd.f32 %v6118_v20, %v4870_v12  ;;  %v18496_v25 = vld [vmem:[#allocation126_spill] sm:$0xff]  ;;  %vm18504_vm7 = vmmov %vm18491_vm2  ;;  %vm18508_vm8 = vcmp.eq.s32.totalorder %v18507_v63, %v18230_v11  ;;  %v18522_v63 = vld [vmem:[#allocation147_spill] sm:$0xff] }
 0x573   : > { %v6286_v24 = vpop.f32.mrf.mxu0  ;;  %8838 = vmatmul.mubr.msk.f32.gmra.mxu0 %vm18493_vm3, %v18228_v40  ;;  %7633 = vmatprep.mubr.f32.mxu1 %v17044_v61  ;;  %vm18519_vm1 = vmmov %vm18508_vm8  ;;  %vm18523_vm2 = vcmp.eq.s32.totalorder %v18522_v63, %v18230_v11  ;;  %v18537_v63 = vld [vmem:[#allocation159_spill] sm:$0xff] }
 0x574   : > { %18492 = vst [vmem:[#allocation418_spill] sm:$0xff] %v14907_v9  ;;  %v6287_v4 = vadd.f32 %v6286_v24, %v18494_v21  ;;  %v7295_v41 = vpop.f32.mrf.mxu1  ;;  %6626 = vmatprep.mubr.f32.mxu0 %v17044_v61  ;;  %v14916_v57 = vadd.f32 %v6120_v10, %v4872_v28  ;;  %v18497_v9 = vld [vmem:[#allocation133_spill] sm:$0xff] }
 0x575   : > { %v6288_v47 = vpop.f32.mrf.mxu0  ;;  %vm18498_vm4 = vcmp.eq.s32.totalorder %v18497_v9, %v18230_v11  ;;  %v18512_v9 = vld [vmem:[#allocation139_spill] sm:$0xff] }
 0x576   : > { %18495 = vst [vmem:[#allocation413_spill] sm:$0xff] %v14916_v57  ;;  %v7280_v17 = vadd.f32 %v7279_v44, %v6287_v4  ;;  %v6289_v20 = vadd.f32 %v6288_v47, %v18496_v25  ;;  %v7300_v12 = vpop.f32.mrf.mxu1  ;;  %8969 = vmatmul.mubr.msk.f32.gmra.mxu1 %vm18498_vm4, %v18228_v40  ;;  %v18500_v44 = vld [vmem:[#allocation128_spill] sm:$0xff]  ;;  %v18502_v57 = vld [vmem:[#allocation135_spill] sm:$0xff]  ;;  %vm18509_vm9 = vmmov %vm18498_vm4  ;;  %vm18513_vm10 = vcmp.eq.s32.totalorder %v18512_v9, %v18230_v11 }
 0x577   : > { %v6293_v13 = vpop.f32.mrf.mxu0  ;;  %8839 = vmatmul.mubr.msk.f32.gmra.mxu0 %vm18499_vm5, %v18228_v40  ;;  %7640 = vmatprep.mubr.f32.mxu1 %v17044_v61  ;;  %vm18503_vm6 = vcmp.eq.s32.totalorder %v18502_v57, %v18230_v11  ;;  %v18517_v57 = vld [vmem:[#allocation143_spill] sm:$0xff]  ;;  %vm18524_vm3 = vmmov %vm18513_vm10 }
 0x578   : > { %8173 = vst [vmem:[%s14928_s14] sm:$0xff] %v7280_v17  ;;  %v7282_v10 = vadd.f32 %v7281_v18, %v6289_v20  ;;  %v6294_v24 = vadd.f32 %v6293_v13, %v18500_v44  ;;  %v7302_v25 = vpop.f32.mrf.mxu1  ;;  %6633 = vmatprep.mubr.f32.mxu0 %v17044_v61  ;;  %v18506_v44 = vld [vmem:[#allocation134_spill] sm:$0xff]  ;;  %vm18514_vm11 = vmmov %vm18503_vm6  ;;  %vm18518_vm0 = vcmp.eq.s32.totalorder %v18517_v57, %v18230_v11  ;;  %v18527_v9 = vld [vmem:[#allocation151_spill] sm:$0xff] }
 0x579   : > { %v6295_v28 = vpop.f32.mrf.mxu0  ;;  %vm18528_vm4 = vcmp.eq.s32.totalorder %v18527_v9, %v18230_v11  ;;  %vm18529_vm5 = vmmov %vm18518_vm0  ;;  %v18532_v57 = vld [vmem:[#allocation155_spill] sm:$0xff] }
 0x57a   : > { %8174 = vst [vmem:[%s14928_s14 + $0x8] sm:$0xff] %v7282_v10  ;;  %v7287_v21 = vadd.f32 %v7286_v7, %v6294_v24  ;;  %v6296_v4 = vadd.f32 %v6295_v28, %v18501_v48  ;;  %v7307_v47 = vpop.f32.mrf.mxu1  ;;  %8970 = vmatmul.mubr.msk.f32.gmra.mxu1 %vm18503_vm6, %v18228_v40  ;;  %v18505_v7 = vld [vmem:[#allocation132_spill] sm:$0xff]  ;;  %vm18533_vm6 = vcmp.eq.s32.totalorder %v18532_v57, %v18230_v11  ;;  %v18542_v9 = vld [vmem:[#allocation163_spill] sm:$0xff] }
 0x57b   : > { %v6300_v22 = vpop.f32.mrf.mxu0  ;;  %8840 = vmatmul.mubr.msk.f32.gmra.mxu0 %vm18504_vm7, %v18228_v40  ;;  %7647 = vmatprep.mubr.f32.mxu1 %v17044_v61  ;;  %vm18534_vm7 = vmmov %vm18523_vm2  ;;  %v18547_v57 = vld [vmem:[#allocation167_spill] sm:$0xff] }
 0x57c   : > { %8175 = vst [vmem:[%s14928_s14 + $0x10] sm:$0xff] %v7287_v21  ;;  %v7289_v18 = vadd.f32 %v7288_v39, %v6296_v4  ;;  %v6301_v17 = vadd.f32 %v6300_v22, %v18505_v7  ;;  %v7309_v20 = vpop.f32.mrf.mxu1  ;;  %6640 = vmatprep.mubr.f32.mxu0 %v17044_v61  ;;  %v18510_v39 = vld [vmem:[#allocation136_spill] sm:$0xff] }
 0x57d   : > { %v6302_v13 = vpop.f32.mrf.mxu0  ;;  %v18511_v7 = vld [vmem:[#allocation140_spill] sm:$0xff] }
 0x57e   : > { %8176 = vst [vmem:[%s14928_s14 + $0x18] sm:$0xff] %v7289_v18  ;;  %v7294_v10 = vadd.f32 %v7293_v5, %v6301_v17  ;;  %v6303_v24 = vadd.f32 %v6302_v13, %v18506_v44  ;;  %v7314_v28 = vpop.f32.mrf.mxu1  ;;  %8971 = vmatmul.mubr.msk.f32.gmra.mxu1 %vm18508_vm8, %v18228_v40  ;;  %vm18538_vm8 = vcmp.eq.s32.totalorder %v18537_v63, %v18230_v11  ;;  %v18552_v63 = vld [vmem:[#allocation171_spill] sm:$0xff] }
 0x57f   : > { %v6307_v48 = vpop.f32.mrf.mxu0  ;;  %8841 = vmatmul.mubr.msk.f32.gmra.mxu0 %vm18509_vm9, %v18228_v40  ;;  %7654 = vmatprep.mubr.f32.mxu1 %v17044_v61  ;;  %vm18539_vm9 = vmmov %vm18528_vm4 }
 0x580   : > { %8177 = vst [vmem:[%s14928_s14 + $0x20] sm:$0xff] %v7294_v10  ;;  %v7296_v22 = vadd.f32 %v7295_v41, %v6303_v24  ;;  %v6308_v5 = vadd.f32 %v6307_v48, %v18510_v39  ;;  %v7316_v21 = vpop.f32.mrf.mxu1  ;;  %6647 = vmatprep.mubr.f32.mxu0 %v17044_v61  ;;  %v18516_v39 = vld [vmem:[#allocation138_spill] sm:$0xff] }
 0x581   : > { %v6309_v4 = vpop.f32.mrf.mxu0 }
 0x582   : > { %8178 = vst [vmem:[%s14928_s14 + $0x28] sm:$0xff] %v7296_v22  ;;  %v7301_v18 = vadd.f32 %v7300_v12, %v6308_v5  ;;  %v6310_v17 = vadd.f32 %v6309_v4, %v18511_v7  ;;  %v7321_v13 = vpop.f32.mrf.mxu1  ;;  %8972 = vmatmul.mubr.msk.f32.gmra.mxu1 %vm18513_vm10, %v18228_v40  ;;  %v18515_v12 = vld [vmem:[#allocation142_spill] sm:$0xff]  ;;  %vm18543_vm10 = vcmp.eq.s32.totalorder %v18542_v9, %v18230_v11  ;;  %v18557_v9 = vld [vmem:[#allocation175_spill] sm:$0xff] }
 0x583   : > { %v6314_v44 = vpop.f32.mrf.mxu0  ;;  %8842 = vmatmul.mubr.msk.f32.gmra.mxu0 %vm18514_vm11, %v18228_v40  ;;  %7661 = vmatprep.mubr.f32.mxu1 %v17044_v61  ;;  %vm18544_vm11 = vmmov %vm18533_vm6 }
 0x584   : > { %8179 = vst [vmem:[%s14928_s14 + $0x30] sm:$0xff] %v7301_v18  ;;  %v7303_v41 = vadd.f32 %v7302_v25, %v6310_v17  ;;  %v6315_v10 = vadd.f32 %v6314_v44, %v18515_v12  ;;  %v7323_v24 = vpop.f32.mrf.mxu1  ;;  %6654 = vmatprep.mubr.f32.mxu0 %v17044_v61  ;;  %v18521_v12 = vld [vmem:[#allocation146_spill] sm:$0xff] }
 0x585   : > { %v6316_v48 = vpop.f32.mrf.mxu0 }
 0x586   : > { %8180 = vst [vmem:[%s14928_s14 + $0x38] sm:$0xff] %v7303_v41  ;;  %v7308_v22 = vadd.f32 %v7307_v47, %v6315_v10  ;;  %v6317_v5 = vadd.f32 %v6316_v48, %v18516_v39  ;;  %v7328_v4 = vpop.f32.mrf.mxu1  ;;  %8973 = vmatmul.mubr.msk.f32.gmra.mxu1 %vm18518_vm0, %v18228_v40  ;;  %v18520_v47 = vld [vmem:[#allocation144_spill] sm:$0xff]  ;;  %vm18548_vm0 = vcmp.eq.s32.totalorder %v18547_v57, %v18230_v11  ;;  %v18562_v57 = vld [vmem:[#allocation179_spill] sm:$0xff] }
 0x587   : > { %v6321_v7 = vpop.f32.mrf.mxu0  ;;  %8843 = vmatmul.mubr.msk.f32.gmra.mxu0 %vm18519_vm1, %v18228_v40  ;;  %7668 = vmatprep.mubr.f32.mxu1 %v17044_v61  ;;  %vm18549_vm1 = vmmov %vm18538_vm8 }
 0x588   : > { %8181 = vst [vmem:[%s14928_s14 + $0x40] sm:$0xff] %v7308_v22  ;;  %v7310_v25 = vadd.f32 %v7309_v20, %v6317_v5  ;;  %v6322_v18 = vadd.f32 %v6321_v7, %v18520_v47  ;;  %v7330_v17 = vpop.f32.mrf.mxu1  ;;  %6661 = vmatprep.mubr.f32.mxu0 %v17044_v61  ;;  %v18526_v47 = vld [vmem:[#allocation148_spill] sm:$0xff] }
 0x589   : > { %v6323_v44 = vpop.f32.mrf.mxu0 }
 0x58a   : > { %8182 = vst [vmem:[%s14928_s14 + $0x48] sm:$0xff] %v7310_v25  ;;  %v7315_v41 = vadd.f32 %v7314_v28, %v6322_v18  ;;  %v6324_v10 = vadd.f32 %v6323_v44, %v18521_v12  ;;  %v7335_v48 = vpop.f32.mrf.mxu1  ;;  %8974 = vmatmul.mubr.msk.f32.gmra.mxu1 %vm18523_vm2, %v18228_v40  ;;  %v18525_v28 = vld [vmem:[#allocation141_spill] sm:$0xff]  ;;  %vm18553_vm2 = vcmp.eq.s32.totalorder %v18552_v63, %v18230_v11  ;;  %v18567_v63 = vld [vmem:[#allocation183_spill] sm:$0xff] }
 0x58b   : > { %v6328_v39 = vpop.f32.mrf.mxu0  ;;  %8844 = vmatmul.mubr.msk.f32.gmra.mxu0 %vm18524_vm3, %v18228_v40  ;;  %7675 = vmatprep.mubr.f32.mxu1 %v17044_v61  ;;  %vm18554_vm3 = vmmov %vm18543_vm10 }
 0x58c   : > { %8183 = vst [vmem:[%s14928_s14 + $0x50] sm:$0xff] %v7315_v41  ;;  %v7317_v20 = vadd.f32 %v7316_v21, %v6324_v10  ;;  %v6329_v22 = vadd.f32 %v6328_v39, %v18525_v28  ;;  %v7337_v5 = vpop.f32.mrf.mxu1  ;;  %6668 = vmatprep.mubr.f32.mxu0 %v17044_v61  ;;  %v18531_v28 = vld [vmem:[#allocation145_spill] sm:$0xff] }
 0x58d   : > { %v6330_v7 = vpop.f32.mrf.mxu0 }
 0x58e   : > { %8184 = vst [vmem:[%s14928_s14 + $0x58] sm:$0xff] %v7317_v20  ;;  %v7322_v25 = vadd.f32 %v7321_v13, %v6329_v22  ;;  %v6331_v18 = vadd.f32 %v6330_v7, %v18526_v47  ;;  %v7342_v44 = vpop.f32.mrf.mxu1  ;;  %8975 = vmatmul.mubr.msk.f32.gmra.mxu1 %vm18528_vm4, %v18228_v40  ;;  %v18530_v13 = vld [vmem:[#allocation150_spill] sm:$0xff]  ;;  %vm18558_vm4 = vcmp.eq.s32.totalorder %v18557_v9, %v18230_v11  ;;  %v18572_v9 = vld [vmem:[#allocation187_spill] sm:$0xff] }
 0x58f   : > { %v6335_v12 = vpop.f32.mrf.mxu0  ;;  %8845 = vmatmul.mubr.msk.f32.gmra.mxu0 %vm18529_vm5, %v18228_v40  ;;  %7682 = vmatprep.mubr.f32.mxu1 %v17044_v61  ;;  %vm18559_vm5 = vmmov %vm18548_vm0 }
 0x590   : > { %8185 = vst [vmem:[%s14928_s14 + $0x60] sm:$0xff] %v7322_v25  ;;  %v7324_v21 = vadd.f32 %v7323_v24, %v6331_v18  ;;  %v6336_v41 = vadd.f32 %v6335_v12, %v18530_v13  ;;  %v7344_v10 = vpop.f32.mrf.mxu1  ;;  %6675 = vmatprep.mubr.f32.mxu0 %v17044_v61  ;;  %v18536_v13 = vld [vmem:[#allocation154_spill] sm:$0xff] }
 0x591   : > { %v6337_v39 = vpop.f32.mrf.mxu0 }
 0x592   : > { %8186 = vst [vmem:[%s14928_s14 + $0x68] sm:$0xff] %v7324_v21  ;;  %v7329_v20 = vadd.f32 %v7328_v4, %v6336_v41  ;;  %v6338_v22 = vadd.f32 %v6337_v39, %v18531_v28  ;;  %v7349_v7 = vpop.f32.mrf.mxu1  ;;  %8976 = vmatmul.mubr.msk.f32.gmra.mxu1 %vm18533_vm6, %v18228_v40  ;;  %v18535_v4 = vld [vmem:[#allocation152_spill] sm:$0xff]  ;;  %vm18563_vm6 = vcmp.eq.s32.totalorder %v18562_v57, %v18230_v11  ;;  %v18577_v57 = vld [vmem:[#allocation191_spill] sm:$0xff] }
 0x593   : > { %v6342_v47 = vpop.f32.mrf.mxu0  ;;  %8846 = vmatmul.mubr.msk.f32.gmra.mxu0 %vm18534_vm7, %v18228_v40  ;;  %7689 = vmatprep.mubr.f32.mxu1 %v17044_v61  ;;  %vm18564_vm7 = vmmov %vm18553_vm2 }
 0x594   : > { %8187 = vst [vmem:[%s14928_s14 + $0x70] sm:$0xff] %v7329_v20  ;;  %v7331_v24 = vadd.f32 %v7330_v17, %v6338_v22  ;;  %v6343_v25 = vadd.f32 %v6342_v47, %v18535_v4  ;;  %v7351_v18 = vpop.f32.mrf.mxu1  ;;  %6682 = vmatprep.mubr.f32.mxu0 %v17044_v61  ;;  %v18541_v4 = vld [vmem:[#allocation156_spill] sm:$0xff] }
 0x595   : > { %v6344_v12 = vpop.f32.mrf.mxu0 }
 0x596   : > { %8188 = vst [vmem:[%s14928_s14 + $0x78] sm:$0xff] %v7331_v24  ;;  %v7336_v21 = vadd.f32 %v7335_v48, %v6343_v25  ;;  %v6345_v41 = vadd.f32 %v6344_v12, %v18536_v13  ;;  %v7356_v39 = vpop.f32.mrf.mxu1  ;;  %8977 = vmatmul.mubr.msk.f32.gmra.mxu1 %vm18538_vm8, %v18228_v40  ;;  %v18540_v48 = vld [vmem:[#allocation149_spill] sm:$0xff]  ;;  %vm18568_vm8 = vcmp.eq.s32.totalorder %v18567_v63, %v18230_v11  ;;  %v18582_v63 = vld [vmem:[#allocation195_spill] sm:$0xff] }
 0x597   : > { %v6349_v28 = vpop.f32.mrf.mxu0  ;;  %8847 = vmatmul.mubr.msk.f32.gmra.mxu0 %vm18539_vm9, %v18228_v40  ;;  %7696 = vmatprep.mubr.f32.mxu1 %v17044_v61  ;;  %vm18569_vm9 = vmmov %vm18558_vm4 }
 0x598   : > { %8189 = vst [vmem:[%s14928_s14 + $0x80] sm:$0xff] %v7336_v21  ;;  %v7338_v17 = vadd.f32 %v7337_v5, %v6345_v41  ;;  %v6350_v20 = vadd.f32 %v6349_v28, %v18540_v48  ;;  %v7358_v22 = vpop.f32.mrf.mxu1  ;;  %6689 = vmatprep.mubr.f32.mxu0 %v17044_v61  ;;  %v18546_v48 = vld [vmem:[#allocation153_spill] sm:$0xff] }
 0x599   : > { %v6351_v47 = vpop.f32.mrf.mxu0 }
 0x59a   : > { %8190 = vst [vmem:[%s14928_s14 + $0x88] sm:$0xff] %v7338_v17  ;;  %v7343_v24 = vadd.f32 %v7342_v44, %v6350_v20  ;;  %v6352_v25 = vadd.f32 %v6351_v47, %v18541_v4  ;;  %v7363_v12 = vpop.f32.mrf.mxu1  ;;  %8978 = vmatmul.mubr.msk.f32.gmra.mxu1 %vm18543_vm10, %v18228_v40  ;;  %v18545_v44 = vld [vmem:[#allocation158_spill] sm:$0xff]  ;;  %vm18573_vm10 = vcmp.eq.s32.totalorder %v18572_v9, %v18230_v11  ;;  %v18587_v9 = vld [vmem:[#allocation199_spill] sm:$0xff] }
 0x59b   : > { %v6356_v13 = vpop.f32.mrf.mxu0  ;;  %8848 = vmatmul.mubr.msk.f32.gmra.mxu0 %vm18544_vm11, %v18228_v40  ;;  %7703 = vmatprep.mubr.f32.mxu1 %v17044_v61  ;;  %vm18574_vm11 = vmmov %vm18563_vm6 }
 0x59c   : > { %8191 = vst [vmem:[%s14928_s14 + $0x90] sm:$0xff] %v7343_v24  ;;  %v7345_v5 = vadd.f32 %v7344_v10, %v6352_v25  ;;  %v6357_v21 = vadd.f32 %v6356_v13, %v18545_v44  ;;  %v7365_v41 = vpop.f32.mrf.mxu1  ;;  %6696 = vmatprep.mubr.f32.mxu0 %v17044_v61  ;;  %v18551_v44 = vld [vmem:[#allocation162_spill] sm:$0xff] }
 0x59d   : > { %v6358_v28 = vpop.f32.mrf.mxu0 }
 0x59e   : > { %8192 = vst [vmem:[%s14928_s14 + $0x98] sm:$0xff] %v7345_v5  ;;  %v7350_v17 = vadd.f32 %v7349_v7, %v6357_v21  ;;  %v6359_v20 = vadd.f32 %v6358_v28, %v18546_v48  ;;  %v7370_v47 = vpop.f32.mrf.mxu1  ;;  %8979 = vmatmul.mubr.msk.f32.gmra.mxu1 %vm18548_vm0, %v18228_v40  ;;  %v18550_v7 = vld [vmem:[#allocation160_spill] sm:$0xff]  ;;  %vm18578_vm0 = vcmp.eq.s32.totalorder %v18577_v57, %v18230_v11  ;;  %v18592_v57 = vld [vmem:[#allocation203_spill] sm:$0xff] }
 0x59f   : > { %v6363_v4 = vpop.f32.mrf.mxu0  ;;  %8849 = vmatmul.mubr.msk.f32.gmra.mxu0 %vm18549_vm1, %v18228_v40  ;;  %7710 = vmatprep.mubr.f32.mxu1 %v17044_v61  ;;  %vm18579_vm1 = vmmov %vm18568_vm8 }
 0x5a0   : > { %8193 = vst [vmem:[%s14928_s14 + $0xa0] sm:$0xff] %v7350_v17  ;;  %v7352_v10 = vadd.f32 %v7351_v18, %v6359_v20  ;;  %v6364_v24 = vadd.f32 %v6363_v4, %v18550_v7  ;;  %v7372_v25 = vpop.f32.mrf.mxu1  ;;  %6703 = vmatprep.mubr.f32.mxu0 %v17044_v61  ;;  %v18556_v7 = vld [vmem:[#allocation164_spill] sm:$0xff] }
 0x5a1   : > { %v6365_v13 = vpop.f32.mrf.mxu0 }
 0x5a2   : > { %8194 = vst [vmem:[%s14928_s14 + $0xa8] sm:$0xff] %v7352_v10  ;;  %v7357_v5 = vadd.f32 %v7356_v39, %v6364_v24  ;;  %v6366_v21 = vadd.f32 %v6365_v13, %v18551_v44  ;;  %v7377_v28 = vpop.f32.mrf.mxu1  ;;  %8980 = vmatmul.mubr.msk.f32.gmra.mxu1 %vm18553_vm2, %v18228_v40  ;;  %v18555_v39 = vld [vmem:[#allocation157_spill] sm:$0xff]  ;;  %vm18583_vm2 = vcmp.eq.s32.totalorder %v18582_v63, %v18230_v11  ;;  %v18597_v63 = vld [vmem:[#allocation207_spill] sm:$0xff] }
 0x5a3   : > { %v6370_v48 = vpop.f32.mrf.mxu0  ;;  %8850 = vmatmul.mubr.msk.f32.gmra.mxu0 %vm18554_vm3, %v18228_v40  ;;  %7717 = vmatprep.mubr.f32.mxu1 %v17044_v61  ;;  %vm18584_vm3 = vmmov %vm18573_vm10 }
 0x5a4   : > { %8195 = vst [vmem:[%s14928_s14 + $0xb0] sm:$0xff] %v7357_v5  ;;  %v7359_v18 = vadd.f32 %v7358_v22, %v6366_v21  ;;  %v6371_v17 = vadd.f32 %v6370_v48, %v18555_v39  ;;  %v7379_v20 = vpop.f32.mrf.mxu1  ;;  %6710 = vmatprep.mubr.f32.mxu0 %v17044_v61  ;;  %v18561_v39 = vld [vmem:[#allocation161_spill] sm:$0xff] }
 0x5a5   : > { %v6372_v4 = vpop.f32.mrf.mxu0 }
 0x5a6   : > { %8196 = vst [vmem:[%s14928_s14 + $0xb8] sm:$0xff] %v7359_v18  ;;  %v7364_v10 = vadd.f32 %v7363_v12, %v6371_v17  ;;  %v6373_v24 = vadd.f32 %v6372_v4, %v18556_v7  ;;  %v7384_v13 = vpop.f32.mrf.mxu1  ;;  %8981 = vmatmul.mubr.msk.f32.gmra.mxu1 %vm18558_vm4, %v18228_v40  ;;  %v18560_v12 = vld [vmem:[#allocation166_spill] sm:$0xff]  ;;  %vm18588_vm4 = vcmp.eq.s32.totalorder %v18587_v9, %v18230_v11  ;;  %v18602_v9 = vld [vmem:[#allocation211_spill] sm:$0xff] }
 0x5a7   : > { %v6377_v44 = vpop.f32.mrf.mxu0  ;;  %8851 = vmatmul.mubr.msk.f32.gmra.mxu0 %vm18559_vm5, %v18228_v40  ;;  %7724 = vmatprep.mubr.f32.mxu1 %v17044_v61  ;;  %vm18589_vm5 = vmmov %vm18578_vm0 }
 0x5a8   : > { %8197 = vst [vmem:[%s14928_s14 + $0xc0] sm:$0xff] %v7364_v10  ;;  %v7366_v22 = vadd.f32 %v7365_v41, %v6373_v24  ;;  %v6378_v5 = vadd.f32 %v6377_v44, %v18560_v12  ;;  %v7386_v21 = vpop.f32.mrf.mxu1  ;;  %6717 = vmatprep.mubr.f32.mxu0 %v17044_v61  ;;  %v18566_v12 = vld [vmem:[#allocation170_spill] sm:$0xff] }
 0x5a9   : > { %v6379_v48 = vpop.f32.mrf.mxu0 }
 0x5aa   : > { %8198 = vst [vmem:[%s14928_s14 + $0xc8] sm:$0xff] %v7366_v22  ;;  %v7371_v18 = vadd.f32 %v7370_v47, %v6378_v5  ;;  %v6380_v17 = vadd.f32 %v6379_v48, %v18561_v39  ;;  %v7391_v4 = vpop.f32.mrf.mxu1  ;;  %8982 = vmatmul.mubr.msk.f32.gmra.mxu1 %vm18563_vm6, %v18228_v40  ;;  %v18565_v47 = vld [vmem:[#allocation168_spill] sm:$0xff]  ;;  %vm18593_vm6 = vcmp.eq.s32.totalorder %v18592_v57, %v18230_v11  ;;  %v18607_v57 = vld [vmem:[#allocation215_spill] sm:$0xff] }
 0x5ab   : > { %v6384_v7 = vpop.f32.mrf.mxu0  ;;  %8852 = vmatmul.mubr.msk.f32.gmra.mxu0 %vm18564_vm7, %v18228_v40  ;;  %7731 = vmatprep.mubr.f32.mxu1 %v17044_v61  ;;  %vm18594_vm7 = vmmov %vm18583_vm2 }
 0x5ac   : > { %8199 = vst [vmem:[%s14928_s14 + $0xd0] sm:$0xff] %v7371_v18  ;;  %v7373_v41 = vadd.f32 %v7372_v25, %v6380_v17  ;;  %v6385_v10 = vadd.f32 %v6384_v7, %v18565_v47  ;;  %v7393_v24 = vpop.f32.mrf.mxu1  ;;  %6724 = vmatprep.mubr.f32.mxu0 %v17044_v61  ;;  %v18571_v47 = vld [vmem:[#allocation172_spill] sm:$0xff] }
 0x5ad   : > { %v6386_v44 = vpop.f32.mrf.mxu0 }
 0x5ae   : > { %8200 = vst [vmem:[%s14928_s14 + $0xd8] sm:$0xff] %v7373_v41  ;;  %v7378_v22 = vadd.f32 %v7377_v28, %v6385_v10  ;;  %v6387_v5 = vadd.f32 %v6386_v44, %v18566_v12  ;;  %v7398_v48 = vpop.f32.mrf.mxu1  ;;  %8983 = vmatmul.mubr.msk.f32.gmra.mxu1 %vm18568_vm8, %v18228_v40  ;;  %v18570_v28 = vld [vmem:[#allocation165_spill] sm:$0xff]  ;;  %vm18598_vm8 = vcmp.eq.s32.totalorder %v18597_v63, %v18230_v11  ;;  %v18612_v63 = vld [vmem:[#allocation219_spill] sm:$0xff] }
 0x5af   : > { %v6391_v39 = vpop.f32.mrf.mxu0  ;;  %8853 = vmatmul.mubr.msk.f32.gmra.mxu0 %vm18569_vm9, %v18228_v40  ;;  %7738 = vmatprep.mubr.f32.mxu1 %v17044_v61  ;;  %vm18599_vm9 = vmmov %vm18588_vm4 }
 0x5b0   : > { %8201 = vst [vmem:[%s14928_s14 + $0xe0] sm:$0xff] %v7378_v22  ;;  %v7380_v25 = vadd.f32 %v7379_v20, %v6387_v5  ;;  %v6392_v18 = vadd.f32 %v6391_v39, %v18570_v28  ;;  %v7400_v17 = vpop.f32.mrf.mxu1  ;;  %6731 = vmatprep.mubr.f32.mxu0 %v17044_v61  ;;  %v18576_v28 = vld [vmem:[#allocation169_spill] sm:$0xff] }
 0x5b1   : > { %v6393_v7 = vpop.f32.mrf.mxu0 }
 0x5b2   : > { %8202 = vst [vmem:[%s14928_s14 + $0xe8] sm:$0xff] %v7380_v25  ;;  %v7385_v41 = vadd.f32 %v7384_v13, %v6392_v18  ;;  %v6394_v10 = vadd.f32 %v6393_v7, %v18571_v47  ;;  %v7405_v44 = vpop.f32.mrf.mxu1  ;;  %8984 = vmatmul.mubr.msk.f32.gmra.mxu1 %vm18573_vm10, %v18228_v40  ;;  %v18575_v13 = vld [vmem:[#allocation174_spill] sm:$0xff]  ;;  %vm18603_vm10 = vcmp.eq.s32.totalorder %v18602_v9, %v18230_v11  ;;  %v18617_v9 = vld [vmem:[#allocation223_spill] sm:$0xff] }
 0x5b3   : > { %v6398_v12 = vpop.f32.mrf.mxu0  ;;  %8854 = vmatmul.mubr.msk.f32.gmra.mxu0 %vm18574_vm11, %v18228_v40  ;;  %7745 = vmatprep.mubr.f32.mxu1 %v17044_v61  ;;  %vm18604_vm11 = vmmov %vm18593_vm6 }
 0x5b4   : > { %8203 = vst [vmem:[%s14928_s14 + $0xf0] sm:$0xff] %v7385_v41  ;;  %v7387_v20 = vadd.f32 %v7386_v21, %v6394_v10  ;;  %v6399_v22 = vadd.f32 %v6398_v12, %v18575_v13  ;;  %v7407_v5 = vpop.f32.mrf.mxu1  ;;  %6738 = vmatprep.mubr.f32.mxu0 %v17044_v61  ;;  %v18581_v13 = vld [vmem:[#allocation178_spill] sm:$0xff] }
 0x5b5   : > { %v6400_v39 = vpop.f32.mrf.mxu0 }
 0x5b6   : > { %8204 = vst [vmem:[%s14928_s14 + $0xf8] sm:$0xff] %v7387_v20  ;;  %v7392_v25 = vadd.f32 %v7391_v4, %v6399_v22  ;;  %v6401_v18 = vadd.f32 %v6400_v39, %v18576_v28  ;;  %v7412_v7 = vpop.f32.mrf.mxu1  ;;  %8985 = vmatmul.mubr.msk.f32.gmra.mxu1 %vm18578_vm0, %v18228_v40  ;;  %v18580_v4 = vld [vmem:[#allocation176_spill] sm:$0xff]  ;;  %vm18608_vm0 = vcmp.eq.s32.totalorder %v18607_v57, %v18230_v11  ;;  %v18622_v57 = vld [vmem:[#allocation227_spill] sm:$0xff] }
 0x5b7   : > { %v6405_v47 = vpop.f32.mrf.mxu0  ;;  %8855 = vmatmul.mubr.msk.f32.gmra.mxu0 %vm18579_vm1, %v18228_v40  ;;  %7752 = vmatprep.mubr.f32.mxu1 %v17044_v61  ;;  %vm18609_vm1 = vmmov %vm18598_vm8 }
 0x5b8   : > { %8205 = vst [vmem:[%s14928_s14 + $0x100] sm:$0xff] %v7392_v25  ;;  %v7394_v21 = vadd.f32 %v7393_v24, %v6401_v18  ;;  %v6406_v41 = vadd.f32 %v6405_v47, %v18580_v4  ;;  %v7414_v10 = vpop.f32.mrf.mxu1  ;;  %6745 = vmatprep.mubr.f32.mxu0 %v17044_v61  ;;  %v18586_v4 = vld [vmem:[#allocation180_spill] sm:$0xff] }
 0x5b9   : > { %v6407_v12 = vpop.f32.mrf.mxu0 }
 0x5ba   : > { %8206 = vst [vmem:[%s14928_s14 + $0x108] sm:$0xff] %v7394_v21  ;;  %v7399_v20 = vadd.f32 %v7398_v48, %v6406_v41  ;;  %v6408_v22 = vadd.f32 %v6407_v12, %v18581_v13  ;;  %v7419_v39 = vpop.f32.mrf.mxu1  ;;  %8986 = vmatmul.mubr.msk.f32.gmra.mxu1 %vm18583_vm2, %v18228_v40  ;;  %v18585_v48 = vld [vmem:[#allocation173_spill] sm:$0xff]  ;;  %vm18613_vm2 = vcmp.eq.s32.totalorder %v18612_v63, %v18230_v11  ;;  %v18627_v63 = vld [vmem:[#allocation231_spill] sm:$0xff] }
 0x5bb   : > { %v6412_v28 = vpop.f32.mrf.mxu0  ;;  %8856 = vmatmul.mubr.msk.f32.gmra.mxu0 %vm18584_vm3, %v18228_v40  ;;  %7759 = vmatprep.mubr.f32.mxu1 %v17044_v61  ;;  %vm18614_vm3 = vmmov %vm18603_vm10 }
 0x5bc   : > { %8207 = vst [vmem:[%s14928_s14 + $0x110] sm:$0xff] %v7399_v20  ;;  %v7401_v24 = vadd.f32 %v7400_v17, %v6408_v22  ;;  %v6413_v25 = vadd.f32 %v6412_v28, %v18585_v48  ;;  %v7421_v18 = vpop.f32.mrf.mxu1  ;;  %6752 = vmatprep.mubr.f32.mxu0 %v17044_v61  ;;  %v18591_v48 = vld [vmem:[#allocation177_spill] sm:$0xff] }
 0x5bd   : > { %v6414_v47 = vpop.f32.mrf.mxu0 }
 0x5be   : > { %8208 = vst [vmem:[%s14928_s14 + $0x118] sm:$0xff] %v7401_v24  ;;  %v7406_v21 = vadd.f32 %v7405_v44, %v6413_v25  ;;  %v6415_v41 = vadd.f32 %v6414_v47, %v18586_v4  ;;  %v7426_v12 = vpop.f32.mrf.mxu1  ;;  %8987 = vmatmul.mubr.msk.f32.gmra.mxu1 %vm18588_vm4, %v18228_v40  ;;  %v18590_v44 = vld [vmem:[#allocation182_spill] sm:$0xff]  ;;  %vm18618_vm4 = vcmp.eq.s32.totalorder %v18617_v9, %v18230_v11  ;;  %v18632_v9 = vld [vmem:[#allocation235_spill] sm:$0xff] }
 0x5bf   : > { %v6419_v13 = vpop.f32.mrf.mxu0  ;;  %8857 = vmatmul.mubr.msk.f32.gmra.mxu0 %vm18589_vm5, %v18228_v40  ;;  %7766 = vmatprep.mubr.f32.mxu1 %v17044_v61  ;;  %vm18619_vm5 = vmmov %vm18608_vm0 }
 0x5c0   : > { %8209 = vst [vmem:[%s14928_s14 + $0x120] sm:$0xff] %v7406_v21  ;;  %v7408_v17 = vadd.f32 %v7407_v5, %v6415_v41  ;;  %v6420_v20 = vadd.f32 %v6419_v13, %v18590_v44  ;;  %v7428_v22 = vpop.f32.mrf.mxu1  ;;  %6759 = vmatprep.mubr.f32.mxu0 %v17044_v61  ;;  %v18596_v44 = vld [vmem:[#allocation186_spill] sm:$0xff] }
 0x5c1   : > { %v6421_v28 = vpop.f32.mrf.mxu0 }
 0x5c2   : > { %8210 = vst [vmem:[%s14928_s14 + $0x128] sm:$0xff] %v7408_v17  ;;  %v7413_v24 = vadd.f32 %v7412_v7, %v6420_v20  ;;  %v6422_v25 = vadd.f32 %v6421_v28, %v18591_v48  ;;  %v7433_v47 = vpop.f32.mrf.mxu1  ;;  %8988 = vmatmul.mubr.msk.f32.gmra.mxu1 %vm18593_vm6, %v18228_v40  ;;  %v18595_v7 = vld [vmem:[#allocation184_spill] sm:$0xff]  ;;  %vm18623_vm6 = vcmp.eq.s32.totalorder %v18622_v57, %v18230_v11  ;;  %v18637_v57 = vld [vmem:[#allocation239_spill] sm:$0xff] }
 0x5c3   : > { %v6426_v4 = vpop.f32.mrf.mxu0  ;;  %8858 = vmatmul.mubr.msk.f32.gmra.mxu0 %vm18594_vm7, %v18228_v40  ;;  %7773 = vmatprep.mubr.f32.mxu1 %v17044_v61  ;;  %vm18624_vm7 = vmmov %vm18613_vm2 }
 0x5c4   : > { %8211 = vst [vmem:[%s14928_s14 + $0x130] sm:$0xff] %v7413_v24  ;;  %v7415_v5 = vadd.f32 %v7414_v10, %v6422_v25  ;;  %v6427_v21 = vadd.f32 %v6426_v4, %v18595_v7  ;;  %v7435_v41 = vpop.f32.mrf.mxu1  ;;  %6766 = vmatprep.mubr.f32.mxu0 %v17044_v61  ;;  %v18601_v7 = vld [vmem:[#allocation188_spill] sm:$0xff] }
 0x5c5   : > { %v6428_v13 = vpop.f32.mrf.mxu0 }
 0x5c6   : > { %8212 = vst [vmem:[%s14928_s14 + $0x138] sm:$0xff] %v7415_v5  ;;  %v7420_v17 = vadd.f32 %v7419_v39, %v6427_v21  ;;  %v6429_v20 = vadd.f32 %v6428_v13, %v18596_v44  ;;  %v7440_v28 = vpop.f32.mrf.mxu1  ;;  %8989 = vmatmul.mubr.msk.f32.gmra.mxu1 %vm18598_vm8, %v18228_v40  ;;  %v18600_v39 = vld [vmem:[#allocation181_spill] sm:$0xff]  ;;  %vm18628_vm8 = vcmp.eq.s32.totalorder %v18627_v63, %v18230_v11  ;;  %v18642_v63 = vld [vmem:[#allocation243_spill] sm:$0xff] }
 0x5c7   : > { %v6433_v48 = vpop.f32.mrf.mxu0  ;;  %8859 = vmatmul.mubr.msk.f32.gmra.mxu0 %vm18599_vm9, %v18228_v40  ;;  %7780 = vmatprep.mubr.f32.mxu1 %v17044_v61  ;;  %vm18629_vm9 = vmmov %vm18618_vm4 }
 0x5c8   : > { %8213 = vst [vmem:[%s14928_s14 + $0x140] sm:$0xff] %v7420_v17  ;;  %v7422_v10 = vadd.f32 %v7421_v18, %v6429_v20  ;;  %v6434_v24 = vadd.f32 %v6433_v48, %v18600_v39  ;;  %v7442_v25 = vpop.f32.mrf.mxu1  ;;  %6773 = vmatprep.mubr.f32.mxu0 %v17044_v61  ;;  %v18606_v39 = vld [vmem:[#allocation185_spill] sm:$0xff] }
 0x5c9   : > { %v6435_v4 = vpop.f32.mrf.mxu0 }
 0x5ca   : > { %8214 = vst [vmem:[%s14928_s14 + $0x148] sm:$0xff] %v7422_v10  ;;  %v7427_v5 = vadd.f32 %v7426_v12, %v6434_v24  ;;  %v6436_v21 = vadd.f32 %v6435_v4, %v18601_v7  ;;  %v7447_v13 = vpop.f32.mrf.mxu1  ;;  %8990 = vmatmul.mubr.msk.f32.gmra.mxu1 %vm18603_vm10, %v18228_v40  ;;  %v18605_v12 = vld [vmem:[#allocation190_spill] sm:$0xff]  ;;  %vm18633_vm10 = vcmp.eq.s32.totalorder %v18632_v9, %v18230_v11  ;;  %v18647_v9 = vld [vmem:[#allocation247_spill] sm:$0xff] }
 0x5cb   : > { %v6440_v44 = vpop.f32.mrf.mxu0  ;;  %8860 = vmatmul.mubr.msk.f32.gmra.mxu0 %vm18604_vm11, %v18228_v40  ;;  %7787 = vmatprep.mubr.f32.mxu1 %v17044_v61  ;;  %vm18634_vm11 = vmmov %vm18623_vm6 }
 0x5cc   : > { %8215 = vst [vmem:[%s14928_s14 + $0x150] sm:$0xff] %v7427_v5  ;;  %v7429_v18 = vadd.f32 %v7428_v22, %v6436_v21  ;;  %v6441_v17 = vadd.f32 %v6440_v44, %v18605_v12  ;;  %v7449_v20 = vpop.f32.mrf.mxu1  ;;  %6780 = vmatprep.mubr.f32.mxu0 %v17044_v61  ;;  %v18611_v12 = vld [vmem:[#allocation194_spill] sm:$0xff] }
 0x5cd   : > { %v6442_v48 = vpop.f32.mrf.mxu0 }
 0x5ce   : > { %8216 = vst [vmem:[%s14928_s14 + $0x158] sm:$0xff] %v7429_v18  ;;  %v7434_v10 = vadd.f32 %v7433_v47, %v6441_v17  ;;  %v6443_v24 = vadd.f32 %v6442_v48, %v18606_v39  ;;  %v7454_v4 = vpop.f32.mrf.mxu1  ;;  %8991 = vmatmul.mubr.msk.f32.gmra.mxu1 %vm18608_vm0, %v18228_v40  ;;  %v18610_v47 = vld [vmem:[#allocation192_spill] sm:$0xff]  ;;  %vm18638_vm0 = vcmp.eq.s32.totalorder %v18637_v57, %v18230_v11  ;;  %v18652_v57 = vld [vmem:[#allocation251_spill] sm:$0xff] }
 0x5cf   : > { %v6447_v7 = vpop.f32.mrf.mxu0  ;;  %8861 = vmatmul.mubr.msk.f32.gmra.mxu0 %vm18609_vm1, %v18228_v40  ;;  %7794 = vmatprep.mubr.f32.mxu1 %v17044_v61  ;;  %vm18639_vm1 = vmmov %vm18628_vm8 }
 0x5d0   : > { %8217 = vst [vmem:[%s14928_s14 + $0x160] sm:$0xff] %v7434_v10  ;;  %v7436_v22 = vadd.f32 %v7435_v41, %v6443_v24  ;;  %v6448_v5 = vadd.f32 %v6447_v7, %v18610_v47  ;;  %v7456_v21 = vpop.f32.mrf.mxu1  ;;  %6787 = vmatprep.mubr.f32.mxu0 %v17044_v61  ;;  %v18616_v47 = vld [vmem:[#allocation196_spill] sm:$0xff] }
 0x5d1   : > { %v6449_v44 = vpop.f32.mrf.mxu0 }
 0x5d2   : > { %8218 = vst [vmem:[%s14928_s14 + $0x168] sm:$0xff] %v7436_v22  ;;  %v7441_v18 = vadd.f32 %v7440_v28, %v6448_v5  ;;  %v6450_v17 = vadd.f32 %v6449_v44, %v18611_v12  ;;  %v7461_v48 = vpop.f32.mrf.mxu1  ;;  %8992 = vmatmul.mubr.msk.f32.gmra.mxu1 %vm18613_vm2, %v18228_v40  ;;  %v18615_v28 = vld [vmem:[#allocation189_spill] sm:$0xff]  ;;  %vm18643_vm2 = vcmp.eq.s32.totalorder %v18642_v63, %v18230_v11  ;;  %v18657_v63 = vld [vmem:[#allocation255_spill] sm:$0xff] }
 0x5d3   : > { %v6454_v39 = vpop.f32.mrf.mxu0  ;;  %8862 = vmatmul.mubr.msk.f32.gmra.mxu0 %vm18614_vm3, %v18228_v40  ;;  %7801 = vmatprep.mubr.f32.mxu1 %v17044_v61  ;;  %vm18644_vm3 = vmmov %vm18633_vm10 }
 0x5d4   : > { %8219 = vst [vmem:[%s14928_s14 + $0x170] sm:$0xff] %v7441_v18  ;;  %v7443_v41 = vadd.f32 %v7442_v25, %v6450_v17  ;;  %v6455_v10 = vadd.f32 %v6454_v39, %v18615_v28  ;;  %v7463_v24 = vpop.f32.mrf.mxu1  ;;  %6794 = vmatprep.mubr.f32.mxu0 %v17044_v61  ;;  %v18621_v28 = vld [vmem:[#allocation193_spill] sm:$0xff] }
 0x5d5   : > { %v6456_v7 = vpop.f32.mrf.mxu0 }
 0x5d6   : > { %8220 = vst [vmem:[%s14928_s14 + $0x178] sm:$0xff] %v7443_v41  ;;  %v7448_v22 = vadd.f32 %v7447_v13, %v6455_v10  ;;  %v6457_v5 = vadd.f32 %v6456_v7, %v18616_v47  ;;  %v7468_v44 = vpop.f32.mrf.mxu1  ;;  %8993 = vmatmul.mubr.msk.f32.gmra.mxu1 %vm18618_vm4, %v18228_v40  ;;  %v18620_v13 = vld [vmem:[#allocation198_spill] sm:$0xff]  ;;  %vm18648_vm4 = vcmp.eq.s32.totalorder %v18647_v9, %v18230_v11  ;;  %v18662_v9 = vld [vmem:[#allocation259_spill] sm:$0xff] }
 0x5d7   : > { %v6461_v12 = vpop.f32.mrf.mxu0  ;;  %8863 = vmatmul.mubr.msk.f32.gmra.mxu0 %vm18619_vm5, %v18228_v40  ;;  %7808 = vmatprep.mubr.f32.mxu1 %v17044_v61  ;;  %vm18649_vm5 = vmmov %vm18638_vm0 }
 0x5d8   : > { %8221 = vst [vmem:[%s14928_s14 + $0x180] sm:$0xff] %v7448_v22  ;;  %v7450_v25 = vadd.f32 %v7449_v20, %v6457_v5  ;;  %v6462_v18 = vadd.f32 %v6461_v12, %v18620_v13  ;;  %v7470_v17 = vpop.f32.mrf.mxu1  ;;  %6801 = vmatprep.mubr.f32.mxu0 %v17044_v61  ;;  %v18626_v13 = vld [vmem:[#allocation202_spill] sm:$0xff] }
 0x5d9   : > { %v6463_v39 = vpop.f32.mrf.mxu0 }
 0x5da   : > { %8222 = vst [vmem:[%s14928_s14 + $0x188] sm:$0xff] %v7450_v25  ;;  %v7455_v41 = vadd.f32 %v7454_v4, %v6462_v18  ;;  %v6464_v10 = vadd.f32 %v6463_v39, %v18621_v28  ;;  %v7475_v7 = vpop.f32.mrf.mxu1  ;;  %8994 = vmatmul.mubr.msk.f32.gmra.mxu1 %vm18623_vm6, %v18228_v40  ;;  %v18625_v4 = vld [vmem:[#allocation200_spill] sm:$0xff]  ;;  %vm18653_vm6 = vcmp.eq.s32.totalorder %v18652_v57, %v18230_v11  ;;  %v18667_v57 = vld [vmem:[#allocation263_spill] sm:$0xff] }
 0x5db   : > { %v6468_v47 = vpop.f32.mrf.mxu0  ;;  %8864 = vmatmul.mubr.msk.f32.gmra.mxu0 %vm18624_vm7, %v18228_v40  ;;  %7815 = vmatprep.mubr.f32.mxu1 %v17044_v61  ;;  %vm18654_vm7 = vmmov %vm18643_vm2 }
 0x5dc   : > { %8223 = vst [vmem:[%s14928_s14 + $0x190] sm:$0xff] %v7455_v41  ;;  %v7457_v20 = vadd.f32 %v7456_v21, %v6464_v10  ;;  %v6469_v22 = vadd.f32 %v6468_v47, %v18625_v4  ;;  %v7477_v5 = vpop.f32.mrf.mxu1  ;;  %6808 = vmatprep.mubr.f32.mxu0 %v17044_v61  ;;  %v18631_v4 = vld [vmem:[#allocation204_spill] sm:$0xff] }
 0x5dd   : > { %v6470_v12 = vpop.f32.mrf.mxu0 }
 0x5de   : > { %8224 = vst [vmem:[%s14928_s14 + $0x198] sm:$0xff] %v7457_v20  ;;  %v7462_v25 = vadd.f32 %v7461_v48, %v6469_v22  ;;  %v6471_v18 = vadd.f32 %v6470_v12, %v18626_v13  ;;  %v7482_v39 = vpop.f32.mrf.mxu1  ;;  %8995 = vmatmul.mubr.msk.f32.gmra.mxu1 %vm18628_vm8, %v18228_v40  ;;  %v18630_v48 = vld [vmem:[#allocation197_spill] sm:$0xff]  ;;  %vm18658_vm8 = vcmp.eq.s32.totalorder %v18657_v63, %v18230_v11  ;;  %v18672_v63 = vld [vmem:[#allocation267_spill] sm:$0xff] }
 0x5df   : > { %v6475_v28 = vpop.f32.mrf.mxu0  ;;  %8865 = vmatmul.mubr.msk.f32.gmra.mxu0 %vm18629_vm9, %v18228_v40  ;;  %7822 = vmatprep.mubr.f32.mxu1 %v17044_v61  ;;  %vm18659_vm9 = vmmov %vm18648_vm4 }
 0x5e0   : > { %8225 = vst [vmem:[%s14928_s14 + $0x1a0] sm:$0xff] %v7462_v25  ;;  %v7464_v21 = vadd.f32 %v7463_v24, %v6471_v18  ;;  %v6476_v41 = vadd.f32 %v6475_v28, %v18630_v48  ;;  %v7484_v10 = vpop.f32.mrf.mxu1  ;;  %6815 = vmatprep.mubr.f32.mxu0 %v17044_v61  ;;  %v18636_v48 = vld [vmem:[#allocation201_spill] sm:$0xff] }
 0x5e1   : > { %v6477_v47 = vpop.f32.mrf.mxu0 }
 0x5e2   : > { %8226 = vst [vmem:[%s14928_s14 + $0x1a8] sm:$0xff] %v7464_v21  ;;  %v7469_v20 = vadd.f32 %v7468_v44, %v6476_v41  ;;  %v6478_v22 = vadd.f32 %v6477_v47, %v18631_v4  ;;  %v7489_v12 = vpop.f32.mrf.mxu1  ;;  %8996 = vmatmul.mubr.msk.f32.gmra.mxu1 %vm18633_vm10, %v18228_v40  ;;  %v18635_v44 = vld [vmem:[#allocation206_spill] sm:$0xff]  ;;  %vm18663_vm10 = vcmp.eq.s32.totalorder %v18662_v9, %v18230_v11  ;;  %v18677_v9 = vld [vmem:[#allocation271_spill] sm:$0xff] }
 0x5e3   : > { %v6482_v13 = vpop.f32.mrf.mxu0  ;;  %8866 = vmatmul.mubr.msk.f32.gmra.mxu0 %vm18634_vm11, %v18228_v40  ;;  %7829 = vmatprep.mubr.f32.mxu1 %v17044_v61  ;;  %vm18664_vm11 = vmmov %vm18653_vm6 }
 0x5e4   : > { %8227 = vst [vmem:[%s14928_s14 + $0x1b0] sm:$0xff] %v7469_v20  ;;  %v7471_v24 = vadd.f32 %v7470_v17, %v6478_v22  ;;  %v6483_v25 = vadd.f32 %v6482_v13, %v18635_v44  ;;  %v7491_v18 = vpop.f32.mrf.mxu1  ;;  %6822 = vmatprep.mubr.f32.mxu0 %v17044_v61  ;;  %v18641_v44 = vld [vmem:[#allocation210_spill] sm:$0xff] }
 0x5e5   : > { %v6484_v28 = vpop.f32.mrf.mxu0 }
 0x5e6   : > { %8228 = vst [vmem:[%s14928_s14 + $0x1b8] sm:$0xff] %v7471_v24  ;;  %v7476_v21 = vadd.f32 %v7475_v7, %v6483_v25  ;;  %v6485_v41 = vadd.f32 %v6484_v28, %v18636_v48  ;;  %v7496_v47 = vpop.f32.mrf.mxu1  ;;  %8997 = vmatmul.mubr.msk.f32.gmra.mxu1 %vm18638_vm0, %v18228_v40  ;;  %v18640_v7 = vld [vmem:[#allocation208_spill] sm:$0xff]  ;;  %vm18668_vm0 = vcmp.eq.s32.totalorder %v18667_v57, %v18230_v11  ;;  %v18682_v57 = vld [vmem:[#allocation275_spill] sm:$0xff] }
 0x5e7   : > { %v6489_v4 = vpop.f32.mrf.mxu0  ;;  %8867 = vmatmul.mubr.msk.f32.gmra.mxu0 %vm18639_vm1, %v18228_v40  ;;  %7836 = vmatprep.mubr.f32.mxu1 %v17044_v61  ;;  %vm18669_vm1 = vmmov %vm18658_vm8 }
 0x5e8   : > { %8229 = vst [vmem:[%s14928_s14 + $0x1c0] sm:$0xff] %v7476_v21  ;;  %v7478_v17 = vadd.f32 %v7477_v5, %v6485_v41  ;;  %v6490_v20 = vadd.f32 %v6489_v4, %v18640_v7  ;;  %v7498_v22 = vpop.f32.mrf.mxu1  ;;  %6829 = vmatprep.mubr.f32.mxu0 %v17044_v61  ;;  %v18646_v7 = vld [vmem:[#allocation212_spill] sm:$0xff] }
 0x5e9   : > { %v6491_v13 = vpop.f32.mrf.mxu0 }
 0x5ea   : > { %8230 = vst [vmem:[%s14928_s14 + $0x1c8] sm:$0xff] %v7478_v17  ;;  %v7483_v24 = vadd.f32 %v7482_v39, %v6490_v20  ;;  %v6492_v25 = vadd.f32 %v6491_v13, %v18641_v44  ;;  %v7503_v28 = vpop.f32.mrf.mxu1  ;;  %8998 = vmatmul.mubr.msk.f32.gmra.mxu1 %vm18643_vm2, %v18228_v40  ;;  %v18645_v39 = vld [vmem:[#allocation205_spill] sm:$0xff]  ;;  %vm18673_vm2 = vcmp.eq.s32.totalorder %v18672_v63, %v18230_v11  ;;  %v18687_v63 = vld [vmem:[#allocation279_spill] sm:$0xff] }
 0x5eb   : > { %v6496_v48 = vpop.f32.mrf.mxu0  ;;  %8868 = vmatmul.mubr.msk.f32.gmra.mxu0 %vm18644_vm3, %v18228_v40  ;;  %7843 = vmatprep.mubr.f32.mxu1 %v17044_v61  ;;  %vm18674_vm3 = vmmov %vm18663_vm10 }
 0x5ec   : > { %8231 = vst [vmem:[%s14928_s14 + $0x1d0] sm:$0xff] %v7483_v24  ;;  %v7485_v5 = vadd.f32 %v7484_v10, %v6492_v25  ;;  %v6497_v21 = vadd.f32 %v6496_v48, %v18645_v39  ;;  %v7505_v41 = vpop.f32.mrf.mxu1  ;;  %6836 = vmatprep.mubr.f32.mxu0 %v17044_v61  ;;  %v18651_v39 = vld [vmem:[#allocation209_spill] sm:$0xff] }
 0x5ed   : > { %v6498_v4 = vpop.f32.mrf.mxu0 }
 0x5ee   : > { %8232 = vst [vmem:[%s14928_s14 + $0x1d8] sm:$0xff] %v7485_v5  ;;  %v7490_v17 = vadd.f32 %v7489_v12, %v6497_v21  ;;  %v6499_v20 = vadd.f32 %v6498_v4, %v18646_v7  ;;  %v7510_v13 = vpop.f32.mrf.mxu1  ;;  %8999 = vmatmul.mubr.msk.f32.gmra.mxu1 %vm18648_vm4, %v18228_v40  ;;  %v18650_v12 = vld [vmem:[#allocation214_spill] sm:$0xff]  ;;  %vm18678_vm4 = vcmp.eq.s32.totalorder %v18677_v9, %v18230_v11  ;;  %v18692_v9 = vld [vmem:[#allocation283_spill] sm:$0xff] }
 0x5ef   : > { %v6503_v44 = vpop.f32.mrf.mxu0  ;;  %8869 = vmatmul.mubr.msk.f32.gmra.mxu0 %vm18649_vm5, %v18228_v40  ;;  %7850 = vmatprep.mubr.f32.mxu1 %v17044_v61  ;;  %vm18679_vm5 = vmmov %vm18668_vm0 }
 0x5f0   : > { %8233 = vst [vmem:[%s14928_s14 + $0x1e0] sm:$0xff] %v7490_v17  ;;  %v7492_v10 = vadd.f32 %v7491_v18, %v6499_v20  ;;  %v6504_v24 = vadd.f32 %v6503_v44, %v18650_v12  ;;  %v7512_v25 = vpop.f32.mrf.mxu1  ;;  %6843 = vmatprep.mubr.f32.mxu0 %v17044_v61  ;;  %v18656_v12 = vld [vmem:[#allocation218_spill] sm:$0xff] }
 0x5f1   : > { %v6505_v48 = vpop.f32.mrf.mxu0 }
 0x5f2   : > { %8234 = vst [vmem:[%s14928_s14 + $0x1e8] sm:$0xff] %v7492_v10  ;;  %v7497_v5 = vadd.f32 %v7496_v47, %v6504_v24  ;;  %v6506_v21 = vadd.f32 %v6505_v48, %v18651_v39  ;;  %v7517_v4 = vpop.f32.mrf.mxu1  ;;  %9000 = vmatmul.mubr.msk.f32.gmra.mxu1 %vm18653_vm6, %v18228_v40  ;;  %v18655_v47 = vld [vmem:[#allocation216_spill] sm:$0xff]  ;;  %vm18683_vm6 = vcmp.eq.s32.totalorder %v18682_v57, %v18230_v11  ;;  %v18697_v57 = vld [vmem:[#allocation287_spill] sm:$0xff] }
 0x5f3   : > { %v6510_v7 = vpop.f32.mrf.mxu0  ;;  %8870 = vmatmul.mubr.msk.f32.gmra.mxu0 %vm18654_vm7, %v18228_v40  ;;  %7857 = vmatprep.mubr.f32.mxu1 %v17044_v61  ;;  %vm18684_vm7 = vmmov %vm18673_vm2 }
 0x5f4   : > { %8235 = vst [vmem:[%s14928_s14 + $0x1f0] sm:$0xff] %v7497_v5  ;;  %v7499_v18 = vadd.f32 %v7498_v22, %v6506_v21  ;;  %v6511_v17 = vadd.f32 %v6510_v7, %v18655_v47  ;;  %v7519_v20 = vpop.f32.mrf.mxu1  ;;  %6850 = vmatprep.mubr.f32.mxu0 %v17044_v61  ;;  %v18661_v47 = vld [vmem:[#allocation220_spill] sm:$0xff] }
 0x5f5   : > { %v6512_v44 = vpop.f32.mrf.mxu0 }
 0x5f6   : > { %8236 = vst [vmem:[%s14928_s14 + $0x1f8] sm:$0xff] %v7499_v18  ;;  %v7504_v10 = vadd.f32 %v7503_v28, %v6511_v17  ;;  %v6513_v24 = vadd.f32 %v6512_v44, %v18656_v12  ;;  %v7524_v48 = vpop.f32.mrf.mxu1  ;;  %9001 = vmatmul.mubr.msk.f32.gmra.mxu1 %vm18658_vm8, %v18228_v40  ;;  %v18660_v28 = vld [vmem:[#allocation213_spill] sm:$0xff]  ;;  %vm18688_vm8 = vcmp.eq.s32.totalorder %v18687_v63, %v18230_v11  ;;  %v18702_v63 = vld [vmem:[#allocation291_spill] sm:$0xff] }
 0x5f7   : > { %v6517_v39 = vpop.f32.mrf.mxu0  ;;  %8871 = vmatmul.mubr.msk.f32.gmra.mxu0 %vm18659_vm9, %v18228_v40  ;;  %7864 = vmatprep.mubr.f32.mxu1 %v17044_v61  ;;  %vm18689_vm9 = vmmov %vm18678_vm4 }
 0x5f8   : > { %8237 = vst [vmem:[%s14928_s14 + $0x200] sm:$0xff] %v7504_v10  ;;  %v7506_v22 = vadd.f32 %v7505_v41, %v6513_v24  ;;  %v6518_v5 = vadd.f32 %v6517_v39, %v18660_v28  ;;  %v7526_v21 = vpop.f32.mrf.mxu1  ;;  %6857 = vmatprep.mubr.f32.mxu0 %v17044_v61  ;;  %v18666_v28 = vld [vmem:[#allocation217_spill] sm:$0xff] }
 0x5f9   : > { %v6519_v7 = vpop.f32.mrf.mxu0 }
 0x5fa   : > { %8238 = vst [vmem:[%s14928_s14 + $0x208] sm:$0xff] %v7506_v22  ;;  %v7511_v18 = vadd.f32 %v7510_v13, %v6518_v5  ;;  %v6520_v17 = vadd.f32 %v6519_v7, %v18661_v47  ;;  %v7531_v44 = vpop.f32.mrf.mxu1  ;;  %9002 = vmatmul.mubr.msk.f32.gmra.mxu1 %vm18663_vm10, %v18228_v40  ;;  %v18665_v13 = vld [vmem:[#allocation222_spill] sm:$0xff]  ;;  %vm18693_vm10 = vcmp.eq.s32.totalorder %v18692_v9, %v18230_v11  ;;  %v18707_v9 = vld [vmem:[#allocation295_spill] sm:$0xff] }
 0x5fb   : > { %v6524_v12 = vpop.f32.mrf.mxu0  ;;  %8872 = vmatmul.mubr.msk.f32.gmra.mxu0 %vm18664_vm11, %v18228_v40  ;;  %7871 = vmatprep.mubr.f32.mxu1 %v17044_v61  ;;  %vm18694_vm11 = vmmov %vm18683_vm6 }
 0x5fc   : > { %8239 = vst [vmem:[%s14928_s14 + $0x210] sm:$0xff] %v7511_v18  ;;  %v7513_v41 = vadd.f32 %v7512_v25, %v6520_v17  ;;  %v6525_v10 = vadd.f32 %v6524_v12, %v18665_v13  ;;  %v7533_v24 = vpop.f32.mrf.mxu1  ;;  %6864 = vmatprep.mubr.f32.mxu0 %v17044_v61  ;;  %v18671_v13 = vld [vmem:[#allocation226_spill] sm:$0xff] }
 0x5fd   : > { %v6526_v39 = vpop.f32.mrf.mxu0 }
 0x5fe   : > { %8240 = vst [vmem:[%s14928_s14 + $0x218] sm:$0xff] %v7513_v41  ;;  %v7518_v22 = vadd.f32 %v7517_v4, %v6525_v10  ;;  %v6527_v5 = vadd.f32 %v6526_v39, %v18666_v28  ;;  %v7538_v7 = vpop.f32.mrf.mxu1  ;;  %9003 = vmatmul.mubr.msk.f32.gmra.mxu1 %vm18668_vm0, %v18228_v40  ;;  %v18670_v4 = vld [vmem:[#allocation224_spill] sm:$0xff]  ;;  %vm18698_vm0 = vcmp.eq.s32.totalorder %v18697_v57, %v18230_v11  ;;  %v18712_v57 = vld [vmem:[#allocation299_spill] sm:$0xff] }
 0x5ff   : > { %v6531_v47 = vpop.f32.mrf.mxu0  ;;  %8873 = vmatmul.mubr.msk.f32.gmra.mxu0 %vm18669_vm1, %v18228_v40  ;;  %7878 = vmatprep.mubr.f32.mxu1 %v17044_v61  ;;  %vm18699_vm1 = vmmov %vm18688_vm8 }
 0x600   : > { %8241 = vst [vmem:[%s14928_s14 + $0x220] sm:$0xff] %v7518_v22  ;;  %v7520_v25 = vadd.f32 %v7519_v20, %v6527_v5  ;;  %v6532_v18 = vadd.f32 %v6531_v47, %v18670_v4  ;;  %v7540_v17 = vpop.f32.mrf.mxu1  ;;  %6871 = vmatprep.mubr.f32.mxu0 %v17044_v61  ;;  %v18676_v4 = vld [vmem:[#allocation228_spill] sm:$0xff] }
 0x601   : > { %v6533_v12 = vpop.f32.mrf.mxu0 }
 0x602   : > { %8242 = vst [vmem:[%s14928_s14 + $0x228] sm:$0xff] %v7520_v25  ;;  %v7525_v41 = vadd.f32 %v7524_v48, %v6532_v18  ;;  %v6534_v10 = vadd.f32 %v6533_v12, %v18671_v13  ;;  %v7545_v39 = vpop.f32.mrf.mxu1  ;;  %9004 = vmatmul.mubr.msk.f32.gmra.mxu1 %vm18673_vm2, %v18228_v40  ;;  %v18675_v48 = vld [vmem:[#allocation221_spill] sm:$0xff]  ;;  %vm18703_vm2 = vcmp.eq.s32.totalorder %v18702_v63, %v18230_v11  ;;  %v18717_v63 = vld [vmem:[#allocation303_spill] sm:$0xff] }
 0x603   : > { %v6538_v28 = vpop.f32.mrf.mxu0  ;;  %8874 = vmatmul.mubr.msk.f32.gmra.mxu0 %vm18674_vm3, %v18228_v40  ;;  %7885 = vmatprep.mubr.f32.mxu1 %v17044_v61  ;;  %vm18704_vm3 = vmmov %vm18693_vm10 }
 0x604   : > { %8243 = vst [vmem:[%s14928_s14 + $0x230] sm:$0xff] %v7525_v41  ;;  %v7527_v20 = vadd.f32 %v7526_v21, %v6534_v10  ;;  %v6539_v22 = vadd.f32 %v6538_v28, %v18675_v48  ;;  %v7547_v5 = vpop.f32.mrf.mxu1  ;;  %6878 = vmatprep.mubr.f32.mxu0 %v17044_v61  ;;  %v18681_v48 = vld [vmem:[#allocation225_spill] sm:$0xff] }
 0x605   : > { %v6540_v47 = vpop.f32.mrf.mxu0 }
 0x606   : > { %8244 = vst [vmem:[%s14928_s14 + $0x238] sm:$0xff] %v7527_v20  ;;  %v7532_v25 = vadd.f32 %v7531_v44, %v6539_v22  ;;  %v6541_v18 = vadd.f32 %v6540_v47, %v18676_v4  ;;  %v7552_v12 = vpop.f32.mrf.mxu1  ;;  %9005 = vmatmul.mubr.msk.f32.gmra.mxu1 %vm18678_vm4, %v18228_v40  ;;  %v18680_v44 = vld [vmem:[#allocation230_spill] sm:$0xff]  ;;  %vm18708_vm4 = vcmp.eq.s32.totalorder %v18707_v9, %v18230_v11  ;;  %v18722_v9 = vld [vmem:[#allocation307_spill] sm:$0xff] }
 0x607   : > { %v6545_v13 = vpop.f32.mrf.mxu0  ;;  %8875 = vmatmul.mubr.msk.f32.gmra.mxu0 %vm18679_vm5, %v18228_v40  ;;  %7892 = vmatprep.mubr.f32.mxu1 %v17044_v61  ;;  %vm18709_vm5 = vmmov %vm18698_vm0 }
 0x608   : > { %8245 = vst [vmem:[%s14928_s14 + $0x240] sm:$0xff] %v7532_v25  ;;  %v7534_v21 = vadd.f32 %v7533_v24, %v6541_v18  ;;  %v6546_v41 = vadd.f32 %v6545_v13, %v18680_v44  ;;  %v7554_v10 = vpop.f32.mrf.mxu1  ;;  %6885 = vmatprep.mubr.f32.mxu0 %v17044_v61  ;;  %v18686_v44 = vld [vmem:[#allocation234_spill] sm:$0xff] }
 0x609   : > { %v6547_v28 = vpop.f32.mrf.mxu0 }
 0x60a   : > { %8246 = vst [vmem:[%s14928_s14 + $0x248] sm:$0xff] %v7534_v21  ;;  %v7539_v20 = vadd.f32 %v7538_v7, %v6546_v41  ;;  %v6548_v22 = vadd.f32 %v6547_v28, %v18681_v48  ;;  %v7559_v47 = vpop.f32.mrf.mxu1  ;;  %9006 = vmatmul.mubr.msk.f32.gmra.mxu1 %vm18683_vm6, %v18228_v40  ;;  %v18685_v7 = vld [vmem:[#allocation232_spill] sm:$0xff]  ;;  %vm18713_vm6 = vcmp.eq.s32.totalorder %v18712_v57, %v18230_v11  ;;  %v18727_v57 = vld [vmem:[#allocation311_spill] sm:$0xff] }
 0x60b   : > { %v6552_v4 = vpop.f32.mrf.mxu0  ;;  %8876 = vmatmul.mubr.msk.f32.gmra.mxu0 %vm18684_vm7, %v18228_v40  ;;  %7899 = vmatprep.mubr.f32.mxu1 %v17044_v61  ;;  %vm18714_vm7 = vmmov %vm18703_vm2 }
 0x60c   : > { %8247 = vst [vmem:[%s14928_s14 + $0x250] sm:$0xff] %v7539_v20  ;;  %v7541_v24 = vadd.f32 %v7540_v17, %v6548_v22  ;;  %v6553_v25 = vadd.f32 %v6552_v4, %v18685_v7  ;;  %v7561_v18 = vpop.f32.mrf.mxu1  ;;  %6892 = vmatprep.mubr.f32.mxu0 %v17044_v61  ;;  %v18691_v7 = vld [vmem:[#allocation236_spill] sm:$0xff] }
 0x60d   : > { %v6554_v13 = vpop.f32.mrf.mxu0 }
 0x60e   : > { %8248 = vst [vmem:[%s14928_s14 + $0x258] sm:$0xff] %v7541_v24  ;;  %v7546_v21 = vadd.f32 %v7545_v39, %v6553_v25  ;;  %v6555_v41 = vadd.f32 %v6554_v13, %v18686_v44  ;;  %v7566_v28 = vpop.f32.mrf.mxu1  ;;  %9007 = vmatmul.mubr.msk.f32.gmra.mxu1 %vm18688_vm8, %v18228_v40  ;;  %v18690_v39 = vld [vmem:[#allocation229_spill] sm:$0xff]  ;;  %vm18718_vm8 = vcmp.eq.s32.totalorder %v18717_v63, %v18230_v11  ;;  %v18732_v63 = vld [vmem:[#allocation315_spill] sm:$0xff] }
 0x60f   : > { %v6559_v48 = vpop.f32.mrf.mxu0  ;;  %8877 = vmatmul.mubr.msk.f32.gmra.mxu0 %vm18689_vm9, %v18228_v40  ;;  %7906 = vmatprep.mubr.f32.mxu1 %v17044_v61  ;;  %vm18719_vm9 = vmmov %vm18708_vm4 }
 0x610   : > { %8249 = vst [vmem:[%s14928_s14 + $0x260] sm:$0xff] %v7546_v21  ;;  %v7548_v17 = vadd.f32 %v7547_v5, %v6555_v41  ;;  %v6560_v20 = vadd.f32 %v6559_v48, %v18690_v39  ;;  %v7568_v22 = vpop.f32.mrf.mxu1  ;;  %6899 = vmatprep.mubr.f32.mxu0 %v17044_v61  ;;  %v18696_v39 = vld [vmem:[#allocation233_spill] sm:$0xff] }
 0x611   : > { %v6561_v4 = vpop.f32.mrf.mxu0 }
 0x612   : > { %8250 = vst [vmem:[%s14928_s14 + $0x268] sm:$0xff] %v7548_v17  ;;  %v7553_v24 = vadd.f32 %v7552_v12, %v6560_v20  ;;  %v6562_v25 = vadd.f32 %v6561_v4, %v18691_v7  ;;  %v7573_v13 = vpop.f32.mrf.mxu1  ;;  %9008 = vmatmul.mubr.msk.f32.gmra.mxu1 %vm18693_vm10, %v18228_v40  ;;  %v18695_v12 = vld [vmem:[#allocation238_spill] sm:$0xff]  ;;  %vm18723_vm10 = vcmp.eq.s32.totalorder %v18722_v9, %v18230_v11  ;;  %v18737_v9 = vld [vmem:[#allocation319_spill] sm:$0xff] }
 0x613   : > { %v6566_v44 = vpop.f32.mrf.mxu0  ;;  %8878 = vmatmul.mubr.msk.f32.gmra.mxu0 %vm18694_vm11, %v18228_v40  ;;  %7913 = vmatprep.mubr.f32.mxu1 %v17044_v61  ;;  %vm18724_vm11 = vmmov %vm18713_vm6 }
 0x614   : > { %8251 = vst [vmem:[%s14928_s14 + $0x270] sm:$0xff] %v7553_v24  ;;  %v7555_v5 = vadd.f32 %v7554_v10, %v6562_v25  ;;  %v6567_v21 = vadd.f32 %v6566_v44, %v18695_v12  ;;  %v7575_v41 = vpop.f32.mrf.mxu1  ;;  %6906 = vmatprep.mubr.f32.mxu0 %v17044_v61  ;;  %v18701_v12 = vld [vmem:[#allocation242_spill] sm:$0xff] }
 0x615   : > { %v6568_v48 = vpop.f32.mrf.mxu0 }
 0x616   : > { %8252 = vst [vmem:[%s14928_s14 + $0x278] sm:$0xff] %v7555_v5  ;;  %v7560_v17 = vadd.f32 %v7559_v47, %v6567_v21  ;;  %v6569_v20 = vadd.f32 %v6568_v48, %v18696_v39  ;;  %v7580_v4 = vpop.f32.mrf.mxu1  ;;  %9009 = vmatmul.mubr.msk.f32.gmra.mxu1 %vm18698_vm0, %v18228_v40  ;;  %v18700_v47 = vld [vmem:[#allocation240_spill] sm:$0xff]  ;;  %vm18728_vm0 = vcmp.eq.s32.totalorder %v18727_v57, %v18230_v11  ;;  %v18742_v57 = vld [vmem:[#allocation323_spill] sm:$0xff] }
 0x617   : > { %v6573_v7 = vpop.f32.mrf.mxu0  ;;  %8879 = vmatmul.mubr.msk.f32.gmra.mxu0 %vm18699_vm1, %v18228_v40  ;;  %7920 = vmatprep.mubr.f32.mxu1 %v17044_v61  ;;  %vm18729_vm1 = vmmov %vm18718_vm8 }
 0x618   : > { %8253 = vst [vmem:[%s14928_s14 + $0x280] sm:$0xff] %v7560_v17  ;;  %v7562_v10 = vadd.f32 %v7561_v18, %v6569_v20  ;;  %v6574_v24 = vadd.f32 %v6573_v7, %v18700_v47  ;;  %v7582_v25 = vpop.f32.mrf.mxu1  ;;  %6913 = vmatprep.mubr.f32.mxu0 %v17044_v61  ;;  %v18706_v47 = vld [vmem:[#allocation244_spill] sm:$0xff] }
 0x619   : > { %v6575_v44 = vpop.f32.mrf.mxu0 }
 0x61a   : > { %8254 = vst [vmem:[%s14928_s14 + $0x288] sm:$0xff] %v7562_v10  ;;  %v7567_v5 = vadd.f32 %v7566_v28, %v6574_v24  ;;  %v6576_v21 = vadd.f32 %v6575_v44, %v18701_v12  ;;  %v7587_v48 = vpop.f32.mrf.mxu1  ;;  %9010 = vmatmul.mubr.msk.f32.gmra.mxu1 %vm18703_vm2, %v18228_v40  ;;  %v18705_v28 = vld [vmem:[#allocation237_spill] sm:$0xff]  ;;  %vm18733_vm2 = vcmp.eq.s32.totalorder %v18732_v63, %v18230_v11  ;;  %v18747_v63 = vld [vmem:[#allocation327_spill] sm:$0xff] }
 0x61b   : > { %v6580_v39 = vpop.f32.mrf.mxu0  ;;  %8880 = vmatmul.mubr.msk.f32.gmra.mxu0 %vm18704_vm3, %v18228_v40  ;;  %7927 = vmatprep.mubr.f32.mxu1 %v17044_v61  ;;  %vm18734_vm3 = vmmov %vm18723_vm10 }
 0x61c   : > { %8255 = vst [vmem:[%s14928_s14 + $0x290] sm:$0xff] %v7567_v5  ;;  %v7569_v18 = vadd.f32 %v7568_v22, %v6576_v21  ;;  %v6581_v17 = vadd.f32 %v6580_v39, %v18705_v28  ;;  %v7589_v20 = vpop.f32.mrf.mxu1  ;;  %6920 = vmatprep.mubr.f32.mxu0 %v17044_v61  ;;  %v18711_v28 = vld [vmem:[#allocation241_spill] sm:$0xff] }
 0x61d   : > { %v6582_v7 = vpop.f32.mrf.mxu0 }
 0x61e   : > { %8256 = vst [vmem:[%s14928_s14 + $0x298] sm:$0xff] %v7569_v18  ;;  %v7574_v10 = vadd.f32 %v7573_v13, %v6581_v17  ;;  %v6583_v24 = vadd.f32 %v6582_v7, %v18706_v47  ;;  %v7594_v44 = vpop.f32.mrf.mxu1  ;;  %9011 = vmatmul.mubr.msk.f32.gmra.mxu1 %vm18708_vm4, %v18228_v40  ;;  %v18710_v13 = vld [vmem:[#allocation246_spill] sm:$0xff]  ;;  %vm18738_vm4 = vcmp.eq.s32.totalorder %v18737_v9, %v18230_v11  ;;  %v18752_v9 = vld [vmem:[#allocation331_spill] sm:$0xff] }
 0x61f   : > { %v6587_v12 = vpop.f32.mrf.mxu0  ;;  %8881 = vmatmul.mubr.msk.f32.gmra.mxu0 %vm18709_vm5, %v18228_v40  ;;  %7934 = vmatprep.mubr.f32.mxu1 %v17044_v61  ;;  %vm18739_vm5 = vmmov %vm18728_vm0 }
 0x620   : > { %8257 = vst [vmem:[%s14928_s14 + $0x2a0] sm:$0xff] %v7574_v10  ;;  %v7576_v22 = vadd.f32 %v7575_v41, %v6583_v24  ;;  %v6588_v5 = vadd.f32 %v6587_v12, %v18710_v13  ;;  %v7596_v21 = vpop.f32.mrf.mxu1  ;;  %6927 = vmatprep.mubr.f32.mxu0 %v17044_v61  ;;  %v18716_v13 = vld [vmem:[#allocation250_spill] sm:$0xff] }
 0x621   : > { %v6589_v39 = vpop.f32.mrf.mxu0 }
 0x622   : > { %8258 = vst [vmem:[%s14928_s14 + $0x2a8] sm:$0xff] %v7576_v22  ;;  %v7581_v18 = vadd.f32 %v7580_v4, %v6588_v5  ;;  %v6590_v17 = vadd.f32 %v6589_v39, %v18711_v28  ;;  %v7601_v7 = vpop.f32.mrf.mxu1  ;;  %9012 = vmatmul.mubr.msk.f32.gmra.mxu1 %vm18713_vm6, %v18228_v40  ;;  %v18715_v4 = vld [vmem:[#allocation248_spill] sm:$0xff]  ;;  %vm18743_vm6 = vcmp.eq.s32.totalorder %v18742_v57, %v18230_v11  ;;  %v18757_v57 = vld [vmem:[#allocation335_spill] sm:$0xff] }
 0x623   : > { %v6594_v47 = vpop.f32.mrf.mxu0  ;;  %8882 = vmatmul.mubr.msk.f32.gmra.mxu0 %vm18714_vm7, %v18228_v40  ;;  %7941 = vmatprep.mubr.f32.mxu1 %v17044_v61  ;;  %vm18744_vm7 = vmmov %vm18733_vm2 }
 0x624   : > { %8259 = vst [vmem:[%s14928_s14 + $0x2b0] sm:$0xff] %v7581_v18  ;;  %v7583_v41 = vadd.f32 %v7582_v25, %v6590_v17  ;;  %v6595_v10 = vadd.f32 %v6594_v47, %v18715_v4  ;;  %v7603_v24 = vpop.f32.mrf.mxu1  ;;  %6934 = vmatprep.mubr.f32.mxu0 %v17044_v61  ;;  %v18721_v4 = vld [vmem:[#allocation252_spill] sm:$0xff] }
 0x625   : > { %v6596_v12 = vpop.f32.mrf.mxu0 }
 0x626   : > { %8260 = vst [vmem:[%s14928_s14 + $0x2b8] sm:$0xff] %v7583_v41  ;;  %v7588_v22 = vadd.f32 %v7587_v48, %v6595_v10  ;;  %v6597_v5 = vadd.f32 %v6596_v12, %v18716_v13  ;;  %v7608_v39 = vpop.f32.mrf.mxu1  ;;  %9013 = vmatmul.mubr.msk.f32.gmra.mxu1 %vm18718_vm8, %v18228_v40  ;;  %v18720_v48 = vld [vmem:[#allocation245_spill] sm:$0xff]  ;;  %vm18748_vm8 = vcmp.eq.s32.totalorder %v18747_v63, %v18230_v11  ;;  %v18762_v63 = vld [vmem:[#allocation339_spill] sm:$0xff] }
 0x627   : > { %v6601_v28 = vpop.f32.mrf.mxu0  ;;  %8883 = vmatmul.mubr.msk.f32.gmra.mxu0 %vm18719_vm9, %v18228_v40  ;;  %7948 = vmatprep.mubr.f32.mxu1 %v17044_v61  ;;  %vm18749_vm9 = vmmov %vm18738_vm4 }
 0x628   : > { %8261 = vst [vmem:[%s14928_s14 + $0x2c0] sm:$0xff] %v7588_v22  ;;  %v7590_v25 = vadd.f32 %v7589_v20, %v6597_v5  ;;  %v6602_v18 = vadd.f32 %v6601_v28, %v18720_v48  ;;  %v7610_v17 = vpop.f32.mrf.mxu1  ;;  %6941 = vmatprep.mubr.f32.mxu0 %v17044_v61  ;;  %v18726_v48 = vld [vmem:[#allocation249_spill] sm:$0xff] }
 0x629   : > { %v6603_v47 = vpop.f32.mrf.mxu0 }
 0x62a   : > { %8262 = vst [vmem:[%s14928_s14 + $0x2c8] sm:$0xff] %v7590_v25  ;;  %v7595_v41 = vadd.f32 %v7594_v44, %v6602_v18  ;;  %v6604_v10 = vadd.f32 %v6603_v47, %v18721_v4  ;;  %v7615_v12 = vpop.f32.mrf.mxu1  ;;  %9014 = vmatmul.mubr.msk.f32.gmra.mxu1 %vm18723_vm10, %v18228_v40  ;;  %v18725_v44 = vld [vmem:[#allocation254_spill] sm:$0xff]  ;;  %vm18753_vm10 = vcmp.eq.s32.totalorder %v18752_v9, %v18230_v11  ;;  %v18767_v9 = vld [vmem:[#allocation343_spill] sm:$0xff] }
 0x62b   : > { %v6608_v13 = vpop.f32.mrf.mxu0  ;;  %8884 = vmatmul.mubr.msk.f32.gmra.mxu0 %vm18724_vm11, %v18228_v40  ;;  %7955 = vmatprep.mubr.f32.mxu1 %v17044_v61  ;;  %vm18754_vm11 = vmmov %vm18743_vm6 }
 0x62c   : > { %8263 = vst [vmem:[%s14928_s14 + $0x2d0] sm:$0xff] %v7595_v41  ;;  %v7597_v20 = vadd.f32 %v7596_v21, %v6604_v10  ;;  %v6609_v22 = vadd.f32 %v6608_v13, %v18725_v44  ;;  %v7617_v5 = vpop.f32.mrf.mxu1  ;;  %6948 = vmatprep.mubr.f32.mxu0 %v17044_v61  ;;  %v18731_v44 = vld [vmem:[#allocation258_spill] sm:$0xff] }
 0x62d   : > { %v6610_v28 = vpop.f32.mrf.mxu0 }
 0x62e   : > { %8264 = vst [vmem:[%s14928_s14 + $0x2d8] sm:$0xff] %v7597_v20  ;;  %v7602_v25 = vadd.f32 %v7601_v7, %v6609_v22  ;;  %v6611_v18 = vadd.f32 %v6610_v28, %v18726_v48  ;;  %v7622_v47 = vpop.f32.mrf.mxu1  ;;  %9015 = vmatmul.mubr.msk.f32.gmra.mxu1 %vm18728_vm0, %v18228_v40  ;;  %v18730_v7 = vld [vmem:[#allocation256_spill] sm:$0xff]  ;;  %vm18758_vm0 = vcmp.eq.s32.totalorder %v18757_v57, %v18230_v11  ;;  %v18772_v57 = vld [vmem:[#allocation347_spill] sm:$0xff] }
 0x62f   : > { %v6615_v4 = vpop.f32.mrf.mxu0  ;;  %8885 = vmatmul.mubr.msk.f32.gmra.mxu0 %vm18729_vm1, %v18228_v40  ;;  %7962 = vmatprep.mubr.f32.mxu1 %v17044_v61  ;;  %vm18759_vm1 = vmmov %vm18748_vm8 }
 0x630   : > { %8265 = vst [vmem:[%s14928_s14 + $0x2e0] sm:$0xff] %v7602_v25  ;;  %v7604_v21 = vadd.f32 %v7603_v24, %v6611_v18  ;;  %v6616_v41 = vadd.f32 %v6615_v4, %v18730_v7  ;;  %v7624_v10 = vpop.f32.mrf.mxu1  ;;  %6955 = vmatprep.mubr.f32.mxu0 %v17044_v61  ;;  %v18736_v7 = vld [vmem:[#allocation260_spill] sm:$0xff] }
 0x631   : > { %v6617_v13 = vpop.f32.mrf.mxu0 }
 0x632   : > { %8266 = vst [vmem:[%s14928_s14 + $0x2e8] sm:$0xff] %v7604_v21  ;;  %v7609_v20 = vadd.f32 %v7608_v39, %v6616_v41  ;;  %v6618_v22 = vadd.f32 %v6617_v13, %v18731_v44  ;;  %v7629_v28 = vpop.f32.mrf.mxu1  ;;  %9016 = vmatmul.mubr.msk.f32.gmra.mxu1 %vm18733_vm2, %v18228_v40  ;;  %v18735_v39 = vld [vmem:[#allocation253_spill] sm:$0xff]  ;;  %vm18763_vm2 = vcmp.eq.s32.totalorder %v18762_v63, %v18230_v11  ;;  %v18777_v63 = vld [vmem:[#allocation351_spill] sm:$0xff] }
 0x633   : > { %v6622_v48 = vpop.f32.mrf.mxu0  ;;  %8886 = vmatmul.mubr.msk.f32.gmra.mxu0 %vm18734_vm3, %v18228_v40  ;;  %7969 = vmatprep.mubr.f32.mxu1 %v17044_v61  ;;  %vm18764_vm3 = vmmov %vm18753_vm10 }
 0x634   : > { %8267 = vst [vmem:[%s14928_s14 + $0x2f0] sm:$0xff] %v7609_v20  ;;  %v7611_v24 = vadd.f32 %v7610_v17, %v6618_v22  ;;  %v6623_v25 = vadd.f32 %v6622_v48, %v18735_v39  ;;  %v7631_v18 = vpop.f32.mrf.mxu1  ;;  %6962 = vmatprep.mubr.f32.mxu0 %v17044_v61  ;;  %v18741_v39 = vld [vmem:[#allocation257_spill] sm:$0xff] }
 0x635   : > { %v6624_v4 = vpop.f32.mrf.mxu0 }
 0x636   : > { %8268 = vst [vmem:[%s14928_s14 + $0x2f8] sm:$0xff] %v7611_v24  ;;  %v7616_v21 = vadd.f32 %v7615_v12, %v6623_v25  ;;  %v6625_v41 = vadd.f32 %v6624_v4, %v18736_v7  ;;  %v7636_v13 = vpop.f32.mrf.mxu1  ;;  %9017 = vmatmul.mubr.msk.f32.gmra.mxu1 %vm18738_vm4, %v18228_v40  ;;  %v18740_v12 = vld [vmem:[#allocation262_spill] sm:$0xff]  ;;  %vm18768_vm4 = vcmp.eq.s32.totalorder %v18767_v9, %v18230_v11  ;;  %v18782_v9 = vld [vmem:[#allocation355_spill] sm:$0xff] }
 0x637   : > { %v6629_v44 = vpop.f32.mrf.mxu0  ;;  %8887 = vmatmul.mubr.msk.f32.gmra.mxu0 %vm18739_vm5, %v18228_v40  ;;  %7976 = vmatprep.mubr.f32.mxu1 %v17044_v61  ;;  %vm18769_vm5 = vmmov %vm18758_vm0 }
 0x638   : > { %8269 = vst [vmem:[%s14928_s14 + $0x300] sm:$0xff] %v7616_v21  ;;  %v7618_v17 = vadd.f32 %v7617_v5, %v6625_v41  ;;  %v6630_v20 = vadd.f32 %v6629_v44, %v18740_v12  ;;  %v7638_v22 = vpop.f32.mrf.mxu1  ;;  %6969 = vmatprep.mubr.f32.mxu0 %v17044_v61  ;;  %v18746_v12 = vld [vmem:[#allocation266_spill] sm:$0xff] }
 0x639   : > { %v6631_v48 = vpop.f32.mrf.mxu0 }
 0x63a   : > { %8270 = vst [vmem:[%s14928_s14 + $0x308] sm:$0xff] %v7618_v17  ;;  %v7623_v24 = vadd.f32 %v7622_v47, %v6630_v20  ;;  %v6632_v25 = vadd.f32 %v6631_v48, %v18741_v39  ;;  %v7643_v4 = vpop.f32.mrf.mxu1  ;;  %9018 = vmatmul.mubr.msk.f32.gmra.mxu1 %vm18743_vm6, %v18228_v40  ;;  %v18745_v47 = vld [vmem:[#allocation264_spill] sm:$0xff]  ;;  %vm18773_vm6 = vcmp.eq.s32.totalorder %v18772_v57, %v18230_v11  ;;  %v18787_v57 = vld [vmem:[#allocation359_spill] sm:$0xff] }
 0x63b   : > { %v6636_v7 = vpop.f32.mrf.mxu0  ;;  %8888 = vmatmul.mubr.msk.f32.gmra.mxu0 %vm18744_vm7, %v18228_v40  ;;  %7983 = vmatprep.mubr.f32.mxu1 %v17044_v61  ;;  %vm18774_vm7 = vmmov %vm18763_vm2 }
 0x63c   : > { %8271 = vst [vmem:[%s14928_s14 + $0x310] sm:$0xff] %v7623_v24  ;;  %v7625_v5 = vadd.f32 %v7624_v10, %v6632_v25  ;;  %v6637_v21 = vadd.f32 %v6636_v7, %v18745_v47  ;;  %v7645_v41 = vpop.f32.mrf.mxu1  ;;  %6976 = vmatprep.mubr.f32.mxu0 %v17044_v61  ;;  %v18751_v47 = vld [vmem:[#allocation268_spill] sm:$0xff] }
 0x63d   : > { %v6638_v44 = vpop.f32.mrf.mxu0 }
 0x63e   : > { %8272 = vst [vmem:[%s14928_s14 + $0x318] sm:$0xff] %v7625_v5  ;;  %v7630_v17 = vadd.f32 %v7629_v28, %v6637_v21  ;;  %v6639_v20 = vadd.f32 %v6638_v44, %v18746_v12  ;;  %v7650_v48 = vpop.f32.mrf.mxu1  ;;  %9019 = vmatmul.mubr.msk.f32.gmra.mxu1 %vm18748_vm8, %v18228_v40  ;;  %v18750_v28 = vld [vmem:[#allocation261_spill] sm:$0xff]  ;;  %vm18778_vm8 = vcmp.eq.s32.totalorder %v18777_v63, %v18230_v11  ;;  %v18792_v63 = vld [vmem:[#allocation363_spill] sm:$0xff] }
 0x63f   : > { %v6643_v39 = vpop.f32.mrf.mxu0  ;;  %8889 = vmatmul.mubr.msk.f32.gmra.mxu0 %vm18749_vm9, %v18228_v40  ;;  %7990 = vmatprep.mubr.f32.mxu1 %v17044_v61  ;;  %vm18779_vm9 = vmmov %vm18768_vm4 }
 0x640   : > { %8273 = vst [vmem:[%s14928_s14 + $0x320] sm:$0xff] %v7630_v17  ;;  %v7632_v10 = vadd.f32 %v7631_v18, %v6639_v20  ;;  %v6644_v24 = vadd.f32 %v6643_v39, %v18750_v28  ;;  %v7652_v25 = vpop.f32.mrf.mxu1  ;;  %6983 = vmatprep.mubr.f32.mxu0 %v17044_v61  ;;  %v18756_v28 = vld [vmem:[#allocation265_spill] sm:$0xff] }
 0x641   : > { %v6645_v7 = vpop.f32.mrf.mxu0 }
 0x642   : > { %8274 = vst [vmem:[%s14928_s14 + $0x328] sm:$0xff] %v7632_v10  ;;  %v7637_v5 = vadd.f32 %v7636_v13, %v6644_v24  ;;  %v6646_v21 = vadd.f32 %v6645_v7, %v18751_v47  ;;  %v7657_v44 = vpop.f32.mrf.mxu1  ;;  %9020 = vmatmul.mubr.msk.f32.gmra.mxu1 %vm18753_vm10, %v18228_v40  ;;  %v18755_v13 = vld [vmem:[#allocation270_spill] sm:$0xff]  ;;  %vm18783_vm10 = vcmp.eq.s32.totalorder %v18782_v9, %v18230_v11  ;;  %v18797_v9 = vld [vmem:[#allocation367_spill] sm:$0xff] }
 0x643   : > { %v6650_v12 = vpop.f32.mrf.mxu0  ;;  %8890 = vmatmul.mubr.msk.f32.gmra.mxu0 %vm18754_vm11, %v18228_v40  ;;  %7997 = vmatprep.mubr.f32.mxu1 %v17044_v61  ;;  %vm18784_vm11 = vmmov %vm18773_vm6 }
 0x644   : > { %8275 = vst [vmem:[%s14928_s14 + $0x330] sm:$0xff] %v7637_v5  ;;  %v7639_v18 = vadd.f32 %v7638_v22, %v6646_v21  ;;  %v6651_v17 = vadd.f32 %v6650_v12, %v18755_v13  ;;  %v7659_v20 = vpop.f32.mrf.mxu1  ;;  %6990 = vmatprep.mubr.f32.mxu0 %v17044_v61  ;;  %v18761_v13 = vld [vmem:[#allocation274_spill] sm:$0xff] }
 0x645   : > { %v6652_v39 = vpop.f32.mrf.mxu0 }
 0x646   : > { %8276 = vst [vmem:[%s14928_s14 + $0x338] sm:$0xff] %v7639_v18  ;;  %v7644_v10 = vadd.f32 %v7643_v4, %v6651_v17  ;;  %v6653_v24 = vadd.f32 %v6652_v39, %v18756_v28  ;;  %v7664_v7 = vpop.f32.mrf.mxu1  ;;  %9021 = vmatmul.mubr.msk.f32.gmra.mxu1 %vm18758_vm0, %v18228_v40  ;;  %v18760_v4 = vld [vmem:[#allocation272_spill] sm:$0xff]  ;;  %vm18788_vm0 = vcmp.eq.s32.totalorder %v18787_v57, %v18230_v11  ;;  %v18802_v57 = vld [vmem:[#allocation371_spill] sm:$0xff] }
 0x647   : > { %v6657_v47 = vpop.f32.mrf.mxu0  ;;  %8891 = vmatmul.mubr.msk.f32.gmra.mxu0 %vm18759_vm1, %v18228_v40  ;;  %8004 = vmatprep.mubr.f32.mxu1 %v17044_v61  ;;  %vm18789_vm1 = vmmov %vm18778_vm8 }
 0x648   : > { %8277 = vst [vmem:[%s14928_s14 + $0x340] sm:$0xff] %v7644_v10  ;;  %v7646_v22 = vadd.f32 %v7645_v41, %v6653_v24  ;;  %v6658_v5 = vadd.f32 %v6657_v47, %v18760_v4  ;;  %v7666_v21 = vpop.f32.mrf.mxu1  ;;  %6997 = vmatprep.mubr.f32.mxu0 %v17044_v61  ;;  %v18766_v4 = vld [vmem:[#allocation276_spill] sm:$0xff] }
 0x649   : > { %v6659_v12 = vpop.f32.mrf.mxu0 }
 0x64a   : > { %8278 = vst [vmem:[%s14928_s14 + $0x348] sm:$0xff] %v7646_v22  ;;  %v7651_v18 = vadd.f32 %v7650_v48, %v6658_v5  ;;  %v6660_v17 = vadd.f32 %v6659_v12, %v18761_v13  ;;  %v7671_v39 = vpop.f32.mrf.mxu1  ;;  %9022 = vmatmul.mubr.msk.f32.gmra.mxu1 %vm18763_vm2, %v18228_v40  ;;  %v18765_v48 = vld [vmem:[#allocation269_spill] sm:$0xff]  ;;  %vm18793_vm2 = vcmp.eq.s32.totalorder %v18792_v63, %v18230_v11  ;;  %v18807_v63 = vld [vmem:[#allocation375_spill] sm:$0xff] }
 0x64b   : > { %v6664_v28 = vpop.f32.mrf.mxu0  ;;  %8892 = vmatmul.mubr.msk.f32.gmra.mxu0 %vm18764_vm3, %v18228_v40  ;;  %8011 = vmatprep.mubr.f32.mxu1 %v17044_v61  ;;  %vm18794_vm3 = vmmov %vm18783_vm10 }
 0x64c   : > { %8279 = vst [vmem:[%s14928_s14 + $0x350] sm:$0xff] %v7651_v18  ;;  %v7653_v41 = vadd.f32 %v7652_v25, %v6660_v17  ;;  %v6665_v10 = vadd.f32 %v6664_v28, %v18765_v48  ;;  %v7673_v24 = vpop.f32.mrf.mxu1  ;;  %7004 = vmatprep.mubr.f32.mxu0 %v17044_v61  ;;  %v18771_v48 = vld [vmem:[#allocation273_spill] sm:$0xff] }
 0x64d   : > { %v6666_v47 = vpop.f32.mrf.mxu0 }
 0x64e   : > { %8280 = vst [vmem:[%s14928_s14 + $0x358] sm:$0xff] %v7653_v41  ;;  %v7658_v22 = vadd.f32 %v7657_v44, %v6665_v10  ;;  %v6667_v5 = vadd.f32 %v6666_v47, %v18766_v4  ;;  %v7678_v12 = vpop.f32.mrf.mxu1  ;;  %9023 = vmatmul.mubr.msk.f32.gmra.mxu1 %vm18768_vm4, %v18228_v40  ;;  %v18770_v44 = vld [vmem:[#allocation278_spill] sm:$0xff]  ;;  %vm18798_vm4 = vcmp.eq.s32.totalorder %v18797_v9, %v18230_v11  ;;  %v18812_v9 = vld [vmem:[#allocation379_spill] sm:$0xff] }
 0x64f   : > { %v6671_v13 = vpop.f32.mrf.mxu0  ;;  %8893 = vmatmul.mubr.msk.f32.gmra.mxu0 %vm18769_vm5, %v18228_v40  ;;  %8018 = vmatprep.mubr.f32.mxu1 %v17044_v61  ;;  %vm18799_vm5 = vmmov %vm18788_vm0 }
 0x650   : > { %8281 = vst [vmem:[%s14928_s14 + $0x360] sm:$0xff] %v7658_v22  ;;  %v7660_v25 = vadd.f32 %v7659_v20, %v6667_v5  ;;  %v6672_v18 = vadd.f32 %v6671_v13, %v18770_v44  ;;  %v7680_v17 = vpop.f32.mrf.mxu1  ;;  %7011 = vmatprep.mubr.f32.mxu0 %v17044_v61  ;;  %v18776_v44 = vld [vmem:[#allocation282_spill] sm:$0xff] }
 0x651   : > { %v6673_v28 = vpop.f32.mrf.mxu0 }
 0x652   : > { %8282 = vst [vmem:[%s14928_s14 + $0x368] sm:$0xff] %v7660_v25  ;;  %v7665_v41 = vadd.f32 %v7664_v7, %v6672_v18  ;;  %v6674_v10 = vadd.f32 %v6673_v28, %v18771_v48  ;;  %v7685_v47 = vpop.f32.mrf.mxu1  ;;  %9024 = vmatmul.mubr.msk.f32.gmra.mxu1 %vm18773_vm6, %v18228_v40  ;;  %v18775_v7 = vld [vmem:[#allocation280_spill] sm:$0xff]  ;;  %vm18803_vm6 = vcmp.eq.s32.totalorder %v18802_v57, %v18230_v11  ;;  %v18817_v57 = vld [vmem:[#allocation383_spill] sm:$0xff] }
 0x653   : > { %v6678_v4 = vpop.f32.mrf.mxu0  ;;  %8894 = vmatmul.mubr.msk.f32.gmra.mxu0 %vm18774_vm7, %v18228_v40  ;;  %8025 = vmatprep.mubr.f32.mxu1 %v17044_v61  ;;  %vm18804_vm7 = vmmov %vm18793_vm2 }
 0x654   : > { %8283 = vst [vmem:[%s14928_s14 + $0x370] sm:$0xff] %v7665_v41  ;;  %v7667_v20 = vadd.f32 %v7666_v21, %v6674_v10  ;;  %v6679_v22 = vadd.f32 %v6678_v4, %v18775_v7  ;;  %v7687_v5 = vpop.f32.mrf.mxu1  ;;  %7018 = vmatprep.mubr.f32.mxu0 %v17044_v61  ;;  %v18781_v7 = vld [vmem:[#allocation284_spill] sm:$0xff] }
 0x655   : > { %v6680_v13 = vpop.f32.mrf.mxu0 }
 0x656   : > { %8284 = vst [vmem:[%s14928_s14 + $0x378] sm:$0xff] %v7667_v20  ;;  %v7672_v25 = vadd.f32 %v7671_v39, %v6679_v22  ;;  %v6681_v18 = vadd.f32 %v6680_v13, %v18776_v44  ;;  %v7692_v28 = vpop.f32.mrf.mxu1  ;;  %9025 = vmatmul.mubr.msk.f32.gmra.mxu1 %vm18778_vm8, %v18228_v40  ;;  %v18780_v39 = vld [vmem:[#allocation277_spill] sm:$0xff]  ;;  %vm18808_vm8 = vcmp.eq.s32.totalorder %v18807_v63, %v18230_v11  ;;  %v18822_v63 = vld [vmem:[#allocation387_spill] sm:$0xff] }
 0x657   : > { %v6685_v48 = vpop.f32.mrf.mxu0  ;;  %8895 = vmatmul.mubr.msk.f32.gmra.mxu0 %vm18779_vm9, %v18228_v40  ;;  %8032 = vmatprep.mubr.f32.mxu1 %v17044_v61  ;;  %vm18809_vm9 = vmmov %vm18798_vm4 }
 0x658   : > { %8285 = vst [vmem:[%s14928_s14 + $0x380] sm:$0xff] %v7672_v25  ;;  %v7674_v21 = vadd.f32 %v7673_v24, %v6681_v18  ;;  %v6686_v41 = vadd.f32 %v6685_v48, %v18780_v39  ;;  %v7694_v10 = vpop.f32.mrf.mxu1  ;;  %7025 = vmatprep.mubr.f32.mxu0 %v17044_v61  ;;  %v18786_v39 = vld [vmem:[#allocation281_spill] sm:$0xff] }
 0x659   : > { %v6687_v4 = vpop.f32.mrf.mxu0 }
 0x65a   : > { %8286 = vst [vmem:[%s14928_s14 + $0x388] sm:$0xff] %v7674_v21  ;;  %v7679_v20 = vadd.f32 %v7678_v12, %v6686_v41  ;;  %v6688_v22 = vadd.f32 %v6687_v4, %v18781_v7  ;;  %v7699_v13 = vpop.f32.mrf.mxu1  ;;  %9026 = vmatmul.mubr.msk.f32.gmra.mxu1 %vm18783_vm10, %v18228_v40  ;;  %v18785_v12 = vld [vmem:[#allocation286_spill] sm:$0xff]  ;;  %vm18813_vm10 = vcmp.eq.s32.totalorder %v18812_v9, %v18230_v11  ;;  %v18827_v9 = vld [vmem:[#allocation391_spill] sm:$0xff] }
 0x65b   : > { %v6692_v44 = vpop.f32.mrf.mxu0  ;;  %8896 = vmatmul.mubr.msk.f32.gmra.mxu0 %vm18784_vm11, %v18228_v40  ;;  %8039 = vmatprep.mubr.f32.mxu1 %v17044_v61  ;;  %vm18814_vm11 = vmmov %vm18803_vm6 }
 0x65c   : > { %8287 = vst [vmem:[%s14928_s14 + $0x390] sm:$0xff] %v7679_v20  ;;  %v7681_v24 = vadd.f32 %v7680_v17, %v6688_v22  ;;  %v6693_v25 = vadd.f32 %v6692_v44, %v18785_v12  ;;  %v7701_v18 = vpop.f32.mrf.mxu1  ;;  %7032 = vmatprep.mubr.f32.mxu0 %v17044_v61  ;;  %v18791_v12 = vld [vmem:[#allocation290_spill] sm:$0xff] }
 0x65d   : > { %v6694_v48 = vpop.f32.mrf.mxu0 }
 0x65e   : > { %8288 = vst [vmem:[%s14928_s14 + $0x398] sm:$0xff] %v7681_v24  ;;  %v7686_v21 = vadd.f32 %v7685_v47, %v6693_v25  ;;  %v6695_v41 = vadd.f32 %v6694_v48, %v18786_v39  ;;  %v7706_v4 = vpop.f32.mrf.mxu1  ;;  %9027 = vmatmul.mubr.msk.f32.gmra.mxu1 %vm18788_vm0, %v18228_v40  ;;  %v18790_v47 = vld [vmem:[#allocation288_spill] sm:$0xff]  ;;  %vm18818_vm0 = vcmp.eq.s32.totalorder %v18817_v57, %v18230_v11  ;;  %v18832_v57 = vld [vmem:[#allocation395_spill] sm:$0xff] }
 0x65f   : > { %v6699_v7 = vpop.f32.mrf.mxu0  ;;  %8897 = vmatmul.mubr.msk.f32.gmra.mxu0 %vm18789_vm1, %v18228_v40  ;;  %8046 = vmatprep.mubr.f32.mxu1 %v17044_v61  ;;  %vm18819_vm1 = vmmov %vm18808_vm8 }
 0x660   : > { %8289 = vst [vmem:[%s14928_s14 + $0x3a0] sm:$0xff] %v7686_v21  ;;  %v7688_v17 = vadd.f32 %v7687_v5, %v6695_v41  ;;  %v6700_v20 = vadd.f32 %v6699_v7, %v18790_v47  ;;  %v7708_v22 = vpop.f32.mrf.mxu1  ;;  %7039 = vmatprep.mubr.f32.mxu0 %v17044_v61  ;;  %v18796_v47 = vld [vmem:[#allocation292_spill] sm:$0xff] }
 0x661   : > { %v6701_v44 = vpop.f32.mrf.mxu0 }
 0x662   : > { %8290 = vst [vmem:[%s14928_s14 + $0x3a8] sm:$0xff] %v7688_v17  ;;  %v7693_v24 = vadd.f32 %v7692_v28, %v6700_v20  ;;  %v6702_v25 = vadd.f32 %v6701_v44, %v18791_v12  ;;  %v7713_v48 = vpop.f32.mrf.mxu1  ;;  %9028 = vmatmul.mubr.msk.f32.gmra.mxu1 %vm18793_vm2, %v18228_v40  ;;  %v18795_v28 = vld [vmem:[#allocation285_spill] sm:$0xff]  ;;  %vm18823_vm2 = vcmp.eq.s32.totalorder %v18822_v63, %v18230_v11  ;;  %v18837_v63 = vld [vmem:[#allocation399_spill] sm:$0xff] }
 0x663   : > { %v6706_v39 = vpop.f32.mrf.mxu0  ;;  %8898 = vmatmul.mubr.msk.f32.gmra.mxu0 %vm18794_vm3, %v18228_v40  ;;  %8053 = vmatprep.mubr.f32.mxu1 %v17044_v61  ;;  %vm18824_vm3 = vmmov %vm18813_vm10 }
 0x664   : > { %8291 = vst [vmem:[%s14928_s14 + $0x3b0] sm:$0xff] %v7693_v24  ;;  %v7695_v5 = vadd.f32 %v7694_v10, %v6702_v25  ;;  %v6707_v21 = vadd.f32 %v6706_v39, %v18795_v28  ;;  %v7715_v41 = vpop.f32.mrf.mxu1  ;;  %7046 = vmatprep.mubr.f32.mxu0 %v17044_v61  ;;  %v18801_v28 = vld [vmem:[#allocation289_spill] sm:$0xff] }
 0x665   : > { %v6708_v7 = vpop.f32.mrf.mxu0 }
 0x666   : > { %8292 = vst [vmem:[%s14928_s14 + $0x3b8] sm:$0xff] %v7695_v5  ;;  %v7700_v17 = vadd.f32 %v7699_v13, %v6707_v21  ;;  %v6709_v20 = vadd.f32 %v6708_v7, %v18796_v47  ;;  %v7720_v44 = vpop.f32.mrf.mxu1  ;;  %9029 = vmatmul.mubr.msk.f32.gmra.mxu1 %vm18798_vm4, %v18228_v40  ;;  %v18800_v13 = vld [vmem:[#allocation294_spill] sm:$0xff]  ;;  %vm18828_vm4 = vcmp.eq.s32.totalorder %v18827_v9, %v18230_v11  ;;  %v18842_v9 = vld [vmem:[#allocation403_spill] sm:$0xff] }
 0x667   : > { %v6713_v12 = vpop.f32.mrf.mxu0  ;;  %8899 = vmatmul.mubr.msk.f32.gmra.mxu0 %vm18799_vm5, %v18228_v40  ;;  %8060 = vmatprep.mubr.f32.mxu1 %v17044_v61  ;;  %vm18829_vm5 = vmmov %vm18818_vm0 }
 0x668   : > { %8293 = vst [vmem:[%s14928_s14 + $0x3c0] sm:$0xff] %v7700_v17  ;;  %v7702_v10 = vadd.f32 %v7701_v18, %v6709_v20  ;;  %v6714_v24 = vadd.f32 %v6713_v12, %v18800_v13  ;;  %v7722_v25 = vpop.f32.mrf.mxu1  ;;  %7053 = vmatprep.mubr.f32.mxu0 %v17044_v61  ;;  %v18806_v13 = vld [vmem:[#allocation298_spill] sm:$0xff] }
 0x669   : > { %v6715_v39 = vpop.f32.mrf.mxu0 }
 0x66a   : > { %8294 = vst [vmem:[%s14928_s14 + $0x3c8] sm:$0xff] %v7702_v10  ;;  %v7707_v5 = vadd.f32 %v7706_v4, %v6714_v24  ;;  %v6716_v21 = vadd.f32 %v6715_v39, %v18801_v28  ;;  %v7727_v7 = vpop.f32.mrf.mxu1  ;;  %9030 = vmatmul.mubr.msk.f32.gmra.mxu1 %vm18803_vm6, %v18228_v40  ;;  %v18805_v4 = vld [vmem:[#allocation296_spill] sm:$0xff]  ;;  %vm18833_vm6 = vcmp.eq.s32.totalorder %v18832_v57, %v18230_v11  ;;  %v18846_v57 = vld [vmem:[#allocation407_spill] sm:$0xff] }
 0x66b   : > { %v6720_v47 = vpop.f32.mrf.mxu0  ;;  %8900 = vmatmul.mubr.msk.f32.gmra.mxu0 %vm18804_vm7, %v18228_v40  ;;  %8067 = vmatprep.mubr.f32.mxu1 %v17044_v61  ;;  %vm18834_vm7 = vmmov %vm18823_vm2 }
 0x66c   : > { %8295 = vst [vmem:[%s14928_s14 + $0x3d0] sm:$0xff] %v7707_v5  ;;  %v7709_v18 = vadd.f32 %v7708_v22, %v6716_v21  ;;  %v6721_v17 = vadd.f32 %v6720_v47, %v18805_v4  ;;  %v7729_v20 = vpop.f32.mrf.mxu1  ;;  %7060 = vmatprep.mubr.f32.mxu0 %v17044_v61  ;;  %v18811_v4 = vld [vmem:[#allocation300_spill] sm:$0xff] }
 0x66d   : > { %v6722_v12 = vpop.f32.mrf.mxu0 }
 0x66e   : > { %8296 = vst [vmem:[%s14928_s14 + $0x3d8] sm:$0xff] %v7709_v18  ;;  %v7714_v10 = vadd.f32 %v7713_v48, %v6721_v17  ;;  %v6723_v24 = vadd.f32 %v6722_v12, %v18806_v13  ;;  %v7734_v39 = vpop.f32.mrf.mxu1  ;;  %9031 = vmatmul.mubr.msk.f32.gmra.mxu1 %vm18808_vm8, %v18228_v40  ;;  %v18810_v48 = vld [vmem:[#allocation293_spill] sm:$0xff]  ;;  %vm18838_vm8 = vcmp.eq.s32.totalorder %v18837_v63, %v18230_v11  ;;  %v18851_v63 = vld [vmem:[#allocation411_spill] sm:$0xff] }
 0x66f   : > { %v6727_v28 = vpop.f32.mrf.mxu0  ;;  %8901 = vmatmul.mubr.msk.f32.gmra.mxu0 %vm18809_vm9, %v18228_v40  ;;  %8074 = vmatprep.mubr.f32.mxu1 %v17044_v61  ;;  %vm18839_vm9 = vmmov %vm18828_vm4 }
 0x670   : > { %8297 = vst [vmem:[%s14928_s14 + $0x3e0] sm:$0xff] %v7714_v10  ;;  %v7716_v22 = vadd.f32 %v7715_v41, %v6723_v24  ;;  %v6728_v5 = vadd.f32 %v6727_v28, %v18810_v48  ;;  %v7736_v21 = vpop.f32.mrf.mxu1  ;;  %7067 = vmatprep.mubr.f32.mxu0 %v17044_v61  ;;  %v18816_v48 = vld [vmem:[#allocation297_spill] sm:$0xff] }
 0x671   : > { %v6729_v47 = vpop.f32.mrf.mxu0 }
 0x672   : > { %8298 = vst [vmem:[%s14928_s14 + $0x3e8] sm:$0xff] %v7716_v22  ;;  %v7721_v18 = vadd.f32 %v7720_v44, %v6728_v5  ;;  %v6730_v17 = vadd.f32 %v6729_v47, %v18811_v4  ;;  %v7741_v12 = vpop.f32.mrf.mxu1  ;;  %9032 = vmatmul.mubr.msk.f32.gmra.mxu1 %vm18813_vm10, %v18228_v40  ;;  %v18815_v44 = vld [vmem:[#allocation302_spill] sm:$0xff]  ;;  %vm18843_vm10 = vcmp.eq.s32.totalorder %v18842_v9, %v18230_v11  ;;  %v18855_v9 = vld [vmem:[#allocation415_spill] sm:$0xff] }
 0x673   : > { %v6734_v13 = vpop.f32.mrf.mxu0  ;;  %8902 = vmatmul.mubr.msk.f32.gmra.mxu0 %vm18814_vm11, %v18228_v40  ;;  %8081 = vmatprep.mubr.f32.mxu1 %v17044_v61  ;;  %vm18844_vm11 = vmmov %vm18833_vm6 }
 0x674   : > { %8299 = vst [vmem:[%s14928_s14 + $0x3f0] sm:$0xff] %v7721_v18  ;;  %v7723_v41 = vadd.f32 %v7722_v25, %v6730_v17  ;;  %v6735_v10 = vadd.f32 %v6734_v13, %v18815_v44  ;;  %v7743_v24 = vpop.f32.mrf.mxu1  ;;  %7074 = vmatprep.mubr.f32.mxu0 %v17044_v61  ;;  %v18821_v44 = vld [vmem:[#allocation306_spill] sm:$0xff] }
 0x675   : > { %v6736_v28 = vpop.f32.mrf.mxu0 }
 0x676   : > { %8300 = vst [vmem:[%s14928_s14 + $0x3f8] sm:$0xff] %v7723_v41  ;;  %v7728_v22 = vadd.f32 %v7727_v7, %v6735_v10  ;;  %v6737_v5 = vadd.f32 %v6736_v28, %v18816_v48  ;;  %v7748_v47 = vpop.f32.mrf.mxu1  ;;  %9033 = vmatmul.mubr.msk.f32.gmra.mxu1 %vm18818_vm0, %v18228_v40  ;;  %v18820_v7 = vld [vmem:[#allocation304_spill] sm:$0xff]  ;;  %vm18847_vm0 = vcmp.eq.s32.totalorder %v18846_v57, %v18230_v11 }
 0x677   : > { %v6741_v4 = vpop.f32.mrf.mxu0  ;;  %8903 = vmatmul.mubr.msk.f32.gmra.mxu0 %vm18819_vm1, %v18228_v40  ;;  %8088 = vmatprep.mubr.f32.mxu1 %v17044_v61  ;;  %vm18848_vm1 = vmmov %vm18838_vm8 }
 0x678   : > { %8301 = vst [vmem:[%s14928_s14 + $0x400] sm:$0xff] %v7728_v22  ;;  %v7730_v25 = vadd.f32 %v7729_v20, %v6737_v5  ;;  %v6742_v18 = vadd.f32 %v6741_v4, %v18820_v7  ;;  %v7750_v17 = vpop.f32.mrf.mxu1  ;;  %7081 = vmatprep.mubr.f32.mxu0 %v17044_v61  ;;  %v18826_v7 = vld [vmem:[#allocation308_spill] sm:$0xff] }
 0x679   : > { %v6743_v13 = vpop.f32.mrf.mxu0 }
 0x67a   : > { %8302 = vst [vmem:[%s14928_s14 + $0x408] sm:$0xff] %v7730_v25  ;;  %v7735_v41 = vadd.f32 %v7734_v39, %v6742_v18  ;;  %v6744_v10 = vadd.f32 %v6743_v13, %v18821_v44  ;;  %v7755_v28 = vpop.f32.mrf.mxu1  ;;  %9034 = vmatmul.mubr.msk.f32.gmra.mxu1 %vm18823_vm2, %v18228_v40  ;;  %v18825_v39 = vld [vmem:[#allocation301_spill] sm:$0xff]  ;;  %vm18852_vm2 = vcmp.eq.s32.totalorder %v18851_v63, %v18230_v11 }
 0x67b   : > { %v6748_v48 = vpop.f32.mrf.mxu0  ;;  %8904 = vmatmul.mubr.msk.f32.gmra.mxu0 %vm18824_vm3, %v18228_v40  ;;  %8095 = vmatprep.mubr.f32.mxu1 %v17044_v61  ;;  %vm18853_vm3 = vmmov %vm18843_vm10 }
 0x67c   : > { %8303 = vst [vmem:[%s14928_s14 + $0x410] sm:$0xff] %v7735_v41  ;;  %v7737_v20 = vadd.f32 %v7736_v21, %v6744_v10  ;;  %v6749_v22 = vadd.f32 %v6748_v48, %v18825_v39  ;;  %v7757_v5 = vpop.f32.mrf.mxu1  ;;  %7088 = vmatprep.mubr.f32.mxu0 %v17044_v61  ;;  %v18831_v39 = vld [vmem:[#allocation305_spill] sm:$0xff] }
 0x67d   : > { %v6750_v4 = vpop.f32.mrf.mxu0 }
 0x67e   : > { %8304 = vst [vmem:[%s14928_s14 + $0x418] sm:$0xff] %v7737_v20  ;;  %v7742_v25 = vadd.f32 %v7741_v12, %v6749_v22  ;;  %v6751_v18 = vadd.f32 %v6750_v4, %v18826_v7  ;;  %v7762_v13 = vpop.f32.mrf.mxu1  ;;  %9035 = vmatmul.mubr.msk.f32.gmra.mxu1 %vm18828_vm4, %v18228_v40  ;;  %v18830_v12 = vld [vmem:[#allocation310_spill] sm:$0xff]  ;;  %vm18856_vm4 = vcmp.eq.s32.totalorder %v18855_v9, %v18230_v11 }
 0x67f   : > { %v6755_v44 = vpop.f32.mrf.mxu0  ;;  %8905 = vmatmul.mubr.msk.f32.gmra.mxu0 %vm18829_vm5, %v18228_v40  ;;  %8102 = vmatprep.mubr.f32.mxu1 %v17044_v61  ;;  %vm18857_vm5 = vmmov %vm18847_vm0 }
 0x680   : > { %8305 = vst [vmem:[%s14928_s14 + $0x420] sm:$0xff] %v7742_v25  ;;  %v7744_v21 = vadd.f32 %v7743_v24, %v6751_v18  ;;  %v6756_v41 = vadd.f32 %v6755_v44, %v18830_v12  ;;  %v7764_v10 = vpop.f32.mrf.mxu1  ;;  %7095 = vmatprep.mubr.f32.mxu0 %v17044_v61  ;;  %v18836_v12 = vld [vmem:[#allocation314_spill] sm:$0xff] }
 0x681   : > { %v6757_v48 = vpop.f32.mrf.mxu0 }
 0x682   : > { %8306 = vst [vmem:[%s14928_s14 + $0x428] sm:$0xff] %v7744_v21  ;;  %v7749_v20 = vadd.f32 %v7748_v47, %v6756_v41  ;;  %v6758_v22 = vadd.f32 %v6757_v48, %v18831_v39  ;;  %v7769_v4 = vpop.f32.mrf.mxu1  ;;  %9036 = vmatmul.mubr.msk.f32.gmra.mxu1 %vm18833_vm6, %v18228_v40  ;;  %v18835_v47 = vld [vmem:[#allocation312_spill] sm:$0xff]  ;;  %vm18859_vm6 = vmmov %vm18852_vm2 }
 0x683   : > { %v6762_v7 = vpop.f32.mrf.mxu0  ;;  %8906 = vmatmul.mubr.msk.f32.gmra.mxu0 %vm18834_vm7, %v18228_v40  ;;  %8109 = vmatprep.mubr.f32.mxu1 %v17044_v61  ;;  %vm18861_vm7 = vmmov %vm18856_vm4 }
 0x684   : > { %8307 = vst [vmem:[%s14928_s14 + $0x430] sm:$0xff] %v7749_v20  ;;  %v7751_v24 = vadd.f32 %v7750_v17, %v6758_v22  ;;  %v6763_v25 = vadd.f32 %v6762_v7, %v18835_v47  ;;  %v7771_v18 = vpop.f32.mrf.mxu1  ;;  %7102 = vmatprep.mubr.f32.mxu0 %v17044_v61  ;;  %v18841_v47 = vld [vmem:[#allocation316_spill] sm:$0xff] }
 0x685   : > { %v6764_v44 = vpop.f32.mrf.mxu0 }
 0x686   : > { %8308 = vst [vmem:[%s14928_s14 + $0x438] sm:$0xff] %v7751_v24  ;;  %v7756_v21 = vadd.f32 %v7755_v28, %v6763_v25  ;;  %v6765_v41 = vadd.f32 %v6764_v44, %v18836_v12  ;;  %v7776_v48 = vpop.f32.mrf.mxu1  ;;  %9037 = vmatmul.mubr.msk.f32.gmra.mxu1 %vm18838_vm8, %v18228_v40  ;;  %v18840_v28 = vld [vmem:[#allocation309_spill] sm:$0xff] }
 0x687   : > { %v6769_v39 = vpop.f32.mrf.mxu0  ;;  %8907 = vmatmul.mubr.msk.f32.gmra.mxu0 %vm18839_vm9, %v18228_v40  ;;  %8116 = vmatprep.mubr.f32.mxu1 %v17044_v61 }
 0x688   : > { %8309 = vst [vmem:[%s14928_s14 + $0x440] sm:$0xff] %v7756_v21  ;;  %v7758_v17 = vadd.f32 %v7757_v5, %v6765_v41  ;;  %v6770_v20 = vadd.f32 %v6769_v39, %v18840_v28  ;;  %v7778_v22 = vpop.f32.mrf.mxu1  ;;  %7109 = vmatprep.mubr.f32.mxu0 %v17044_v61 }
 0x689   : > { %v6771_v7 = vpop.f32.mrf.mxu0 }
 0x68a   : > { %8310 = vst [vmem:[%s14928_s14 + $0x448] sm:$0xff] %v7758_v17  ;;  %v7763_v24 = vadd.f32 %v7762_v13, %v6770_v20  ;;  %v6772_v25 = vadd.f32 %v6771_v7, %v18841_v47  ;;  %v7783_v44 = vpop.f32.mrf.mxu1  ;;  %9038 = vmatmul.mubr.msk.f32.gmra.mxu1 %vm18843_vm10, %v18228_v40  ;;  %v18845_v17 = vld [vmem:[#allocation318_spill] sm:$0xff] }
 0x68b   : > { %v6776_v12 = vpop.f32.mrf.mxu0  ;;  %8908 = vmatmul.mubr.msk.f32.gmra.mxu0 %vm18844_vm11, %v18228_v40  ;;  %8123 = vmatprep.mubr.f32.mxu1 %v17044_v61 }
 0x68c   : > { %8311 = vst [vmem:[%s14928_s14 + $0x450] sm:$0xff] %v7763_v24  ;;  %v7765_v5 = vadd.f32 %v7764_v10, %v6772_v25  ;;  %v6777_v13 = vadd.f32 %v6776_v12, %v14031_v33  ;;  %v7785_v21 = vpop.f32.mrf.mxu1  ;;  %7116 = vmatprep.mubr.f32.mxu0 %v17044_v61  ;;  %v18849_v10 = vld [vmem:[#allocation313_spill] sm:$0xff]  ;;  %v18850_v12 = vld [vmem:[#allocation320_spill] sm:$0xff] }
 0x68d   : > { %v6778_v41 = vpop.f32.mrf.mxu0 }
 0x68e   : > { %8312 = vst [vmem:[%s14928_s14 + $0x458] sm:$0xff] %v7765_v5  ;;  %v7770_v39 = vadd.f32 %v7769_v4, %v6777_v13  ;;  %v6779_v28 = vadd.f32 %v6778_v41, %v18845_v17  ;;  %v7790_v20 = vpop.f32.mrf.mxu1  ;;  %9039 = vmatmul.mubr.msk.f32.gmra.mxu1 %vm18847_vm0, %v18228_v40 }
 0x68f   : > { %v6783_v7 = vpop.f32.mrf.mxu0  ;;  %8909 = vmatmul.mubr.msk.f32.gmra.mxu0 %vm18848_vm1, %v18228_v40  ;;  %8130 = vmatprep.mubr.f32.mxu1 %v17044_v61 }
 0x690   : > { %8313 = vst [vmem:[%s14928_s14 + $0x460] sm:$0xff] %v7770_v39  ;;  %v7772_v33 = vadd.f32 %v7771_v18, %v6779_v28  ;;  %v6784_v4 = vadd.f32 %v6783_v7, %v18849_v10  ;;  %v7792_v24 = vpop.f32.mrf.mxu1  ;;  %7123 = vmatprep.mubr.f32.mxu0 %v17044_v61  ;;  %v18854_v7 = vld [vmem:[#allocation322_spill] sm:$0xff] }
 0x691   : > { %v6785_v47 = vpop.f32.mrf.mxu0 }
 0x692   : > { %8314 = vst [vmem:[%s14928_s14 + $0x468] sm:$0xff] %v7772_v33  ;;  %v7777_v25 = vadd.f32 %v7776_v48, %v6784_v4  ;;  %v6786_v5 = vadd.f32 %v6785_v47, %v18850_v12  ;;  %v7797_v13 = vpop.f32.mrf.mxu1  ;;  %9040 = vmatmul.mubr.msk.f32.gmra.mxu1 %vm18852_vm2, %v18228_v40 }
 0x693   : > { %v6790_v41 = vpop.f32.mrf.mxu0  ;;  %8910 = vmatmul.mubr.msk.f32.gmra.mxu0 %vm18853_vm3, %v18228_v40  ;;  %8137 = vmatprep.mubr.f32.mxu1 %v17044_v61 }
 0x694   : > { %8315 = vst [vmem:[%s14928_s14 + $0x470] sm:$0xff] %v7777_v25  ;;  %v7779_v18 = vadd.f32 %v7778_v22, %v6786_v5  ;;  %v6791_v48 = vadd.f32 %v6790_v41, %v14053_v38  ;;  %v7799_v39 = vpop.f32.mrf.mxu1  ;;  %7130 = vmatprep.mubr.f32.mxu0 %v17044_v61 }
 0x695   : > { %v6792_v17 = vpop.f32.mrf.mxu0 }
 0x696   : > { %8316 = vst [vmem:[%s14928_s14 + $0x478] sm:$0xff] %v7779_v18  ;;  %v7784_v28 = vadd.f32 %v7783_v44, %v6791_v48  ;;  %v6793_v33 = vadd.f32 %v6792_v17, %v18854_v7  ;;  %v7804_v10 = vpop.f32.mrf.mxu1  ;;  %9041 = vmatmul.mubr.msk.f32.gmra.mxu1 %vm18856_vm4, %v18228_v40 }
 0x697   : > { %v6797_v4 = vpop.f32.mrf.mxu0  ;;  %8911 = vmatmul.mubr.msk.f32.gmra.mxu0 %vm18857_vm5, %v18228_v40  ;;  %8144 = vmatprep.mubr.f32.mxu1 %v17044_v61 }
 0x698   : > { %8317 = vst [vmem:[%s14928_s14 + $0x480] sm:$0xff] %v7784_v28  ;;  %v7786_v38 = vadd.f32 %v7785_v21, %v6793_v33  ;;  %v6798_v22 = vadd.f32 %v6797_v4, %v14064_v32  ;;  %v7806_v44 = vpop.f32.mrf.mxu1  ;;  %7137 = vmatprep.mubr.f32.mxu0 %v17044_v61  ;;  %v18862_v33 = vld [vmem:[#allocation317_spill] sm:$0xff] }
 0x699   : > { %v6799_v47 = vpop.f32.mrf.mxu0 }
 0x69a   : > { %8318 = vst [vmem:[%s14928_s14 + $0x488] sm:$0xff] %v7786_v38  ;;  %v7791_v25 = vadd.f32 %v7790_v20, %v6798_v22  ;;  %v6800_v12 = vadd.f32 %v6799_v47, %v14070_v37  ;;  %v7811_v5 = vpop.f32.mrf.mxu1  ;;  %9042 = vmatmul.mubr.msk.f32.gmra.mxu1 %vm803_vm12, %v18228_v40 }
 0x69b   : > { %v6804_v41 = vpop.f32.mrf.mxu0  ;;  %8912 = vmatmul.mubr.msk.f32.gmra.mxu0 %vm18859_vm6, %v18228_v40  ;;  %8151 = vmatprep.mubr.f32.mxu1 %v17044_v61 }
 0x69c   : > { %8319 = vst [vmem:[%s14928_s14 + $0x490] sm:$0xff] %v7791_v25  ;;  %v7793_v32 = vadd.f32 %v7792_v24, %v6800_v12  ;;  %v6805_v21 = vadd.f32 %v6804_v41, %v14075_v46  ;;  %v7813_v37 = vpop.f32.mrf.mxu1  ;;  %7144 = vmatprep.mubr.f32.mxu0 %v17044_v61  ;;  %v18865_v41 = vld [vmem:[#allocation326_spill] sm:$0xff] }
 0x69d   : > { %v6806_v20 = vpop.f32.mrf.mxu0 }
 0x69e   : > { %8320 = vst [vmem:[%s14928_s14 + $0x498] sm:$0xff] %v7793_v32  ;;  %v7798_v18 = vadd.f32 %v7797_v13, %v6805_v21  ;;  %v6807_v48 = vadd.f32 %v6806_v20, %v14081_v35  ;;  %v7818_v17 = vpop.f32.mrf.mxu1  ;;  %9043 = vmatmul.mubr.msk.f32.gmra.mxu1 %vm804_vm13, %v18228_v40 }
 0x69f   : > { %v6811_v28 = vpop.f32.mrf.mxu0  ;;  %8913 = vmatmul.mubr.msk.f32.gmra.mxu0 %vm18861_vm7, %v18228_v40  ;;  %8158 = vmatprep.mubr.f32.mxu1 %v17044_v61 }
 0x6a0   : > { %8321 = vst [vmem:[%s14928_s14 + $0x4a0] sm:$0xff] %v7798_v18  ;;  %v7800_v46 = vadd.f32 %v7799_v39, %v6807_v48  ;;  %v6812_v24 = vadd.f32 %v6811_v28, %v14086_v42  ;;  %v7820_v35 = vpop.f32.mrf.mxu1  ;;  %7151 = vmatprep.mubr.f32.mxu0 %v17044_v61  ;;  %v18864_v39 = vld [vmem:[#allocation324_spill] sm:$0xff] }
 0x6a1   : > { %v6813_v13 = vpop.f32.mrf.mxu0 }
 0x6a2   : > { %8322 = vst [vmem:[%s14928_s14 + $0x4a8] sm:$0xff] %v7800_v46  ;;  %v7805_v7 = vadd.f32 %v7804_v10, %v6812_v24  ;;  %v6814_v4 = vadd.f32 %v6813_v13, %v18862_v33  ;;  %v7825_v38 = vpop.f32.mrf.mxu1  ;;  %9044 = vmatmul.mubr.msk.f32.gmra.mxu1 %vm805_vm14, %v18228_v40 }
 0x6a3   : > { %v6818_v22 = vpop.f32.mrf.mxu0  ;;  %8914 = vmatmul.mubr.msk.f32.gmra.mxu0 %vm803_vm12, %v18228_v40  ;;  %8165 = vmatprep.mubr.f32.mxu1 %v17044_v61 }
 0x6a4   : > { %8323 = vst [vmem:[%s14928_s14 + $0x4b0] sm:$0xff] %v7805_v7  ;;  %v7807_v42 = vadd.f32 %v7806_v44, %v6814_v4  ;;  %v6819_v10 = vadd.f32 %v6818_v22, %v18864_v39  ;;  %v7827_v47 = vpop.f32.mrf.mxu1  ;;  %7158 = vmatprep.mubr.f32.mxu0 %v17044_v61 }
 0x6a5   : > { %v6820_v25 = vpop.f32.mrf.mxu0 }
 0x6a6   : > { %8324 = vst [vmem:[%s14928_s14 + $0x4b8] sm:$0xff] %v7807_v42  ;;  %v7812_v12 = vadd.f32 %v7811_v5, %v6819_v10  ;;  %v6821_v32 = vadd.f32 %v6820_v25, %v18865_v41  ;;  %v7832_v21 = vpop.f32.mrf.mxu1  ;;  %9045 = vmatmul.mubr.msk.f32.gmra.mxu1 %vm806_vm15, %v18228_v40 }
 0x6a7   : > { %v6825_v20 = vpop.f32.mrf.mxu0  ;;  %8915 = vmatmul.mubr.msk.f32.gmra.mxu0 %vm804_vm13, %v18228_v40 }
 0x6a8   : > { %8325 = vst [vmem:[%s14928_s14 + $0x4c0] sm:$0xff] %v7812_v12  ;;  %v7814_v44 = vadd.f32 %v7813_v37, %v6821_v32  ;;  %v6826_v18 = vadd.f32 %v6825_v20, %v14110_v58  ;;  %v7834_v5 = vpop.f32.mrf.mxu1  ;;  %7165 = vmatprep.mubr.f32.mxu0 %v17044_v61 }
 0x6a9   : > { %v6827_v48 = vpop.f32.mrf.mxu0 }
 0x6aa   : > { %8326 = vst [vmem:[%s14928_s14 + $0x4c8] sm:$0xff] %v7814_v44  ;;  %v7819_v28 = vadd.f32 %v7818_v17, %v6826_v18  ;;  %v6828_v46 = vadd.f32 %v6827_v48, %v14116_v19  ;;  %v7839_v24 = vpop.f32.mrf.mxu1 }
 0x6ab   : > { %v6832_v13 = vpop.f32.mrf.mxu0  ;;  %8916 = vmatmul.mubr.msk.f32.gmra.mxu0 %vm805_vm14, %v18228_v40 }
 0x6ac   : > { %8327 = vst [vmem:[%s14928_s14 + $0x4d0] sm:$0xff] %v7819_v28  ;;  %v7821_v37 = vadd.f32 %v7820_v35, %v6828_v46  ;;  %v6833_v58 = vadd.f32 %v6832_v13, %v14123_v60  ;;  %v7841_v63 = vpop.f32.mrf.mxu1  ;;  %7172 = vmatprep.mubr.f32.mxu0 %v17044_v61 }
 0x6ad   : > { %v6834_v7 = vpop.f32.mrf.mxu0 }
 0x6ae   : > { %8328 = vst [vmem:[%s14928_s14 + $0x4d8] sm:$0xff] %v7821_v37  ;;  %v7826_v19 = vadd.f32 %v7825_v38, %v6833_v58  ;;  %v6835_v17 = vadd.f32 %v6834_v7, %v14129_v14  ;;  %v7846_v33 = vpop.f32.mrf.mxu1 }
 0x6af   : > { %v6839_v4 = vpop.f32.mrf.mxu0  ;;  %8917 = vmatmul.mubr.msk.f32.gmra.mxu0 %vm806_vm15, %v18228_v40 }
 0x6b0   : > { %8329 = vst [vmem:[%s14928_s14 + $0x4e0] sm:$0xff] %v7826_v19  ;;  %v7828_v35 = vadd.f32 %v7827_v47, %v6835_v17  ;;  %v6840_v60 = vadd.f32 %v6839_v4, %v14136_v52  ;;  %v7848_v9 = vpop.f32.mrf.mxu1 }
 0x6b1   : > { %v6841_v61 = vpop.f32.mrf.mxu0 }
 0x6b2   : > { %8330 = vst [vmem:[%s14928_s14 + $0x4e8] sm:$0xff] %v7828_v35  ;;  %v7833_v22 = vadd.f32 %v7832_v21, %v6840_v60  ;;  %v6842_v38 = vadd.f32 %v6841_v61, %v14145_v3  ;;  %v7853_v14 = vpop.f32.mrf.mxu1 }
 0x6b3   : > { %v6846_v42 = vpop.f32.mrf.mxu0 }
 0x6b4   : > { %8331 = vst [vmem:[%s14928_s14 + $0x4f0] sm:$0xff] %v7833_v22  ;;  %v7835_v39 = vadd.f32 %v7834_v5, %v6842_v38  ;;  %v6847_v11 = vadd.f32 %v6846_v42, %v14152_v55  ;;  %v7855_v40 = vpop.f32.mrf.mxu1 }
 0x6b5   : > { %v6848_v10 = vpop.f32.mrf.mxu0 }
 0x6b6   : > { %8332 = vst [vmem:[%s14928_s14 + $0x4f8] sm:$0xff] %v7835_v39  ;;  %v7840_v47 = vadd.f32 %v7839_v24, %v6847_v11  ;;  %v6849_v52 = vadd.f32 %v6848_v10, %v14161_v50  ;;  %v7860_v25 = vpop.f32.mrf.mxu1 }
 0x6b7   : > { %v6853_v12 = vpop.f32.mrf.mxu0 }
 0x6b8   : > { %8333 = vst [vmem:[%s14928_s14 + $0x500] sm:$0xff] %v7840_v47  ;;  %v7842_v41 = vadd.f32 %v7841_v63, %v6849_v52  ;;  %v6854_v3 = vadd.f32 %v6853_v12, %v14168_v34  ;;  %v7862_v32 = vpop.f32.mrf.mxu1 }
 0x6b9   : > { %v6855_v21 = vpop.f32.mrf.mxu0 }
 0x6ba   : > { %8334 = vst [vmem:[%s14928_s14 + $0x508] sm:$0xff] %v7842_v41  ;;  %v7847_v57 = vadd.f32 %v7846_v33, %v6854_v3  ;;  %v6856_v55 = vadd.f32 %v6855_v21, %v14177_v30  ;;  %v7867_v20 = vpop.f32.mrf.mxu1 }
 0x6bb   : > { %v6860_v44 = vpop.f32.mrf.mxu0 }
 0x6bc   : > { %8335 = vst [vmem:[%s14928_s14 + $0x510] sm:$0xff] %v7847_v57  ;;  %v7849_v18 = vadd.f32 %v7848_v9, %v6856_v55  ;;  %v6861_v50 = vadd.f32 %v6860_v44, %v14184_v59  ;;  %v7869_v5 = vpop.f32.mrf.mxu1 }
 0x6bd   : > { %v6862_v48 = vpop.f32.mrf.mxu0 }
 0x6be   : > { %8336 = vst [vmem:[%s14928_s14 + $0x518] sm:$0xff] %v7849_v18  ;;  %v7854_v28 = vadd.f32 %v7853_v14, %v6861_v50  ;;  %v6863_v34 = vadd.f32 %v6862_v48, %v14193_v45  ;;  %v7874_v46 = vpop.f32.mrf.mxu1 }
 0x6bf   : > { %v6867_v24 = vpop.f32.mrf.mxu0 }
 0x6c0   : > { %8337 = vst [vmem:[%s14928_s14 + $0x520] sm:$0xff] %v7854_v28  ;;  %v7856_v13 = vadd.f32 %v7855_v40, %v6863_v34  ;;  %v6868_v30 = vadd.f32 %v6867_v24, %v14200_v27  ;;  %v7876_v37 = vpop.f32.mrf.mxu1 }
 0x6c1   : > { %v6869_v58 = vpop.f32.mrf.mxu0 }
 0x6c2   : > { %8338 = vst [vmem:[%s14928_s14 + $0x528] sm:$0xff] %v7856_v13  ;;  %v7861_v63 = vadd.f32 %v7860_v25, %v6868_v30  ;;  %v6870_v59 = vadd.f32 %v6869_v58, %v14209_v16  ;;  %v7881_v7 = vpop.f32.mrf.mxu1 }
 0x6c3   : > { %v6874_v19 = vpop.f32.mrf.mxu0 }
 0x6c4   : > { %8339 = vst [vmem:[%s14928_s14 + $0x530] sm:$0xff] %v7861_v63  ;;  %v7863_v17 = vadd.f32 %v7862_v32, %v6870_v59  ;;  %v6875_v45 = vadd.f32 %v6874_v19, %v14216_v1  ;;  %v7883_v33 = vpop.f32.mrf.mxu1 }
 0x6c5   : > { %v6876_v4 = vpop.f32.mrf.mxu0 }
 0x6c6   : > { %8340 = vst [vmem:[%s14928_s14 + $0x538] sm:$0xff] %v7863_v17  ;;  %v7868_v35 = vadd.f32 %v7867_v20, %v6875_v45  ;;  %v6877_v27 = vadd.f32 %v6876_v4, %v14225_v29  ;;  %v7888_v60 = vpop.f32.mrf.mxu1 }
 0x6c7   : > { %v6881_v9 = vpop.f32.mrf.mxu0 }
 0x6c8   : > { %8341 = vst [vmem:[%s14928_s14 + $0x540] sm:$0xff] %v7868_v35  ;;  %v7870_v61 = vadd.f32 %v7869_v5, %v6877_v27  ;;  %v6882_v16 = vadd.f32 %v6881_v9, %v14232_v0  ;;  %v7890_v22 = vpop.f32.mrf.mxu1 }
 0x6c9   : > { %v6883_v38 = vpop.f32.mrf.mxu0 }
 0x6ca   : > { %8342 = vst [vmem:[%s14928_s14 + $0x548] sm:$0xff] %v7870_v61  ;;  %v7875_v14 = vadd.f32 %v7874_v46, %v6882_v16  ;;  %v6884_v1 = vadd.f32 %v6883_v38, %v14241_v54  ;;  %v7895_v42 = vpop.f32.mrf.mxu1 }
 0x6cb   : > { %v6888_v39 = vpop.f32.mrf.mxu0 }
 0x6cc   : > { %8343 = vst [vmem:[%s14928_s14 + $0x550] sm:$0xff] %v7875_v14  ;;  %v7877_v11 = vadd.f32 %v7876_v37, %v6884_v1  ;;  %v6889_v29 = vadd.f32 %v6888_v39, %v14248_v36  ;;  %v7897_v40 = vpop.f32.mrf.mxu1 }
 0x6cd   : > { %v6890_v10 = vpop.f32.mrf.mxu0 }
 0x6ce   : > { %8344 = vst [vmem:[%s14928_s14 + $0x558] sm:$0xff] %v7877_v11  ;;  %v7882_v47 = vadd.f32 %v7881_v7, %v6889_v29  ;;  %v6891_v0 = vadd.f32 %v6890_v10, %v14257_v56  ;;  %v7902_v52 = vpop.f32.mrf.mxu1 }
 0x6cf   : > { %v6895_v25 = vpop.f32.mrf.mxu0 }
 0x6d0   : > { %8345 = vst [vmem:[%s14928_s14 + $0x560] sm:$0xff] %v7882_v47  ;;  %v7884_v12 = vadd.f32 %v7883_v33, %v6891_v0  ;;  %v6896_v54 = vadd.f32 %v6895_v25, %v14264_v62  ;;  %v7904_v41 = vpop.f32.mrf.mxu1 }
 0x6d1   : > { %v6897_v3 = vpop.f32.mrf.mxu0 }
 0x6d2   : > { %8346 = vst [vmem:[%s14928_s14 + $0x568] sm:$0xff] %v7884_v12  ;;  %v7889_v32 = vadd.f32 %v7888_v60, %v6896_v54  ;;  %v6898_v36 = vadd.f32 %v6897_v3, %v14273_v31  ;;  %v7909_v21 = vpop.f32.mrf.mxu1  ;;  %v18870_v12 = vld [vmem:[#allocation325_spill] sm:$0xff] }
 0x6d3   : > { %v6902_v57 = vpop.f32.mrf.mxu0 }
 0x6d4   : > { %8347 = vst [vmem:[%s14928_s14 + $0x570] sm:$0xff] %v7889_v32  ;;  %v7891_v55 = vadd.f32 %v7890_v22, %v6898_v36  ;;  %v6903_v56 = vadd.f32 %v6902_v57, %v14280_v53  ;;  %v7911_v20 = vpop.f32.mrf.mxu1  ;;  %v18871_v36 = vld [vmem:[#allocation332_spill] sm:$0xff] }
 0x6d5   : > { %v6904_v44 = vpop.f32.mrf.mxu0 }
 0x6d6   : > { %8348 = vst [vmem:[%s14928_s14 + $0x578] sm:$0xff] %v7891_v55  ;;  %v7896_v18 = vadd.f32 %v7895_v42, %v6903_v56  ;;  %v6905_v62 = vadd.f32 %v6904_v44, %v14289_v51  ;;  %v7916_v50 = vpop.f32.mrf.mxu1 }
 0x6d7   : > { %v6909_v5 = vpop.f32.mrf.mxu0 }
 0x6d8   : > { %8349 = vst [vmem:[%s14928_s14 + $0x580] sm:$0xff] %v7896_v18  ;;  %v7898_v48 = vadd.f32 %v7897_v40, %v6905_v62  ;;  %v6910_v31 = vadd.f32 %v6909_v5, %v14296_v26  ;;  %v7918_v28 = vpop.f32.mrf.mxu1  ;;  %v18873_v5 = vld [vmem:[#allocation329_spill] sm:$0xff] }
 0x6d9   : > { %v6911_v34 = vpop.f32.mrf.mxu0 }
 0x6da   : > { %8350 = vst [vmem:[%s14928_s14 + $0x588] sm:$0xff] %v7898_v48  ;;  %v7903_v46 = vadd.f32 %v7902_v52, %v6910_v31  ;;  %v6912_v53 = vadd.f32 %v6911_v34, %v14305_v23  ;;  %v7923_v24 = vpop.f32.mrf.mxu1 }
 0x6db   : > { %v6916_v13 = vpop.f32.mrf.mxu0 }
 0x6dc   : > { %8351 = vst [vmem:[%s14928_s14 + $0x590] sm:$0xff] %v7903_v46  ;;  %v7905_v30 = vadd.f32 %v7904_v41, %v6912_v53  ;;  %v6917_v51 = vadd.f32 %v6916_v13, %v14312_v43  ;;  %v7925_v37 = vpop.f32.mrf.mxu1  ;;  %v18874_v46 = vld [vmem:[#allocation336_spill] sm:$0xff] }
 0x6dd   : > { %v6918_v58 = vpop.f32.mrf.mxu0 }
 0x6de   : > { %8352 = vst [vmem:[%s14928_s14 + $0x598] sm:$0xff] %v7905_v30  ;;  %v7910_v63 = vadd.f32 %v7909_v21, %v6917_v51  ;;  %v6919_v26 = vadd.f32 %v6918_v58, %v14321_v49  ;;  %v7930_v59 = vpop.f32.mrf.mxu1  ;;  %v18875_v51 = vld [vmem:[#allocation338_spill] sm:$0xff] }
 0x6df   : > { %v6923_v7 = vpop.f32.mrf.mxu0 }
 0x6e0   : > { %8353 = vst [vmem:[%s14928_s14 + $0x5a0] sm:$0xff] %v7910_v63  ;;  %v7912_v19 = vadd.f32 %v7911_v20, %v6919_v26  ;;  %v6924_v23 = vadd.f32 %v6923_v7, %v14328_v6  ;;  %v7932_v17 = vpop.f32.mrf.mxu1  ;;  %v18872_v20 = vld [vmem:[#allocation334_spill] sm:$0xff] }
 0x6e1   : > { %v6925_v45 = vpop.f32.mrf.mxu0 }
 0x6e2   : > { %8354 = vst [vmem:[%s14928_s14 + $0x5a8] sm:$0xff] %v7912_v19  ;;  %v7917_v33 = vadd.f32 %v7916_v50, %v6924_v23  ;;  %v6926_v43 = vadd.f32 %v6925_v45, %v14337_v15  ;;  %v7937_v4 = vpop.f32.mrf.mxu1  ;;  %v18867_v15 = vld [vmem:[#allocation321_spill] sm:$0xff]  ;;  %v18877_v45 = vld [vmem:[#allocation340_spill] sm:$0xff] }
 0x6e3   : > { %v6930_v35 = vpop.f32.mrf.mxu0 }
 0x6e4   : > { %8355 = vst [vmem:[%s14928_s14 + $0x5b0] sm:$0xff] %v7917_v33  ;;  %v7919_v27 = vadd.f32 %v7918_v28, %v6926_v43  ;;  %v6931_v49 = vadd.f32 %v6930_v35, %v14344_v8  ;;  %v7939_v60 = vpop.f32.mrf.mxu1  ;;  %v18868_v8 = vld [vmem:[#allocation328_spill] sm:$0xff] }
 0x6e5   : > { %v6932_v9 = vpop.f32.mrf.mxu0 }
 0x6e6   : > { %8356 = vst [vmem:[%s14928_s14 + $0x5b8] sm:$0xff] %v7919_v27  ;;  %v7924_v61 = vadd.f32 %v7923_v24, %v6931_v49  ;;  %v6933_v6 = vadd.f32 %v6932_v9, %v14353_v2  ;;  %v7944_v16 = vpop.f32.mrf.mxu1  ;;  %v18869_v2 = vld [vmem:[#allocation330_spill] sm:$0xff] }
 0x6e7   : > { %v6937_v22 = vpop.f32.mrf.mxu0  ;;  %v18878_v27 = vld [vmem:[#allocation342_spill] sm:$0xff] }
 0x6e8   : > { %8357 = vst [vmem:[%s14928_s14 + $0x5c0] sm:$0xff] %v7924_v61  ;;  %v7926_v38 = vadd.f32 %v7925_v37, %v6933_v6  ;;  %v6938_v14 = vadd.f32 %v6937_v22, %v18867_v15  ;;  %v7946_v1 = vpop.f32.mrf.mxu1  ;;  %v18879_v6 = vld [vmem:[#allocation337_spill] sm:$0xff] }
 0x6e9   : > { %v6939_v42 = vpop.f32.mrf.mxu0 }
 0x6ea   : > { %8358 = vst [vmem:[%s14928_s14 + $0x5c8] sm:$0xff] %v7926_v38  ;;  %v7931_v39 = vadd.f32 %v7930_v59, %v6938_v14  ;;  %v6940_v11 = vadd.f32 %v6939_v42, %v18868_v8  ;;  %v7951_v29 = vpop.f32.mrf.mxu1  ;;  %v18876_v59 = vld [vmem:[#allocation333_spill] sm:$0xff]  ;;  %v18880_v14 = vld [vmem:[#allocation344_spill] sm:$0xff] }
 0x6eb   : > { %v6944_v40 = vpop.f32.mrf.mxu0 }
 0x6ec   : > { %8359 = vst [vmem:[%s14928_s14 + $0x5d0] sm:$0xff] %v7931_v39  ;;  %v7933_v10 = vadd.f32 %v7932_v17, %v6940_v11  ;;  %v6945_v47 = vadd.f32 %v6944_v40, %v18869_v2  ;;  %v7953_v0 = vpop.f32.mrf.mxu1  ;;  %v18881_v11 = vld [vmem:[#allocation346_spill] sm:$0xff] }
 0x6ed   : > { %v6946_v52 = vpop.f32.mrf.mxu0 }
 0x6ee   : > { %8360 = vst [vmem:[%s14928_s14 + $0x5d8] sm:$0xff] %v7933_v10  ;;  %v7938_v25 = vadd.f32 %v7937_v4, %v6945_v47  ;;  %v6947_v54 = vadd.f32 %v6946_v52, %v18870_v12  ;;  %v7958_v41 = vpop.f32.mrf.mxu1  ;;  %v18882_v47 = vld [vmem:[#allocation341_spill] sm:$0xff] }
 0x6ef   : > { %v6951_v3 = vpop.f32.mrf.mxu0 }
 0x6f0   : > { %8361 = vst [vmem:[%s14928_s14 + $0x5e0] sm:$0xff] %v7938_v25  ;;  %v7940_v32 = vadd.f32 %v7939_v60, %v6947_v54  ;;  %v6952_v21 = vadd.f32 %v6951_v3, %v18871_v36  ;;  %v7960_v57 = vpop.f32.mrf.mxu1  ;;  %v18883_v54 = vld [vmem:[#allocation348_spill] sm:$0xff] }
 0x6f1   : > { %v6953_v55 = vpop.f32.mrf.mxu0 }
 0x6f2   : > { %8362 = vst [vmem:[%s14928_s14 + $0x5e8] sm:$0xff] %v7940_v32  ;;  %v7945_v56 = vadd.f32 %v7944_v16, %v6952_v21  ;;  %v6954_v44 = vadd.f32 %v6953_v55, %v18872_v20  ;;  %v7965_v18 = vpop.f32.mrf.mxu1  ;;  %v18884_v21 = vld [vmem:[#allocation350_spill] sm:$0xff] }
 0x6f3   : > { %v6958_v62 = vpop.f32.mrf.mxu0 }
 0x6f4   : > { %8363 = vst [vmem:[%s14928_s14 + $0x5f0] sm:$0xff] %v7945_v56  ;;  %v7947_v50 = vadd.f32 %v7946_v1, %v6954_v44  ;;  %v6959_v48 = vadd.f32 %v6958_v62, %v18873_v5  ;;  %v7967_v31 = vpop.f32.mrf.mxu1  ;;  %v18885_v44 = vld [vmem:[#allocation345_spill] sm:$0xff] }
 0x6f5   : > { %v6960_v28 = vpop.f32.mrf.mxu0 }
 0x6f6   : > { %8364 = vst [vmem:[%s14928_s14 + $0x5f8] sm:$0xff] %v7947_v50  ;;  %v7952_v34 = vadd.f32 %v7951_v29, %v6959_v48  ;;  %v6961_v53 = vadd.f32 %v6960_v28, %v18874_v46  ;;  %v7972_v24 = vpop.f32.mrf.mxu1  ;;  %v18886_v48 = vld [vmem:[#allocation352_spill] sm:$0xff] }
 0x6f7   : > { %v6965_v13 = vpop.f32.mrf.mxu0 }
 0x6f8   : > { %8365 = vst [vmem:[%s14928_s14 + $0x600] sm:$0xff] %v7952_v34  ;;  %v7954_v30 = vadd.f32 %v7953_v0, %v6961_v53  ;;  %v6966_v37 = vadd.f32 %v6965_v13, %v18875_v51  ;;  %v7974_v58 = vpop.f32.mrf.mxu1  ;;  %v18887_v53 = vld [vmem:[#allocation354_spill] sm:$0xff] }
 0x6f9   : > { %v6967_v63 = vpop.f32.mrf.mxu0 }
 0x6fa   : > { %8366 = vst [vmem:[%s14928_s14 + $0x608] sm:$0xff] %v7954_v30  ;;  %v7959_v26 = vadd.f32 %v7958_v41, %v6966_v37  ;;  %v6968_v7 = vadd.f32 %v6967_v63, %v18876_v59  ;;  %v7979_v19 = vpop.f32.mrf.mxu1  ;;  %v18888_v37 = vld [vmem:[#allocation349_spill] sm:$0xff] }
 0x6fb   : > { %v6972_v23 = vpop.f32.mrf.mxu0 }
 0x6fc   : > { %8367 = vst [vmem:[%s14928_s14 + $0x610] sm:$0xff] %v7959_v26  ;;  %v7961_v17 = vadd.f32 %v7960_v57, %v6968_v7  ;;  %v6973_v33 = vadd.f32 %v6972_v23, %v18877_v45  ;;  %v7981_v43 = vpop.f32.mrf.mxu1  ;;  %v18889_v7 = vld [vmem:[#allocation356_spill] sm:$0xff] }
 0x6fd   : > { %v6974_v4 = vpop.f32.mrf.mxu0 }
 0x6fe   : > { %8368 = vst [vmem:[%s14928_s14 + $0x618] sm:$0xff] %v7961_v17  ;;  %v7966_v35 = vadd.f32 %v7965_v18, %v6973_v33  ;;  %v6975_v49 = vadd.f32 %v6974_v4, %v18878_v27  ;;  %v7986_v60 = vpop.f32.mrf.mxu1  ;;  %v18890_v33 = vld [vmem:[#allocation358_spill] sm:$0xff] }
 0x6ff   : > { %v6979_v9 = vpop.f32.mrf.mxu0 }
 0x700   : > { %8369 = vst [vmem:[%s14928_s14 + $0x620] sm:$0xff] %v7966_v35  ;;  %v7968_v61 = vadd.f32 %v7967_v31, %v6975_v49  ;;  %v6980_v16 = vadd.f32 %v6979_v9, %v18879_v6  ;;  %v7988_v22 = vpop.f32.mrf.mxu1  ;;  %v18891_v49 = vld [vmem:[#allocation353_spill] sm:$0xff] }
 0x701   : > { %v6981_v38 = vpop.f32.mrf.mxu0 }
 0x702   : > { %8370 = vst [vmem:[%s14928_s14 + $0x628] sm:$0xff] %v7968_v61  ;;  %v7973_v15 = vadd.f32 %v7972_v24, %v6980_v16  ;;  %v6982_v1 = vadd.f32 %v6981_v38, %v18880_v14  ;;  %v7993_v42 = vpop.f32.mrf.mxu1  ;;  %v18892_v16 = vld [vmem:[#allocation360_spill] sm:$0xff] }
 0x703   : > { %v6986_v39 = vpop.f32.mrf.mxu0 }
 0x704   : > { %8371 = vst [vmem:[%s14928_s14 + $0x630] sm:$0xff] %v7973_v15  ;;  %v7975_v8 = vadd.f32 %v7974_v58, %v6982_v1  ;;  %v6987_v29 = vadd.f32 %v6986_v39, %v18881_v11  ;;  %v7995_v40 = vpop.f32.mrf.mxu1  ;;  %v18893_v1 = vld [vmem:[#allocation362_spill] sm:$0xff] }
 0x705   : > { %v6988_v10 = vpop.f32.mrf.mxu0 }
 0x706   : > { %8372 = vst [vmem:[%s14928_s14 + $0x638] sm:$0xff] %v7975_v8  ;;  %v7980_v2 = vadd.f32 %v7979_v19, %v6987_v29  ;;  %v6989_v0 = vadd.f32 %v6988_v10, %v18882_v47  ;;  %v8000_v52 = vpop.f32.mrf.mxu1  ;;  %v18894_v29 = vld [vmem:[#allocation357_spill] sm:$0xff] }
 0x707   : > { %v6993_v25 = vpop.f32.mrf.mxu0 }
 0x708   : > { %8373 = vst [vmem:[%s14928_s14 + $0x640] sm:$0xff] %v7980_v2  ;;  %v7982_v12 = vadd.f32 %v7981_v43, %v6989_v0  ;;  %v6994_v41 = vadd.f32 %v6993_v25, %v18883_v54  ;;  %v8002_v3 = vpop.f32.mrf.mxu1  ;;  %v18895_v0 = vld [vmem:[#allocation364_spill] sm:$0xff] }
 0x709   : > { %v6995_v32 = vpop.f32.mrf.mxu0 }
 0x70a   : > { %8374 = vst [vmem:[%s14928_s14 + $0x648] sm:$0xff] %v7982_v12  ;;  %v7987_v36 = vadd.f32 %v7986_v60, %v6994_v41  ;;  %v6996_v57 = vadd.f32 %v6995_v32, %v18884_v21  ;;  %v8007_v55 = vpop.f32.mrf.mxu1  ;;  %v18896_v41 = vld [vmem:[#allocation366_spill] sm:$0xff] }
 0x70b   : > { %v7000_v56 = vpop.f32.mrf.mxu0 }
 0x70c   : > { %8375 = vst [vmem:[%s14928_s14 + $0x650] sm:$0xff] %v7987_v36  ;;  %v7989_v20 = vadd.f32 %v7988_v22, %v6996_v57  ;;  %v7001_v18 = vadd.f32 %v7000_v56, %v18885_v44  ;;  %v8009_v62 = vpop.f32.mrf.mxu1  ;;  %v18897_v57 = vld [vmem:[#allocation361_spill] sm:$0xff] }
 0x70d   : > { %v7002_v50 = vpop.f32.mrf.mxu0 }
 0x70e   : > { %8376 = vst [vmem:[%s14928_s14 + $0x658] sm:$0xff] %v7989_v20  ;;  %v7994_v5 = vadd.f32 %v7993_v42, %v7001_v18  ;;  %v7003_v31 = vadd.f32 %v7002_v50, %v18886_v48  ;;  %v8014_v28 = vpop.f32.mrf.mxu1  ;;  %v18898_v18 = vld [vmem:[#allocation368_spill] sm:$0xff] }
 0x70f   : > { %v7007_v34 = vpop.f32.mrf.mxu0 }
 0x710   : > { %8377 = vst [vmem:[%s14928_s14 + $0x660] sm:$0xff] %v7994_v5  ;;  %v7996_v46 = vadd.f32 %v7995_v40, %v7003_v31  ;;  %v7008_v24 = vadd.f32 %v7007_v34, %v18887_v53  ;;  %v8016_v13 = vpop.f32.mrf.mxu1  ;;  %v18899_v31 = vld [vmem:[#allocation370_spill] sm:$0xff] }
 0x711   : > { %v7009_v30 = vpop.f32.mrf.mxu0 }
 0x712   : > { %8378 = vst [vmem:[%s14928_s14 + $0x668] sm:$0xff] %v7996_v46  ;;  %v8001_v51 = vadd.f32 %v8000_v52, %v7008_v24  ;;  %v7010_v58 = vadd.f32 %v7009_v30, %v18888_v37  ;;  %v8021_v63 = vpop.f32.mrf.mxu1  ;;  %v18900_v24 = vld [vmem:[#allocation365_spill] sm:$0xff] }
 0x713   : > { %v7014_v26 = vpop.f32.mrf.mxu0 }
 0x714   : > { %8379 = vst [vmem:[%s14928_s14 + $0x670] sm:$0xff] %v8001_v51  ;;  %v8003_v59 = vadd.f32 %v8002_v3, %v7010_v58  ;;  %v7015_v19 = vadd.f32 %v7014_v26, %v18889_v7  ;;  %v8023_v23 = vpop.f32.mrf.mxu1  ;;  %v18901_v58 = vld [vmem:[#allocation372_spill] sm:$0xff] }
 0x715   : > { %v7016_v17 = vpop.f32.mrf.mxu0 }
 0x716   : > { %8380 = vst [vmem:[%s14928_s14 + $0x678] sm:$0xff] %v8003_v59  ;;  %v8008_v45 = vadd.f32 %v8007_v55, %v7015_v19  ;;  %v7017_v43 = vadd.f32 %v7016_v17, %v18890_v33  ;;  %v8028_v4 = vpop.f32.mrf.mxu1  ;;  %v18902_v19 = vld [vmem:[#allocation374_spill] sm:$0xff] }
 0x717   : > { %v7021_v35 = vpop.f32.mrf.mxu0 }
 0x718   : > { %8381 = vst [vmem:[%s14928_s14 + $0x680] sm:$0xff] %v8008_v45  ;;  %v8010_v27 = vadd.f32 %v8009_v62, %v7017_v43  ;;  %v7022_v60 = vadd.f32 %v7021_v35, %v18891_v49  ;;  %v8030_v9 = vpop.f32.mrf.mxu1  ;;  %v18903_v43 = vld [vmem:[#allocation369_spill] sm:$0xff] }
 0x719   : > { %v7023_v61 = vpop.f32.mrf.mxu0 }
 0x71a   : > { %8382 = vst [vmem:[%s14928_s14 + $0x688] sm:$0xff] %v8010_v27  ;;  %v8015_v6 = vadd.f32 %v8014_v28, %v7022_v60  ;;  %v7024_v22 = vadd.f32 %v7023_v61, %v18892_v16  ;;  %v8035_v38 = vpop.f32.mrf.mxu1  ;;  %v18904_v60 = vld [vmem:[#allocation376_spill] sm:$0xff] }
 0x71b   : > { %v7028_v15 = vpop.f32.mrf.mxu0 }
 0x71c   : > { %8383 = vst [vmem:[%s14928_s14 + $0x690] sm:$0xff] %v8015_v6  ;;  %v8017_v14 = vadd.f32 %v8016_v13, %v7024_v22  ;;  %v7029_v42 = vadd.f32 %v7028_v15, %v18893_v1  ;;  %v8037_v39 = vpop.f32.mrf.mxu1  ;;  %v18905_v22 = vld [vmem:[#allocation378_spill] sm:$0xff] }
 0x71d   : > { %v7030_v8 = vpop.f32.mrf.mxu0 }
 0x71e   : > { %8384 = vst [vmem:[%s14928_s14 + $0x698] sm:$0xff] %v8017_v14  ;;  %v8022_v11 = vadd.f32 %v8021_v63, %v7029_v42  ;;  %v7031_v40 = vadd.f32 %v7030_v8, %v18894_v29  ;;  %v8042_v10 = vpop.f32.mrf.mxu1  ;;  %v18906_v42 = vld [vmem:[#allocation373_spill] sm:$0xff] }
 0x71f   : > { %v7035_v2 = vpop.f32.mrf.mxu0 }
 0x720   : > { %8385 = vst [vmem:[%s14928_s14 + $0x6a0] sm:$0xff] %v8022_v11  ;;  %v8024_v47 = vadd.f32 %v8023_v23, %v7031_v40  ;;  %v7036_v52 = vadd.f32 %v7035_v2, %v18895_v0  ;;  %v8044_v25 = vpop.f32.mrf.mxu1  ;;  %v18907_v40 = vld [vmem:[#allocation380_spill] sm:$0xff] }
 0x721   : > { %v7037_v12 = vpop.f32.mrf.mxu0 }
 0x722   : > { %8386 = vst [vmem:[%s14928_s14 + $0x6a8] sm:$0xff] %v8024_v47  ;;  %v8029_v54 = vadd.f32 %v8028_v4, %v7036_v52  ;;  %v7038_v3 = vadd.f32 %v7037_v12, %v18896_v41  ;;  %v8049_v32 = vpop.f32.mrf.mxu1  ;;  %v18908_v52 = vld [vmem:[#allocation382_spill] sm:$0xff] }
 0x723   : > { %v7042_v36 = vpop.f32.mrf.mxu0 }
 0x724   : > { %8387 = vst [vmem:[%s14928_s14 + $0x6b0] sm:$0xff] %v8029_v54  ;;  %v8031_v21 = vadd.f32 %v8030_v9, %v7038_v3  ;;  %v7043_v55 = vadd.f32 %v7042_v36, %v18897_v57  ;;  %v8051_v56 = vpop.f32.mrf.mxu1  ;;  %v18909_v3 = vld [vmem:[#allocation377_spill] sm:$0xff] }
 0x725   : > { %v7044_v20 = vpop.f32.mrf.mxu0 }
 0x726   : > { %8388 = vst [vmem:[%s14928_s14 + $0x6b8] sm:$0xff] %v8031_v21  ;;  %v8036_v44 = vadd.f32 %v8035_v38, %v7043_v55  ;;  %v7045_v62 = vadd.f32 %v7044_v20, %v18898_v18  ;;  %v8056_v50 = vpop.f32.mrf.mxu1  ;;  %v18910_v55 = vld [vmem:[#allocation384_spill] sm:$0xff] }
 0x727   : > { %v7049_v5 = vpop.f32.mrf.mxu0 }
 0x728   : > { %8389 = vst [vmem:[%s14928_s14 + $0x6c0] sm:$0xff] %v8036_v44  ;;  %v8038_v48 = vadd.f32 %v8037_v39, %v7045_v62  ;;  %v7050_v28 = vadd.f32 %v7049_v5, %v18899_v31  ;;  %v8058_v34 = vpop.f32.mrf.mxu1  ;;  %v18911_v62 = vld [vmem:[#allocation386_spill] sm:$0xff] }
 0x729   : > { %v7051_v46 = vpop.f32.mrf.mxu0 }
 0x72a   : > { %8390 = vst [vmem:[%s14928_s14 + $0x6c8] sm:$0xff] %v8038_v48  ;;  %v8043_v53 = vadd.f32 %v8042_v10, %v7050_v28  ;;  %v7052_v13 = vadd.f32 %v7051_v46, %v18900_v24  ;;  %v8063_v30 = vpop.f32.mrf.mxu1  ;;  %v18912_v28 = vld [vmem:[#allocation381_spill] sm:$0xff] }
 0x72b   : > { %v7056_v51 = vpop.f32.mrf.mxu0 }
 0x72c   : > { %8391 = vst [vmem:[%s14928_s14 + $0x6d0] sm:$0xff] %v8043_v53  ;;  %v8045_v37 = vadd.f32 %v8044_v25, %v7052_v13  ;;  %v7057_v63 = vadd.f32 %v7056_v51, %v18901_v58  ;;  %v8065_v26 = vpop.f32.mrf.mxu1  ;;  %v18913_v13 = vld [vmem:[#allocation388_spill] sm:$0xff] }
 0x72d   : > { %v7058_v59 = vpop.f32.mrf.mxu0 }
 0x72e   : > { %8392 = vst [vmem:[%s14928_s14 + $0x6d8] sm:$0xff] %v8045_v37  ;;  %v8050_v7 = vadd.f32 %v8049_v32, %v7057_v63  ;;  %v7059_v23 = vadd.f32 %v7058_v59, %v18902_v19  ;;  %v8070_v17 = vpop.f32.mrf.mxu1  ;;  %v18914_v63 = vld [vmem:[#allocation390_spill] sm:$0xff] }
 0x72f   : > { %v7063_v45 = vpop.f32.mrf.mxu0 }
 0x730   : > { %8393 = vst [vmem:[%s14928_s14 + $0x6e0] sm:$0xff] %v8050_v7  ;;  %v8052_v33 = vadd.f32 %v8051_v56, %v7059_v23  ;;  %v7064_v4 = vadd.f32 %v7063_v45, %v18903_v43  ;;  %v8072_v35 = vpop.f32.mrf.mxu1  ;;  %v18915_v23 = vld [vmem:[#allocation385_spill] sm:$0xff] }
 0x731   : > { %v7065_v27 = vpop.f32.mrf.mxu0 }
 0x732   : > { %8394 = vst [vmem:[%s14928_s14 + $0x6e8] sm:$0xff] %v8052_v33  ;;  %v8057_v49 = vadd.f32 %v8056_v50, %v7064_v4  ;;  %v7066_v9 = vadd.f32 %v7065_v27, %v18904_v60  ;;  %v8077_v61 = vpop.f32.mrf.mxu1  ;;  %v18916_v4 = vld [vmem:[#allocation392_spill] sm:$0xff] }
 0x733   : > { %v7070_v6 = vpop.f32.mrf.mxu0 }
 0x734   : > { %8395 = vst [vmem:[%s14928_s14 + $0x6f0] sm:$0xff] %v8057_v49  ;;  %v8059_v16 = vadd.f32 %v8058_v34, %v7066_v9  ;;  %v7071_v38 = vadd.f32 %v7070_v6, %v18905_v22  ;;  %v8079_v15 = vpop.f32.mrf.mxu1  ;;  %v18917_v9 = vld [vmem:[#allocation394_spill] sm:$0xff] }
 0x735   : > { %v7072_v14 = vpop.f32.mrf.mxu0 }
 0x736   : > { %8396 = vst [vmem:[%s14928_s14 + $0x6f8] sm:$0xff] %v8059_v16  ;;  %v8064_v1 = vadd.f32 %v8063_v30, %v7071_v38  ;;  %v7073_v39 = vadd.f32 %v7072_v14, %v18906_v42  ;;  %v8084_v8 = vpop.f32.mrf.mxu1  ;;  %v18918_v38 = vld [vmem:[#allocation389_spill] sm:$0xff] }
 0x737   : > { %v7077_v11 = vpop.f32.mrf.mxu0 }
 0x738   : > { %8397 = vst [vmem:[%s14928_s14 + $0x700] sm:$0xff] %v8064_v1  ;;  %v8066_v29 = vadd.f32 %v8065_v26, %v7073_v39  ;;  %v7078_v10 = vadd.f32 %v7077_v11, %v18907_v40  ;;  %v8086_v2 = vpop.f32.mrf.mxu1  ;;  %v18919_v39 = vld [vmem:[#allocation396_spill] sm:$0xff] }
 0x739   : > { %v7079_v47 = vpop.f32.mrf.mxu0 }
 0x73a   : > { %8398 = vst [vmem:[%s14928_s14 + $0x708] sm:$0xff] %v8066_v29  ;;  %v8071_v0 = vadd.f32 %v8070_v17, %v7078_v10  ;;  %v7080_v25 = vadd.f32 %v7079_v47, %v18908_v52  ;;  %v8091_v12 = vpop.f32.mrf.mxu1  ;;  %v18920_v10 = vld [vmem:[#allocation398_spill] sm:$0xff] }
 0x73b   : > { %v7084_v54 = vpop.f32.mrf.mxu0 }
 0x73c   : > { %8399 = vst [vmem:[%s14928_s14 + $0x710] sm:$0xff] %v8071_v0  ;;  %v8073_v41 = vadd.f32 %v8072_v35, %v7080_v25  ;;  %v7085_v32 = vadd.f32 %v7084_v54, %v18909_v3  ;;  %v8093_v36 = vpop.f32.mrf.mxu1  ;;  %v18921_v25 = vld [vmem:[#allocation393_spill] sm:$0xff] }
 0x73d   : > { %v7086_v21 = vpop.f32.mrf.mxu0 }
 0x73e   : > { %8400 = vst [vmem:[%s14928_s14 + $0x718] sm:$0xff] %v8073_v41  ;;  %v8078_v57 = vadd.f32 %v8077_v61, %v7085_v32  ;;  %v7087_v56 = vadd.f32 %v7086_v21, %v18910_v55  ;;  %v8098_v20 = vpop.f32.mrf.mxu1  ;;  %v18922_v32 = vld [vmem:[#allocation400_spill] sm:$0xff] }
 0x73f   : > { %v7091_v44 = vpop.f32.mrf.mxu0 }
 0x740   : > { %8401 = vst [vmem:[%s14928_s14 + $0x720] sm:$0xff] %v8078_v57  ;;  %v8080_v18 = vadd.f32 %v8079_v15, %v7087_v56  ;;  %v7092_v50 = vadd.f32 %v7091_v44, %v18911_v62  ;;  %v8100_v5 = vpop.f32.mrf.mxu1  ;;  %v18923_v56 = vld [vmem:[#allocation402_spill] sm:$0xff] }
 0x741   : > { %v7093_v48 = vpop.f32.mrf.mxu0 }
 0x742   : > { %8402 = vst [vmem:[%s14928_s14 + $0x728] sm:$0xff] %v8080_v18  ;;  %v8085_v31 = vadd.f32 %v8084_v8, %v7092_v50  ;;  %v7094_v34 = vadd.f32 %v7093_v48, %v18912_v28  ;;  %v8105_v46 = vpop.f32.mrf.mxu1  ;;  %v18924_v50 = vld [vmem:[#allocation397_spill] sm:$0xff] }
 0x743   : > { %v7098_v53 = vpop.f32.mrf.mxu0 }
 0x744   : > { %8403 = vst [vmem:[%s14928_s14 + $0x730] sm:$0xff] %v8085_v31  ;;  %v8087_v24 = vadd.f32 %v8086_v2, %v7094_v34  ;;  %v7099_v30 = vadd.f32 %v7098_v53, %v18913_v13  ;;  %v8107_v51 = vpop.f32.mrf.mxu1  ;;  %v18925_v34 = vld [vmem:[#allocation404_spill] sm:$0xff] }
 0x745   : > { %v7100_v37 = vpop.f32.mrf.mxu0 }
 0x746   : > { %8404 = vst [vmem:[%s14928_s14 + $0x738] sm:$0xff] %v8087_v24  ;;  %v8092_v58 = vadd.f32 %v8091_v12, %v7099_v30  ;;  %v7101_v26 = vadd.f32 %v7100_v37, %v18914_v63  ;;  %v8112_v59 = vpop.f32.mrf.mxu1  ;;  %v18926_v30 = vld [vmem:[#allocation406_spill] sm:$0xff] }
 0x747   : > { %v7105_v7 = vpop.f32.mrf.mxu0 }
 0x748   : > { %8405 = vst [vmem:[%s14928_s14 + $0x740] sm:$0xff] %v8092_v58  ;;  %v8094_v19 = vadd.f32 %v8093_v36, %v7101_v26  ;;  %v7106_v17 = vadd.f32 %v7105_v7, %v18915_v23  ;;  %v8114_v45 = vpop.f32.mrf.mxu1  ;;  %v18927_v26 = vld [vmem:[#allocation401_spill] sm:$0xff]  ;;  %v18928_v23 = vld [vmem:[#allocation408_spill] sm:$0xff] }
 0x749   : > { %v7107_v33 = vpop.f32.mrf.mxu0 }
 0x74a   : > { %8406 = vst [vmem:[%s14928_s14 + $0x748] sm:$0xff] %v8094_v19  ;;  %v8099_v43 = vadd.f32 %v8098_v20, %v7106_v17  ;;  %v7108_v35 = vadd.f32 %v7107_v33, %v18916_v4  ;;  %v8119_v27 = vpop.f32.mrf.mxu1  ;;  %v18929_v4 = vld [vmem:[#allocation410_spill] sm:$0xff] }
 0x74b   : > { %v7112_v49 = vpop.f32.mrf.mxu0 }
 0x74c   : > { %8407 = vst [vmem:[%s14928_s14 + $0x750] sm:$0xff] %v8099_v43  ;;  %v8101_v60 = vadd.f32 %v8100_v5, %v7108_v35  ;;  %v7113_v61 = vadd.f32 %v7112_v49, %v18917_v9  ;;  %v8121_v6 = vpop.f32.mrf.mxu1 }
 0x74d   : > { %v7114_v16 = vpop.f32.mrf.mxu0 }
 0x74e   : > { %8408 = vst [vmem:[%s14928_s14 + $0x758] sm:$0xff] %v8101_v60  ;;  %v8106_v22 = vadd.f32 %v8105_v46, %v7113_v61  ;;  %v7115_v15 = vadd.f32 %v7114_v16, %v18918_v38  ;;  %v8126_v14 = vpop.f32.mrf.mxu1  ;;  %v18930_v60 = vld [vmem:[#allocation405_spill] sm:$0xff] }
 0x74f   : > { %v7119_v1 = vpop.f32.mrf.mxu0 }
 0x750   : > { %8409 = vst [vmem:[%s14928_s14 + $0x760] sm:$0xff] %v8106_v22  ;;  %v8108_v42 = vadd.f32 %v8107_v51, %v7115_v15  ;;  %v7120_v8 = vadd.f32 %v7119_v1, %v18919_v39  ;;  %v8128_v11 = vpop.f32.mrf.mxu1  ;;  %v18931_v22 = vld [vmem:[#allocation412_spill] sm:$0xff]  ;;  %v18932_v1 = vld [vmem:[#allocation414_spill] sm:$0xff] }
 0x751   : > { %v7121_v29 = vpop.f32.mrf.mxu0 }
 0x752   : > { %8410 = vst [vmem:[%s14928_s14 + $0x768] sm:$0xff] %v8108_v42  ;;  %v8113_v40 = vadd.f32 %v8112_v59, %v7120_v8  ;;  %v7122_v2 = vadd.f32 %v7121_v29, %v18920_v10  ;;  %v8133_v47 = vpop.f32.mrf.mxu1  ;;  %v18933_v29 = vld [vmem:[#allocation409_spill] sm:$0xff] }
 0x753   : > { %v7126_v0 = vpop.f32.mrf.mxu0 }
 0x754   : > { %8411 = vst [vmem:[%s14928_s14 + $0x770] sm:$0xff] %v8113_v40  ;;  %v8115_v52 = vadd.f32 %v8114_v45, %v7122_v2  ;;  %v7127_v12 = vadd.f32 %v7126_v0, %v18921_v25  ;;  %v8135_v54 = vpop.f32.mrf.mxu1 }
 0x755   : > { %v7128_v41 = vpop.f32.mrf.mxu0 }
 0x756   : > { %8412 = vst [vmem:[%s14928_s14 + $0x778] sm:$0xff] %v8115_v52  ;;  %v8120_v3 = vadd.f32 %v8119_v27, %v7127_v12  ;;  %v7129_v36 = vadd.f32 %v7128_v41, %v18922_v32  ;;  %v8140_v21 = vpop.f32.mrf.mxu1 }
 0x757   : > { %v7133_v57 = vpop.f32.mrf.mxu0 }
 0x758   : > { %8413 = vst [vmem:[%s14928_s14 + $0x780] sm:$0xff] %v8120_v3  ;;  %v8122_v55 = vadd.f32 %v8121_v6, %v7129_v36  ;;  %v7134_v20 = vadd.f32 %v7133_v57, %v18923_v56  ;;  %v8142_v44 = vpop.f32.mrf.mxu1  ;;  %v18936_v36 = vld [vmem:[#allocation413_spill] sm:$0xff] }
 0x759   : > { %v7135_v18 = vpop.f32.mrf.mxu0 }
 0x75a   : > { %8414 = vst [vmem:[%s14928_s14 + $0x788] sm:$0xff] %v8122_v55  ;;  %v8127_v62 = vadd.f32 %v8126_v14, %v7134_v20  ;;  %v7136_v5 = vadd.f32 %v7135_v18, %v18924_v50  ;;  %v8147_v48 = vpop.f32.mrf.mxu1 }
 0x75b   : > { %v7140_v31 = vpop.f32.mrf.mxu0 }
 0x75c   : > { %8415 = vst [vmem:[%s14928_s14 + $0x790] sm:$0xff] %v8127_v62  ;;  %v8129_v28 = vadd.f32 %v8128_v11, %v7136_v5  ;;  %v7141_v46 = vadd.f32 %v7140_v31, %v18925_v34  ;;  %v8149_v53 = vpop.f32.mrf.mxu1 }
 0x75d   : > { %v7142_v24 = vpop.f32.mrf.mxu0 }
 0x75e   : > { %8416 = vst [vmem:[%s14928_s14 + $0x798] sm:$0xff] %v8129_v28  ;;  %v8134_v13 = vadd.f32 %v8133_v47, %v7141_v46  ;;  %v7143_v51 = vadd.f32 %v7142_v24, %v18926_v30  ;;  %v8154_v37 = vpop.f32.mrf.mxu1  ;;  %v18934_v47 = vld [vmem:[#allocation416_spill] sm:$0xff] }
 0x75f   : > { %v7147_v58 = vpop.f32.mrf.mxu0 }
 0x760   : > { %8417 = vst [vmem:[%s14928_s14 + $0x7a0] sm:$0xff] %v8134_v13  ;;  %v8136_v63 = vadd.f32 %v8135_v54, %v7143_v51  ;;  %v7148_v59 = vadd.f32 %v7147_v58, %v18927_v26  ;;  %v8156_v45 = vpop.f32.mrf.mxu1  ;;  %v18935_v54 = vld [vmem:[#allocation418_spill] sm:$0xff] }
 0x761   : > { %v7149_v7 = vpop.f32.mrf.mxu0 }
 0x762   : > { %8418 = vst [vmem:[%s14928_s14 + $0x7a8] sm:$0xff] %v8136_v63  ;;  %v8141_v19 = vadd.f32 %v8140_v21, %v7148_v59  ;;  %v7150_v17 = vadd.f32 %v7149_v7, %v18928_v23  ;;  %v8161_v61 = vpop.f32.mrf.mxu1 }
 0x763   : > { %v7154_v33 = vpop.f32.mrf.mxu0 }
 0x764   : > { %8419 = vst [vmem:[%s14928_s14 + $0x7b0] sm:$0xff] %v8141_v19  ;;  %v8143_v43 = vadd.f32 %v8142_v44, %v7150_v17  ;;  %v7155_v35 = vadd.f32 %v7154_v33, %v18929_v4  ;;  %v8163_v39 = vpop.f32.mrf.mxu1 }
 0x765   : > { %v7156_v27 = vpop.f32.mrf.mxu0 }
 0x766   : > { %8420 = vst [vmem:[%s14928_s14 + $0x7b8] sm:$0xff] %v8143_v43  ;;  %v8148_v49 = vadd.f32 %v8147_v48, %v7155_v35  ;;  %v7157_v9 = vadd.f32 %v7156_v27, %v18930_v60  ;;  %v8168_v52 = vpop.f32.mrf.mxu1 }
 0x767   : > { %v7161_v6 = vpop.f32.mrf.mxu0 }
 0x768   : > { %8421 = vst [vmem:[%s14928_s14 + $0x7c0] sm:$0xff] %v8148_v49  ;;  %v8150_v16 = vadd.f32 %v8149_v53, %v7157_v9  ;;  %v7162_v38 = vadd.f32 %v7161_v6, %v18931_v22  ;;  %v8170_v57 = vpop.f32.mrf.mxu1 }
 0x769   : > { %v7163_v15 = vpop.f32.mrf.mxu0 }
 0x76a   : > { %8422 = vst [vmem:[%s14928_s14 + $0x7c8] sm:$0xff] %v8150_v16  ;;  %v8155_v14 = vadd.f32 %v8154_v37, %v7162_v38  ;;  %v7164_v42 = vadd.f32 %v7163_v15, %v18932_v1 }
 0x76b   : > { %v7168_v8 = vpop.f32.mrf.mxu0 }
 0x76c   : > { %8423 = vst [vmem:[%s14928_s14 + $0x7d0] sm:$0xff] %v8155_v14  ;;  %v8157_v11 = vadd.f32 %v8156_v45, %v7164_v42  ;;  %v7169_v40 = vadd.f32 %v7168_v8, %v18933_v29 }
 0x76d   : > { %v7170_v10 = vpop.f32.mrf.mxu0 }
 0x76e   : > { %8424 = vst [vmem:[%s14928_s14 + $0x7d8] sm:$0xff] %v8157_v11  ;;  %v8162_v2 = vadd.f32 %v8161_v61, %v7169_v40  ;;  %v7171_v0 = vadd.f32 %v7170_v10, %v18934_v47 }
 0x76f   : > { %v7175_v25 = vpop.f32.mrf.mxu0 }
 0x770   : > { %8425 = vst [vmem:[%s14928_s14 + $0x7e0] sm:$0xff] %v8162_v2  ;;  %v8164_v12 = vadd.f32 %v8163_v39, %v7171_v0  ;;  %v7176_v41 = vadd.f32 %v7175_v25, %v18935_v54 }
 0x771   : > { %v7177_v3 = vpop.f32.mrf.mxu0 }
 0x772   : > { %8426 = vst [vmem:[%s14928_s14 + $0x7e8] sm:$0xff] %v8164_v12  ;;  %v8169_v32 = vadd.f32 %v8168_v52, %v7176_v41  ;;  %v7178_v21 = vadd.f32 %v7177_v3, %v18936_v36  ;;  %8436 = sbr.rel (!%p9272_p5) target bundleno = 1938 (0x792), region = 36 }
 0x774   : > { %8427 = vst [vmem:[%s14928_s14 + $0x7f0] sm:$0xff] %v8169_v32  ;;  %v8171_v55 = vadd.f32 %v8170_v57, %v7178_v21 }
 0x776   : > { %8428 = vst [vmem:[%s14928_s14 + $0x7f8] sm:$0xff] %v8171_v55 }
 0x777   : > { %s18943_s17 = smov (!%p8439_p8, %s8438_s17), 128 }
 0x778   : > { %s16216_s21 = sshll.u32 %s18943_s17, 8 }
 0x779   : > { %s8444_s22 = ssub.s32 32768, %s16216_s21 }
 0x77a   : > { %8445 = vsyncadd %s16211_s16, %s8444_s22  ;;  %p9050_p9 = scmp.ne.s32.totalorder %s16216_s21, 0  ;;  %s9059_s23 = sshll.u32 %s9255_s13, 15 }
 0x77b   : > { %s16225_s25 = scalar_lea.hbm %s16273_s2, %s9059_s23  ;;  %s8451_s26 = sshll.u32 %s14928_s14, 4  ;;  %s16228_s26 = int_to_ptr.vmem [resolvable:$true] %s8451_s26 }
 0x77c   : > { %s9144_s27 = scalar_lea.vmem %s16228_s26, %s16216_s21  ;;  %s9216_s28 = smov [#allocation5]  }
 0x77d   : > { %p9145_p5 = scmp.ne.s32.totalorder %s16228_s26, %s9144_s27  ;;  %s9148_s29 = sshll.u32 %s9216_s28, 4  ;;  %s9149_s29 = int_to_ptr.vmem [resolvable:$false] %s9148_s29 }
 0x77e   : > { %s9150_s13 = scalar_lea.vmem %s9149_s29, 65536  ;;  %p9151_p12 = scmp.lt.s32.totalorder %s16228_s26, %s9149_s29 }
 0x77f   : > { %p9146_p10 = pnand %p9145_p5, %p9050_p9  ;;  %p9152_p13 = scmp.lt.s32.totalorder %s9150_s13, %s9144_s27 }
 0x781   : > { %p9147_p11 = pneg %p9146_p10  ;;  %p9153_p0 = por %p9152_p13, %p9151_p12 }
 0x783   : > { %p9154_p1 = pnand %p9153_p0, %p9147_p11 }
 0x785   : > { %9157 = shalt.err (!%p9154_p1)
}
 0x786   : > { %s9158_s30 = scalar_lea.hbm %s16225_s25, %s16216_s21  ;;  %s9162_s5 = scalar_lea.hbm %s16273_s2, 80128 }
 0x787   : > { %p9159_p2 = scmp.ne.s32.totalorder %s16225_s25, %s9158_s30  ;;  %p9163_p7 = scmp.lt.s32.totalorder %s16225_s25, %s16273_s2 }
 0x788   : > { %p9164_p6 = scmp.lt.s32.totalorder %s9162_s5, %s9158_s30 }
 0x789   : > { %p9160_p3 = pnand %p9159_p2, %p9050_p9 }
 0x78a   : > { %p9165_p8 = por %p9164_p6, %p9163_p7 }
 0x78b   : > { %p9161_p4 = pneg %p9160_p3 }
 0x78d   : > { %p9166_p5 = pnand %p9165_p8, %p9161_p4 }
 0x78f   : > { %9169 = shalt.err (!%p9166_p5)
}
 0x790   : > { %s9217_s8 = smov 256   ;;  %s9218_s14 = smov 16  }
 0x791   : > { %8457 = dma.vmem_to_hbm [thread:$0]  (%p9050_p9), %s16228_s26, %s16216_s21, %s16225_s25, %s16211_s16, %s9217_s8, %s9217_s8, %s9218_s14  }
 0x792 PF: > { %p9075_p10 = scmp.ge.s32.totalorder %s9208_s12, 2  ;;  %s8466_s17 = sand.u32 1, %s9196_s9  }
 0x793   : > { %p18937_p11 = scmp.ne.s32.totalorder %s16996_s20, 0  ;;  %s8467_s22 = scalar_lea.sflag [#allocation4], %s8466_s17 }
 0x795   : > { %p9070_p12 = pnand %p9075_p10, %p18937_p11 }
 0x797   : > { %p9071_p13 = pneg %p9070_p12 }
 0x799   : > { %9191 = dma.done.wait (%p9071_p13), %s8467_s22, 32768  }
 0x79a   : > { %9193 = vsyncadd (%p9071_p13), %s8467_s22, 4294934528  ;;  %p13_p0 = scmp.ge.s32.totalorder %s9259_s15, 5   ;;  %s18938_s9 = smov %s9200_s10 }
 0x79b   : > { %s18939_s10 = smov %s9204_s11  ;;  %s18940_s11 = smov %s9270_s18 }
 0x79c   : > { %s18941_s12 = smov %s9259_s15  ;;  %15 = sbr.rel (!%p13_p0) target bundleno = 4 (0x4), region = 68 }
 0x7a1   :  { %8472 = vsyncpa [#allocation3], 1 }
 0x7a2   :  { %8474 = vsyncpa [#allocation3 + $0x1], 1 }
 0x7a3   :  { %8475 = vsyncpa [#allocation4], 1 }
 0x7a4   :  { %8477 = vsyncpa [#allocation4 + $0x1], 1 }

</bundles_post_ra>
